<compile_context>
chip_gen: v6e
topology: v6e:2x2x1
jax: 0.10.0
libtpu: 0.0.40
codegen_flags: <defaults>
</compile_context>

<pallas_src>
import jax
import jax.numpy as jnp
from jax.experimental import pallas as pl
from jax.experimental.pallas import tpu as pltpu

EPS = 1e-5
# MXU operands for the conv / skip matmuls (accumulation stays f32).
MATMUL_DTYPE = jnp.bfloat16
VMEM_LIMIT_BYTES = 48 * 1024 * 1024  # > 32 MiB scoped default, < v7x 64 MiB physical


def _silu(x):
    return x * jax.nn.sigmoid(x)


def _row_tile(hw):
    # largest "nice" row tile that divides H*W (keeps the stats grid exact).
    for cand in (1024, 512, 256, 128, 64, 32, 16, 8):
        if hw % cand == 0:
            return cand
    return hw


def _cparams(dimension_semantics):
    return pltpu.CompilerParams(
        dimension_semantics=dimension_semantics,
        vmem_limit_bytes=VMEM_LIMIT_BYTES,
    )


def resnet_block_forward(x_nchw, t_emb, p):
    N, Cin, H, W = x_nchw.shape
    Cout = p["conv1_b"].shape[0]
    T = t_emb.shape[1]
    HW = H * W
    M = N * HW
    inv_m = 1.0 / float(M)
    f32 = jnp.float32

    # ---------------- host-side layout plumbing (no compute) ----------------
    x_b = jnp.transpose(x_nchw, (0, 2, 3, 1)).astype(f32).reshape(N, HW, Cin)  # (N, H*W, Cin)
    t3 = t_emb.astype(f32).reshape(N, 1, T)

    g1 = p["bn1_g"].reshape(1, Cin).astype(f32)
    b1 = p["bn1_b"].reshape(1, Cin).astype(f32)
    w1 = jnp.transpose(p["conv1_w"], (2, 3, 1, 0)).reshape(9, Cin, Cout).astype(MATMUL_DTYPE)
    cb1 = p["conv1_b"].reshape(1, Cout).astype(f32)
    wt = p["time_w"].T.astype(f32)                                  # (T, Cout)
    bt = p["time_b"].reshape(1, Cout).astype(f32)
    g2 = p["bn2_g"].reshape(1, Cout).astype(f32)
    b2 = p["bn2_b"].reshape(1, Cout).astype(f32)
    w2 = jnp.transpose(p["conv2_w"], (2, 3, 1, 0)).reshape(9, Cout, Cout).astype(MATMUL_DTYPE)
    cb2 = p["conv2_b"].reshape(1, Cout).astype(f32)
    ws = p["skip_w"][:, :, 0, 0].T.astype(MATMUL_DTYPE)             # (Cin, Cout)
    bs = p["skip_b"].reshape(1, Cout).astype(f32)

    # ---------------- in-kernel helpers (close over static shape ints) ----------------
    def _pad_rows(h, c):
        # flat (y, x)-ordered activations -> zero padded so that for kernel offset
        # (di, dj) the needed input row is padded[r + di*W + dj]  (r = y*W + x).
        z = jnp.zeros((W + 1, c), jnp.float32)
        return jnp.concatenate([z, h, z], axis=0)           # ((H+2)*W + 2, c)

    def _conv3x3(hp, w_ref, n_out):
        # 3x3 conv (pad=1) as 9 shifted (HW, c) @ (c, n_out) MXU matmuls.
        # W-boundary wrap-around is killed with per-row masks; H padding is the zero slab.
        col = jax.lax.broadcasted_iota(jnp.int32, (HW, 1), 0) % W
        mask_l = col > 0            # x != 0      (needed when dj == 0)
        mask_r = col < (W - 1)      # x != W-1    (needed when dj == 2)
        acc = jnp.zeros((HW, n_out), jnp.float32)
        for di in range(3):
            for dj in range(3):
                off = di * W + dj
                patch = hp[off:off + HW, :]
                if dj == 0:
                    patch = jnp.where(mask_l, patch, 0.0)
                elif dj == 2:
                    patch = jnp.where(mask_r, patch, 0.0)
                acc = acc + jnp.dot(patch.astype(MATMUL_DTYPE),
                                    w_ref[di * 3 + dj],
                                    preferred_element_type=jnp.float32)
        return acc

    def _fold_bn(s, ss, g, b):
        # fold batch-stat BN into a single per-channel scale/shift.
        mean = s * inv_m
        var = ss * inv_m - mean * mean
        scale = g * jax.lax.rsqrt(var + EPS)
        shift = b - mean * scale
        return scale, shift

    # ---------------- kernel 1: BN1 batch statistics (streaming reduction) ----------------
    def stats_kernel(x_ref, sum_ref, ssq_ref):
        @pl.when((pl.program_id(0) == 0) & (pl.program_id(1) == 0))
        def _():
            sum_ref[...] = jnp.zeros_like(sum_ref)
            ssq_ref[...] = jnp.zeros_like(ssq_ref)

        xb = x_ref[0]                                        # (tile_r, Cin)
        sum_ref[...] += jnp.sum(xb, axis=0, keepdims=True)
        ssq_ref[...] += jnp.sum(xb * xb, axis=0, keepdims=True)

    tr = _row_tile(HW)
    sum1, ssq1 = pl.pallas_call(
        stats_kernel,
        out_shape=(jax.ShapeDtypeStruct((1, Cin), f32),
                   jax.ShapeDtypeStruct((1, Cin), f32)),
        grid=(N, HW // tr),
        in_specs=[pl.BlockSpec((1, tr, Cin), lambda n, r: (n, r, 0))],
        out_specs=(pl.BlockSpec((1, Cin), lambda n, r: (0, 0)),
                   pl.BlockSpec((1, Cin), lambda n, r: (0, 0))),
        compiler_params=_cparams(("arbitrary", "arbitrary")),
    )(x_b)

    # ------- kernel 2: BN1 -> SiLU -> conv1(3x3) + time-emb bias (+ BN2 partial stats) -------
    def block1_kernel(sum1_ref, ssq1_ref, g1_ref, b1_ref, w1_ref, cb1_ref,
                      wt_ref, bt_ref, x_ref, t_ref,
                      h_ref, ps_ref, pss_ref):
        scale, shift = _fold_bn(sum1_ref[...], ssq1_ref[...], g1_ref[...], b1_ref[...])
        h = _silu(x_ref[0] * scale + shift)                  # (HW, Cin), f32
        acc = _conv3x3(_pad_rows(h, Cin), w1_ref, Cout)      # (HW, Cout), f32
        # per-image time-embedding bias (grid axis selects t_emb[n]; no one-hot matmul)
        temb = jnp.dot(_silu(t_ref[0]), wt_ref[...],
                       preferred_element_type=jnp.float32) + bt_ref[...]
        hpre = acc + cb1_ref[...] + temb
        h_ref[0] = hpre
        # per-image partial sums for BN2 (summed across the batch in kernel 3)
        ps_ref[0] = jnp.sum(hpre, axis=0, keepdims=True)
        pss_ref[0] = jnp.sum(hpre * hpre, axis=0, keepdims=True)

    hpre, psum2, pssq2 = pl.pallas_call(
        block1_kernel,
        out_shape=(jax.ShapeDtypeStruct((N, HW, Cout), f32),
                   jax.ShapeDtypeStruct((N, 1, Cout), f32),
                   jax.ShapeDtypeStruct((N, 1, Cout), f32)),
        grid=(N,),
        in_specs=[
            pl.BlockSpec((1, Cin), lambda n: (0, 0)),            # sum1
            pl.BlockSpec((1, Cin), lambda n: (0, 0)),            # sumsq1
            pl.BlockSpec((1, Cin), lambda n: (0, 0)),            # bn1 gamma
            pl.BlockSpec((1, Cin), lambda n: (0, 0)),            # bn1 beta
            pl.BlockSpec((9, Cin, Cout), lambda n: (0, 0, 0)),   # conv1 weight (bf16, DMA once)
            pl.BlockSpec((1, Cout), lambda n: (0, 0)),           # conv1 bias
            pl.BlockSpec((T, Cout), lambda n: (0, 0)),           # time-emb weight
            pl.BlockSpec((1, Cout), lambda n: (0, 0)),           # time-emb bias
            pl.BlockSpec((1, HW, Cin), lambda n: (n, 0, 0)),     # x, this image
            pl.BlockSpec((1, 1, T), lambda n: (n, 0, 0)),        # t_emb, this image
        ],
        out_specs=(
            pl.BlockSpec((1, HW, Cout), lambda n: (n, 0, 0)),
            pl.BlockSpec((1, 1, Cout), lambda n: (n, 0, 0)),
            pl.BlockSpec((1, 1, Cout), lambda n: (n, 0, 0)),
        ),
        compiler_params=_cparams(("parallel",)),
    )(sum1, ssq1, g1, b1, w1, cb1, wt, bt, x_b, t3)

    # ------- kernel 3: BN2 -> SiLU -> conv2(3x3) + 1x1 skip conv + residual add -------
    def block2_kernel(ps_ref, pss_ref, g2_ref, b2_ref, w2_ref, cb2_ref,
                      ws_ref, bs_ref, h_ref, x_ref, o_ref):
        s2 = jnp.sum(ps_ref[...], axis=0)                    # (1, Cout)
        ss2 = jnp.sum(pss_ref[...], axis=0)
        scale, shift = _fold_bn(s2, ss2, g2_ref[...], b2_ref[...])
        h2 = _silu(h_ref[0] * scale + shift)                 # (HW, Cout), f32
        conv = _conv3x3(_pad_rows(h2, Cout), w2_ref, Cout) + cb2_ref[...]
        skip = jnp.dot(x_ref[0].astype(MATMUL_DTYPE), ws_ref[...],
                       preferred_element_type=jnp.float32) + bs_ref[...]
        o_ref[0] = conv + skip

    out_b = pl.pallas_call(
        block2_kernel,
        out_shape=jax.ShapeDtypeStruct((N, HW, Cout), f32),
        grid=(N,),
        in_specs=[
            pl.BlockSpec((N, 1, Cout), lambda n: (0, 0, 0)),     # BN2 partial sums (tiny)
            pl.BlockSpec((N, 1, Cout), lambda n: (0, 0, 0)),     # BN2 partial sumsq
            pl.BlockSpec((1, Cout), lambda n: (0, 0)),           # bn2 gamma
            pl.BlockSpec((1, Cout), lambda n: (0, 0)),           # bn2 beta
            pl.BlockSpec((9, Cout, Cout), lambda n: (0, 0, 0)),  # conv2 weight (bf16, DMA once)
            pl.BlockSpec((1, Cout), lambda n: (0, 0)),           # conv2 bias
            pl.BlockSpec((Cin, Cout), lambda n: (0, 0)),         # skip weight (bf16)
            pl.BlockSpec((1, Cout), lambda n: (0, 0)),           # skip bias
            pl.BlockSpec((1, HW, Cout), lambda n: (n, 0, 0)),    # conv1+temb output, this image
            pl.BlockSpec((1, HW, Cin), lambda n: (n, 0, 0)),     # x, this image (skip path)
        ],
        out_specs=pl.BlockSpec((1, HW, Cout), lambda n: (n, 0, 0)),
        compiler_params=_cparams(("parallel",)),
    )(psum2, pssq2, g2, b2, w2, cb2, ws, bs, hpre, x_b)

    return jnp.transpose(out_b.reshape(N, H, W, Cout), (0, 3, 1, 2))  # back to NCHW


# ----------------------------- pure-JAX reference -----------------------------

def _ref_forward(x, t, p):
    def bn(h, g, b):
        mean = h.mean(axis=(0, 2, 3), keepdims=True)
        var = ((h - mean) ** 2).mean(axis=(0, 2, 3), keepdims=True)
        return (h - mean) / jnp.sqrt(var + EPS) * g[None, :, None, None] + b[None, :, None, None]

    def conv(h, w, b, pad):
        return jax.lax.conv_general_dilated(
            h, w, (1, 1), [(pad, pad), (pad, pad)],
            dimension_numbers=("NCHW", "OIHW", "NCHW")) + b[None, :, None, None]

    h = _silu(bn(x, p["bn1_g"], p["bn1_b"]))
    h = conv(h, p["conv1_w"], p["conv1_b"], 1)
    temb = _silu(t) @ p["time_w"].T + p["time_b"]
    h = h + temb[:, :, None, None]
    h = _silu(bn(h, p["bn2_g"], p["bn2_b"]))
    h = conv(h, p["conv2_w"], p["conv2_b"], 1)
    skip = conv(x, p["skip_w"], p["skip_b"], 0)
    return h + skip


if __name__ == "__main__":
    N, Cin, Cout, H, W, T = 2, 4, 8, 16, 16, 32
    key = jax.random.PRNGKey(0)
    ks = jax.random.split(key, 16)

    def rnd(k, shape, scale=0.1):
        return scale * jax.random.normal(k, shape, dtype=jnp.float32)

    params = dict(
        bn1_g=1.0 + rnd(ks[0], (Cin,)), bn1_b=rnd(ks[1], (Cin,)),
        conv1_w=rnd(ks[2], (Cout, Cin, 3, 3)), conv1_b=rnd(ks[3], (Cout,)),
        time_w=rnd(ks[4], (Cout, T)), time_b=rnd(ks[5], (Cout,)),
        bn2_g=1.0 + rnd(ks[6], (Cout,)), bn2_b=rnd(ks[7], (Cout,)),
        conv2_w=rnd(ks[8], (Cout, Cout, 3, 3)), conv2_b=rnd(ks[9], (Cout,)),
        skip_w=rnd(ks[10], (Cout, Cin, 1, 1)), skip_b=rnd(ks[11], (Cout,)),
    )
    x = jax.random.normal(ks[12], (N, Cin, H, W), dtype=jnp.float32)
    t_emb = jax.random.normal(ks[13], (N, T), dtype=jnp.float32)

    out = jax.jit(resnet_block_forward)(x, t_emb, params)
    out = jax.block_until_ready(out)

    ref = _ref_forward(x, t_emb, params)
    assert out.shape == (N, Cout, H, W), out.shape
    # Tolerance relaxed vs the pure-f32 reference because the conv/skip MXU operands are
    # intentionally fed as bf16 (per perf review); accumulation, BN stats and SiLU stay f32.
    assert jnp.allclose(out, ref, atol=2e-2, rtol=2e-2), float(jnp.max(jnp.abs(out - ref)))
    print("KERNEL_OK")
</pallas_src>

<mosaic_0001>
module attributes {stable_mosaic.version = 11 : i64} {
  func.func @stats_kernel(%arg0: i32, %arg1: i32, %arg2: memref<1x256x4xf32, #tpu.memory_space<vmem>>, %arg3: memref<1x4xf32, #tpu.memory_space<vmem>>, %arg4: memref<1x4xf32, #tpu.memory_space<vmem>>) attributes {dimension_semantics = [#tpu.dimension_semantics<arbitrary>, #tpu.dimension_semantics<arbitrary>], iteration_bounds = array<i64: 2, 1>, scalar_prefetch = 0 : i64, scratch_operands = 0 : i64, tpu.core_type = #tpu.core_type<tc>, window_params = [{transform_indices = @transform_0, window_bounds = array<i64: 1, 256, 4>}, {pipeline_mode = #tpu.pipeline_mode<synchronous>, transform_indices = @transform_1, window_bounds = array<i64: 1, 4>}, {pipeline_mode = #tpu.pipeline_mode<synchronous>, transform_indices = @transform_2, window_bounds = array<i64: 1, 4>}]} {
    %c0_i32 = arith.constant 0 : i32
    %0 = arith.cmpi eq, %arg0, %c0_i32 : i32
    %c0_i32_0 = arith.constant 0 : i32
    %1 = arith.cmpi eq, %arg1, %c0_i32_0 : i32
    %2 = arith.andi %0, %1 : i1
    %3 = arith.extui %2 : i1 to i32
    %c0_i32_1 = arith.constant 0 : i32
    %4 = arith.cmpi ne, %3, %c0_i32_1 : i32
    scf.if %4 {
      %cst_13 = arith.constant 0.000000e+00 : f32
      %18 = vector.broadcast %cst_13 : f32 to vector<1x4xf32>
      %c0_14 = arith.constant 0 : index
      %c0_15 = arith.constant 0 : index
      %19 = vector.load %arg3[%c0_14, %c0_15] : memref<1x4xf32, #tpu.memory_space<vmem>>, vector<1x4xf32>
      tpu.vector_store %arg3[%c0_14, %c0_15], %18 {strides = array<i32>} : memref<1x4xf32, #tpu.memory_space<vmem>>, vector<1x4xf32>,
      %cst_16 = arith.constant 0.000000e+00 : f32
      %20 = vector.broadcast %cst_16 : f32 to vector<1x4xf32>
      %c0_17 = arith.constant 0 : index
      %c0_18 = arith.constant 0 : index
      %21 = vector.load %arg4[%c0_17, %c0_18] : memref<1x4xf32, #tpu.memory_space<vmem>>, vector<1x4xf32>
      tpu.vector_store %arg4[%c0_17, %c0_18], %20 {strides = array<i32>} : memref<1x4xf32, #tpu.memory_space<vmem>>, vector<1x4xf32>,
    } else {
    }
    %c0 = arith.constant 0 : index
    %c0_2 = arith.constant 0 : index
    %c0_3 = arith.constant 0 : index
    %5 = vector.load %arg2[%c0, %c0_2, %c0_3] : memref<1x256x4xf32, #tpu.memory_space<vmem>>, vector<1x256x4xf32>
    %6 = vector.shape_cast %5 : vector<1x256x4xf32> to vector<256x4xf32>
    %c0_4 = arith.constant 0 : index
    %c0_5 = arith.constant 0 : index
    %7 = vector.load %arg3[%c0_4, %c0_5] : memref<1x4xf32, #tpu.memory_space<vmem>>, vector<1x4xf32>
    %cst = arith.constant dense<0.000000e+00> : vector<4xf32>
    %8 = vector.multi_reduction <add>, %6, %cst [0] : vector<256x4xf32> to vector<4xf32>
    %9 = vector.shape_cast %8 : vector<4xf32> to vector<1x4xf32>
    %10 = arith.addf %7, %9 : vector<1x4xf32>
    %c0_6 = arith.constant 0 : index
    %c0_7 = arith.constant 0 : index
    %11 = vector.load %arg3[%c0_6, %c0_7] : memref<1x4xf32, #tpu.memory_space<vmem>>, vector<1x4xf32>
    tpu.vector_store %arg3[%c0_6, %c0_7], %10 {strides = array<i32>} : memref<1x4xf32, #tpu.memory_space<vmem>>, vector<1x4xf32>,
    %c0_8 = arith.constant 0 : index
    %c0_9 = arith.constant 0 : index
    %12 = vector.load %arg4[%c0_8, %c0_9] : memref<1x4xf32, #tpu.memory_space<vmem>>, vector<1x4xf32>
    %13 = arith.mulf %6, %6 : vector<256x4xf32>
    %cst_10 = arith.constant dense<0.000000e+00> : vector<4xf32>
    %14 = vector.multi_reduction <add>, %13, %cst_10 [0] : vector<256x4xf32> to vector<4xf32>
    %15 = vector.shape_cast %14 : vector<4xf32> to vector<1x4xf32>
    %16 = arith.addf %12, %15 : vector<1x4xf32>
    %c0_11 = arith.constant 0 : index
    %c0_12 = arith.constant 0 : index
    %17 = vector.load %arg4[%c0_11, %c0_12] : memref<1x4xf32, #tpu.memory_space<vmem>>, vector<1x4xf32>
    tpu.vector_store %arg4[%c0_11, %c0_12], %16 {strides = array<i32>} : memref<1x4xf32, #tpu.memory_space<vmem>>, vector<1x4xf32>,
    return
  }
  func.func @transform_0(%arg0: i32, %arg1: i32) -> (i32, i32, i32) {
    %c0_i32 = arith.constant 0 : i32
    %c0_i32_0 = arith.constant 0 : i32
    return %arg0, %arg1, %c0_i32 : i32, i32, i32
  }
  func.func @transform_1(%arg0: i32, %arg1: i32) -> (i32, i32) {
    %c0_i32 = arith.constant 0 : i32
    %c0_i32_0 = arith.constant 0 : i32
    %c0_i32_1 = arith.constant 0 : i32
    return %c0_i32, %c0_i32_0 : i32, i32
  }
  func.func @transform_2(%arg0: i32, %arg1: i32) -> (i32, i32) {
    %c0_i32 = arith.constant 0 : i32
    %c0_i32_0 = arith.constant 0 : i32
    %c0_i32_1 = arith.constant 0 : i32
    return %c0_i32, %c0_i32_0 : i32, i32
  }
}

module attributes {stable_mosaic.version = 11 : i64} {
  func.func @block1_kernel(%arg0: i32, %arg1: memref<1x4xf32, #tpu.memory_space<vmem>>, %arg2: memref<1x4xf32, #tpu.memory_space<vmem>>, %arg3: memref<1x4xf32, #tpu.memory_space<vmem>>, %arg4: memref<1x4xf32, #tpu.memory_space<vmem>>, %arg5: memref<9x4x8xbf16, #tpu.memory_space<vmem>>, %arg6: memref<1x8xf32, #tpu.memory_space<vmem>>, %arg7: memref<32x8xf32, #tpu.memory_space<vmem>>, %arg8: memref<1x8xf32, #tpu.memory_space<vmem>>, %arg9: memref<1x256x4xf32, #tpu.memory_space<vmem>>, %arg10: memref<1x1x32xf32, #tpu.memory_space<vmem>>, %arg11: memref<1x256x8xf32, #tpu.memory_space<vmem>>, %arg12: memref<1x1x8xf32, #tpu.memory_space<vmem>>, %arg13: memref<1x1x8xf32, #tpu.memory_space<vmem>>) attributes {dimension_semantics = [#tpu.dimension_semantics<parallel>], iteration_bounds = array<i64: 2>, scalar_prefetch = 0 : i64, scratch_operands = 0 : i64, tpu.core_type = #tpu.core_type<tc>, window_params = [{pipeline_mode = #tpu.pipeline_mode<synchronous>, transform_indices = @transform_0, window_bounds = array<i64: 1, 4>}, {pipeline_mode = #tpu.pipeline_mode<synchronous>, transform_indices = @transform_1, window_bounds = array<i64: 1, 4>}, {pipeline_mode = #tpu.pipeline_mode<synchronous>, transform_indices = @transform_2, window_bounds = array<i64: 1, 4>}, {pipeline_mode = #tpu.pipeline_mode<synchronous>, transform_indices = @transform_3, window_bounds = array<i64: 1, 4>}, {pipeline_mode = #tpu.pipeline_mode<synchronous>, transform_indices = @transform_4, window_bounds = array<i64: 9, 4, 8>}, {pipeline_mode = #tpu.pipeline_mode<synchronous>, transform_indices = @transform_5, window_bounds = array<i64: 1, 8>}, {pipeline_mode = #tpu.pipeline_mode<synchronous>, transform_indices = @transform_6, window_bounds = array<i64: 32, 8>}, {pipeline_mode = #tpu.pipeline_mode<synchronous>, transform_indices = @transform_7, window_bounds = array<i64: 1, 8>}, {transform_indices = @transform_8, window_bounds = array<i64: 1, 256, 4>}, {transform_indices = @transform_9, window_bounds = array<i64: 1, 1, 32>}, {transform_indices = @transform_10, window_bounds = array<i64: 1, 256, 8>}, {transform_indices = @transform_11, window_bounds = array<i64: 1, 1, 8>}, {transform_indices = @transform_12, window_bounds = array<i64: 1, 1, 8>}]} {
    %c0 = arith.constant 0 : index
    %c0_0 = arith.constant 0 : index
    %0 = vector.load %arg1[%c0, %c0_0] : memref<1x4xf32, #tpu.memory_space<vmem>>, vector<1x4xf32>
    %c0_1 = arith.constant 0 : index
    %c0_2 = arith.constant 0 : index
    %1 = vector.load %arg2[%c0_1, %c0_2] : memref<1x4xf32, #tpu.memory_space<vmem>>, vector<1x4xf32>
    %c0_3 = arith.constant 0 : index
    %c0_4 = arith.constant 0 : index
    %2 = vector.load %arg3[%c0_3, %c0_4] : memref<1x4xf32, #tpu.memory_space<vmem>>, vector<1x4xf32>
    %c0_5 = arith.constant 0 : index
    %c0_6 = arith.constant 0 : index
    %3 = vector.load %arg4[%c0_5, %c0_6] : memref<1x4xf32, #tpu.memory_space<vmem>>, vector<1x4xf32>
    %cst = arith.constant 0.001953125 : f32
    %4 = vector.broadcast %cst : f32 to vector<1x4xf32>
    %5 = arith.mulf %0, %4 : vector<1x4xf32>
    %cst_7 = arith.constant 0.001953125 : f32
    %6 = vector.broadcast %cst_7 : f32 to vector<1x4xf32>
    %7 = arith.mulf %1, %6 : vector<1x4xf32>
    %8 = arith.mulf %5, %5 : vector<1x4xf32>
    %9 = arith.subf %7, %8 : vector<1x4xf32>
    %cst_8 = arith.constant 9.99999974E-6 : f32
    %10 = vector.broadcast %cst_8 : f32 to vector<1x4xf32>
    %11 = arith.addf %9, %10 : vector<1x4xf32>
    %12 = math.rsqrt %11 : vector<1x4xf32>
    %13 = arith.mulf %2, %12 : vector<1x4xf32>
    %14 = arith.mulf %5, %13 : vector<1x4xf32>
    %15 = arith.subf %3, %14 : vector<1x4xf32>
    %c0_9 = arith.constant 0 : index
    %c0_10 = arith.constant 0 : index
    %c0_11 = arith.constant 0 : index
    %16 = vector.load %arg9[%c0_9, %c0_10, %c0_11] : memref<1x256x4xf32, #tpu.memory_space<vmem>>, vector<1x256x4xf32>
    %17 = vector.shape_cast %16 : vector<1x256x4xf32> to vector<256x4xf32>
    %18 = vector.broadcast %13 : vector<1x4xf32> to vector<256x4xf32>
    %19 = arith.mulf %17, %18 : vector<256x4xf32>
    %20 = vector.broadcast %15 : vector<1x4xf32> to vector<256x4xf32>
    %21 = arith.addf %19, %20 : vector<256x4xf32>
    %22 = arith.negf %21 : vector<256x4xf32>
    %23 = math.exp %22 : vector<256x4xf32>
    %cst_12 = arith.constant 1.000000e+00 : f32
    %24 = vector.broadcast %cst_12 : f32 to vector<256x4xf32>
    %25 = arith.addf %24, %23 : vector<256x4xf32>
    %26 = arith.divf %24, %25 : vector<256x4xf32>
    %27 = arith.mulf %21, %26 : vector<256x4xf32>
    %cst_13 = arith.constant 0.000000e+00 : f32
    %28 = vector.broadcast %cst_13 : f32 to vector<17x4xf32>
    %29 = tpu.concatenate %28, %27, %28 in 0 : vector<17x4xf32>, vector<256x4xf32>, vector<17x4xf32> -> vector<290x4xf32>
    %30 = tpu.iota {dimensions = array<i32: 0>} : vector<256x1xi32>
    %c16_i32 = arith.constant 16 : i32
    %c0_i32 = arith.constant 0 : i32
    %31 = arith.cmpi eq, %c16_i32, %c0_i32 : i32
    %c1_i32 = arith.constant 1 : i32
    %32 = arith.select %31, %c1_i32, %c16_i32 : i32
    %33 = vector.broadcast %32 : i32 to vector<256x1xi32>
    %34 = arith.remsi %30, %33 : vector<256x1xi32>
    %c0_i32_14 = arith.constant 0 : i32
    %35 = vector.broadcast %c0_i32_14 : i32 to vector<256x1xi32>
    %36 = arith.cmpi ne, %34, %35 : vector<256x1xi32>
    %c0_i32_15 = arith.constant 0 : i32
    %37 = vector.broadcast %c0_i32_15 : i32 to vector<256x1xi32>
    %38 = arith.cmpi slt, %34, %37 : vector<256x1xi32>
    %c0_i32_16 = arith.constant 0 : i32
    %39 = arith.cmpi slt, %32, %c0_i32_16 : i32
    %40 = vector.broadcast %39 : i1 to vector<256x1xi1>
    %41 = vector.broadcast %40 : vector<256x1xi1> to vector<256x1xi1>
    %42 = arith.xori %38, %41 : vector<256x1xi1>
    %43 = arith.andi %42, %36 : vector<256x1xi1>
    %44 = vector.broadcast %32 : i32 to vector<256x1xi32>
    %45 = arith.addi %34, %44 : vector<256x1xi32>
    %46 = arith.select %43, %45, %34 : vector<256x1xi1>, vector<256x1xi32>
    %c0_i32_17 = arith.constant 0 : i32
    %47 = vector.broadcast %c0_i32_17 : i32 to vector<256x1xi32>
    %48 = arith.cmpi sgt, %46, %47 : vector<256x1xi32>
    %c15_i32 = arith.constant 15 : i32
    %49 = vector.broadcast %c15_i32 : i32 to vector<256x1xi32>
    %50 = arith.cmpi slt, %46, %49 : vector<256x1xi32>
    %cst_18 = arith.constant 0.000000e+00 : f32
    %51 = vector.broadcast %cst_18 : f32 to vector<256x8xf32>
    %52 = vector.extract_strided_slice %29 {offsets = [0, 0], sizes = [256, 4], strides = [1, 1]} : vector<290x4xf32> to vector<256x4xf32>
    %cst_19 = arith.constant 0.000000e+00 : f32
    %53 = vector.shape_cast %48 : vector<256x1xi1> to vector<256x1xi1>
    %54 = vector.broadcast %53 : vector<256x1xi1> to vector<256x4xi1>
    %55 = vector.broadcast %cst_19 : f32 to vector<256x4xf32>
    %56 = arith.select %54, %52, %55 : vector<256x4xi1>, vector<256x4xf32>
    %57 = arith.truncf %56 : vector<256x4xf32> to vector<256x4xbf16>
    %c0_20 = arith.constant 0 : index
    %c0_21 = arith.constant 0 : index
    %c0_22 = arith.constant 0 : index
    %58 = vector.load %arg5[%c0_20, %c0_21, %c0_22] : memref<9x4x8xbf16, #tpu.memory_space<vmem>>, vector<1x4x8xbf16>
    %59 = vector.shape_cast %58 : vector<1x4x8xbf16> to vector<4x8xbf16>
    %cst_23 = arith.constant dense<0.000000e+00> : vector<256x8xf32>
    %60 = tpu.matmul %57, %59, %cst_23 {dimension_numbers = #tpu.dot_dimension_numbers<[1], [0], [0], [1], [0, 0, 1, 1], [], []>} : vector<256x4xbf16>, vector<4x8xbf16>, vector<256x8xf32> -> vector<256x8xf32>
    %61 = arith.addf %51, %60 : vector<256x8xf32>
    %62 = vector.extract_strided_slice %29 {offsets = [1, 0], sizes = [256, 4], strides = [1, 1]} : vector<290x4xf32> to vector<256x4xf32>
    %63 = arith.truncf %62 : vector<256x4xf32> to vector<256x4xbf16>
    %c1 = arith.constant 1 : index
    %c0_24 = arith.constant 0 : index
    %c0_25 = arith.constant 0 : index
    %64 = vector.load %arg5[%c1, %c0_24, %c0_25] : memref<9x4x8xbf16, #tpu.memory_space<vmem>>, vector<1x4x8xbf16>
    %65 = vector.shape_cast %64 : vector<1x4x8xbf16> to vector<4x8xbf16>
    %cst_26 = arith.constant dense<0.000000e+00> : vector<256x8xf32>
    %66 = tpu.matmul %63, %65, %cst_26 {dimension_numbers = #tpu.dot_dimension_numbers<[1], [0], [0], [1], [0, 0, 1, 1], [], []>} : vector<256x4xbf16>, vector<4x8xbf16>, vector<256x8xf32> -> vector<256x8xf32>
    %67 = arith.addf %61, %66 : vector<256x8xf32>
    %68 = vector.extract_strided_slice %29 {offsets = [2, 0], sizes = [256, 4], strides = [1, 1]} : vector<290x4xf32> to vector<256x4xf32>
    %cst_27 = arith.constant 0.000000e+00 : f32
    %69 = vector.shape_cast %50 : vector<256x1xi1> to vector<256x1xi1>
    %70 = vector.broadcast %69 : vector<256x1xi1> to vector<256x4xi1>
    %71 = vector.broadcast %cst_27 : f32 to vector<256x4xf32>
    %72 = arith.select %70, %68, %71 : vector<256x4xi1>, vector<256x4xf32>
    %73 = arith.truncf %72 : vector<256x4xf32> to vector<256x4xbf16>
    %c2 = arith.constant 2 : index
    %c0_28 = arith.constant 0 : index
    %c0_29 = arith.constant 0 : index
    %74 = vector.load %arg5[%c2, %c0_28, %c0_29] : memref<9x4x8xbf16, #tpu.memory_space<vmem>>, vector<1x4x8xbf16>
    %75 = vector.shape_cast %74 : vector<1x4x8xbf16> to vector<4x8xbf16>
    %cst_30 = arith.constant dense<0.000000e+00> : vector<256x8xf32>
    %76 = tpu.matmul %73, %75, %cst_30 {dimension_numbers = #tpu.dot_dimension_numbers<[1], [0], [0], [1], [0, 0, 1, 1], [], []>} : vector<256x4xbf16>, vector<4x8xbf16>, vector<256x8xf32> -> vector<256x8xf32>
    %77 = arith.addf %67, %76 : vector<256x8xf32>
    %78 = vector.extract_strided_slice %29 {offsets = [16, 0], sizes = [256, 4], strides = [1, 1]} : vector<290x4xf32> to vector<256x4xf32>
    %cst_31 = arith.constant 0.000000e+00 : f32
    %79 = vector.shape_cast %48 : vector<256x1xi1> to vector<256x1xi1>
    %80 = vector.broadcast %79 : vector<256x1xi1> to vector<256x4xi1>
    %81 = vector.broadcast %cst_31 : f32 to vector<256x4xf32>
    %82 = arith.select %80, %78, %81 : vector<256x4xi1>, vector<256x4xf32>
    %83 = arith.truncf %82 : vector<256x4xf32> to vector<256x4xbf16>
    %c3 = arith.constant 3 : index
    %c0_32 = arith.constant 0 : index
    %c0_33 = arith.constant 0 : index
    %84 = vector.load %arg5[%c3, %c0_32, %c0_33] : memref<9x4x8xbf16, #tpu.memory_space<vmem>>, vector<1x4x8xbf16>
    %85 = vector.shape_cast %84 : vector<1x4x8xbf16> to vector<4x8xbf16>
    %cst_34 = arith.constant dense<0.000000e+00> : vector<256x8xf32>
    %86 = tpu.matmul %83, %85, %cst_34 {dimension_numbers = #tpu.dot_dimension_numbers<[1], [0], [0], [1], [0, 0, 1, 1], [], []>} : vector<256x4xbf16>, vector<4x8xbf16>, vector<256x8xf32> -> vector<256x8xf32>
    %87 = arith.addf %77, %86 : vector<256x8xf32>
    %88 = vector.extract_strided_slice %29 {offsets = [17, 0], sizes = [256, 4], strides = [1, 1]} : vector<290x4xf32> to vector<256x4xf32>
    %89 = arith.truncf %88 : vector<256x4xf32> to vector<256x4xbf16>
    %c4 = arith.constant 4 : index
    %c0_35 = arith.constant 0 : index
    %c0_36 = arith.constant 0 : index
    %90 = vector.load %arg5[%c4, %c0_35, %c0_36] : memref<9x4x8xbf16, #tpu.memory_space<vmem>>, vector<1x4x8xbf16>
    %91 = vector.shape_cast %90 : vector<1x4x8xbf16> to vector<4x8xbf16>
    %cst_37 = arith.constant dense<0.000000e+00> : vector<256x8xf32>
    %92 = tpu.matmul %89, %91, %cst_37 {dimension_numbers = #tpu.dot_dimension_numbers<[1], [0], [0], [1], [0, 0, 1, 1], [], []>} : vector<256x4xbf16>, vector<4x8xbf16>, vector<256x8xf32> -> vector<256x8xf32>
    %93 = arith.addf %87, %92 : vector<256x8xf32>
    %94 = vector.extract_strided_slice %29 {offsets = [18, 0], sizes = [256, 4], strides = [1, 1]} : vector<290x4xf32> to vector<256x4xf32>
    %cst_38 = arith.constant 0.000000e+00 : f32
    %95 = vector.shape_cast %50 : vector<256x1xi1> to vector<256x1xi1>
    %96 = vector.broadcast %95 : vector<256x1xi1> to vector<256x4xi1>
    %97 = vector.broadcast %cst_38 : f32 to vector<256x4xf32>
    %98 = arith.select %96, %94, %97 : vector<256x4xi1>, vector<256x4xf32>
    %99 = arith.truncf %98 : vector<256x4xf32> to vector<256x4xbf16>
    %c5 = arith.constant 5 : index
    %c0_39 = arith.constant 0 : index
    %c0_40 = arith.constant 0 : index
    %100 = vector.load %arg5[%c5, %c0_39, %c0_40] : memref<9x4x8xbf16, #tpu.memory_space<vmem>>, vector<1x4x8xbf16>
    %101 = vector.shape_cast %100 : vector<1x4x8xbf16> to vector<4x8xbf16>
    %cst_41 = arith.constant dense<0.000000e+00> : vector<256x8xf32>
    %102 = tpu.matmul %99, %101, %cst_41 {dimension_numbers = #tpu.dot_dimension_numbers<[1], [0], [0], [1], [0, 0, 1, 1], [], []>} : vector<256x4xbf16>, vector<4x8xbf16>, vector<256x8xf32> -> vector<256x8xf32>
    %103 = arith.addf %93, %102 : vector<256x8xf32>
    %104 = vector.extract_strided_slice %29 {offsets = [32, 0], sizes = [256, 4], strides = [1, 1]} : vector<290x4xf32> to vector<256x4xf32>
    %cst_42 = arith.constant 0.000000e+00 : f32
    %105 = vector.shape_cast %48 : vector<256x1xi1> to vector<256x1xi1>
    %106 = vector.broadcast %105 : vector<256x1xi1> to vector<256x4xi1>
    %107 = vector.broadcast %cst_42 : f32 to vector<256x4xf32>
    %108 = arith.select %106, %104, %107 : vector<256x4xi1>, vector<256x4xf32>
    %109 = arith.truncf %108 : vector<256x4xf32> to vector<256x4xbf16>
    %c6 = arith.constant 6 : index
    %c0_43 = arith.constant 0 : index
    %c0_44 = arith.constant 0 : index
    %110 = vector.load %arg5[%c6, %c0_43, %c0_44] : memref<9x4x8xbf16, #tpu.memory_space<vmem>>, vector<1x4x8xbf16>
    %111 = vector.shape_cast %110 : vector<1x4x8xbf16> to vector<4x8xbf16>
    %cst_45 = arith.constant dense<0.000000e+00> : vector<256x8xf32>
    %112 = tpu.matmul %109, %111, %cst_45 {dimension_numbers = #tpu.dot_dimension_numbers<[1], [0], [0], [1], [0, 0, 1, 1], [], []>} : vector<256x4xbf16>, vector<4x8xbf16>, vector<256x8xf32> -> vector<256x8xf32>
    %113 = arith.addf %103, %112 : vector<256x8xf32>
    %114 = vector.extract_strided_slice %29 {offsets = [33, 0], sizes = [256, 4], strides = [1, 1]} : vector<290x4xf32> to vector<256x4xf32>
    %115 = arith.truncf %114 : vector<256x4xf32> to vector<256x4xbf16>
    %c7 = arith.constant 7 : index
    %c0_46 = arith.constant 0 : index
    %c0_47 = arith.constant 0 : index
    %116 = vector.load %arg5[%c7, %c0_46, %c0_47] : memref<9x4x8xbf16, #tpu.memory_space<vmem>>, vector<1x4x8xbf16>
    %117 = vector.shape_cast %116 : vector<1x4x8xbf16> to vector<4x8xbf16>
    %cst_48 = arith.constant dense<0.000000e+00> : vector<256x8xf32>
    %118 = tpu.matmul %115, %117, %cst_48 {dimension_numbers = #tpu.dot_dimension_numbers<[1], [0], [0], [1], [0, 0, 1, 1], [], []>} : vector<256x4xbf16>, vector<4x8xbf16>, vector<256x8xf32> -> vector<256x8xf32>
    %119 = arith.addf %113, %118 : vector<256x8xf32>
    %120 = vector.extract_strided_slice %29 {offsets = [34, 0], sizes = [256, 4], strides = [1, 1]} : vector<290x4xf32> to vector<256x4xf32>
    %cst_49 = arith.constant 0.000000e+00 : f32
    %121 = vector.shape_cast %50 : vector<256x1xi1> to vector<256x1xi1>
    %122 = vector.broadcast %121 : vector<256x1xi1> to vector<256x4xi1>
    %123 = vector.broadcast %cst_49 : f32 to vector<256x4xf32>
    %124 = arith.select %122, %120, %123 : vector<256x4xi1>, vector<256x4xf32>
    %125 = arith.truncf %124 : vector<256x4xf32> to vector<256x4xbf16>
    %c8 = arith.constant 8 : index
    %c0_50 = arith.constant 0 : index
    %c0_51 = arith.constant 0 : index
    %126 = vector.load %arg5[%c8, %c0_50, %c0_51] : memref<9x4x8xbf16, #tpu.memory_space<vmem>>, vector<1x4x8xbf16>
    %127 = vector.shape_cast %126 : vector<1x4x8xbf16> to vector<4x8xbf16>
    %cst_52 = arith.constant dense<0.000000e+00> : vector<256x8xf32>
    %128 = tpu.matmul %125, %127, %cst_52 {dimension_numbers = #tpu.dot_dimension_numbers<[1], [0], [0], [1], [0, 0, 1, 1], [], []>} : vector<256x4xbf16>, vector<4x8xbf16>, vector<256x8xf32> -> vector<256x8xf32>
    %129 = arith.addf %119, %128 : vector<256x8xf32>
    %c0_53 = arith.constant 0 : index
    %c0_54 = arith.constant 0 : index
    %c0_55 = arith.constant 0 : index
    %130 = vector.load %arg10[%c0_53, %c0_54, %c0_55] : memref<1x1x32xf32, #tpu.memory_space<vmem>>, vector<1x1x32xf32>
    %131 = vector.shape_cast %130 : vector<1x1x32xf32> to vector<1x32xf32>
    %132 = arith.negf %131 : vector<1x32xf32>
    %133 = math.exp %132 : vector<1x32xf32>
    %cst_56 = arith.constant 1.000000e+00 : f32
    %134 = vector.broadcast %cst_56 : f32 to vector<1x32xf32>
    %135 = arith.addf %134, %133 : vector<1x32xf32>
    %136 = arith.divf %134, %135 : vector<1x32xf32>
    %137 = arith.mulf %131, %136 : vector<1x32xf32>
    %c0_57 = arith.constant 0 : index
    %c0_58 = arith.constant 0 : index
    %138 = vector.load %arg7[%c0_57, %c0_58] : memref<32x8xf32, #tpu.memory_space<vmem>>, vector<32x8xf32>
    %cst_59 = arith.constant dense<0.000000e+00> : vector<1x8xf32>
    %139 = tpu.matmul %137, %138, %cst_59 {dimension_numbers = #tpu.dot_dimension_numbers<[1], [0], [0], [1], [0, 0, 1, 1], [], []>} : vector<1x32xf32>, vector<32x8xf32>, vector<1x8xf32> -> vector<1x8xf32>
    %c0_60 = arith.constant 0 : index
    %c0_61 = arith.constant 0 : index
    %140 = vector.load %arg8[%c0_60, %c0_61] : memref<1x8xf32, #tpu.memory_space<vmem>>, vector<1x8xf32>
    %141 = arith.addf %139, %140 : vector<1x8xf32>
    %c0_62 = arith.constant 0 : index
    %c0_63 = arith.constant 0 : index
    %142 = vector.load %arg6[%c0_62, %c0_63] : memref<1x8xf32, #tpu.memory_space<vmem>>, vector<1x8xf32>
    %143 = vector.broadcast %142 : vector<1x8xf32> to vector<256x8xf32>
    %144 = arith.addf %129, %143 : vector<256x8xf32>
    %145 = vector.broadcast %141 : vector<1x8xf32> to vector<256x8xf32>
    %146 = arith.addf %144, %145 : vector<256x8xf32>
    %c0_64 = arith.constant 0 : index
    %c0_65 = arith.constant 0 : index
    %c0_66 = arith.constant 0 : index
    %147 = vector.load %arg11[%c0_64, %c0_65, %c0_66] : memref<1x256x8xf32, #tpu.memory_space<vmem>>, vector<1x256x8xf32>
    %148 = vector.shape_cast %147 : vector<1x256x8xf32> to vector<256x8xf32>
    %149 = vector.shape_cast %146 : vector<256x8xf32> to vector<1x256x8xf32>
    tpu.vector_store %arg11[%c0_64, %c0_65, %c0_66], %149 {strides = array<i32>} : memref<1x256x8xf32, #tpu.memory_space<vmem>>, vector<1x256x8xf32>,
    %cst_67 = arith.constant dense<0.000000e+00> : vector<8xf32>
    %150 = vector.multi_reduction <add>, %146, %cst_67 [0] : vector<256x8xf32> to vector<8xf32>
    %151 = vector.shape_cast %150 : vector<8xf32> to vector<1x8xf32>
    %c0_68 = arith.constant 0 : index
    %c0_69 = arith.constant 0 : index
    %c0_70 = arith.constant 0 : index
    %152 = vector.load %arg12[%c0_68, %c0_69, %c0_70] : memref<1x1x8xf32, #tpu.memory_space<vmem>>, vector<1x1x8xf32>
    %153 = vector.shape_cast %152 : vector<1x1x8xf32> to vector<1x8xf32>
    %154 = vector.shape_cast %151 : vector<1x8xf32> to vector<1x1x8xf32>
    tpu.vector_store %arg12[%c0_68, %c0_69, %c0_70], %154 {strides = array<i32>} : memref<1x1x8xf32, #tpu.memory_space<vmem>>, vector<1x1x8xf32>,
    %155 = arith.mulf %146, %146 : vector<256x8xf32>
    %cst_71 = arith.constant dense<0.000000e+00> : vector<8xf32>
    %156 = vector.multi_reduction <add>, %155, %cst_71 [0] : vector<256x8xf32> to vector<8xf32>
    %157 = vector.shape_cast %156 : vector<8xf32> to vector<1x8xf32>
    %c0_72 = arith.constant 0 : index
    %c0_73 = arith.constant 0 : index
    %c0_74 = arith.constant 0 : index
    %158 = vector.load %arg13[%c0_72, %c0_73, %c0_74] : memref<1x1x8xf32, #tpu.memory_space<vmem>>, vector<1x1x8xf32>
    %159 = vector.shape_cast %158 : vector<1x1x8xf32> to vector<1x8xf32>
    %160 = vector.shape_cast %157 : vector<1x8xf32> to vector<1x1x8xf32>
    tpu.vector_store %arg13[%c0_72, %c0_73, %c0_74], %160 {strides = array<i32>} : memref<1x1x8xf32, #tpu.memory_space<vmem>>, vector<1x1x8xf32>,
    return
  }
  func.func @transform_0(%arg0: i32) -> (i32, i32) {
    %c0_i32 = arith.constant 0 : i32
    %c0_i32_0 = arith.constant 0 : i32
    %c0_i32_1 = arith.constant 0 : i32
    return %c0_i32, %c0_i32_0 : i32, i32
  }
  func.func @transform_1(%arg0: i32) -> (i32, i32) {
    %c0_i32 = arith.constant 0 : i32
    %c0_i32_0 = arith.constant 0 : i32
    %c0_i32_1 = arith.constant 0 : i32
    return %c0_i32, %c0_i32_0 : i32, i32
  }
  func.func @transform_2(%arg0: i32) -> (i32, i32) {
    %c0_i32 = arith.constant 0 : i32
    %c0_i32_0 = arith.constant 0 : i32
    %c0_i32_1 = arith.constant 0 : i32
    return %c0_i32, %c0_i32_0 : i32, i32
  }
  func.func @transform_3(%arg0: i32) -> (i32, i32) {
    %c0_i32 = arith.constant 0 : i32
    %c0_i32_0 = arith.constant 0 : i32
    %c0_i32_1 = arith.constant 0 : i32
    return %c0_i32, %c0_i32_0 : i32, i32
  }
  func.func @transform_4(%arg0: i32) -> (i32, i32, i32) {
    %c0_i32 = arith.constant 0 : i32
    %c0_i32_0 = arith.constant 0 : i32
    %c0_i32_1 = arith.constant 0 : i32
    %c0_i32_2 = arith.constant 0 : i32
    return %c0_i32, %c0_i32_0, %c0_i32_1 : i32, i32, i32
  }
  func.func @transform_5(%arg0: i32) -> (i32, i32) {
    %c0_i32 = arith.constant 0 : i32
    %c0_i32_0 = arith.constant 0 : i32
    %c0_i32_1 = arith.constant 0 : i32
    return %c0_i32, %c0_i32_0 : i32, i32
  }
  func.func @transform_6(%arg0: i32) -> (i32, i32) {
    %c0_i32 = arith.constant 0 : i32
    %c0_i32_0 = arith.constant 0 : i32
    %c0_i32_1 = arith.constant 0 : i32
    return %c0_i32, %c0_i32_0 : i32, i32
  }
  func.func @transform_7(%arg0: i32) -> (i32, i32) {
    %c0_i32 = arith.constant 0 : i32
    %c0_i32_0 = arith.constant 0 : i32
    %c0_i32_1 = arith.constant 0 : i32
    return %c0_i32, %c0_i32_0 : i32, i32
  }
  func.func @transform_8(%arg0: i32) -> (i32, i32, i32) {
    %c0_i32 = arith.constant 0 : i32
    %c0_i32_0 = arith.constant 0 : i32
    %c0_i32_1 = arith.constant 0 : i32
    return %arg0, %c0_i32, %c0_i32_0 : i32, i32, i32
  }
  func.func @transform_9(%arg0: i32) -> (i32, i32, i32) {
    %c0_i32 = arith.constant 0 : i32
    %c0_i32_0 = arith.constant 0 : i32
    %c0_i32_1 = arith.constant 0 : i32
    return %arg0, %c0_i32, %c0_i32_0 : i32, i32, i32
  }
  func.func @transform_10(%arg0: i32) -> (i32, i32, i32) {
    %c0_i32 = arith.constant 0 : i32
    %c0_i32_0 = arith.constant 0 : i32
    %c0_i32_1 = arith.constant 0 : i32
    return %arg0, %c0_i32, %c0_i32_0 : i32, i32, i32
  }
  func.func @transform_11(%arg0: i32) -> (i32, i32, i32) {
    %c0_i32 = arith.constant 0 : i32
    %c0_i32_0 = arith.constant 0 : i32
    %c0_i32_1 = arith.constant 0 : i32
    return %arg0, %c0_i32, %c0_i32_0 : i32, i32, i32
  }
  func.func @transform_12(%arg0: i32) -> (i32, i32, i32) {
    %c0_i32 = arith.constant 0 : i32
    %c0_i32_0 = arith.constant 0 : i32
    %c0_i32_1 = arith.constant 0 : i32
    return %arg0, %c0_i32, %c0_i32_0 : i32, i32, i32
  }
}

module attributes {stable_mosaic.version = 11 : i64} {
  func.func @block2_kernel(%arg0: i32, %arg1: memref<2x1x8xf32, #tpu.memory_space<vmem>>, %arg2: memref<2x1x8xf32, #tpu.memory_space<vmem>>, %arg3: memref<1x8xf32, #tpu.memory_space<vmem>>, %arg4: memref<1x8xf32, #tpu.memory_space<vmem>>, %arg5: memref<9x8x8xbf16, #tpu.memory_space<vmem>>, %arg6: memref<1x8xf32, #tpu.memory_space<vmem>>, %arg7: memref<4x8xbf16, #tpu.memory_space<vmem>>, %arg8: memref<1x8xf32, #tpu.memory_space<vmem>>, %arg9: memref<1x256x8xf32, #tpu.memory_space<vmem>>, %arg10: memref<1x256x4xf32, #tpu.memory_space<vmem>>, %arg11: memref<1x256x8xf32, #tpu.memory_space<vmem>>) attributes {dimension_semantics = [#tpu.dimension_semantics<parallel>], iteration_bounds = array<i64: 2>, scalar_prefetch = 0 : i64, scratch_operands = 0 : i64, tpu.core_type = #tpu.core_type<tc>, window_params = [{pipeline_mode = #tpu.pipeline_mode<synchronous>, transform_indices = @transform_0, window_bounds = array<i64: 2, 1, 8>}, {pipeline_mode = #tpu.pipeline_mode<synchronous>, transform_indices = @transform_1, window_bounds = array<i64: 2, 1, 8>}, {pipeline_mode = #tpu.pipeline_mode<synchronous>, transform_indices = @transform_2, window_bounds = array<i64: 1, 8>}, {pipeline_mode = #tpu.pipeline_mode<synchronous>, transform_indices = @transform_3, window_bounds = array<i64: 1, 8>}, {pipeline_mode = #tpu.pipeline_mode<synchronous>, transform_indices = @transform_4, window_bounds = array<i64: 9, 8, 8>}, {pipeline_mode = #tpu.pipeline_mode<synchronous>, transform_indices = @transform_5, window_bounds = array<i64: 1, 8>}, {pipeline_mode = #tpu.pipeline_mode<synchronous>, transform_indices = @transform_6, window_bounds = array<i64: 4, 8>}, {pipeline_mode = #tpu.pipeline_mode<synchronous>, transform_indices = @transform_7, window_bounds = array<i64: 1, 8>}, {transform_indices = @transform_8, window_bounds = array<i64: 1, 256, 8>}, {transform_indices = @transform_9, window_bounds = array<i64: 1, 256, 4>}, {transform_indices = @transform_10, window_bounds = array<i64: 1, 256, 8>}]} {
    %c0 = arith.constant 0 : index
    %c0_0 = arith.constant 0 : index
    %c0_1 = arith.constant 0 : index
    %0 = vector.load %arg1[%c0, %c0_0, %c0_1] : memref<2x1x8xf32, #tpu.memory_space<vmem>>, vector<2x1x8xf32>
    %cst = arith.constant dense<0.000000e+00> : vector<1x8xf32>
    %1 = vector.multi_reduction <add>, %0, %cst [0] : vector<2x1x8xf32> to vector<1x8xf32>
    %c0_2 = arith.constant 0 : index
    %c0_3 = arith.constant 0 : index
    %c0_4 = arith.constant 0 : index
    %2 = vector.load %arg2[%c0_2, %c0_3, %c0_4] : memref<2x1x8xf32, #tpu.memory_space<vmem>>, vector<2x1x8xf32>
    %cst_5 = arith.constant dense<0.000000e+00> : vector<1x8xf32>
    %3 = vector.multi_reduction <add>, %2, %cst_5 [0] : vector<2x1x8xf32> to vector<1x8xf32>
    %c0_6 = arith.constant 0 : index
    %c0_7 = arith.constant 0 : index
    %4 = vector.load %arg3[%c0_6, %c0_7] : memref<1x8xf32, #tpu.memory_space<vmem>>, vector<1x8xf32>
    %c0_8 = arith.constant 0 : index
    %c0_9 = arith.constant 0 : index
    %5 = vector.load %arg4[%c0_8, %c0_9] : memref<1x8xf32, #tpu.memory_space<vmem>>, vector<1x8xf32>
    %cst_10 = arith.constant 0.001953125 : f32
    %6 = vector.broadcast %cst_10 : f32 to vector<1x8xf32>
    %7 = arith.mulf %1, %6 : vector<1x8xf32>
    %cst_11 = arith.constant 0.001953125 : f32
    %8 = vector.broadcast %cst_11 : f32 to vector<1x8xf32>
    %9 = arith.mulf %3, %8 : vector<1x8xf32>
    %10 = arith.mulf %7, %7 : vector<1x8xf32>
    %11 = arith.subf %9, %10 : vector<1x8xf32>
    %cst_12 = arith.constant 9.99999974E-6 : f32
    %12 = vector.broadcast %cst_12 : f32 to vector<1x8xf32>
    %13 = arith.addf %11, %12 : vector<1x8xf32>
    %14 = math.rsqrt %13 : vector<1x8xf32>
    %15 = arith.mulf %4, %14 : vector<1x8xf32>
    %16 = arith.mulf %7, %15 : vector<1x8xf32>
    %17 = arith.subf %5, %16 : vector<1x8xf32>
    %c0_13 = arith.constant 0 : index
    %c0_14 = arith.constant 0 : index
    %c0_15 = arith.constant 0 : index
    %18 = vector.load %arg9[%c0_13, %c0_14, %c0_15] : memref<1x256x8xf32, #tpu.memory_space<vmem>>, vector<1x256x8xf32>
    %19 = vector.shape_cast %18 : vector<1x256x8xf32> to vector<256x8xf32>
    %20 = vector.broadcast %15 : vector<1x8xf32> to vector<256x8xf32>
    %21 = arith.mulf %19, %20 : vector<256x8xf32>
    %22 = vector.broadcast %17 : vector<1x8xf32> to vector<256x8xf32>
    %23 = arith.addf %21, %22 : vector<256x8xf32>
    %24 = arith.negf %23 : vector<256x8xf32>
    %25 = math.exp %24 : vector<256x8xf32>
    %cst_16 = arith.constant 1.000000e+00 : f32
    %26 = vector.broadcast %cst_16 : f32 to vector<256x8xf32>
    %27 = arith.addf %26, %25 : vector<256x8xf32>
    %28 = arith.divf %26, %27 : vector<256x8xf32>
    %29 = arith.mulf %23, %28 : vector<256x8xf32>
    %cst_17 = arith.constant 0.000000e+00 : f32
    %30 = vector.broadcast %cst_17 : f32 to vector<17x8xf32>
    %31 = tpu.concatenate %30, %29, %30 in 0 : vector<17x8xf32>, vector<256x8xf32>, vector<17x8xf32> -> vector<290x8xf32>
    %32 = tpu.iota {dimensions = array<i32: 0>} : vector<256x1xi32>
    %c16_i32 = arith.constant 16 : i32
    %c0_i32 = arith.constant 0 : i32
    %33 = arith.cmpi eq, %c16_i32, %c0_i32 : i32
    %c1_i32 = arith.constant 1 : i32
    %34 = arith.select %33, %c1_i32, %c16_i32 : i32
    %35 = vector.broadcast %34 : i32 to vector<256x1xi32>
    %36 = arith.remsi %32, %35 : vector<256x1xi32>
    %c0_i32_18 = arith.constant 0 : i32
    %37 = vector.broadcast %c0_i32_18 : i32 to vector<256x1xi32>
    %38 = arith.cmpi ne, %36, %37 : vector<256x1xi32>
    %c0_i32_19 = arith.constant 0 : i32
    %39 = vector.broadcast %c0_i32_19 : i32 to vector<256x1xi32>
    %40 = arith.cmpi slt, %36, %39 : vector<256x1xi32>
    %c0_i32_20 = arith.constant 0 : i32
    %41 = arith.cmpi slt, %34, %c0_i32_20 : i32
    %42 = vector.broadcast %41 : i1 to vector<256x1xi1>
    %43 = vector.broadcast %42 : vector<256x1xi1> to vector<256x1xi1>
    %44 = arith.xori %40, %43 : vector<256x1xi1>
    %45 = arith.andi %44, %38 : vector<256x1xi1>
    %46 = vector.broadcast %34 : i32 to vector<256x1xi32>
    %47 = arith.addi %36, %46 : vector<256x1xi32>
    %48 = arith.select %45, %47, %36 : vector<256x1xi1>, vector<256x1xi32>
    %c0_i32_21 = arith.constant 0 : i32
    %49 = vector.broadcast %c0_i32_21 : i32 to vector<256x1xi32>
    %50 = arith.cmpi sgt, %48, %49 : vector<256x1xi32>
    %c15_i32 = arith.constant 15 : i32
    %51 = vector.broadcast %c15_i32 : i32 to vector<256x1xi32>
    %52 = arith.cmpi slt, %48, %51 : vector<256x1xi32>
    %cst_22 = arith.constant 0.000000e+00 : f32
    %53 = vector.broadcast %cst_22 : f32 to vector<256x8xf32>
    %54 = vector.extract_strided_slice %31 {offsets = [0, 0], sizes = [256, 8], strides = [1, 1]} : vector<290x8xf32> to vector<256x8xf32>
    %cst_23 = arith.constant 0.000000e+00 : f32
    %55 = vector.shape_cast %50 : vector<256x1xi1> to vector<256x1xi1>
    %56 = vector.broadcast %55 : vector<256x1xi1> to vector<256x8xi1>
    %57 = vector.broadcast %cst_23 : f32 to vector<256x8xf32>
    %58 = arith.select %56, %54, %57 : vector<256x8xi1>, vector<256x8xf32>
    %59 = arith.truncf %58 : vector<256x8xf32> to vector<256x8xbf16>
    %c0_24 = arith.constant 0 : index
    %c0_25 = arith.constant 0 : index
    %c0_26 = arith.constant 0 : index
    %60 = vector.load %arg5[%c0_24, %c0_25, %c0_26] : memref<9x8x8xbf16, #tpu.memory_space<vmem>>, vector<1x8x8xbf16>
    %61 = vector.shape_cast %60 : vector<1x8x8xbf16> to vector<8x8xbf16>
    %cst_27 = arith.constant dense<0.000000e+00> : vector<256x8xf32>
    %62 = tpu.matmul %59, %61, %cst_27 {dimension_numbers = #tpu.dot_dimension_numbers<[1], [0], [0], [1], [0, 0, 1, 1], [], []>} : vector<256x8xbf16>, vector<8x8xbf16>, vector<256x8xf32> -> vector<256x8xf32>
    %63 = arith.addf %53, %62 : vector<256x8xf32>
    %64 = vector.extract_strided_slice %31 {offsets = [1, 0], sizes = [256, 8], strides = [1, 1]} : vector<290x8xf32> to vector<256x8xf32>
    %65 = arith.truncf %64 : vector<256x8xf32> to vector<256x8xbf16>
    %c1 = arith.constant 1 : index
    %c0_28 = arith.constant 0 : index
    %c0_29 = arith.constant 0 : index
    %66 = vector.load %arg5[%c1, %c0_28, %c0_29] : memref<9x8x8xbf16, #tpu.memory_space<vmem>>, vector<1x8x8xbf16>
    %67 = vector.shape_cast %66 : vector<1x8x8xbf16> to vector<8x8xbf16>
    %cst_30 = arith.constant dense<0.000000e+00> : vector<256x8xf32>
    %68 = tpu.matmul %65, %67, %cst_30 {dimension_numbers = #tpu.dot_dimension_numbers<[1], [0], [0], [1], [0, 0, 1, 1], [], []>} : vector<256x8xbf16>, vector<8x8xbf16>, vector<256x8xf32> -> vector<256x8xf32>
    %69 = arith.addf %63, %68 : vector<256x8xf32>
    %70 = vector.extract_strided_slice %31 {offsets = [2, 0], sizes = [256, 8], strides = [1, 1]} : vector<290x8xf32> to vector<256x8xf32>
    %cst_31 = arith.constant 0.000000e+00 : f32
    %71 = vector.shape_cast %52 : vector<256x1xi1> to vector<256x1xi1>
    %72 = vector.broadcast %71 : vector<256x1xi1> to vector<256x8xi1>
    %73 = vector.broadcast %cst_31 : f32 to vector<256x8xf32>
    %74 = arith.select %72, %70, %73 : vector<256x8xi1>, vector<256x8xf32>
    %75 = arith.truncf %74 : vector<256x8xf32> to vector<256x8xbf16>
    %c2 = arith.constant 2 : index
    %c0_32 = arith.constant 0 : index
    %c0_33 = arith.constant 0 : index
    %76 = vector.load %arg5[%c2, %c0_32, %c0_33] : memref<9x8x8xbf16, #tpu.memory_space<vmem>>, vector<1x8x8xbf16>
    %77 = vector.shape_cast %76 : vector<1x8x8xbf16> to vector<8x8xbf16>
    %cst_34 = arith.constant dense<0.000000e+00> : vector<256x8xf32>
    %78 = tpu.matmul %75, %77, %cst_34 {dimension_numbers = #tpu.dot_dimension_numbers<[1], [0], [0], [1], [0, 0, 1, 1], [], []>} : vector<256x8xbf16>, vector<8x8xbf16>, vector<256x8xf32> -> vector<256x8xf32>
    %79 = arith.addf %69, %78 : vector<256x8xf32>
    %80 = vector.extract_strided_slice %31 {offsets = [16, 0], sizes = [256, 8], strides = [1, 1]} : vector<290x8xf32> to vector<256x8xf32>
    %cst_35 = arith.constant 0.000000e+00 : f32
    %81 = vector.shape_cast %50 : vector<256x1xi1> to vector<256x1xi1>
    %82 = vector.broadcast %81 : vector<256x1xi1> to vector<256x8xi1>
    %83 = vector.broadcast %cst_35 : f32 to vector<256x8xf32>
    %84 = arith.select %82, %80, %83 : vector<256x8xi1>, vector<256x8xf32>
    %85 = arith.truncf %84 : vector<256x8xf32> to vector<256x8xbf16>
    %c3 = arith.constant 3 : index
    %c0_36 = arith.constant 0 : index
    %c0_37 = arith.constant 0 : index
    %86 = vector.load %arg5[%c3, %c0_36, %c0_37] : memref<9x8x8xbf16, #tpu.memory_space<vmem>>, vector<1x8x8xbf16>
    %87 = vector.shape_cast %86 : vector<1x8x8xbf16> to vector<8x8xbf16>
    %cst_38 = arith.constant dense<0.000000e+00> : vector<256x8xf32>
    %88 = tpu.matmul %85, %87, %cst_38 {dimension_numbers = #tpu.dot_dimension_numbers<[1], [0], [0], [1], [0, 0, 1, 1], [], []>} : vector<256x8xbf16>, vector<8x8xbf16>, vector<256x8xf32> -> vector<256x8xf32>
    %89 = arith.addf %79, %88 : vector<256x8xf32>
    %90 = vector.extract_strided_slice %31 {offsets = [17, 0], sizes = [256, 8], strides = [1, 1]} : vector<290x8xf32> to vector<256x8xf32>
    %91 = arith.truncf %90 : vector<256x8xf32> to vector<256x8xbf16>
    %c4 = arith.constant 4 : index
    %c0_39 = arith.constant 0 : index
    %c0_40 = arith.constant 0 : index
    %92 = vector.load %arg5[%c4, %c0_39, %c0_40] : memref<9x8x8xbf16, #tpu.memory_space<vmem>>, vector<1x8x8xbf16>
    %93 = vector.shape_cast %92 : vector<1x8x8xbf16> to vector<8x8xbf16>
    %cst_41 = arith.constant dense<0.000000e+00> : vector<256x8xf32>
    %94 = tpu.matmul %91, %93, %cst_41 {dimension_numbers = #tpu.dot_dimension_numbers<[1], [0], [0], [1], [0, 0, 1, 1], [], []>} : vector<256x8xbf16>, vector<8x8xbf16>, vector<256x8xf32> -> vector<256x8xf32>
    %95 = arith.addf %89, %94 : vector<256x8xf32>
    %96 = vector.extract_strided_slice %31 {offsets = [18, 0], sizes = [256, 8], strides = [1, 1]} : vector<290x8xf32> to vector<256x8xf32>
    %cst_42 = arith.constant 0.000000e+00 : f32
    %97 = vector.shape_cast %52 : vector<256x1xi1> to vector<256x1xi1>
    %98 = vector.broadcast %97 : vector<256x1xi1> to vector<256x8xi1>
    %99 = vector.broadcast %cst_42 : f32 to vector<256x8xf32>
    %100 = arith.select %98, %96, %99 : vector<256x8xi1>, vector<256x8xf32>
    %101 = arith.truncf %100 : vector<256x8xf32> to vector<256x8xbf16>
    %c5 = arith.constant 5 : index
    %c0_43 = arith.constant 0 : index
    %c0_44 = arith.constant 0 : index
    %102 = vector.load %arg5[%c5, %c0_43, %c0_44] : memref<9x8x8xbf16, #tpu.memory_space<vmem>>, vector<1x8x8xbf16>
    %103 = vector.shape_cast %102 : vector<1x8x8xbf16> to vector<8x8xbf16>
    %cst_45 = arith.constant dense<0.000000e+00> : vector<256x8xf32>
    %104 = tpu.matmul %101, %103, %cst_45 {dimension_numbers = #tpu.dot_dimension_numbers<[1], [0], [0], [1], [0, 0, 1, 1], [], []>} : vector<256x8xbf16>, vector<8x8xbf16>, vector<256x8xf32> -> vector<256x8xf32>
    %105 = arith.addf %95, %104 : vector<256x8xf32>
    %106 = vector.extract_strided_slice %31 {offsets = [32, 0], sizes = [256, 8], strides = [1, 1]} : vector<290x8xf32> to vector<256x8xf32>
    %cst_46 = arith.constant 0.000000e+00 : f32
    %107 = vector.shape_cast %50 : vector<256x1xi1> to vector<256x1xi1>
    %108 = vector.broadcast %107 : vector<256x1xi1> to vector<256x8xi1>
    %109 = vector.broadcast %cst_46 : f32 to vector<256x8xf32>
    %110 = arith.select %108, %106, %109 : vector<256x8xi1>, vector<256x8xf32>
    %111 = arith.truncf %110 : vector<256x8xf32> to vector<256x8xbf16>
    %c6 = arith.constant 6 : index
    %c0_47 = arith.constant 0 : index
    %c0_48 = arith.constant 0 : index
    %112 = vector.load %arg5[%c6, %c0_47, %c0_48] : memref<9x8x8xbf16, #tpu.memory_space<vmem>>, vector<1x8x8xbf16>
    %113 = vector.shape_cast %112 : vector<1x8x8xbf16> to vector<8x8xbf16>
    %cst_49 = arith.constant dense<0.000000e+00> : vector<256x8xf32>
    %114 = tpu.matmul %111, %113, %cst_49 {dimension_numbers = #tpu.dot_dimension_numbers<[1], [0], [0], [1], [0, 0, 1, 1], [], []>} : vector<256x8xbf16>, vector<8x8xbf16>, vector<256x8xf32> -> vector<256x8xf32>
    %115 = arith.addf %105, %114 : vector<256x8xf32>
    %116 = vector.extract_strided_slice %31 {offsets = [33, 0], sizes = [256, 8], strides = [1, 1]} : vector<290x8xf32> to vector<256x8xf32>
    %117 = arith.truncf %116 : vector<256x8xf32> to vector<256x8xbf16>
    %c7 = arith.constant 7 : index
    %c0_50 = arith.constant 0 : index
    %c0_51 = arith.constant 0 : index
    %118 = vector.load %arg5[%c7, %c0_50, %c0_51] : memref<9x8x8xbf16, #tpu.memory_space<vmem>>, vector<1x8x8xbf16>
    %119 = vector.shape_cast %118 : vector<1x8x8xbf16> to vector<8x8xbf16>
    %cst_52 = arith.constant dense<0.000000e+00> : vector<256x8xf32>
    %120 = tpu.matmul %117, %119, %cst_52 {dimension_numbers = #tpu.dot_dimension_numbers<[1], [0], [0], [1], [0, 0, 1, 1], [], []>} : vector<256x8xbf16>, vector<8x8xbf16>, vector<256x8xf32> -> vector<256x8xf32>
    %121 = arith.addf %115, %120 : vector<256x8xf32>
    %122 = vector.extract_strided_slice %31 {offsets = [34, 0], sizes = [256, 8], strides = [1, 1]} : vector<290x8xf32> to vector<256x8xf32>
    %cst_53 = arith.constant 0.000000e+00 : f32
    %123 = vector.shape_cast %52 : vector<256x1xi1> to vector<256x1xi1>
    %124 = vector.broadcast %123 : vector<256x1xi1> to vector<256x8xi1>
    %125 = vector.broadcast %cst_53 : f32 to vector<256x8xf32>
    %126 = arith.select %124, %122, %125 : vector<256x8xi1>, vector<256x8xf32>
    %127 = arith.truncf %126 : vector<256x8xf32> to vector<256x8xbf16>
    %c8 = arith.constant 8 : index
    %c0_54 = arith.constant 0 : index
    %c0_55 = arith.constant 0 : index
    %128 = vector.load %arg5[%c8, %c0_54, %c0_55] : memref<9x8x8xbf16, #tpu.memory_space<vmem>>, vector<1x8x8xbf16>
    %129 = vector.shape_cast %128 : vector<1x8x8xbf16> to vector<8x8xbf16>
    %cst_56 = arith.constant dense<0.000000e+00> : vector<256x8xf32>
    %130 = tpu.matmul %127, %129, %cst_56 {dimension_numbers = #tpu.dot_dimension_numbers<[1], [0], [0], [1], [0, 0, 1, 1], [], []>} : vector<256x8xbf16>, vector<8x8xbf16>, vector<256x8xf32> -> vector<256x8xf32>
    %131 = arith.addf %121, %130 : vector<256x8xf32>
    %c0_57 = arith.constant 0 : index
    %c0_58 = arith.constant 0 : index
    %132 = vector.load %arg6[%c0_57, %c0_58] : memref<1x8xf32, #tpu.memory_space<vmem>>, vector<1x8xf32>
    %133 = vector.broadcast %132 : vector<1x8xf32> to vector<256x8xf32>
    %134 = arith.addf %131, %133 : vector<256x8xf32>
    %c0_59 = arith.constant 0 : index
    %c0_60 = arith.constant 0 : index
    %c0_61 = arith.constant 0 : index
    %135 = vector.load %arg10[%c0_59, %c0_60, %c0_61] : memref<1x256x4xf32, #tpu.memory_space<vmem>>, vector<1x256x4xf32>
    %136 = vector.shape_cast %135 : vector<1x256x4xf32> to vector<256x4xf32>
    %137 = arith.truncf %136 : vector<256x4xf32> to vector<256x4xbf16>
    %c0_62 = arith.constant 0 : index
    %c0_63 = arith.constant 0 : index
    %138 = vector.load %arg7[%c0_62, %c0_63] : memref<4x8xbf16, #tpu.memory_space<vmem>>, vector<4x8xbf16>
    %cst_64 = arith.constant dense<0.000000e+00> : vector<256x8xf32>
    %139 = tpu.matmul %137, %138, %cst_64 {dimension_numbers = #tpu.dot_dimension_numbers<[1], [0], [0], [1], [0, 0, 1, 1], [], []>} : vector<256x4xbf16>, vector<4x8xbf16>, vector<256x8xf32> -> vector<256x8xf32>
    %c0_65 = arith.constant 0 : index
    %c0_66 = arith.constant 0 : index
    %140 = vector.load %arg8[%c0_65, %c0_66] : memref<1x8xf32, #tpu.memory_space<vmem>>, vector<1x8xf32>
    %141 = vector.broadcast %140 : vector<1x8xf32> to vector<256x8xf32>
    %142 = arith.addf %139, %141 : vector<256x8xf32>
    %143 = arith.addf %134, %142 : vector<256x8xf32>
    %c0_67 = arith.constant 0 : index
    %c0_68 = arith.constant 0 : index
    %c0_69 = arith.constant 0 : index
    %144 = vector.load %arg11[%c0_67, %c0_68, %c0_69] : memref<1x256x8xf32, #tpu.memory_space<vmem>>, vector<1x256x8xf32>
    %145 = vector.shape_cast %144 : vector<1x256x8xf32> to vector<256x8xf32>
    %146 = vector.shape_cast %143 : vector<256x8xf32> to vector<1x256x8xf32>
    tpu.vector_store %arg11[%c0_67, %c0_68, %c0_69], %146 {strides = array<i32>} : memref<1x256x8xf32, #tpu.memory_space<vmem>>, vector<1x256x8xf32>,
    return
  }
  func.func @transform_0(%arg0: i32) -> (i32, i32, i32) {
    %c0_i32 = arith.constant 0 : i32
    %c0_i32_0 = arith.constant 0 : i32
    %c0_i32_1 = arith.constant 0 : i32
    %c0_i32_2 = arith.constant 0 : i32
    return %c0_i32, %c0_i32_0, %c0_i32_1 : i32, i32, i32
  }
  func.func @transform_1(%arg0: i32) -> (i32, i32, i32) {
    %c0_i32 = arith.constant 0 : i32
    %c0_i32_0 = arith.constant 0 : i32
    %c0_i32_1 = arith.constant 0 : i32
    %c0_i32_2 = arith.constant 0 : i32
    return %c0_i32, %c0_i32_0, %c0_i32_1 : i32, i32, i32
  }
  func.func @transform_2(%arg0: i32) -> (i32, i32) {
    %c0_i32 = arith.constant 0 : i32
    %c0_i32_0 = arith.constant 0 : i32
    %c0_i32_1 = arith.constant 0 : i32
    return %c0_i32, %c0_i32_0 : i32, i32
  }
  func.func @transform_3(%arg0: i32) -> (i32, i32) {
    %c0_i32 = arith.constant 0 : i32
    %c0_i32_0 = arith.constant 0 : i32
    %c0_i32_1 = arith.constant 0 : i32
    return %c0_i32, %c0_i32_0 : i32, i32
  }
  func.func @transform_4(%arg0: i32) -> (i32, i32, i32) {
    %c0_i32 = arith.constant 0 : i32
    %c0_i32_0 = arith.constant 0 : i32
    %c0_i32_1 = arith.constant 0 : i32
    %c0_i32_2 = arith.constant 0 : i32
    return %c0_i32, %c0_i32_0, %c0_i32_1 : i32, i32, i32
  }
  func.func @transform_5(%arg0: i32) -> (i32, i32) {
    %c0_i32 = arith.constant 0 : i32
    %c0_i32_0 = arith.constant 0 : i32
    %c0_i32_1 = arith.constant 0 : i32
    return %c0_i32, %c0_i32_0 : i32, i32
  }
  func.func @transform_6(%arg0: i32) -> (i32, i32) {
    %c0_i32 = arith.constant 0 : i32
    %c0_i32_0 = arith.constant 0 : i32
    %c0_i32_1 = arith.constant 0 : i32
    return %c0_i32, %c0_i32_0 : i32, i32
  }
  func.func @transform_7(%arg0: i32) -> (i32, i32) {
    %c0_i32 = arith.constant 0 : i32
    %c0_i32_0 = arith.constant 0 : i32
    %c0_i32_1 = arith.constant 0 : i32
    return %c0_i32, %c0_i32_0 : i32, i32
  }
  func.func @transform_8(%arg0: i32) -> (i32, i32, i32) {
    %c0_i32 = arith.constant 0 : i32
    %c0_i32_0 = arith.constant 0 : i32
    %c0_i32_1 = arith.constant 0 : i32
    return %arg0, %c0_i32, %c0_i32_0 : i32, i32, i32
  }
  func.func @transform_9(%arg0: i32) -> (i32, i32, i32) {
    %c0_i32 = arith.constant 0 : i32
    %c0_i32_0 = arith.constant 0 : i32
    %c0_i32_1 = arith.constant 0 : i32
    return %arg0, %c0_i32, %c0_i32_0 : i32, i32, i32
  }
  func.func @transform_10(%arg0: i32) -> (i32, i32, i32) {
    %c0_i32 = arith.constant 0 : i32
    %c0_i32_0 = arith.constant 0 : i32
    %c0_i32_1 = arith.constant 0 : i32
    return %arg0, %c0_i32, %c0_i32_0 : i32, i32, i32
  }
}

</mosaic_0001>

<bundles_post_ra>
// kernel: resnet_block_forward.3
= control target key start
LH: loop header
LB: loop body
LE: loop exit
PB: predicated region body
PF: predicated region fallthrough
CT: control target
= control target key end

     0   :  { %s498_s9 = smov 0   ;;  %s500_s10 = smov 0   ;;  %s646_s0 = inlined_call_operand.vmem [shape: f32[2,256,4], index: 0, kind: input, shape index: {}]   ;;  %s647_s1 = inlined_call_operand.vmem [shape: f32[1,4], index: 1, kind: output, shape index: {0}]   ;;  %s648_s2 = inlined_call_operand.vmem [shape: f32[1,4], index: 2, kind: output, shape index: {1}]  }
   0x1   :  { %s502_s11 = smov 0  }
   0x2 LB: > { %s25_s12 = sadd.s32 1, %s476_s10  ;;  %p425_p0 = scmp.ge.s32.totalorder %s480_s11, 1  ;;  %s480_s11 = sphi %s502_s11, %s13_s11   ;;  %s476_s10 = sphi %s500_s10, %s650_s10   ;;  %s472_s9 = sphi %s498_s9, %s649_s9  }
   0x3   : > { %p27_p1 = scmp.ge.s32.totalorder %s25_s12, 2  ;;  %p124_p2 = scmp.lt.s32.totalorder %s480_s11, 3 }
   0x5   : > { %s652_s12 = smov (%p27_p1, %s25_s12), 0  ;;  %p125_p3 = pnand %p425_p0, %p124_p2 }
   0x6   : > { %p146_p4 = scmp.lt.s32.totalorder (!%p125_p3), %s472_s9, 1  ;;  %p155_p5 = scmp.eq.s32.totalorder (!%p125_p3), %s472_s9, 0 }
   0x7   : > { %128 = sbr.rel (%p125_p3) target bundleno = 101 (0x65), region = 24 }
   0xc   : > { %s654_s9 = smov (!%p146_p4, %s472_s9), 1  ;;  %160 = sbr.rel (!%p155_p5) target bundleno = 17 (0x11), region = 28  ;;  %vm161_vm0 = vcmask (%p155_p5), 24576   ;;  %v482_v0 = vmov (%p155_p5), 0.0  }
   0xd   : > { %s431_s13 = sshll.u32 %s654_s9, 8  ;;  %162 = vst.msk [vmem:[%s647_s1] sm:$0x1] (%p155_p5), %vm161_vm0, %v482_v0  ;;  %163 = vst.msk [vmem:[%s648_s2] sm:$0x1] (%p155_p5), %vm161_vm0, %v482_v0 }
   0xe   : > { %s519_s16 = scalar_lea.vmem %s646_s0, %s431_s13 }
  0x11 PF: > { %v164_v1 = vld [vmem:[%s519_s16] sm:$0xff]  ;;  %v165_v2 = vld [vmem:[%s519_s16 + $0x8] sm:$0xff]  ;;  %v166_v3 = vld [vmem:[%s519_s16 + $0x10] sm:$0xff]  ;;  %vm197_vm1 = vcmask 31744   ;;  %vm268_vm2 = vcmask 24576  }
  0x12   : > { %v198_v4 = vsel %vm197_vm1, %v164_v1, 0.0  ;;  %v199_v5 = vsel %vm197_vm1, %v165_v2, 0.0  ;;  %v201_v6 = vsel %vm197_vm1, %v166_v3, 0.0  ;;  %v167_v7 = vld [vmem:[%s519_s16 + $0x18] sm:$0xff]  ;;  %v168_v10 = vld [vmem:[%s519_s16 + $0x20] sm:$0xff]  ;;  %v169_v13 = vld [vmem:[%s519_s16 + $0x28] sm:$0xff]  ;;  %v271_v28 = vmul.f32 %v164_v1, %v164_v1 }
  0x13   : > { %v200_v8 = vadd.f32 %v199_v5, %v198_v4  ;;  %v203_v9 = vsel %vm197_vm1, %v167_v7, 0.0  ;;  %v205_v12 = vsel %vm197_vm1, %v168_v10, 0.0  ;;  %v207_v15 = vsel %vm197_vm1, %v169_v13, 0.0  ;;  %v170_v16 = vld [vmem:[%s519_s16 + $0x30] sm:$0xff]  ;;  %v171_v19 = vld [vmem:[%s519_s16 + $0x38] sm:$0xff]  ;;  %v172_v22 = vld [vmem:[%s519_s16 + $0x40] sm:$0xff] }
  0x14   : > { %v209_v18 = vsel %vm197_vm1, %v170_v16, 0.0  ;;  %v211_v21 = vsel %vm197_vm1, %v171_v19, 0.0  ;;  %v213_v24 = vsel %vm197_vm1, %v172_v22, 0.0  ;;  %v173_v25 = vld [vmem:[%s519_s16 + $0x48] sm:$0xff]  ;;  %v272_v29 = vmul.f32 %v165_v2, %v165_v2  ;;  %v174_v31 = vld [vmem:[%s519_s16 + $0x50] sm:$0xff]  ;;  %v175_v33 = vld [vmem:[%s519_s16 + $0x58] sm:$0xff] }
  0x15   : > { %v202_v11 = vadd.f32 %v201_v6, %v200_v8  ;;  %v215_v27 = vsel %vm197_vm1, %v173_v25, 0.0  ;;  %v273_v30 = vmul.f32 %v166_v3, %v166_v3  ;;  %v217_v34 = vsel %vm197_vm1, %v174_v31, 0.0  ;;  %v176_v42 = vld [vmem:[%s519_s16 + $0x60] sm:$0xff]  ;;  %v177_v48 = vld [vmem:[%s519_s16 + $0x68] sm:$0xff]  ;;  %v178_v54 = vld [vmem:[%s519_s16 + $0x70] sm:$0xff] }
  0x16   : > { %v274_v35 = vmul.f32 %v167_v7, %v167_v7  ;;  %v219_v37 = vsel %vm197_vm1, %v175_v33, 0.0  ;;  %v275_v38 = vmul.f32 %v168_v10, %v168_v10  ;;  %v303_v39 = vsel %vm197_vm1, %v271_v28, 0.0  ;;  %v179_v60 = vld [vmem:[%s519_s16 + $0x78] sm:$0xff]  ;;  %v180_v2 = vld [vmem:[%s519_s16 + $0x80] sm:$0xff]  ;;  %v181_v8 = vld [vmem:[%s519_s16 + $0x88] sm:$0xff] }
  0x17   : > { %v204_v14 = vadd.f32 %v203_v9, %v202_v11  ;;  %v304_v40 = vsel %vm197_vm1, %v272_v29, 0.0  ;;  %v306_v41 = vsel %vm197_vm1, %v273_v30, 0.0  ;;  %v221_v45 = vsel %vm197_vm1, %v176_v42, 0.0 }
  0x18   : > { %v305_v44 = vadd.f32 %v304_v40, %v303_v39  ;;  %v276_v46 = vmul.f32 %v169_v13, %v169_v13  ;;  %v308_v47 = vsel %vm197_vm1, %v274_v35, 0.0  ;;  %v223_v51 = vsel %vm197_vm1, %v177_v48, 0.0 }
  0x19   : > { %v206_v17 = vadd.f32 %v205_v12, %v204_v14  ;;  %v277_v52 = vmul.f32 %v170_v16, %v170_v16  ;;  %v310_v53 = vsel %vm197_vm1, %v275_v38, 0.0  ;;  %v225_v57 = vsel %vm197_vm1, %v178_v54, 0.0  ;;  %v182_v14 = vld [vmem:[%s519_s16 + $0x90] sm:$0xff] }
  0x1a   : > { %v307_v50 = vadd.f32 %v306_v41, %v305_v44  ;;  %v278_v58 = vmul.f32 %v171_v19, %v171_v19  ;;  %v312_v59 = vsel %vm197_vm1, %v276_v46, 0.0  ;;  %v227_v63 = vsel %vm197_vm1, %v179_v60, 0.0  ;;  %v186_v38 = vld [vmem:[%s519_s16 + $0xb0] sm:$0xff]  ;;  %v187_v44 = vld [vmem:[%s519_s16 + $0xb8] sm:$0xff] }
  0x1b   : > { %v208_v20 = vadd.f32 %v207_v15, %v206_v17  ;;  %v279_v0 = vmul.f32 %v172_v22, %v172_v22  ;;  %v314_v1 = vsel %vm197_vm1, %v277_v52, 0.0  ;;  %v229_v5 = vsel %vm197_vm1, %v180_v2, 0.0 }
  0x1c   : > { %v309_v56 = vadd.f32 %v308_v47, %v307_v50  ;;  %v280_v6 = vmul.f32 %v173_v25, %v173_v25  ;;  %v316_v7 = vsel %vm197_vm1, %v278_v58, 0.0  ;;  %v231_v11 = vsel %vm197_vm1, %v181_v8, 0.0  ;;  %v188_v50 = vld [vmem:[%s519_s16 + $0xc0] sm:$0xff] }
  0x1d   : > { %v210_v23 = vadd.f32 %v209_v18, %v208_v20  ;;  %v281_v12 = vmul.f32 %v174_v31, %v174_v31  ;;  %v318_v13 = vsel %vm197_vm1, %v279_v0, 0.0  ;;  %v233_v17 = vsel %vm197_vm1, %v182_v14, 0.0  ;;  %v183_v20 = vld [vmem:[%s519_s16 + $0x98] sm:$0xff] }
  0x1e   : > { %v311_v62 = vadd.f32 %v310_v53, %v309_v56  ;;  %v282_v18 = vmul.f32 %v175_v33, %v175_v33  ;;  %v320_v19 = vsel %vm197_vm1, %v280_v6, 0.0  ;;  %v284_v30 = vmul.f32 %v177_v48, %v177_v48  ;;  %v189_v56 = vld [vmem:[%s519_s16 + $0xc8] sm:$0xff] }
  0x1f   : > { %v212_v26 = vadd.f32 %v211_v21, %v210_v23  ;;  %v235_v23 = vsel %vm197_vm1, %v183_v20, 0.0  ;;  %v322_v25 = vsel %vm197_vm1, %v281_v12, 0.0  ;;  %v241_v41 = vsel %vm197_vm1, %v186_v38, 0.0 }
  0x20   : > { %v313_v4 = vadd.f32 %v312_v59, %v311_v62  ;;  %v324_v31 = vsel %vm197_vm1, %v282_v18, 0.0  ;;  %v243_v47 = vsel %vm197_vm1, %v187_v44, 0.0  ;;  %v287_v48 = vmul.f32 %v180_v2, %v180_v2  ;;  %v190_v62 = vld [vmem:[%s519_s16 + $0xd0] sm:$0xff] }
  0x21   : > { %v214_v32 = vadd.f32 %v213_v24, %v212_v26  ;;  %v283_v24 = vmul.f32 %v176_v42, %v176_v42  ;;  %v184_v26 = vld [vmem:[%s519_s16 + $0xa0] sm:$0xff]  ;;  %v286_v42 = vmul.f32 %v179_v60, %v179_v60  ;;  %v245_v53 = vsel %vm197_vm1, %v188_v50, 0.0 }
  0x22   : > { %v315_v10 = vadd.f32 %v314_v1, %v313_v4  ;;  %v237_v29 = vsel %vm197_vm1, %v184_v26, 0.0  ;;  %v247_v59 = vsel %vm197_vm1, %v189_v56, 0.0  ;;  %v289_v60 = vmul.f32 %v182_v14, %v182_v14  ;;  %v191_v4 = vld [vmem:[%s519_s16 + $0xd8] sm:$0xff] }
  0x23   : > { %v216_v36 = vadd.f32 %v215_v27, %v214_v32  ;;  %v185_v32 = vld [vmem:[%s519_s16 + $0xa8] sm:$0xff]  ;;  %v249_v1 = vsel %vm197_vm1, %v190_v62, 0.0  ;;  %v290_v2 = vmul.f32 %v183_v20, %v183_v20  ;;  %v293_v20 = vmul.f32 %v186_v38, %v186_v38 }
  0x24   : > { %v317_v16 = vadd.f32 %v316_v7, %v315_v10  ;;  %v239_v35 = vsel %vm197_vm1, %v185_v32, 0.0  ;;  %v251_v7 = vsel %vm197_vm1, %v191_v4, 0.0  ;;  %v192_v10 = vld [vmem:[%s519_s16 + $0xe0] sm:$0xff]  ;;  %v292_v14 = vmul.f32 %v185_v32, %v185_v32 }
  0x25   : > { %v218_v43 = vadd.f32 %v217_v34, %v216_v36  ;;  %v285_v36 = vmul.f32 %v178_v54, %v178_v54  ;;  %v288_v54 = vmul.f32 %v181_v8, %v181_v8  ;;  %v291_v8 = vmul.f32 %v184_v26, %v184_v26 }
  0x26   : > { %v319_v22 = vadd.f32 %v318_v13, %v317_v16  ;;  %v253_v13 = vsel %vm197_vm1, %v192_v10, 0.0  ;;  %v193_v16 = vld [vmem:[%s519_s16 + $0xe8] sm:$0xff]  ;;  %v294_v26 = vmul.f32 %v187_v44, %v187_v44  ;;  %v295_v32 = vmul.f32 %v188_v50, %v188_v50 }
  0x27   : > { %v220_v49 = vadd.f32 %v219_v37, %v218_v43  ;;  %v326_v37 = vsel %vm197_vm1, %v283_v24, 0.0  ;;  %v328_v43 = vsel %vm197_vm1, %v284_v30, 0.0  ;;  %v298_v44 = vmul.f32 %v191_v4, %v191_v4 }
  0x28   : > { %v321_v28 = vadd.f32 %v320_v19, %v319_v22  ;;  %v255_v19 = vsel %vm197_vm1, %v193_v16, 0.0  ;;  %v194_v22 = vld [vmem:[%s519_s16 + $0xf0] sm:$0xff] }
  0x29   : > { %v222_v55 = vadd.f32 %v221_v45, %v220_v49  ;;  %v330_v49 = vsel %vm197_vm1, %v285_v36, 0.0  ;;  %v296_v36 = vmul.f32 %v189_v56, %v189_v56  ;;  %v301_v56 = vmul.f32 %v194_v22, %v194_v22 }
  0x2a   : > { %v323_v34 = vadd.f32 %v322_v25, %v321_v28  ;;  %v257_v25 = vsel %vm197_vm1, %v194_v22, 0.0  ;;  %v195_v28 = vld [vmem:[%s519_s16 + $0xf8] sm:$0xff] }
  0x2b   : > { %v224_v61 = vadd.f32 %v223_v51, %v222_v55  ;;  %v332_v55 = vsel %vm197_vm1, %v286_v42, 0.0 }
  0x2c   : > { %v325_v40 = vadd.f32 %v324_v31, %v323_v34  ;;  %v259_v31 = vsel %vm197_vm1, %v195_v28, 0.0 }
  0x2d   : > { %v226_v3 = vadd.f32 %v225_v57, %v224_v61  ;;  %v334_v61 = vsel %vm197_vm1, %v287_v48, 0.0  ;;  %v299_v48 = vmul.f32 %v192_v10, %v192_v10 }
  0x2e   : > { %v327_v46 = vadd.f32 %v326_v37, %v325_v40  ;;  %v348_v37 = vsel %vm197_vm1, %v294_v26, 0.0  ;;  %v297_v40 = vmul.f32 %v190_v62, %v190_v62 }
  0x2f   : > { %v228_v9 = vadd.f32 %v227_v63, %v226_v3  ;;  %v336_v3 = vsel %vm197_vm1, %v288_v54, 0.0 }
  0x30   : > { %v329_v52 = vadd.f32 %v328_v43, %v327_v46 }
  0x31   : > { %v230_v15 = vadd.f32 %v229_v5, %v228_v9  ;;  %v338_v9 = vsel %vm197_vm1, %v289_v60, 0.0  ;;  %v196_v60 = vld [vmem:[%s647_s1] sm:$0x1] }
  0x32   : > { %v331_v58 = vadd.f32 %v330_v49, %v329_v52  ;;  %v354_v49 = vsel %vm197_vm1, %v297_v40, 0.0  ;;  %v300_v52 = vmul.f32 %v193_v16, %v193_v16 }
  0x33   : > { %v232_v21 = vadd.f32 %v231_v11, %v230_v15  ;;  %v340_v15 = vsel %vm197_vm1, %v290_v2, 0.0 }
  0x34   : > { %v333_v0 = vadd.f32 %v332_v55, %v331_v58  ;;  %v360_v62 = vsel %vm197_vm1, %v300_v52, 0.0 }
  0x35   : > { %v234_v27 = vadd.f32 %v233_v17, %v232_v21  ;;  %v342_v21 = vsel %vm197_vm1, %v291_v8, 0.0 }
  0x36   : > { %v335_v6 = vadd.f32 %v334_v61, %v333_v0  ;;  %v302_v61 = vmul.f32 %v195_v28, %v195_v28 }
  0x37   : > { %v236_v33 = vadd.f32 %v235_v23, %v234_v27  ;;  %v344_v27 = vsel %vm197_vm1, %v292_v14, 0.0 }
  0x38   : > { %v337_v12 = vadd.f32 %v336_v3, %v335_v6  ;;  %v364_v4 = vsel %vm197_vm1, %v302_v61, 0.0 }
  0x39   : > { %v238_v39 = vadd.f32 %v237_v29, %v236_v33  ;;  %v346_v33 = vsel %vm197_vm1, %v293_v20, 0.0 }
  0x3a   : > { %v339_v18 = vadd.f32 %v338_v9, %v337_v12  ;;  %v270_v12 = vld [vmem:[%s648_s2] sm:$0x1] }
  0x3b   : > { %v240_v45 = vadd.f32 %v239_v35, %v238_v39 }
  0x3c   : > { %v341_v24 = vadd.f32 %v340_v15, %v339_v18 }
  0x3d   : > { %v242_v51 = vadd.f32 %v241_v41, %v240_v45  ;;  %v350_v41 = vsel %vm197_vm1, %v295_v32, 0.0  ;;  %v352_v45 = vsel %vm197_vm1, %v296_v36, 0.0 }
  0x3e   : > { %v343_v30 = vadd.f32 %v342_v21, %v341_v24 }
  0x3f   : > { %v244_v57 = vadd.f32 %v243_v47, %v242_v51 }
  0x40   : > { %v345_v35 = vadd.f32 %v344_v27, %v343_v30 }
  0x41   : > { %v246_v63 = vadd.f32 %v245_v53, %v244_v57  ;;  %v356_v53 = vsel %vm197_vm1, %v298_v44, 0.0  ;;  %v358_v57 = vsel %vm197_vm1, %v299_v48, 0.0 }
  0x42   : > { %v347_v39 = vadd.f32 %v346_v33, %v345_v35 }
  0x43   : > { %v248_v5 = vadd.f32 %v247_v59, %v246_v63 }
  0x44   : > { %v349_v43 = vadd.f32 %v348_v37, %v347_v39 }
  0x45   : > { %v250_v11 = vadd.f32 %v249_v1, %v248_v5  ;;  %v362_v1 = vsel %vm197_vm1, %v301_v56, 0.0 }
  0x46   : > { %v351_v47 = vadd.f32 %v350_v41, %v349_v43 }
  0x47   : > { %v252_v17 = vadd.f32 %v251_v7, %v250_v11 }
  0x48   : > { %v353_v51 = vadd.f32 %v352_v45, %v351_v47 }
  0x49   : > { %v254_v23 = vadd.f32 %v253_v13, %v252_v17 }
  0x4a   : > { %v355_v55 = vadd.f32 %v354_v49, %v353_v51 }
  0x4b   : > { %v256_v29 = vadd.f32 %v255_v19, %v254_v23 }
  0x4c   : > { %v357_v59 = vadd.f32 %v356_v53, %v355_v55 }
  0x4d   : > { %v258_v34 = vadd.f32 %v257_v25, %v256_v29 }
  0x4e   : > { %v359_v0 = vadd.f32 %v358_v57, %v357_v59 }
  0x4f   : > { %v260_v38 = vadd.f32 %v259_v31, %v258_v34 }
  0x50   : > { %v361_v3 = vadd.f32 %v360_v62, %v359_v0 }
  0x51   : > { %v261_v42 = vrot.slane %v260_v38, 4 }
  0x52   : > { %v363_v5 = vadd.f32 %v362_v1, %v361_v3 }
  0x53   : > { %v262_v46 = vadd.f32 %v261_v42, %v260_v38 }
  0x54   : > { %v365_v6 = vadd.f32 %v364_v4, %v363_v5 }
  0x55   : > { %v263_v50 = vrot.slane %v262_v46, 2 }
  0x56   : > { %v366_v7 = vrot.slane %v365_v6, 4 }
  0x57   : > { %v264_v54 = vadd.f32 %v263_v50, %v262_v46 }
  0x58   : > { %v367_v8 = vadd.f32 %v366_v7, %v365_v6 }
  0x59   : > { %v265_v58 = vrot.slane %v264_v54, 1 }
  0x5a   : > { %v368_v9 = vrot.slane %v367_v8, 2 }
  0x5b   : > { %v266_v63 = vadd.f32 %v265_v58, %v264_v54 }
  0x5c   : > { %v369_v10 = vadd.f32 %v368_v9, %v367_v8 }
  0x5d   : > { %v267_v2 = vadd.f32 %v266_v63, %v196_v60 }
  0x5e   : > { %v370_v11 = vrot.slane %v369_v10, 1 }
  0x5f   : > { %269 = vst.msk [vmem:[%s647_s1] sm:$0x1] %vm268_vm2, %v267_v2 }
  0x60   : > { %v371_v13 = vadd.f32 %v370_v11, %v369_v10 }
  0x62   : > { %v372_v14 = vadd.f32 %v371_v13, %v270_v12 }
  0x64   : > { %373 = vst.msk [vmem:[%s648_s2] sm:$0x1] %vm268_vm2, %v372_v14 }
  0x65 PF: > { %s13_s11 = sadd.s32 1, %s480_s11   ;;  %s649_s9 = smov %s476_s10 }
  0x66   : > { %p10_p6 = scmp.ge.s32.totalorder %s13_s11, 4   ;;  %s650_s10 = smov %s652_s12 }
  0x68   :  { %12 = sbr.rel (!%p10_p6) target bundleno = 2 (0x2), region = 62 }

// kernel: resnet_block_forward.4
= control target key start
LH: loop header
LB: loop body
LE: loop exit
PB: predicated region body
PF: predicated region fallthrough
CT: control target
= control target key end

     0   :  { %s5555_s21 = smov 0   ;;  %s8070_s0 = inlined_call_operand.vmem [shape: f32[1,4], index: 0, kind: input, shape index: {}]   ;;  %s8071_s1 = inlined_call_operand.vmem [shape: f32[1,4], index: 1, kind: input, shape index: {}]   ;;  %s8072_s2 = inlined_call_operand.vmem [shape: f32[1,4], index: 2, kind: input, shape index: {}]   ;;  %s8073_s3 = inlined_call_operand.vmem [shape: f32[1,4], index: 3, kind: input, shape index: {}]   ;;  %s8074_s4 = inlined_call_operand.vmem [shape: bf16[9,4,8], index: 4, kind: input, shape index: {}]   ;;  %s8075_s5 = inlined_call_operand.vmem [shape: f32[1,8], index: 5, kind: input, shape index: {}]   ;;  %s8076_s6 = inlined_call_operand.vmem [shape: f32[32,8], index: 6, kind: input, shape index: {}]   ;;  %s8077_s7 = inlined_call_operand.vmem [shape: f32[1,8], index: 7, kind: input, shape index: {}]   ;;  %s8078_s8 = inlined_call_operand.vmem [shape: f32[2,256,4], index: 8, kind: input, shape index: {}]   ;;  %s8079_s9 = inlined_call_operand.vmem [shape: f32[2,1,32], index: 9, kind: input, shape index: {}]   ;;  %s8080_s10 = inlined_call_operand.vmem [shape: f32[2,256,8], index: 10, kind: output, shape index: {0}]   ;;  %s8081_s11 = inlined_call_operand.vmem [shape: f32[2,1,8], index: 11, kind: output, shape index: {1}]   ;;  %s8082_s12 = inlined_call_operand.vmem [shape: f32[2,1,8], index: 12, kind: output, shape index: {2}]  }
   0x1 LB: > { %s4646_s22 = sadd.s32 4294967295, %s5484_s21   ;;  %p4650_p0 = scmp.ge.s32.totalorder %s5484_s21, 1  ;;  %s5484_s21 = sphi %s5555_s21, %s23_s21  }
   0x2   : > { %p375_p1 = scmp.lt.s32.totalorder %s5484_s21, 3 }
   0x4   : > { %p376_p2 = pnand %p4650_p0, %p375_p1 }
   0x6   : > { %379 = sbr.rel (%p376_p2) target bundleno = 719 (0x2cf), region = 60 }
   0xb   : > { %v4687_v0 = vld [vmem:[%s8074_s4 + $0x2] sm:$0x3]  ;;  %vm8158_vm0 = vcmask 1041408   ;;  %v446_v1 = vld [vmem:[%s8070_s0] sm:$0x1]  ;;  %p426_p3 = scmp.lt.s32.totalorder %s4646_s22, 1  ;;  %v492_v10 = vlaneseq }
   0xc   : > { %5322 = vmatprep.subr.msk.bf16.mxu0 %vm8158_vm0, %v4687_v0  ;;  %5323 = vmatprep.subr.msk.bf16.mxu1 %vm8158_vm0, %v4687_v0  ;;  %v1716_v2 = vsel %vm8158_vm0, %v4687_v0, 0  ;;  %v447_v3 = vld [vmem:[%s8071_s1] sm:$0x1]  ;;  %v450_v4 = vmul.f32 0.001953125, %v446_v1  ;;  %v5632_v41 = vld [vmem:[%s8074_s4 + $0x4] sm:$0x3] }
   0xd   : > { %5004 = vmatpush3.bf16.msra.mxu0 %v1716_v2  ;;  %5321 = vmatpush3.bf16.msra.mxu1 %v1716_v2  ;;  %v451_v5 = vmul.f32 0.001953125, %v447_v3  ;;  %v5578_v7 = vld [vmem:[%s8074_s4] sm:$0x3]  ;;  %s8759_s22 = smov (!%p426_p3, %s4646_s22), 1  ;;  %v5584_v11 = vshrl.u32 %v492_v10, 7  ;;  %vm8144_vm1 = vcmask 1040384  }
   0xe   : > { %v452_v6 = vmul.f32 %v450_v4, %v450_v4  ;;  %5324 = vmatprep.subr.msk.bf16.mxu1 %vm8158_vm0, %v5578_v7  ;;  %s4843_s13 = sshll.u32 %s8759_s22, 8  ;;  %v448_v12 = vld [vmem:[%s8072_s2] sm:$0x1]  ;;  %5325 = vmatprep.subr.msk.bf16.mxu0 %vm8158_vm0, %v5632_v41  ;;  %vm8143_vm2 = vsmask.f32 7424  ;;  %vm8160_vm3 = vcmask 31744   ;;  %s433_s15 = scalar_lea.vmem %s8079_s9, %s8759_s22 }
   0xf   : > { %s5595_s18 = scalar_lea.vmem %s8078_s8, %s4843_s13  ;;  %v5598_v13 = vsub.s32 0, %v5584_v11  ;;  %v449_v15 = vld [vmem:[%s8073_s3] sm:$0x1]  ;;  %vm8145_vm6 = vcmask 1045504   ;;  %s7650_s24 = scalar_lea.vmem %s8080_s10, %s4843_s13 }
  0x10   : > { %v453_v8 = vsub.f32 %v451_v5, %v452_v6  ;;  %v459_v17 = vld [vmem:[%s5595_s18] sm:$0xff]  ;;  %v460_v18 = vld [vmem:[%s5595_s18 + $0x8] sm:$0xff]  ;;  %v461_v19 = vld [vmem:[%s5595_s18 + $0x10] sm:$0xff]  ;;  %s441_s26 = scalar_lea.vmem %s8081_s11, %s8759_s22  ;;  %s444_s29 = scalar_lea.vmem %s8082_s12, %s8759_s22 }
  0x11   : > { %8262 = vst [vmem:[#allocation2_spill] sm:$0xff] %v5598_v13  ;;  %v462_v22 = vld [vmem:[%s5595_s18 + $0x18] sm:$0xff]  ;;  %v476_v23 = vld [vmem:[%s5595_s18 + $0x88] sm:$0xff]  ;;  %v477_v24 = vld [vmem:[%s5595_s18 + $0x90] sm:$0xff] }
  0x12   : > { %v454_v9 = vadd.f32 1e-05, %v453_v8  ;;  %v478_v25 = vld [vmem:[%s5595_s18 + $0x98] sm:$0xff]  ;;  %v479_v30 = vld [vmem:[%s5595_s18 + $0xa0] sm:$0xff]  ;;  %v480_v31 = vld [vmem:[%s5595_s18 + $0xa8] sm:$0xff] }
  0x13   : > { %v481_v37 = vld [vmem:[%s5595_s18 + $0xb0] sm:$0xff]  ;;  %v482_v38 = vld [vmem:[%s5595_s18 + $0xb8] sm:$0xff]  ;;  %v463_v46 = vld [vmem:[%s5595_s18 + $0x20] sm:$0xff] }
  0x14   : > { %5344 = vrsqrt.f32 %v454_v9  ;;  %v464_v51 = vld [vmem:[%s5595_s18 + $0x28] sm:$0xff]  ;;  %v465_v52 = vld [vmem:[%s5595_s18 + $0x30] sm:$0xff]  ;;  %v466_v60 = vld [vmem:[%s5595_s18 + $0x38] sm:$0xff] }
  0x15   : > { %v483_v0 = vld [vmem:[%s5595_s18 + $0xc0] sm:$0xff] }
  0x21   : > { %v5345_v14 = vpop.eup %5344 }
  0x22   : > { %v456_v16 = vmul.f32 %v5345_v14, %v448_v12 }
  0x24   : > { %v457_v20 = vmul.f32 %v456_v16, %v450_v4  ;;  %v5607_v21 = vrot.slane %v456_v16, %v5598_v13 }
  0x26   : > { %v458_v26 = vsub.f32 %v449_v15, %v457_v20  ;;  %v497_v27 = vmul.f32 %v5607_v21, %v459_v17  ;;  %v498_v28 = vmul.f32 %v5607_v21, %v460_v18  ;;  %v499_v29 = vmul.f32 %v5607_v21, %v461_v19 }
  0x27   : > { %v500_v32 = vmul.f32 %v5607_v21, %v462_v22  ;;  %v514_v33 = vmul.f32 %v5607_v21, %v476_v23  ;;  %v515_v34 = vmul.f32 %v5607_v21, %v477_v24  ;;  %v516_v36 = vmul.f32 %v5607_v21, %v478_v25 }
  0x28   : > { %v5622_v35 = vrot.slane %v458_v26, %v5598_v13  ;;  %v517_v39 = vmul.f32 %v5607_v21, %v479_v30  ;;  %v518_v40 = vmul.f32 %v5607_v21, %v480_v31  ;;  %v519_v49 = vmul.f32 %v5607_v21, %v481_v37  ;;  %v485_v37 = vld [vmem:[%s5595_s18 + $0xd0] sm:$0xff] }
  0x29   : > { %v520_v50 = vmul.f32 %v5607_v21, %v482_v38  ;;  %v501_v59 = vmul.f32 %v5607_v21, %v463_v46  ;;  %v502_v63 = vmul.f32 %v5607_v21, %v464_v51  ;;  %v503_v3 = vmul.f32 %v5607_v21, %v465_v52  ;;  %v467_v46 = vld [vmem:[%s5595_s18 + $0x40] sm:$0xff]  ;;  %v468_v52 = vld [vmem:[%s5595_s18 + $0x48] sm:$0xff] }
  0x2a   : > { %v5635_v42 = vadd.f32 %v5622_v35, %v497_v27  ;;  %v5638_v43 = vadd.f32 %v5622_v35, %v498_v28  ;;  %v5641_v44 = vadd.f32 %v5622_v35, %v499_v29  ;;  %v5644_v45 = vadd.f32 %v5622_v35, %v500_v32 }
  0x2b   : > { %v5650_v47 = vadd.f32 %v5622_v35, %v514_v33  ;;  %v5653_v48 = vadd.f32 %v5622_v35, %v515_v34  ;;  %v5663_v56 = vadd.f32 %v5622_v35, %v516_v36  ;;  %v5667_v58 = vadd.f32 %v5622_v35, %v517_v39  ;;  %v484_v33 = vld [vmem:[%s5595_s18 + $0xc8] sm:$0xff] }
  0x2c   : > { %v4655_v53 = vmul.f32 -1.442695, %v5635_v42  ;;  %v4656_v54 = vmul.f32 -1.442695, %v5638_v43  ;;  %v4657_v55 = vmul.f32 -1.442695, %v5641_v44  ;;  %v5672_v61 = vadd.f32 %v5622_v35, %v518_v40 }
  0x2d   : > { %v4658_v57 = vmul.f32 -1.442695, %v5644_v45  ;;  %v4672_v62 = vmul.f32 -1.442695, %v5650_v47  ;;  %v4673_v1 = vmul.f32 -1.442695, %v5653_v48  ;;  %v5679_v2 = vadd.f32 %v5622_v35, %v519_v49 }
  0x2e   : > { %5346 = vpow2.f32 %v4655_v53  ;;  %v4674_v4 = vmul.f32 -1.442695, %v5663_v56  ;;  %v5684_v5 = vadd.f32 %v5622_v35, %v520_v50  ;;  %v504_v6 = vmul.f32 %v5607_v21, %v466_v60  ;;  %v486_v40 = vld [vmem:[%s5595_s18 + $0xd8] sm:$0xff] }
  0x2f   : > { %5348 = vpow2.f32 %v4656_v54  ;;  %v4675_v8 = vmul.f32 -1.442695, %v5667_v58  ;;  %v5689_v9 = vadd.f32 %v5622_v35, %v501_v59  ;;  %v521_v10 = vmul.f32 %v5607_v21, %v483_v0 }
  0x30   : > { %5350 = vpow2.f32 %v4657_v55  ;;  %v4676_v12 = vmul.f32 -1.442695, %v5672_v61  ;;  %v5694_v14 = vadd.f32 %v5622_v35, %v502_v63  ;;  %v4677_v15 = vmul.f32 -1.442695, %v5679_v2  ;;  %v469_v63 = vld [vmem:[%s5595_s18 + $0x50] sm:$0xff] }
  0x31   : > { %5352 = vpow2.f32 %v4658_v57  ;;  %v5698_v16 = vadd.f32 %v5622_v35, %v503_v3  ;;  %v4678_v17 = vmul.f32 -1.442695, %v5684_v5  ;;  %v5702_v18 = vadd.f32 %v5622_v35, %v504_v6 }
  0x32   : > { %5354 = vpow2.f32 %v4672_v62  ;;  %v4659_v19 = vmul.f32 -1.442695, %v5689_v9  ;;  %v5706_v20 = vadd.f32 %v5622_v35, %v521_v10  ;;  %v4660_v22 = vmul.f32 -1.442695, %v5694_v14 }
  0x33   : > { %5356 = vpow2.f32 %v4673_v1  ;;  %v4661_v23 = vmul.f32 -1.442695, %v5698_v16  ;;  %v4662_v24 = vmul.f32 -1.442695, %v5702_v18  ;;  %v522_v51 = vmul.f32 %v5607_v21, %v484_v33 }
  0x34   : > { %5358 = vpow2.f32 %v4674_v4  ;;  %v4679_v25 = vmul.f32 -1.442695, %v5706_v20  ;;  %v523_v55 = vmul.f32 %v5607_v21, %v485_v37  ;;  %v524_v60 = vmul.f32 %v5607_v21, %v486_v40  ;;  %v488_v37 = vld [vmem:[%s5595_s18 + $0xe8] sm:$0xff] }
  0x35   : > { %5360 = vpow2.f32 %v4675_v8  ;;  %v505_v62 = vmul.f32 %v5607_v21, %v467_v46  ;;  %v506_v3 = vmul.f32 %v5607_v21, %v468_v52  ;;  %v5724_v8 = vadd.f32 %v5622_v35, %v522_v51 }
  0x36   : > { %5362 = vpow2.f32 %v4676_v12  ;;  %v5745_v33 = vsel %vm8158_vm0, %v5578_v7, 0 }
  0x37   : > { %5364 = vpow2.f32 %v4677_v15  ;;  %v5727_v15 = vadd.f32 %v5622_v35, %v523_v55  ;;  %v4680_v40 = vmul.f32 -1.442695, %v5724_v8 }
  0x38   : > { %5366 = vpow2.f32 %v4678_v17  ;;  %v470_v17 = vld [vmem:[%s5595_s18 + $0x58] sm:$0xff] }
  0x39   : > { %5368 = vpow2.f32 %v4659_v19  ;;  %v507_v19 = vmul.f32 %v5607_v21, %v469_v63  ;;  %v4681_v51 = vmul.f32 -1.442695, %v5727_v15 }
  0x3a   : > { %5370 = vpow2.f32 %v4660_v22 }
  0x3b   : > { %v5347_v26 = vpop.eup %5346  ;;  %5372 = vpow2.f32 %v4661_v23  ;;  %v5751_v46 = vadd.f32 %v5622_v35, %v507_v19 }
  0x3c   : > { %v5349_v27 = vpop.eup %5348  ;;  %v663_v28 = vadd.f32 1.0, %v5347_v26  ;;  %5374 = vpow2.f32 %v4662_v24  ;;  %v5732_v24 = vadd.f32 %v5622_v35, %v524_v60  ;;  %v526_v60 = vmul.f32 %v5607_v21, %v488_v37 }
  0x3d   : > { %v5351_v29 = vpop.eup %5350  ;;  %v664_v30 = vadd.f32 1.0, %v5349_v27  ;;  %5376 = vpow2.f32 %v4679_v25  ;;  %v5735_v25 = vadd.f32 %v5622_v35, %v505_v62  ;;  %v5486_v27 = vmov 0  }
  0x3e   : > { %v5353_v31 = vpop.eup %5352  ;;  %5378 = vrcp.f32 %v663_v28  ;;  %v665_v32 = vadd.f32 1.0, %v5351_v29  ;;  %v5737_v28 = vrot.slane %v5486_v27, 1  ;;  %v4682_v7 = vmul.f32 -1.442695, %v5732_v24 }
  0x3f   : > { %v5355_v34 = vpop.eup %5354  ;;  %5380 = vrcp.f32 %v664_v30  ;;  %v666_v36 = vadd.f32 1.0, %v5353_v31  ;;  %v5740_v30 = vadd.f32 %v5622_v35, %v506_v3  ;;  %v487_v31 = vld [vmem:[%s5595_s18 + $0xe0] sm:$0xff]  ;;  %v5757_v52 = vmul.f32 -1.442695, %v5735_v25 }
  0x40   : > { %v5357_v38 = vpop.eup %5356  ;;  %5382 = vrcp.f32 %v665_v32  ;;  %v680_v39 = vadd.f32 1.0, %v5355_v34  ;;  %8263 = vst [vmem:[#allocation3_spill] sm:$0xff] %v5737_v28  ;;  %v2352_v37 = vsel %vm8158_vm0, %v5632_v41, 0 }
  0x41   : > { %v5359_v49 = vpop.eup %5358  ;;  %5384 = vrcp.f32 %v666_v36  ;;  %v681_v50 = vadd.f32 1.0, %v5357_v38  ;;  %v508_v36 = vmul.f32 %v5607_v21, %v470_v17 }
  0x42   : > { %v5361_v53 = vpop.eup %5360  ;;  %v682_v54 = vadd.f32 1.0, %v5359_v49  ;;  %5386 = vrcp.f32 %v680_v39  ;;  %v489_v49 = vld [vmem:[%s5595_s18 + $0xf0] sm:$0xff] }
  0x43   : > { %v5363_v57 = vpop.eup %5362  ;;  %v683_v59 = vadd.f32 1.0, %v5361_v53  ;;  %5388 = vrcp.f32 %v681_v50  ;;  %v525_v53 = vmul.f32 %v5607_v21, %v487_v31 }
  0x44   : > { %v5365_v0 = vpop.eup %5364  ;;  %v684_v1 = vadd.f32 1.0, %v5363_v57  ;;  %5390 = vrcp.f32 %v682_v54 }
  0x45   : > { %v5367_v4 = vpop.eup %5366  ;;  %5392 = vrcp.f32 %v683_v59  ;;  %v685_v6 = vadd.f32 1.0, %v5365_v0  ;;  %v5762_v59 = vmul.f32 -1.442695, %v5740_v30  ;;  %v5767_v0 = vadd.f32 %v5622_v35, %v508_v36 }
  0x46   : > { %v5369_v10 = vpop.eup %5368  ;;  %5394 = vrcp.f32 %v684_v1  ;;  %v686_v12 = vadd.f32 1.0, %v5367_v4  ;;  %v5770_v1 = vmul.f32 %v5607_v21, %v489_v49  ;;  %v5780_v17 = vadd.f32 %v5622_v35, %v525_v53 }
  0x47   : > { %v5371_v22 = vpop.eup %5370  ;;  %5396 = vrcp.f32 %v685_v6  ;;  %v667_v23 = vadd.f32 1.0, %v5369_v10  ;;  %v5774_v6 = vmul.f32 -1.442695, %v5751_v46 }
  0x48   : > { %v5373_v26 = vpop.eup %5372  ;;  %5398 = vrcp.f32 %v686_v12  ;;  %v668_v29 = vadd.f32 1.0, %v5371_v22 }
  0x49   : > { %v5375_v32 = vpop.eup %5374  ;;  %5400 = vrcp.f32 %v667_v23  ;;  %v669_v34 = vadd.f32 1.0, %v5373_v26 }
  0x4a   : > { %v5377_v38 = vpop.eup %5376  ;;  %5402 = vrcp.f32 %v668_v29  ;;  %v670_v39 = vadd.f32 1.0, %v5375_v32 }
  0x4b   : > { %v5379_v50 = vpop.eup %5378  ;;  %v687_v57 = vadd.f32 1.0, %v5377_v38  ;;  %5404 = vrcp.f32 %v669_v34 }
  0x4c   : > { %v5381_v54 = vpop.eup %5380  ;;  %v759_v55 = vmul.f32 %v5379_v50, %v5635_v42  ;;  %5406 = vrcp.f32 %v670_v39 }
  0x4d   : > { %v5383_v62 = vpop.eup %5382  ;;  %v760_v63 = vmul.f32 %v5381_v54, %v5638_v43  ;;  %5408 = vpow2.f32 %v4680_v40 }
  0x4e   : > { %v5385_v3 = vpop.eup %5384  ;;  %v824_v4 = vrot.slane %v759_v55, 7  ;;  %v761_v42 = vmul.f32 %v5383_v62, %v5641_v44  ;;  %5410 = vrcp.f32 %v687_v57  ;;  %v5786_v44 = vadd.f32 %v5622_v35, %v526_v60 }
  0x4f   : > { %v5387_v10 = vpop.eup %5386  ;;  %v825_v12 = vrot.slane %v760_v63, 7  ;;  %v5777_v43 = vmul.f32 %v5385_v3, %v5644_v45  ;;  %5412 = vpow2.f32 %v4681_v51 }
  0x50   : > { %v5389_v19 = vpop.eup %5388  ;;  %v5783_v22 = vsel %vm8144_vm1, 0.0, %v824_v4  ;;  %v827_v23 = vrot.slane %v761_v42, 7  ;;  %v5793_v29 = vmul.f32 %v5387_v10, %v5650_v47  ;;  %5414 = vpow2.f32 %v4682_v7 }
  0x51   : > { %v5391_v26 = vpop.eup %5390  ;;  %v5789_v27 = vsel %vm8144_vm1, %v824_v4, %v825_v12  ;;  %v829_v45 = vrot.slane %v5777_v43, 7  ;;  %v777_v31 = vmul.f32 %v5389_v19, %v5653_v48 }
  0x52   : > { %v5393_v32 = vpop.eup %5392  ;;  %v1514_v34 = vpack.c.bf16 %v5789_v27, %v5783_v22  ;;  %v5799_v36 = vsel %vm8144_vm1, %v825_v12, %v827_v23  ;;  %v778_v47 = vmul.f32 %v5391_v26, %v5663_v56  ;;  %v8083_v54 = vrot.slane %v5793_v29, 7 }
  0x53   : > { %v5395_v38 = vpop.eup %5394  ;;  %v5806_v39 = vsel %vm8144_vm1, %v827_v23, %v829_v45  ;;  %v779_v48 = vmul.f32 %v5393_v32, %v5667_v58  ;;  %v859_v55 = vrot.slane %v777_v31, 7 }
  0x54   : > { %v5397_v40 = vpop.eup %5396  ;;  %v1541_v49 = vshll.u32 %v1514_v34, 16  ;;  %v1545_v50 = vshrl.u32 %v1514_v34, 16  ;;  %v1515_v51 = vpack.c.bf16 %v5806_v39, %v5799_v36  ;;  %v780_v53 = vmul.f32 %v5395_v38, %v5672_v61 }
  0x55   : > { %v5399_v41 = vpop.eup %5398  ;;  %v861_v57 = vrot.slane %v778_v47, 7  ;;  %v863_v60 = vrot.slane %v779_v48, 7  ;;  %v781_v58 = vmul.f32 %v5397_v40, %v5679_v2  ;;  %v5818_v4 = vsel %vm8144_vm1, %v8083_v54, %v859_v55  ;;  %v473_v54 = vld [vmem:[%s5595_s18 + $0x70] sm:$0xff] }
  0x56   : > { %v5401_v62 = vpop.eup %5400  ;;  %v1543_v63 = vrot.slane %v1541_v49, 1  ;;  %v1549_v56 = vshll.u32 %v1515_v51, 16  ;;  %v865_v3 = vrot.slane %v780_v53, 7  ;;  %v5827_v10 = vmul.f32 %v5399_v41, %v5684_v5  ;;  %v5848_v49 = vld [vmem:[%s8074_s4 + $0x8] sm:$0x3] }
  0x57   : > { %v5403_v7 = vpop.eup %5402  ;;  %v5821_v61 = vsel %vm8144_vm1, %v859_v55, %v861_v57  ;;  %v5824_v42 = vsel %vm8144_vm1, %v861_v57, %v863_v60  ;;  %v867_v32 = vrot.slane %v781_v58, 7  ;;  %v763_v47 = vmul.f32 %v5401_v62, %v5689_v9 }
  0x58   : > { %8264 = vst [vmem:[#allocation4_spill] sm:$0xff] %v5821_v61  ;;  %v1544_v12 = vsel %vm8143_vm2, %v5737_v28, %v1543_v63  ;;  %v1547_v19 = vor.u32 %v1545_v50, %v1543_v63  ;;  %v1551_v2 = vrot.slane %v1549_v56, 1  ;;  %v5832_v23 = vsel %vm8144_vm1, %v863_v60, %v865_v3  ;;  %v5405_v34 = vpop.eup %5404 }
  0x59   : > { %5005 = vmatprep.mubr.msk.bf16.mxu0 %vm8160_vm3, %v1544_v12  ;;  %v1523_v26 = vpack.c.bf16 %v5821_v61, %v5818_v4  ;;  %v1524_v31 = vpack.c.bf16 %v5832_v23, %v5824_v42  ;;  %v8084_v5 = vrot.slane %v5827_v10, 7  ;;  %v764_v48 = vmul.f32 %v5403_v7, %v5694_v14  ;;  %v5407_v50 = vpop.eup %5406 }
  0x5a   : > { %v5841_v38 = vsel %vm8143_vm2, %v1547_v19, %v1551_v2  ;;  %v1553_v40 = vshrl.u32 %v1515_v51, 16  ;;  %v5853_v57 = vsel %vm8144_vm1, %v865_v3, %v867_v32  ;;  %v5409_v60 = vpop.eup %5408  ;;  %v831_v51 = vrot.slane %v763_v47, 7 }
  0x5b   : > { %8265 = vst [vmem:[#allocation5_spill] sm:$0xff] %v5841_v38  ;;  %5006 = vmatmul.mubr.msk.bf16.vlgmr.msra.gmra.mxu0 %vm8160_vm3, %v5841_v38  ;;  %v1613_v53 = vshll.u32 %v1523_v26, 16  ;;  %v1617_v41 = vshrl.u32 %v1523_v26, 16  ;;  %v1621_v55 = vshll.u32 %v1524_v31, 16  ;;  %v5858_v9 = vsel %vm8144_vm1, %v867_v32, %v8084_v5  ;;  %v5860_v63 = vpop.eup %5410 }
  0x5c   : > { %v1625_v14 = vshrl.u32 %v1524_v31, 16  ;;  %v833_v62 = vrot.slane %v764_v48, 7  ;;  %5072 = vmatpush3.bf16.msra.mxu0 %v2352_v37  ;;  %v5866_v3 = vpack.c.bf16 %v5858_v9, %v5853_v57  ;;  %v5870_v7 = vadd.f32 %v5622_v35, %v5770_v1  ;;  %v5413_v31 = vpop.eup %5412 }
  0x5d   : > { %v5862_v56 = vrot.slane %v1613_v53, 1  ;;  %v1623_v58 = vrot.slane %v1621_v55, 1  ;;  %5327 = vmatprep.subr.msk.bf16.mxu0 %vm8158_vm0, %v5848_v49  ;;  %v5877_v37 = vsel %vm8144_vm1, %v829_v45, %v831_v51  ;;  %v765_v19 = vmul.f32 %v5405_v34, %v5698_v16  ;;  %v471_v45 = vld [vmem:[%s5595_s18 + $0x60] sm:$0xff]  ;;  %v5415_v48 = vpop.eup %5414 }
  0x5e   : > { %v5880_v12 = vsel %vm8144_vm1, %v831_v51, %v833_v62  ;;  %v5884_v26 = vmul.f32 %v5407_v50, %v5702_v18  ;;  %v1629_v47 = vshll.u32 %v5866_v3, 16  ;;  %v1555_v53 = vor.u32 %v1553_v40, %v1551_v2  ;;  %v472_v18 = vld [vmem:[%s5595_s18 + $0x68] sm:$0xff] }
  0x5f   : > { %v1619_v1 = vor.u32 %v1617_v41, %v5862_v56  ;;  %v1627_v32 = vor.u32 %v1625_v14, %v1623_v58  ;;  %v1516_v43 = vpack.c.bf16 %v5880_v12, %v5877_v37  ;;  %v835_v55 = vrot.slane %v765_v19, 7 }
  0x60   : > { %v8085_v16 = vrot.slane %v5884_v26, 7  ;;  %v688_v34 = vadd.f32 1.0, %v5409_v60  ;;  %v5896_v41 = vrot.slane %v1629_v47, 1  ;;  %v509_v40 = vmul.f32 %v5607_v21, %v471_v45  ;;  %v474_v60 = vld [vmem:[%s5595_s18 + $0x78] sm:$0xff]  ;;  %v5923_v47 = vld [vmem:[%s8074_s4 + $0x6] sm:$0x3] }
  0x61   : > { %v5894_v50 = vsel %vm8143_vm2, %v1619_v1, %v1623_v58  ;;  %v1557_v14 = vshll.u32 %v1516_v43, 16  ;;  %v1561_v51 = vshrl.u32 %v1516_v43, 16  ;;  %v5902_v5 = vsel %vm8144_vm1, %v833_v62, %v835_v55  ;;  %v475_v43 = vld [vmem:[%s5595_s18 + $0x80] sm:$0xff] }
  0x62   : > { %8266 = vst [vmem:[#allocation6_spill] sm:$0xff] %v5894_v50  ;;  %5025 = vmatprep.mubr.msk.bf16.mxu1 %vm8160_vm3, %v5894_v50  ;;  %8267 = vst [vmem:[#allocation7_spill] sm:$0xff] %v5902_v5  ;;  %v5907_v2 = vsel %vm8144_vm1, %v835_v55, %v8085_v16  ;;  %5416 = vrcp.f32 %v688_v34  ;;  %v5913_v58 = vsel %vm8143_vm2, %v1627_v32, %v5896_v41  ;;  %v689_v45 = vadd.f32 1.0, %v5413_v31 }
  0x63   : > { %8268 = vst [vmem:[#allocation8_spill] sm:$0xff] %v5907_v2  ;;  %8269 = vst [vmem:[#allocation9_spill] sm:$0xff] %v5913_v58  ;;  %v1559_v19 = vrot.slane %v1557_v14, 1  ;;  %v5917_v1 = vpack.c.bf16 %v5907_v2, %v5902_v5  ;;  %v510_v62 = vmul.f32 %v5607_v21, %v472_v18  ;;  %5026 = vmatmul.mubr.msk.bf16.vlgmr.msra.gmra.mxu1 %vm8160_vm3, %v5913_v58  ;;  %v690_v55 = vadd.f32 1.0, %v5415_v48 }
  0x64   : > { %5418 = vpow2.f32 %v5757_v52  ;;  %v511_v32 = vmul.f32 %v5607_v21, %v473_v54  ;;  %5038 = vmatpush3.bf16.msra.mxu1 %v5745_v33  ;;  %v512_v16 = vmul.f32 %v5607_v21, %v474_v60  ;;  %v4666_v31 = vmul.f32 -1.442695, %v5767_v0 }
  0x65   : > { %v5932_v34 = vsel %vm8143_vm2, %v1555_v53, %v1559_v19  ;;  %v1563_v18 = vor.u32 %v1561_v51, %v1559_v19  ;;  %v1565_v14 = vshll.u32 %v5917_v1, 16  ;;  %5420 = vrcp.f32 %v689_v45  ;;  %5326 = vmatprep.subr.msk.bf16.mxu1 %vm8158_vm0, %v5923_v47 }
  0x66   : > { %8270 = vst [vmem:[#allocation10_spill] sm:$0xff] %v5932_v34  ;;  %5009 = vmatprep.mubr.msk.bf16.mxu0 %vm8160_vm3, %v5932_v34  ;;  %v5940_v52 = vadd.f32 %v5622_v35, %v509_v40  ;;  %v513_v33 = vmul.f32 %v5607_v21, %v475_v43  ;;  %5422 = vrcp.f32 %v690_v55  ;;  %v4683_v48 = vmul.f32 -1.442695, %v5780_v17 }
  0x67   : > { %v5945_v54 = vrot.slane %v1565_v14, 1  ;;  %v5949_v53 = vadd.f32 %v5622_v35, %v510_v62  ;;  %5424 = vpow2.f32 %v5762_v59  ;;  %v4684_v51 = vmul.f32 -1.442695, %v5786_v44 }
  0x68   : > { %v5954_v40 = vadd.f32 %v5622_v35, %v511_v32  ;;  %5426 = vpow2.f32 %v5774_v6  ;;  %v4685_v19 = vmul.f32 -1.442695, %v5870_v7  ;;  %v5963_v43 = vadd.f32 %v5622_v35, %v512_v16 }
  0x69   : > { %v5958_v60 = vsel %vm8143_vm2, %v1563_v18, %v5945_v54  ;;  %v783_v59 = vmul.f32 %v5860_v63, %v5706_v20  ;;  %5428 = vpow2.f32 %v4666_v31  ;;  %v4667_v62 = vmul.f32 -1.442695, %v5940_v52 }
  0x6a   : > { %8271 = vst [vmem:[#allocation11_spill] sm:$0xff] %v5958_v60  ;;  %5010 = vmatmul.mubr.msk.bf16.gmra.mxu0 %vm8160_vm3, %v5958_v60  ;;  %v5971_v45 = vadd.f32 %v5622_v35, %v513_v33  ;;  %5430 = vpow2.f32 %v4683_v48  ;;  %v4668_v6 = vmul.f32 -1.442695, %v5949_v53  ;;  %v4669_v55 = vmul.f32 -1.442695, %v5954_v40 }
  0x6b   : > { %5432 = vpow2.f32 %v4684_v51  ;;  %v4670_v16 = vmul.f32 -1.442695, %v5963_v43  ;;  %v871_v32 = vrot.slane %v783_v59, 7  ;;  %v8272_v31 = vrot.slane %v5827_v10, 7 }
  0x6c   : > { %5434 = vpow2.f32 %v4685_v19  ;;  %v4671_v18 = vmul.f32 -1.442695, %v5971_v45  ;;  %v1633_v59 = vshrl.u32 %v5866_v3, 16 }
  0x6d   : > { %5436 = vpow2.f32 %v4667_v62  ;;  %v5981_v33 = vsel %vm8144_vm1, %v8272_v31, %v871_v32 }
  0x6e   : > { %5438 = vpow2.f32 %v4668_v6  ;;  %v1635_v3 = vor.u32 %v1633_v59, %v5896_v41 }
  0x6f   : > { %v5417_v20 = vpop.eup %5416  ;;  %5440 = vpow2.f32 %v4669_v55 }
  0x70   : > { %v784_v63 = vmul.f32 %v5417_v20, %v5724_v8  ;;  %5442 = vpow2.f32 %v4670_v16 }
  0x71   : > { %v5419_v14 = vpop.eup %5418  ;;  %5444 = vpow2.f32 %v4671_v18 }
  0x72   : > { %v873_v48 = vrot.slane %v784_v63, 7  ;;  %v671_v51 = vadd.f32 1.0, %v5419_v14  ;;  %v5421_v19 = vpop.eup %5420 }
  0x73   : > { %v5423_v62 = vpop.eup %5422  ;;  %v785_v8 = vmul.f32 %v5421_v19, %v5727_v15 }
  0x74   : > { %v5985_v13 = vsel %vm8144_vm1, %v871_v32, %v873_v48  ;;  %5446 = vrcp.f32 %v671_v51  ;;  %v5425_v6 = vpop.eup %5424  ;;  %v5991_v55 = vmul.f32 %v5423_v62, %v5732_v24 }
  0x75   : > { %8273 = vst [vmem:[#allocation12_spill] sm:$0xff] %v5985_v13  ;;  %v1526_v10 = vpack.c.bf16 %v5985_v13, %v5981_v33  ;;  %v5427_v16 = vpop.eup %5426  ;;  %v875_v20 = vrot.slane %v785_v8, 7  ;;  %v672_v18 = vadd.f32 1.0, %v5425_v6 }
  0x76   : > { %v5429_v63 = vpop.eup %5428  ;;  %v8090_v32 = vrot.slane %v5991_v55, 7  ;;  %v673_v31 = vadd.f32 1.0, %v5427_v16 }
  0x77   : > { %v1637_v14 = vshll.u32 %v1526_v10, 16  ;;  %v5431_v28 = vpop.eup %5430  ;;  %v5996_v15 = vsel %vm8144_vm1, %v873_v48, %v875_v20  ;;  %v1641_v51 = vshrl.u32 %v1526_v10, 16  ;;  %5448 = vrcp.f32 %v672_v18 }
  0x78   : > { %8274 = vst [vmem:[#allocation13_spill] sm:$0xff] %v5996_v15  ;;  %v674_v19 = vadd.f32 1.0, %v5429_v63  ;;  %v5433_v58 = vpop.eup %5432  ;;  %v6001_v62 = vsel %vm8144_vm1, %v875_v20, %v8090_v32  ;;  %5450 = vrcp.f32 %v673_v31  ;;  %v691_v41 = vadd.f32 1.0, %v5431_v28 }
  0x79   : > { %v1639_v24 = vrot.slane %v1637_v14, 1  ;;  %8275 = vst [vmem:[#allocation14_spill] sm:$0xff] %v6001_v62  ;;  %v5435_v59 = vpop.eup %5434  ;;  %v6005_v8 = vpack.c.bf16 %v6001_v62, %v5996_v15  ;;  %v692_v48 = vadd.f32 1.0, %v5433_v58 }
  0x7a   : > { %5452 = vrcp.f32 %v674_v19  ;;  %v5437_v6 = vpop.eup %5436  ;;  %v693_v16 = vadd.f32 1.0, %v5435_v59 }
  0x7b   : > { %v6008_v10 = vsel %vm8143_vm2, %v1635_v3, %v1639_v24  ;;  %5454 = vrcp.f32 %v691_v41  ;;  %v5439_v18 = vpop.eup %5438  ;;  %v1643_v20 = vor.u32 %v1641_v51, %v1639_v24  ;;  %v1645_v28 = vshll.u32 %v6005_v8, 16 }
  0x7c   : > { %8276 = vst [vmem:[#allocation15_spill] sm:$0xff] %v6008_v10  ;;  %5029 = vmatprep.mubr.msk.bf16.mxu1 %vm8160_vm3, %v6008_v10  ;;  %5456 = vrcp.f32 %v692_v48  ;;  %v675_v63 = vadd.f32 1.0, %v5437_v6  ;;  %v5441_v14 = vpop.eup %5440  ;;  %v676_v31 = vadd.f32 1.0, %v5439_v18  ;;  %v925_v24 = vadd.s32 16, %v5584_v11 }
  0x7d   : > { %5458 = vrcp.f32 %v693_v16  ;;  %v5443_v19 = vpop.eup %5442  ;;  %v1647_v58 = vrot.slane %v1645_v28, 1  ;;  %v677_v32 = vadd.f32 1.0, %v5441_v14  ;;  %v927_v6 = vadd.s32 32, %v5584_v11 }
  0x7e   : > { %5460 = vrcp.f32 %v675_v63  ;;  %v5445_v3 = vpop.eup %5444  ;;  %v678_v41 = vadd.f32 1.0, %v5443_v19  ;;  %v6022_v16 = vadd.s32 48, %v5584_v11  ;;  %v973_v28 = vand.u32 15, %v925_v24 }
  0x7f   : > { %5462 = vrcp.f32 %v676_v31  ;;  %v6014_v59 = vsel %vm8143_vm2, %v1643_v20, %v1647_v58  ;;  %v679_v10 = vadd.f32 1.0, %v5445_v3  ;;  %v1569_v31 = vshrl.u32 %v5917_v1, 16 }
  0x80   : > { %8277 = vst [vmem:[#allocation16_spill] sm:$0xff] %v6014_v59  ;;  %5464 = vrcp.f32 %v677_v32  ;;  %5030 = vmatmul.mubr.msk.bf16.gmra.mxu1 %vm8160_vm3, %v6014_v59  ;;  %v6025_v32 = vadd.s32 8, %v5584_v11  ;;  %v8278_v24 = vrot.slane %v5884_v26, 7  ;;  %v1649_v1 = vshrl.u32 %v6005_v8, 16 }
  0x81   : > { %v5447_v51 = vpop.eup %5446  ;;  %5466 = vrcp.f32 %v678_v41  ;;  %v987_v41 = vand.u32 15, %v927_v6  ;;  %v6045_v6 = vadd.s32 64, %v5584_v11  ;;  %vm6076_vm4 = vcmp.gt.s32.totalorder %v973_v28, 0 }
  0x82   : > { %v767_v48 = vmul.f32 %v5447_v51, %v5735_v25  ;;  %5468 = vrcp.f32 %v679_v10  ;;  %v6031_v25 = vsel %vm8158_vm0, %v5923_v47, 0 }
  0x83   : > { %vm6091_vm5 = vcmp.gt.s32.totalorder %v987_v41, 0 }
  0x84   : > { %v839_v18 = vrot.slane %v767_v48, 7  ;;  %v5449_v20 = vpop.eup %5448 }
  0x85   : > { %v5451_v63 = vpop.eup %5450  ;;  %v768_v14 = vmul.f32 %v5449_v20, %v5740_v30 }
  0x86   : > { %v769_v3 = vmul.f32 %v5451_v63, %v5751_v46  ;;  %v6038_v48 = vsel %vm8144_vm1, %v8278_v24, %v839_v18  ;;  %v1571_v24 = vor.u32 %v1569_v31, %v5945_v54  ;;  %v1651_v54 = vor.u32 %v1649_v1, %v1647_v58 }
  0x87   : > { %v5453_v19 = vpop.eup %5452  ;;  %8279 = vst [vmem:[#allocation17_spill] sm:$0xff] %v6038_v48  ;;  %v841_v59 = vrot.slane %v768_v14, 7 }
  0x88   : > { %v5455_v51 = vpop.eup %5454  ;;  %v770_v30 = vmul.f32 %v5453_v19, %v5767_v0  ;;  %v843_v47 = vrot.slane %v769_v3, 7 }
  0x89   : > { %v5457_v20 = vpop.eup %5456  ;;  %v787_v50 = vmul.f32 %v5455_v51, %v5780_v17  ;;  %v6048_v26 = vsel %vm8144_vm1, %v839_v18, %v841_v59 }
  0x8a   : > { %v5459_v63 = vpop.eup %5458  ;;  %8280 = vst [vmem:[#allocation18_spill] sm:$0xff] %v6048_v26  ;;  %v845_v14 = vrot.slane %v770_v30, 7  ;;  %v788_v0 = vmul.f32 %v5457_v20, %v5786_v44  ;;  %v1518_v8 = vpack.c.bf16 %v6048_v26, %v6038_v48  ;;  %v6055_v17 = vsel %vm8144_vm1, %v841_v59, %v843_v47 }
  0x8b   : > { %v5461_v19 = vpop.eup %5460  ;;  %v879_v3 = vrot.slane %v787_v50, 7  ;;  %v6058_v51 = vmul.f32 %v5459_v63, %v5870_v7  ;;  %v8282_v59 = vrot.slane %v5991_v55, 7 }
  0x8c   : > { %v5463_v46 = vpop.eup %5462  ;;  %v6061_v18 = vsel %vm8144_vm1, %v843_v47, %v845_v14  ;;  %v881_v10 = vrot.slane %v788_v0, 7  ;;  %v771_v31 = vmul.f32 %v5461_v19, %v5940_v52  ;;  %v1573_v30 = vshll.u32 %v1518_v8, 16 }
  0x8d   : > { %8281 = vst [vmem:[#allocation19_spill] sm:$0xff] %v6058_v51  ;;  %v5465_v44 = vpop.eup %5464  ;;  %v1519_v20 = vpack.c.bf16 %v6061_v18, %v6055_v17  ;;  %v1577_v60 = vshrl.u32 %v1518_v8, 16  ;;  %v6069_v50 = vsel %vm8144_vm1, %v8282_v59, %v879_v3  ;;  %v8102_v47 = vrot.slane %v6058_v51, 7 }
  0x8e   : > { %8283 = vst [vmem:[#allocation20_spill] sm:$0xff] %v6069_v50  ;;  %v6072_v7 = vsel %vm8144_vm1, %v879_v3, %v881_v10  ;;  %v772_v58 = vmul.f32 %v5463_v46, %v5949_v53  ;;  %v847_v1 = vrot.slane %v771_v31, 7  ;;  %v5467_v52 = vpop.eup %5466  ;;  %v1575_v0 = vrot.slane %v1573_v30, 1 }
  0x8f   : > { %8284 = vst [vmem:[#allocation21_spill] sm:$0xff] %v6072_v7  ;;  %v1581_v19 = vshll.u32 %v1519_v20, 16  ;;  %v1528_v55 = vpack.c.bf16 %v6072_v7, %v6069_v50  ;;  %v1585_v8 = vshrl.u32 %v1519_v20, 16  ;;  %v6085_v3 = vsel %vm8144_vm1, %v881_v10, %v8102_v47  ;;  %v5469_v31 = vpop.eup %5468 }
  0x90   : > { %v6088_v59 = vsel %vm8144_vm1, %v845_v14, %v847_v1  ;;  %v849_v53 = vrot.slane %v772_v58, 7  ;;  %v773_v28 = vmul.f32 %v5465_v44, %v5954_v40  ;;  %v6096_v30 = vsel %vm8143_vm2, %v1571_v24, %v1575_v0 }
  0x91   : > { %8289 = vst [vmem:[#allocation22_spill] sm:$0xff] %v6096_v30  ;;  %v1579_v20 = vor.u32 %v1577_v60, %v1575_v0  ;;  %v1583_v34 = vrot.slane %v1581_v19, 1  ;;  %v1653_v51 = vshll.u32 %v1528_v55, 16  ;;  %5013 = vmatprep.mubr.msk.bf16.mxu0 %vm8160_vm3, %v6096_v30  ;;  %v1529_v10 = vpack.c.bf16 %v6085_v3, %v6085_v3  ;;  %v6204_v30 = vld [vmem:[%s8074_s4 + $0xa] sm:$0x3] }
  0x92   : > { %v1657_v14 = vshrl.u32 %v1528_v55, 16  ;;  %v6103_v40 = vsel %vm8144_vm1, %v847_v1, %v849_v53  ;;  %v774_v41 = vmul.f32 %v5467_v52, %v5963_v43  ;;  %v851_v19 = vrot.slane %v773_v28, 7  ;;  %8309 = vst [vmem:[#allocation32_spill] sm:$0xff] %v6204_v30 }
  0x93   : > { %v6107_v44 = vsel %vm8143_vm2, %v1579_v20, %v1583_v34  ;;  %v1655_v24 = vrot.slane %v1653_v51, 1  ;;  %v1520_v60 = vpack.c.bf16 %v6103_v40, %v6088_v59  ;;  %v1587_v58 = vor.u32 %v1585_v8, %v1583_v34 }
  0x94   : > { %8290 = vst [vmem:[#allocation23_spill] sm:$0xff] %v6107_v44  ;;  %5014 = vmatmul.mubr.msk.bf16.gmra.mxu0 %vm8160_vm3, %v6107_v44  ;;  %v1661_v0 = vshll.u32 %v1529_v10, 16  ;;  %v853_v47 = vrot.slane %v774_v41, 7  ;;  %v775_v55 = vmul.f32 %v5469_v31, %v5971_v45  ;;  %v6122_v34 = vsel %vm8144_vm1, %v849_v53, %v851_v19 }
  0x95   : > { %v6115_v1 = vsel %vm8143_vm2, %v1651_v54, %v1655_v24  ;;  %v6117_v43 = vor.u32 %v1657_v14, %v1655_v24  ;;  %v1589_v52 = vshll.u32 %v1520_v60, 16  ;;  %v1593_v20 = vshrl.u32 %v1520_v60, 16 }
  0x96   : > { %8291 = vst [vmem:[#allocation24_spill] sm:$0xff] %v6115_v1  ;;  %5033 = vmatprep.mubr.msk.bf16.mxu1 %vm8160_vm3, %v6115_v1  ;;  %v1663_v51 = vrot.slane %v1661_v0, 1  ;;  %v6125_v8 = vsel %vm8144_vm1, %v851_v19, %v853_v47  ;;  %v855_v28 = vrot.slane %v775_v55, 7  ;;  %v8293_v45 = vand.u32 15, %v6022_v16 }
  0x97   : > { %8292 = vst [vmem:[#allocation25_spill] sm:$0xff] %v6117_v43  ;;  %v8294_v54 = vmov 0  ;;  %v1591_v31 = vrot.slane %v1589_v52, 1  ;;  %v1521_v10 = vpack.c.bf16 %v6125_v8, %v6122_v34  ;;  %v8103_v14 = vmov 0.0  }
  0x98   : > { %vm6129_vm7 = vcmp.gt.s32.totalorder %v8293_v45, 0  ;;  %v6136_v41 = vrot.slane %v8103_v14, 2  ;;  %v926_v53 = vadd.s32 24, %v5584_v11  ;;  %v1664_v24 = vsel %vm8143_vm2, %v6117_v43, %v1663_v51 }
  0x99   : > { %v8295_v54 = vsel %vm6129_vm7, 4294967295, %v8294_v54  ;;  %v6142_v60 = vsel %vm8144_vm1, %v853_v47, %v855_v28  ;;  %v8298_v16 = vrot.slane %v5793_v29, 7  ;;  %5034 = vmatmul.mubr.msk.bf16.gmra.mxu1 %vm8160_vm3, %v1664_v24  ;;  %v6152_v55 = vsel %vm8143_vm2, %v1587_v58, %v1591_v31 }
  0x9a   : > { %8296 = vst [vmem:[#allocation26_spill] sm:$0xff] %v8295_v54  ;;  %8297 = vst [vmem:[#allocation27_spill] sm:$0xff] %v6136_v41  ;;  %v1595_v52 = vor.u32 %v1593_v20, %v1591_v31  ;;  %v1597_v45 = vshll.u32 %v1521_v10, 16  ;;  %v1467_v47 = vsel %vm6076_vm4, %v5783_v22, 0.0  ;;  %5017 = vmatprep.mubr.msk.bf16.mxu0 %vm8160_vm3, %v6152_v55  ;;  %v5488_v29 = vmov 0.0|0.0  }
  0x9b   : > { %v6147_v0 = vsel %vm8144_vm1, %v855_v28, %v8298_v16  ;;  %8299 = vst [vmem:[#allocation28_spill] sm:$0xff] %v6152_v55  ;;  %5039 = vmatprep.mubr.bf16.mxu1 %v5488_v29  ;;  %v1601_v28 = vshrl.u32 %v1521_v10, 16  ;;  %v8300_v24 = vand.u32 15, %v6025_v32  ;;  %v8301_v58 = vmov 0 }
  0x9c   : > { %v1522_v51 = vpack.c.bf16 %v6147_v0, %v6142_v60  ;;  %v1015_v20 = vand.u32 15, %v6045_v6  ;;  %v1599_v31 = vrot.slane %v1597_v45, 1  ;;  %v1469_v19 = vsel %vm6091_vm5, %v5799_v36, 0.0 }
  0x9d   : > { %vm6163_vm8 = vcmp.lt.s32.totalorder %v8300_v24, 15  ;;  %v8304_v1 = vrot.slane %v5783_v22, 2  ;;  %v980_v29 = vand.u32 15, %v926_v53  ;;  %v933_v32 = vadd.s32 80, %v5584_v11 }
  0x9e   : > { %v8302_v58 = vsel %vm6163_vm8, 4294967295, %v8301_v58  ;;  %v1605_v16 = vshll.u32 %v1522_v51, 16  ;;  %v1609_v14 = vshrl.u32 %v1522_v51, 16  ;;  %v928_v24 = vadd.s32 40, %v5584_v11 }
  0x9f   : > { %8303 = vst [vmem:[#allocation29_spill] sm:$0xff] %v8302_v58  ;;  %v2160_v10 = vsel %vm8145_vm6, %v6136_v41, %v8304_v1  ;;  %v1498_v43 = vpack.c.bf16 %v5789_v27, %v1467_v47  ;;  %v6179_v6 = vsel %vm8143_vm2, %v1595_v52, %v1599_v31  ;;  %v1603_v45 = vor.u32 %v1601_v28, %v1599_v31 }
  0xa0   : > { %8305 = vst [vmem:[#allocation30_spill] sm:$0xff] %v6179_v6  ;;  %v1607_v51 = vrot.slane %v1605_v16, 1  ;;  %v2161_v55 = vrot.slane %v5789_v27, 2  ;;  %5018 = vmatmul.mubr.msk.bf16.gmra.mxu0 %vm8160_vm3, %v6179_v6  ;;  %v1499_v44 = vpack.c.bf16 %v5806_v39, %v1469_v19  ;;  %vm6185_vm9 = vcmp.gt.s32.totalorder %v1015_v20, 0 }
  0xa1   : > { %v930_v53 = vadd.s32 56, %v5584_v11  ;;  %v2163_v47 = vrot.slane %v5799_v36, 2  ;;  %v2254_v31 = vsel %vm6163_vm8, %v2160_v10, 0.0  ;;  %v994_v16 = vand.u32 15, %v928_v24  ;;  %5040 = vmatmul.mubr.msk.bf16.vlgmr.msra.gmra.mxu1 %vm8160_vm3, %v1498_v43 }
  0xa2   : > { %v6192_v52 = vsel %vm8143_vm2, %v1603_v45, %v1607_v51  ;;  %v1611_v28 = vor.u32 %v1609_v14, %v1607_v51  ;;  %v2165_v19 = vrot.slane %v5806_v39, 2  ;;  %v2167_v20 = vrot.slane %v5877_v37, 2  ;;  %5106 = vmatpush3.bf16.msra.mxu1 %v6031_v25  ;;  %5043 = vmatprep.mubr.msk.bf16.mxu1 %vm8160_vm3, %v1499_v44 }
  0xa3   : > { %8308 = vst [vmem:[#allocation31_spill] sm:$0xff] %v6192_v52  ;;  %5021 = vmatprep.mubr.msk.bf16.mxu0 %vm8160_vm3, %v6192_v52  ;;  %v935_v6 = vadd.s32 96, %v5584_v11  ;;  %v1471_v14 = vsel %vm6129_vm7, %v5877_v37, 0.0  ;;  %v1029_v10 = vand.u32 15, %v933_v32  ;;  %v1473_v24 = vsel %vm6185_vm9, %v5902_v5, 0.0  ;;  %5328 = vmatprep.subr.msk.bf16.mxu1 %vm8158_vm0, %v6204_v30 }
  0xa4   : > { %v1008_v45 = vand.u32 15, %v930_v53  ;;  %v2169_v51 = vrot.slane %v5880_v12, 2  ;;  %v2171_v58 = vrot.slane %v5902_v5, 2  ;;  %v6219_v43 = vsel %vm8143_vm2, %v1611_v28, %v5862_v56 }
  0xa5   : > { %8310 = vst [vmem:[#allocation33_spill] sm:$0xff] %v6219_v43  ;;  %v2285_v52 = vpack.c.bf16 %v2254_v31, %v6136_v41  ;;  %vm6222_vm10 = vcmp.lt.s32.totalorder %v980_v29, 15  ;;  %v8311_v32 = vmov 0  ;;  %v6227_v25 = vsel %vm8145_vm6, %v2161_v55, %v2163_v47 }
  0xa6   : > { %v8312_v32 = vsel %vm6222_vm10, 4294967295, %v8311_v32  ;;  %8314 = vst [vmem:[#allocation35_spill] sm:$0xff] %v6227_v25  ;;  %vm6231_vm11 = vcmp.lt.s32.totalorder %v994_v16, 15  ;;  %v8315_v44 = vmov 0  ;;  %v6236_v53 = vsel %vm8145_vm6, %v2165_v19, %v2167_v20 }
  0xa7   : > { %8313 = vst [vmem:[#allocation34_spill] sm:$0xff] %v8312_v32  ;;  %v8316_v44 = vsel %vm6231_vm11, 4294967295, %v8315_v44  ;;  %8318 = vst [vmem:[#allocation37_spill] sm:$0xff] %v6236_v53  ;;  %v1043_v56 = vand.u32 15, %v935_v6  ;;  %v932_v28 = vadd.s32 72, %v5584_v11  ;;  %v1500_v29 = vpack.c.bf16 %v5880_v12, %v1471_v14 }
  0xa8   : > { %8317 = vst [vmem:[#allocation36_spill] sm:$0xff] %v8316_v44  ;;  %v1501_v31 = vpack.c.bf16 %v5907_v2, %v1473_v24  ;;  %vm6241_vm12 = vcmp.gt.s32.totalorder %v1029_v10, 0  ;;  %5022 = vmatmul.mubr.msk.bf16.gmra.mxu0 %vm8160_vm3, %v6219_v43  ;;  %v8321_v16 = vrot.slane %v5783_v22, 2  ;;  %vm6252_vm13 = vcmp.lt.s32.totalorder %v1008_v45, 15 }
  0xa9   : > { %v8323_v6 = vmov 0  ;;  %v6257_v14 = vsel %vm8145_vm6, %v2169_v51, %v2171_v58  ;;  %v937_v10 = vadd.s32 112, %v5584_v11  ;;  %5073 = vmatprep.mubr.msk.bf16.mxu0 %vm8160_vm3, %v2285_v52  ;;  %v2256_v24 = vsel %vm6222_vm10, %v6227_v25, 0.0  ;;  %5044 = vmatmul.mubr.msk.bf16.gmra.mxu1 %vm8160_vm3, %v1500_v29 }
  0xaa   : > { %v6250_v38 = vsel %vm8145_vm6, %v8321_v16, %v2161_v55  ;;  %v8324_v6 = vsel %vm6252_vm13, 4294967295, %v8323_v6  ;;  %8326 = vst [vmem:[#allocation40_spill] sm:$0xff] %v6257_v14  ;;  %v6265_v43 = vsel %vm8145_vm6, %v2163_v47, %v2165_v19  ;;  %v2258_v55 = vsel %vm6231_vm11, %v6236_v53, 0.0  ;;  %5047 = vmatprep.mubr.msk.bf16.mxu1 %vm8160_vm3, %v1501_v31 }
  0xab   : > { %8322 = vst [vmem:[#allocation38_spill] sm:$0xff] %v6250_v38  ;;  %8325 = vst [vmem:[#allocation39_spill] sm:$0xff] %v8324_v6  ;;  %v939_v45 = vadd.s32 128, %v5584_v11  ;;  %vm6271_vm14 = vcmp.gt.s32.totalorder %v1043_v56, 0  ;;  %v6276_v54 = vsel %vm8145_vm6, %v2167_v20, %v2169_v51  ;;  %v1022_v52 = vand.u32 15, %v932_v28 }
  0xac   : > { %8327 = vst [vmem:[#allocation41_spill] sm:$0xff] %v6265_v43  ;;  %8330 = vst [vmem:[#allocation42_spill] sm:$0xff] %v6276_v54  ;;  %v934_v32 = vadd.s32 88, %v5584_v11  ;;  %v2260_v47 = vsel %vm6252_vm13, %v6257_v14, 0.0  ;;  %v2173_v19 = vrot.slane %v5907_v2, 2  ;;  %v2175_v44 = vrot.slane %v6038_v48, 2 }
  0xad   : > { %v943_v56 = vadd.s32 160, %v5584_v11  ;;  %v2286_v20 = vpack.c.bf16 %v2256_v24, %v6250_v38  ;;  %v1475_v51 = vsel %vm6241_vm12, %v6038_v48, 0.0  ;;  %v1057_v28 = vand.u32 15, %v937_v10 }
  0xae   : > { %v941_v29 = vadd.s32 144, %v5584_v11  ;;  %v2287_v6 = vpack.c.bf16 %v2258_v55, %v6265_v43  ;;  %v1477_v14 = vsel %vm6271_vm14, %v6055_v17, 0.0  ;;  %v1071_v53 = vand.u32 15, %v939_v45 }
  0xaf   : > { %v2288_v25 = vpack.c.bf16 %v2260_v47, %v6276_v54  ;;  %vm6297_vm15 = vcmp.lt.s32.totalorder %v1022_v52, 15  ;;  %v8331_v31 = vmov 0  ;;  %v1036_v24 = vand.u32 15, %v934_v32 }
  0xb0   : > { %v8332_v31 = vsel %vm6297_vm15, 4294967295, %v8331_v31  ;;  %v936_v38 = vadd.s32 104, %v5584_v11  ;;  %v1502_v10 = vpack.c.bf16 %v6048_v26, %v1475_v51  ;;  %v6304_v2 = vsel %vm8145_vm6, %v2173_v19, %v2175_v44  ;;  %5074 = vmatmul.mubr.msk.bf16.vlgmr.msra.gmra.mxu0 %vm8160_vm3, %v2286_v20  ;;  %v6319_v51 = vld [vmem:[%s8074_s4 + $0xc] sm:$0x3] }
  0xb1   : > { %8333 = vst [vmem:[#allocation43_spill] sm:$0xff] %v8332_v31  ;;  %8334 = vst [vmem:[#allocation44_spill] sm:$0xff] %v6304_v2  ;;  %v1099_v55 = vand.u32 15, %v943_v56  ;;  %v938_v43 = vadd.s32 120, %v5584_v11  ;;  %v1503_v45 = vpack.c.bf16 %v6061_v18, %v1477_v14  ;;  %vm6309_vm2 = vcmp.gt.s32.totalorder %v1057_v28, 0  ;;  %5077 = vmatprep.mubr.msk.bf16.mxu0 %vm8160_vm3, %v2287_v6 }
  0xb2   : > { %v6314_v32 = vsel %vm8145_vm6, %v2171_v58, %v2173_v19  ;;  %v1085_v47 = vand.u32 15, %v941_v29  ;;  %8338 = vst [vmem:[#allocation46_spill] sm:$0xff] %v6319_v51  ;;  %vm6322_vm1 = vcmp.gt.s32.totalorder %v1071_v53, 0  ;;  %v8339_v56 = vmov 0  ;;  %5048 = vmatmul.mubr.msk.bf16.gmra.mxu1 %vm8160_vm3, %v1502_v10 }
  0xb3   : > { %8337 = vst [vmem:[#allocation45_spill] sm:$0xff] %v6314_v32  ;;  %v8340_v56 = vsel %vm6322_vm1, 4294967295, %v8339_v56  ;;  %v2177_v14 = vrot.slane %v6048_v26, 2  ;;  %v2179_v20 = vrot.slane %v6055_v17, 2  ;;  %v2865_v58 = vsel %vm8158_vm0, %v5848_v49, 0  ;;  %5051 = vmatprep.mubr.msk.bf16.mxu1 %vm8160_vm3, %v1503_v45 }
  0xb4   : > { %8341 = vst [vmem:[#allocation47_spill] sm:$0xff] %v8340_v56  ;;  %v2262_v19 = vsel %vm6297_vm15, %v6304_v2, 0.0  ;;  %v1050_v28 = vand.u32 15, %v936_v38  ;;  %v2181_v29 = vrot.slane %v6061_v18, 2  ;;  %v2183_v6 = vrot.slane %v6088_v59, 2  ;;  %5140 = vmatpush3.bf16.msra.mxu0 %v2865_v58 }
  0xb5   : > { %vm6336_vm6 = vcmp.lt.s32.totalorder %v1036_v24, 15  ;;  %v8342_v53 = vmov 0  ;;  %vm6340_vm13 = vcmp.gt.s32.totalorder %v1099_v55, 0  ;;  %v8345_v54 = vmov 0  ;;  %5329 = vmatprep.subr.msk.bf16.mxu0 %vm8158_vm0, %v6319_v51 }
  0xb6   : > { %v8343_v53 = vsel %vm6336_vm6, 4294967295, %v8342_v53  ;;  %v8346_v54 = vsel %vm6340_vm13, 4294967295, %v8345_v54  ;;  %v1064_v49 = vand.u32 15, %v938_v43  ;;  %v945_v31 = vadd.s32 176, %v5584_v11 }
  0xb7   : > { %8344 = vst [vmem:[#allocation48_spill] sm:$0xff] %v8343_v53  ;;  %8347 = vst [vmem:[#allocation49_spill] sm:$0xff] %v8346_v54  ;;  %v1479_v38 = vsel %vm6309_vm2, %v6088_v59, 0.0  ;;  %v1481_v24 = vsel %vm6322_vm1, %v6122_v34, 0.0  ;;  %vm6354_vm15 = vcmp.gt.s32.totalorder %v1085_v47, 0  ;;  %v8348_v10 = vmov 0 }
  0xb8   : > { %v8349_v10 = vsel %vm6354_vm15, 4294967295, %v8348_v10  ;;  %v940_v43 = vadd.s32 136, %v5584_v11  ;;  %v2289_v55 = vpack.c.bf16 %v2262_v19, %v6314_v32  ;;  %vm8351_vm11 = vcmask 1045504  }
  0xb9   : > { %8350 = vst [vmem:[#allocation50_spill] sm:$0xff] %v8349_v10  ;;  %v6361_v58 = vsel %vm8351_vm11, %v2177_v14, %v2179_v20  ;;  %v2185_v45 = vrot.slane %v6103_v40, 2  ;;  %v2187_v2 = vrot.slane %v6122_v34, 2  ;;  %vm6365_vm0 = vcmp.lt.s32.totalorder %v1050_v28, 15  ;;  %vm8356_vm3 = vmmov %vm8351_vm11 }
  0xba   : > { %8352 = vst [vmem:[#allocation51_spill] sm:$0xff] %v6361_v58  ;;  %v8353_v51 = vmov 0  ;;  %v6370_v47 = vsel %vm8356_vm3, %v2181_v29, %v2183_v6  ;;  %v1485_v26 = vsel %vm6340_vm13, %v5818_v4, 0.0  ;;  %v947_v19 = vadd.s32 192, %v5584_v11  ;;  %vm8362_vm8 = vmmov %vm8356_vm3 }
  0xbb   : > { %v8354_v51 = vsel %vm6365_vm0, 4294967295, %v8353_v51  ;;  %8357 = vst [vmem:[#allocation53_spill] sm:$0xff] %v6370_v47  ;;  %v1504_v32 = vpack.c.bf16 %v6103_v40, %v1479_v38  ;;  %v1505_v48 = vpack.c.bf16 %v6125_v8, %v1481_v24  ;;  %vm6378_vm11 = vcmp.lt.s32.totalorder %v1064_v49, 15 }
  0xbc   : > { %8355 = vst [vmem:[#allocation52_spill] sm:$0xff] %v8354_v51  ;;  %v8358_v5 = vmov 0  ;;  %v1113_v28 = vand.u32 15, %v945_v31  ;;  %vm8361_vm10 = vcmask 31744   ;;  %v6384_v30 = vsel %vm8362_vm8, %v2175_v44, %v2177_v14 }
  0xbd   : > { %v8359_v5 = vsel %vm6378_vm11, 4294967295, %v8358_v5  ;;  %5078 = vmatmul.mubr.msk.bf16.gmra.mxu0 %vm8361_vm10, %v2288_v25  ;;  %8363 = vst [vmem:[#allocation55_spill] sm:$0xff] %v6384_v30  ;;  %v2264_v54 = vsel %vm6336_vm6, %v6361_v58, 0.0  ;;  %v1483_v38 = vsel %vm6354_vm15, %v6142_v60, 0.0  ;;  %v6393_v24 = vsel %vm8356_vm3, %v2179_v20, %v2181_v29  ;;  %vm8365_vm13 = vmmov %vm8361_vm10 }
  0xbe   : > { %8360 = vst [vmem:[#allocation54_spill] sm:$0xff] %v8359_v5  ;;  %8364 = vst [vmem:[#allocation56_spill] sm:$0xff] %v6393_v24  ;;  %5081 = vmatprep.mubr.msk.bf16.mxu0 %vm8365_vm13, %v2289_v55  ;;  %v2266_v25 = vsel %vm6365_vm0, %v6370_v47, 0.0  ;;  %v1078_v31 = vand.u32 15, %v940_v43  ;;  %v942_v14 = vadd.s32 152, %v5584_v11  ;;  %v1507_v49 = vpack.c.bf16 %v5821_v61, %v1485_v26  ;;  %v490_v47 = vld [vmem:[%s5595_s18 + $0xf8] sm:$0xff] }
  0xbf   : > { %vm8366_vm10 = vmmov %vm8356_vm3  ;;  %v2189_v53 = vrot.slane %v6125_v8, 2  ;;  %v2191_v58 = vrot.slane %v6142_v60, 2  ;;  %v2290_v20 = vpack.c.bf16 %v2264_v54, %v6384_v30  ;;  %v1506_v29 = vpack.c.bf16 %v6147_v0, %v1483_v38 }
  0xc0   : > { %v6400_v44 = vsel %vm8366_vm10, %v2185_v45, %v2187_v2  ;;  %vm8368_vm8 = vmmov %vm8365_vm13  ;;  %vm6409_vm13 = vcmp.gt.s32.totalorder %v1113_v28, 0  ;;  %v8369_v55 = vmov 0  ;;  %v1127_v51 = vand.u32 15, %v947_v19 }
  0xc1   : > { %8367 = vst [vmem:[#allocation57_spill] sm:$0xff] %v6400_v44  ;;  %5052 = vmatmul.mubr.msk.bf16.gmra.mxu1 %vm8368_vm8, %v1504_v32  ;;  %v8370_v55 = vsel %vm6409_vm13, 4294967295, %v8369_v55  ;;  %vm8372_vm3 = vmmov %vm8368_vm8  ;;  %v2291_v43 = vpack.c.bf16 %v2266_v25, %v6393_v24  ;;  %v6416_v26 = vsel %vm8366_vm10, %v2183_v6, %v2185_v45  ;;  %v2268_v32 = vsel %vm6378_vm11, %v6400_v44, 0.0 }
  0xc2   : > { %8371 = vst [vmem:[#allocation58_spill] sm:$0xff] %v8370_v55  ;;  %5055 = vmatprep.mubr.msk.bf16.mxu1 %vm8372_vm3, %v1505_v48  ;;  %v949_v54 = vadd.s32 208, %v5584_v11  ;;  %vm6422_vm8 = vcmp.lt.s32.totalorder %v1078_v31, 15  ;;  %v8373_v38 = vmov 0  ;;  %v1092_v28 = vand.u32 15, %v942_v14  ;;  %vm8376_vm3 = vmmov %vm8366_vm10 }
  0xc3   : > { %v8374_v38 = vsel %vm6422_vm8, 4294967295, %v8373_v38  ;;  %v2193_v19 = vrot.slane %v6147_v0, 2  ;;  %v2195_v48 = vrot.slane %v5818_v4, 2  ;;  %v6429_v25 = vsel %vm8376_vm3, %v2187_v2, %v2189_v53  ;;  %vm8378_vm10 = vmmov %vm8376_vm3 }
  0xc4   : > { %8375 = vst [vmem:[#allocation59_spill] sm:$0xff] %v8374_v38  ;;  %8377 = vst [vmem:[#allocation60_spill] sm:$0xff] %v6429_v25  ;;  %v6432_v6 = vsel %vm8378_vm10, %v2189_v53, %v2191_v58  ;;  %v944_v45 = vadd.s32 168, %v5584_v11  ;;  %v2557_v31 = vsel %vm6241_vm12, %v6055_v17, 0.0  ;;  %vm6438_vm11 = vcmp.gt.s32.totalorder %v1127_v51, 0 }
  0xc5   : > { %8379 = vst [vmem:[#allocation61_spill] sm:$0xff] %v6432_v6  ;;  %v8380_v5 = vmov 0  ;;  %v6443_v14 = vpack.c.bf16 %v6061_v18, %v2557_v31  ;;  %v2559_v2 = vsel %vm6271_vm14, %v6088_v59, 0.0  ;;  %v2561_v53 = vsel %vm6309_vm2, %v6122_v34, 0.0  ;;  %v8559_v46 = vld [vmem:[#allocation56_spill] sm:$0xff] }
  0xc6   : > { %v8381_v5 = vsel %vm6438_vm11, 4294967295, %v8380_v5  ;;  %vm8383_vm3 = vcmask 31744   ;;  %v1141_v24 = vand.u32 15, %v949_v54  ;;  %v6453_v44 = vpack.c.bf16 %v6103_v40, %v2559_v2 }
  0xc7   : > { %8382 = vst [vmem:[#allocation62_spill] sm:$0xff] %v8381_v5  ;;  %5082 = vmatmul.mubr.msk.bf16.gmra.mxu0 %vm8383_vm3, %v2290_v20  ;;  %v6456_v51 = vpack.c.bf16 %v6125_v8, %v2561_v53  ;;  %v2563_v31 = vsel %vm6322_vm1, %v6142_v60, 0.0  ;;  %vm8384_vm10 = vmmov %vm8383_vm3  ;;  %v2270_v30 = vsel %vm6422_vm8, %v6432_v6, 0.0  ;;  %vm6466_vm0 = vcmp.lt.s32.totalorder %v1092_v28, 15 }
  0xc8   : > { %5085 = vmatprep.mubr.msk.bf16.mxu0 %vm8384_vm10, %v2291_v43  ;;  %v8385_v20 = vmov 0  ;;  %vm8388_vm3 = vcmask 1045504   ;;  %v6474_v2 = vpack.c.bf16 %v6147_v0, %v2563_v31  ;;  %v1106_v53 = vand.u32 15, %v944_v45 }
  0xc9   : > { %v8386_v20 = vsel %vm6466_vm0, 4294967295, %v8385_v20  ;;  %v6471_v54 = vsel %vm8388_vm3, %v2193_v19, %v2195_v48  ;;  %v2197_v56 = vrot.slane %v5821_v61, 2  ;;  %v2199_v10 = vrot.slane %v5824_v42, 2  ;;  %5056 = vmatmul.mubr.msk.bf16.gmra.mxu1 %vm8384_vm10, %v1506_v29  ;;  %vm8390_vm3 = vmmov %vm8384_vm10 }
  0xca   : > { %8387 = vst [vmem:[#allocation63_spill] sm:$0xff] %v8386_v20  ;;  %8389 = vst [vmem:[#allocation64_spill] sm:$0xff] %v6471_v54  ;;  %v951_v43 = vadd.s32 224, %v5584_v11  ;;  %v1487_v28 = vsel %vm6409_vm13, %v5824_v42, 0.0  ;;  %v528_v38 = vmul.f32 %v5607_v21, %v490_v47  ;;  %5059 = vmatprep.mubr.msk.bf16.mxu1 %vm8390_vm3, %v1507_v49  ;;  %v2292_v31 = vpack.c.bf16 %v2268_v32, %v6416_v26 }
  0xcb   : > { %v1489_v45 = vsel %vm6438_vm11, %v5853_v57, 0.0  ;;  %vm6489_vm1 = vcmp.gt.s32.totalorder %v1141_v24, 0  ;;  %v8391_v6 = vmov 0  ;;  %v946_v29 = vadd.s32 184, %v5584_v11 }
  0xcc   : > { %v8392_v6 = vsel %vm6489_vm1, 4294967295, %v8391_v6  ;;  %v2293_v61 = vpack.c.bf16 %v2270_v30, %v6429_v25  ;;  %vm8394_vm10 = vcmask 1045504   ;;  %v2272_v21 = vsel %vm6466_vm0, %v6471_v54, 0.0 }
  0xcd   : > { %8393 = vst [vmem:[#allocation65_spill] sm:$0xff] %v8392_v6  ;;  %v6496_v55 = vsel %vm8394_vm10, %v2191_v58, %v2193_v19  ;;  %v6502_v47 = vadd.f32 %v5622_v35, %v528_v38  ;;  %vm6504_vm3 = vcmp.lt.s32.totalorder %v1106_v53, 15  ;;  %v8395_v49 = vmov 0  ;;  %vm8397_vm8 = vmmov %vm8394_vm10 }
  0xce   : > { %v8396_v49 = vsel %vm6504_vm3, 4294967295, %v8395_v49  ;;  %v6509_v24 = vsel %vm8397_vm8, %v2197_v56, %v2199_v10  ;;  %v1155_v32 = vand.u32 15, %v951_v43  ;;  %v1508_v30 = vpack.c.bf16 %v5832_v23, %v1487_v28  ;;  %vm8399_vm0 = vmmov %vm8397_vm8 }
  0xcf   : > { %v1491_v58 = vsel %vm6489_vm1, %v5981_v33, 0.0  ;;  %v948_v19 = vadd.s32 200, %v5584_v11  ;;  %v4686_v20 = vmul.f32 -1.442695, %v6502_v47  ;;  %vm8398_vm10 = vcmask 31744  }
  0xd0   : > { %5086 = vmatmul.mubr.msk.bf16.gmra.mxu0 %vm8398_vm10, %v2292_v31  ;;  %v1509_v35 = vpack.c.bf16 %v5858_v9, %v1489_v45  ;;  %v2294_v38 = vpack.c.bf16 %v2272_v21, %v6496_v55  ;;  %v6521_v53 = vsel %vm8399_vm0, %v2195_v48, %v2197_v56  ;;  %v1120_v43 = vand.u32 15, %v946_v29  ;;  %vm8400_vm8 = vmmov %vm8398_vm10 }
  0xd1   : > { %5089 = vmatprep.mubr.msk.bf16.mxu0 %vm8400_vm8, %v2293_v61  ;;  %v2274_v28 = vsel %vm6504_vm3, %v6509_v24, 0.0  ;;  %v2201_v25 = vrot.slane %v5832_v23, 2  ;;  %v953_v54 = vadd.s32 240, %v5584_v11  ;;  %5470 = vpow2.f32 %v4686_v20  ;;  %vm8403_vm0 = vmmov %vm8400_vm8 }
  0xd2   : > { %v1510_v31 = vpack.c.bf16 %v5985_v13, %v1491_v58  ;;  %vm6530_vm10 = vcmp.gt.s32.totalorder %v1155_v32, 0  ;;  %v2203_v56 = vrot.slane %v5853_v57, 2  ;;  %v3369_v61 = vsel %vm6185_vm9, %v6055_v17, 0.0  ;;  %5060 = vmatmul.mubr.msk.bf16.gmra.mxu1 %vm8403_vm0, %v1508_v30  ;;  %vm8404_vm8 = vmmov %vm8403_vm0 }
  0xd3   : > { %v1134_v48 = vand.u32 15, %v948_v19  ;;  %v2205_v29 = vrot.slane %v5858_v9, 2  ;;  %v2207_v21 = vrot.slane %v5981_v33, 2  ;;  %v6542_v20 = vpack.c.bf16 %v6061_v18, %v3369_v61  ;;  %5063 = vmatprep.mubr.msk.bf16.mxu1 %vm8404_vm8, %v1509_v35 }
  0xd4   : > { %v2295_v32 = vpack.c.bf16 %v2274_v28, %v6521_v53  ;;  %vm6546_vm3 = vcmp.lt.s32.totalorder %v1120_v43, 15  ;;  %v8405_v58 = vmov 0  ;;  %v3371_v17 = vsel %vm6241_vm12, %v6088_v59, 0.0 }
  0xd5   : > { %v8406_v58 = vsel %vm6546_vm3, 4294967295, %v8405_v58  ;;  %v3373_v30 = vsel %vm6271_vm14, %v6122_v34, 0.0  ;;  %v1493_v18 = vsel %vm6530_vm10, %v5996_v15, 0.0  ;;  %v1169_v19 = vand.u32 15, %v953_v54 }
  0xd6   : > { %v6560_v35 = vpack.c.bf16 %v6103_v40, %v3371_v17  ;;  %v6563_v43 = vpack.c.bf16 %v6125_v8, %v3373_v30  ;;  %vm8407_vm0 = vcmask 1045504   ;;  %v950_v59 = vadd.s32 216, %v5584_v11 }
  0xd7   : > { %v6566_v28 = vsel %vm8407_vm0, %v2201_v25, %v2203_v56  ;;  %v959_v41 = vand.u32 15, %v5584_v11  ;;  %v3375_v34 = vsel %vm6309_vm2, %v6142_v60, 0.0  ;;  %vm6573_vm12 = vcmp.lt.s32.totalorder %v1134_v48, 15  ;;  %vm8411_vm14 = vmmov %vm8407_vm0 }
  0xd8   : > { %v8408_v16 = vmov 0  ;;  %v6578_v40 = vsel %vm8411_vm14, %v2205_v29, %v2207_v21  ;;  %v952_v8 = vadd.s32 232, %v5584_v11  ;;  %v6582_v54 = vpack.c.bf16 %v6147_v0, %v3375_v34  ;;  %5090 = vmatmul.mubr.msk.bf16.gmra.mxu0 %vm8404_vm8, %v2294_v38  ;;  %vm8413_vm2 = vmmov %vm8404_vm8 }
  0xd9   : > { %v8409_v16 = vsel %vm6573_vm12, 4294967295, %v8408_v16  ;;  %v1511_v61 = vpack.c.bf16 %v6001_v62, %v1493_v18  ;;  %v6587_v17 = vsel %vm8407_vm0, %v2199_v10, %v2201_v25  ;;  %5093 = vmatprep.mubr.msk.bf16.mxu0 %vm8413_vm2, %v2295_v32  ;;  %v2276_v60 = vsel %vm6546_vm3, %v6566_v28, 0.0  ;;  %vm8417_vm8 = vmmov %vm8407_vm0 }
  0xda   : > { %8410 = vst [vmem:[#allocation66_spill] sm:$0xff] %v8409_v16  ;;  %8412 = vst [vmem:[#allocation67_spill] sm:$0xff] %v6582_v54  ;;  %vm6593_vm14 = vcmp.gt.s32.totalorder %v1169_v19, 0  ;;  %v8414_v52 = vmov 0  ;;  %v2209_v0 = vrot.slane %v5985_v13, 2  ;;  %v2211_v48 = vrot.slane %v5996_v15, 2  ;;  %5064 = vmatmul.mubr.msk.bf16.gmra.mxu1 %vm8413_vm2, %v1510_v31 }
  0xdb   : > { %v8415_v52 = vsel %vm6593_vm14, 4294967295, %v8414_v52  ;;  %v6600_v38 = vsel %vm8417_vm8, %v2203_v56, %v2205_v29  ;;  %v2278_v10 = vsel %vm6573_vm12, %v6578_v40, 0.0  ;;  %v1148_v25 = vand.u32 15, %v950_v59  ;;  %vm8421_vm3 = vmmov %vm8413_vm2  ;;  %v8601_v54 = vld [vmem:[#allocation13_spill] sm:$0xff] }
  0xdc   : > { %8416 = vst [vmem:[#allocation68_spill] sm:$0xff] %v8415_v52  ;;  %8418 = vst [vmem:[#allocation69_spill] sm:$0xff] %v6600_v38  ;;  %vm6605_vm0 = vcmp.gt.s32.totalorder %v959_v41, 0  ;;  %v8419_v32 = vmov 0  ;;  %v1162_v30 = vand.u32 15, %v952_v8  ;;  %v2213_v18 = vrot.slane %v6001_v62, 2  ;;  %5067 = vmatprep.mubr.msk.bf16.mxu1 %vm8421_vm3, %v1511_v61 }
  0xdd   : > { %v8420_v32 = vsel %vm6605_vm0, 4294967295, %v8419_v32  ;;  %v2215_v19 = vrot.slane %v6069_v50, 2  ;;  %v2296_v56 = vpack.c.bf16 %v2276_v60, %v6587_v17  ;;  %v1495_v29 = vsel %vm6593_vm14, %v6069_v50, 0.0 }
  0xde   : > { %v2297_v59 = vpack.c.bf16 %v2278_v10, %v6600_v38  ;;  %v2547_v41 = vsel %vm6605_vm0, %v5783_v22, 0.0  ;;  %v5471_v31 = vpop.eup %5470  ;;  %vm6621_vm8 = vcmp.lt.s32.totalorder %v1148_v25, 15  ;;  %v8422_v34 = vmov 0 }
  0xdf   : > { %v8423_v34 = vsel %vm6621_vm8, 4294967295, %v8422_v34  ;;  %vm8425_vm2 = vcmask 1045504   ;;  %v954_v61 = vadd.s32 248, %v5584_v11  ;;  %v1512_v60 = vpack.c.bf16 %v6072_v7, %v1495_v29 }
  0xe0   : > { %8424 = vst [vmem:[#allocation70_spill] sm:$0xff] %v8423_v34  ;;  %v6626_v8 = vsel %vm8425_vm2, %v2209_v0, %v2211_v48  ;;  %vm6630_vm3 = vcmp.lt.s32.totalorder %v1162_v30, 15  ;;  %vm8428_vm12 = vmmov %vm8425_vm2  ;;  %v694_v22 = vadd.f32 1.0, %v5471_v31  ;;  %vm8429_vm6 = vcmask 31744  }
  0xe1   : > { %v6635_v10 = vsel %vm8428_vm12, %v2213_v18, %v2215_v19  ;;  %5094 = vmatmul.mubr.msk.bf16.gmra.mxu0 %vm8429_vm6, %v2296_v56  ;;  %v2579_v25 = vpack.c.bf16 %v5789_v27, %v2547_v41  ;;  %vm8430_vm0 = vmmov %vm8429_vm6  ;;  %v6641_v38 = vsel %vm8425_vm2, %v2207_v21, %v2209_v0  ;;  %v2280_v11 = vsel %vm6621_vm8, %v6626_v8, 0.0 }
  0xe2   : > { %5097 = vmatprep.mubr.msk.bf16.mxu0 %vm8430_vm0, %v2297_v59  ;;  %8431 = vst [vmem:[#allocation71_spill] sm:$0xff] %v6641_v38  ;;  %vm8432_vm1 = vmmov %vm8425_vm2  ;;  %5472 = vrcp.f32 %v694_v22  ;;  %v2282_v29 = vsel %vm6630_vm3, %v6635_v10, 0.0  ;;  %v1176_v56 = vand.u32 15, %v954_v61  ;;  %v2217_v27 = vrot.slane %v6072_v7, 2  ;;  %v8442_v22 = vld [vmem:[#allocation32_spill] sm:$0xff] }
  0xe3   : > { %v6647_v30 = vsel %vm8432_vm1, %v2211_v48, %v2213_v18  ;;  %v8235_v59 = vrot.slane %v6085_v3, 2  ;;  %vm8434_vm6 = vmmov %vm8430_vm0  ;;  %v2298_v21 = vpack.c.bf16 %v2280_v11, %v6641_v38  ;;  %v2549_v0 = vsel %vm6076_vm4, %v5799_v36, 0.0 }
  0xe4   : > { %8433 = vst [vmem:[#allocation72_spill] sm:$0xff] %v6647_v30  ;;  %5068 = vmatmul.mubr.msk.bf16.gmra.mxu1 %vm8434_vm6, %v1512_v60  ;;  %vm8435_vm12 = vmmov %vm8430_vm0  ;;  %v2299_v48 = vpack.c.bf16 %v2282_v29, %v6647_v30  ;;  %v2551_v18 = vsel %vm6091_vm5, %v5877_v37, 0.0  ;;  %vm6664_vm1 = vcmp.lt.s32.totalorder %v1176_v56, 15  ;;  %v8436_v41 = vmov 0  ;;  %v6688_v56 = vld [vmem:[%s8074_s4 + $0xe] sm:$0x3] }
  0xe5   : > { %5107 = vmatprep.mubr.msk.bf16.mxu1 %vm8435_vm12, %v2579_v25  ;;  %v8437_v41 = vsel %vm6664_vm1, 4294967295, %v8436_v41  ;;  %vm8439_vm0 = vmmov %vm8425_vm2  ;;  %v2580_v61 = vpack.c.bf16 %v5806_v39, %v2549_v0  ;;  %v2581_v60 = vpack.c.bf16 %v5880_v12, %v2551_v18  ;;  %v8449_v0 = vld [vmem:[#allocation7_spill] sm:$0xff]  ;;  %v3389_v1 = vsel %vm6530_vm10, %v6085_v3, 0.0 }
  0xe6   : > { %8438 = vst [vmem:[#allocation73_spill] sm:$0xff] %v8437_v41  ;;  %v6671_v31 = vsel %vm8439_vm0, %v2217_v27, %v8235_v59  ;;  %vm8441_vm2 = vmmov %vm8434_vm6  ;;  %vm8443_vm6 = vcmask 1041408   ;;  %v8453_v59 = vld [vmem:[#allocation8_spill] sm:$0xff]  ;;  %v8459_v30 = vld [vmem:[#allocation19_spill] sm:$0xff] }
  0xe7   : > { %8440 = vst [vmem:[#allocation74_spill] sm:$0xff] %v6671_v31  ;;  %v3166_v25 = vsel %vm8443_vm6, %v8442_v22, 0  ;;  %vm8444_vm12 = vmmov %vm8441_vm2  ;;  %v2284_v29 = vsel %vm6664_vm1, %v6671_v31, 0.0 }
  0xe8   : > { %vm8445_vm8 = vmmov %vm8439_vm0 }
  0xe9   : > { %5098 = vmatmul.mubr.msk.bf16.gmra.mxu0 %vm8441_vm2, %v2298_v21  ;;  %v6680_v11 = vsel %vm8445_vm8, %v2215_v19, %v2217_v27  ;;  %vm8447_vm0 = vmmov %vm8441_vm2  ;;  %v2553_v19 = vsel %vm6129_vm7, %v8449_v0, 0.0  ;;  %v8451_v27 = vld [vmem:[#allocation17_spill] sm:$0xff] }
  0xea   : > { %5101 = vmatprep.mubr.msk.bf16.mxu0 %vm8444_vm12, %v2299_v48  ;;  %8446 = vst [vmem:[#allocation32_spill] sm:$0xff] %v6680_v11  ;;  %v2300_v21 = vpack.c.bf16 %v2284_v29, %v6680_v11  ;;  %vm8448_vm2 = vmmov %vm8447_vm0  ;;  %v2555_v18 = vsel %vm6185_vm9, %v8451_v27, 0.0  ;;  %v2582_v41 = vpack.c.bf16 %v8453_v59, %v2553_v19  ;;  %v8456_v29 = vld [vmem:[#allocation5_spill] sm:$0xff]  ;;  %v8460_v19 = vrot.slane %v8459_v30, 7  ;;  %v6731_v30 = vld [vmem:[%s8074_s4 + $0x10] sm:$0x3] }
  0xeb   : > { %vm8452_vm8 = vmmov %vm8443_vm6 }
  0xec   : > { %5108 = vmatmul.mubr.msk.bf16.vlgmr.msra.gmra.mxu1 %vm8447_vm0, %v2580_v61  ;;  %vm8454_vm6 = vmmov %vm8447_vm0 }
  0xed   : > { %5174 = vmatpush3.bf16.msra.mxu1 %v3166_v25  ;;  %5111 = vmatprep.mubr.msk.bf16.mxu1 %vm8448_vm2, %v2581_v60  ;;  %v8455_v25 = vld [vmem:[#allocation18_spill] sm:$0xff]  ;;  %vm8457_vm12 = vmmov %vm8447_vm0  ;;  %vm8461_vm2 = vcmask 1040384  }
  0xee   : > { %5330 = vmatprep.subr.msk.bf16.mxu1 %vm8452_vm8, %v6688_v56  ;;  %v2583_v60 = vpack.c.bf16 %v8455_v25, %v2555_v18  ;;  %vm8458_vm9 = vmmov %vm8447_vm0 }
  0xef   : > { %v5473_v22 = vpop.eup %5472  ;;  %vm8462_vm8 = vmmov %vm8461_vm2 }
  0xf0   : > { %v790_v61 = vmul.f32 %v5473_v22, %v6502_v47 }
  0xf1   : > { %5102 = vmatmul.mubr.msk.bf16.gmra.mxu0 %vm8454_vm6, %v2300_v21  ;;  %vm8466_vm6 = vcmask 1041408  }
  0xf2   : > { %5141 = vmatprep.mubr.msk.bf16.mxu0 %vm8457_vm12, %v8456_v29  ;;  %v885_v11 = vrot.slane %v790_v61, 7  ;;  %v8465_v61 = vld [vmem:[#allocation46_spill] sm:$0xff]  ;;  %vm8468_vm12 = vmmov %vm8447_vm0 }
  0xf3   : > { %v8474_v29 = vld [vmem:[#allocation22_spill] sm:$0xff] }
  0xf4   : > { %5112 = vmatmul.mubr.msk.bf16.gmra.mxu1 %vm8458_vm9, %v2582_v41  ;;  %v6715_v47 = vsel %vm8461_vm2, %v8460_v19, %v885_v11  ;;  %v6718_v21 = vsel %vm8462_vm8, %v885_v11, 0.0  ;;  %v3459_v41 = vsel %vm8466_vm6, %v8465_v61, 0  ;;  %v8469_v11 = vld [vmem:[#allocation11_spill] sm:$0xff]  ;;  %vm8470_vm9 = vmmov %vm8447_vm0  ;;  %v2565_v61 = vsel %vm6354_vm15, %v5818_v4, 0.0 }
  0xf5   : > { %5115 = vmatprep.mubr.msk.bf16.mxu1 %vm8447_vm0, %v2583_v60  ;;  %8463 = vst [vmem:[#allocation7_spill] sm:$0xff] %v6718_v21  ;;  %v6721_v18 = vpack.c.bf16 %v6715_v47, %v3389_v1  ;;  %v8467_v60 = vld [vmem:[#allocation10_spill] sm:$0xff]  ;;  %vm8471_vm0 = vmmov %vm8466_vm6  ;;  %v8476_v1 = vld [vmem:[#allocation23_spill] sm:$0xff]  ;;  %v3096_v19 = vsel %vm6630_vm3, %v6671_v31, 0.0 }
  0xf6   : > { %vm8472_vm2 = vmmov %vm8470_vm9 }
  0xf7   : > { %8464 = vst [vmem:[#allocation26_spill] sm:$0xff] %v6721_v18  ;;  %vm8473_vm8 = vmmov %vm8472_vm2 }
  0xf8   : > { %vm8475_vm6 = vmmov %vm8472_vm2 }
  0xf9   : > { %5142 = vmatmul.mubr.msk.bf16.vlgmr.msra.gmra.mxu0 %vm8468_vm12, %v8467_v60  ;;  %vm8477_vm1 = vmmov %vm8472_vm2  ;;  %v8496_v60 = vld [vmem:[#allocation6_spill] sm:$0xff] }
  0xfa   : > { %5145 = vmatprep.mubr.msk.bf16.mxu0 %vm8470_vm9, %v8469_v11  ;;  %5208 = vmatpush3.bf16.msra.mxu0 %v3459_v41  ;;  %vm8478_vm12 = vmmov %vm8477_vm1  ;;  %v8483_v41 = vld [vmem:[#allocation4_spill] sm:$0xff]  ;;  %v8486_v11 = vld [vmem:[#allocation30_spill] sm:$0xff] }
  0xfb   : > { %5331 = vmatprep.subr.msk.bf16.mxu0 %vm8471_vm0, %v6731_v30  ;;  %vm8479_vm9 = vmmov %vm8477_vm1  ;;  %v2588_v22 = vpack.c.bf16 %v8483_v41, %v2565_v61  ;;  %v2571_v61 = vsel %vm6438_vm11, %v5981_v33, 0.0 }
  0xfc   : > { %5116 = vmatmul.mubr.msk.bf16.gmra.mxu1 %vm8472_vm2, %v6443_v14  ;;  %v8481_v14 = vld [vmem:[#allocation49_spill] sm:$0xff]  ;;  %vm8485_vm2 = vmmov %vm8477_vm1 }
  0xfd   : > { %5119 = vmatprep.mubr.msk.bf16.mxu1 %vm8473_vm8, %v6453_v44  ;;  %vm8482_vm0 = vnez %v8481_v14  ;;  %vm8487_vm8 = vmmov %vm8477_vm1 }
  0xfe   : > { %v2567_v44 = vsel %vm8482_vm0, %v5824_v42, 0.0 }
 0x101   : > { %5146 = vmatmul.mubr.msk.bf16.gmra.mxu0 %vm8475_vm6, %v8474_v29  ;;  %v8484_v29 = vld [vmem:[#allocation28_spill] sm:$0xff]  ;;  %vm8488_vm6 = vmmov %vm8477_vm1 }
 0x102   : > { %5149 = vmatprep.mubr.msk.bf16.mxu0 %vm8477_vm1, %v8476_v1  ;;  %v2589_v1 = vpack.c.bf16 %v5832_v23, %v2567_v44  ;;  %v2591_v44 = vpack.c.bf16 %v5985_v13, %v2571_v61 }
 0x104   : > { %5120 = vmatmul.mubr.msk.bf16.gmra.mxu1 %vm8478_vm12, %v6456_v51  ;;  %vm8491_vm12 = vmmov %vm8477_vm1 }
 0x105   : > { %5123 = vmatprep.mubr.msk.bf16.mxu1 %vm8479_vm9, %v6474_v2  ;;  %v2569_v2 = vsel %vm6409_vm13, %v5853_v57, 0.0  ;;  %vm8493_vm9 = vmmov %vm8477_vm1 }
 0x106   : > { %v2590_v18 = vpack.c.bf16 %v5858_v9, %v2569_v2  ;;  %v2575_v2 = vsel %vm6530_vm10, %v6069_v50, 0.0  ;;  %vm8503_vm10 = vmmov %vm8477_vm1 }
 0x109   : > { %5150 = vmatmul.mubr.msk.bf16.gmra.mxu0 %vm8485_vm2, %v8484_v29  ;;  %v8490_v29 = vld [vmem:[#allocation31_spill] sm:$0xff]  ;;  %vm8494_vm2 = vmmov %vm8477_vm1 }
 0x10a   : > { %5153 = vmatprep.mubr.msk.bf16.mxu0 %vm8477_vm1, %v8486_v11  ;;  %v8492_v11 = vld [vmem:[#allocation33_spill] sm:$0xff] }
 0x10c   : > { %5124 = vmatmul.mubr.msk.bf16.gmra.mxu1 %vm8487_vm8, %v2588_v22  ;;  %v2841_v22 = vpack.c.bf16 %v6715_v47, %v6085_v3  ;;  %vm8495_vm8 = vnez %v8392_v6 }
 0x10d   : > { %5127 = vmatprep.mubr.msk.bf16.mxu1 %vm8488_vm6, %v2589_v1  ;;  %v2573_v1 = vsel %vm8495_vm8, %v5996_v15, 0.0  ;;  %vm8497_vm6 = vmmov %vm8477_vm1  ;;  %v8525_v15 = vld [vmem:[#allocation41_spill] sm:$0xff] }
 0x10e   : > { %v2592_v61 = vpack.c.bf16 %v6001_v62, %v2573_v1  ;;  %v2850_v45 = vshrl.u32 %v2841_v22, 16  ;;  %v2577_v1 = vsel %vm6593_vm14, %v6085_v3, 0.0  ;;  %vm8518_vm14 = vmmov %vm8477_vm1 }
 0x10f   : > { %v2594_v62 = vpack.c.bf16 %v6715_v47, %v2577_v1  ;;  %v8516_v1 = vld [vmem:[#allocation34_spill] sm:$0xff] }
 0x111   : > { %5154 = vmatmul.mubr.msk.bf16.gmra.mxu0 %vm8491_vm12, %v8490_v29  ;;  %v2846_v29 = vshll.u32 %v2841_v22, 16  ;;  %vm8499_vm12 = vmmov %vm8477_vm1 }
 0x112   : > { %5157 = vmatprep.mubr.msk.bf16.mxu0 %vm8493_vm9, %v8492_v11  ;;  %v8498_v11 = vld [vmem:[#allocation9_spill] sm:$0xff]  ;;  %vm8502_vm9 = vmmov %vm8477_vm1 }
 0x113   : > { %v2848_v6 = vrot.slane %v2846_v29, 1  ;;  %v8509_v29 = vld [vmem:[#allocation38_spill] sm:$0xff] }
 0x114   : > { %5128 = vmatmul.mubr.msk.bf16.gmra.mxu1 %vm8494_vm2, %v2590_v18  ;;  %v2593_v18 = vpack.c.bf16 %v6072_v7, %v2575_v2  ;;  %v8504_v2 = vld [vmem:[#allocation35_spill] sm:$0xff]  ;;  %v8505_v7 = vld [vmem:[#allocation29_spill] sm:$0xff] }
 0x115   : > { %5131 = vmatprep.mubr.msk.bf16.mxu1 %vm8477_vm1, %v2591_v44  ;;  %v8500_v44 = vmov 0.0   ;;  %vm8506_vm2 = vnez %v8505_v7  ;;  %v2852_v5 = vor.u32 %v2850_v45, %v2848_v6 }
 0x116   : > { %v6795_v13 = vpack.c.bf16 %v8500_v44, %v6718_v21 }
 0x118   : > { %8501 = vst [vmem:[#allocation17_spill] sm:$0xff] %v6795_v13 }
 0x119   : > { %5158 = vmatmul.mubr.msk.bf16.gmra.mxu0 %vm8497_vm6, %v8496_v60  ;;  %v3658_v60 = vshll.u32 %v6795_v13, 16  ;;  %vm8511_vm6 = vmmov %vm8477_vm1  ;;  %v2842_v13 = vpack.c.bf16 %v6718_v21, %v6718_v21 }
 0x11a   : > { %5161 = vmatprep.mubr.msk.bf16.mxu0 %vm8499_vm12, %v8498_v11  ;;  %v3068_v11 = vsel %vm8506_vm2, %v8504_v2, 0.0  ;;  %vm8512_vm12 = vsmask.f32 7424 }
 0x11b   : > { %v6806_v50 = vrot.slane %v3658_v60, 1  ;;  %v3099_v22 = vpack.c.bf16 %v3068_v11, %v8509_v29  ;;  %v8515_v60 = vld [vmem:[#allocation37_spill] sm:$0xff]  ;;  %v2854_v2 = vshll.u32 %v2842_v13, 16  ;;  %v8519_v11 = vld [vmem:[#allocation40_spill] sm:$0xff] }
 0x11c   : > { %5132 = vmatmul.mubr.msk.bf16.gmra.mxu1 %vm8502_vm9, %v2592_v61  ;;  %v8508_v61 = vld [vmem:[#allocation15_spill] sm:$0xff]  ;;  %vm8514_vm9 = vmmov %vm8477_vm1  ;;  %v8520_v29 = vld [vmem:[#allocation36_spill] sm:$0xff] }
 0x11d   : > { %5135 = vmatprep.mubr.msk.bf16.mxu1 %vm8503_vm10, %v2593_v18  ;;  %8507 = vst [vmem:[#allocation8_spill] sm:$0xff] %v6806_v50  ;;  %v8510_v18 = vld [vmem:[#allocation16_spill] sm:$0xff]  ;;  %v6818_v52 = vsel %vm8512_vm12, %v2852_v5, %v6806_v50  ;;  %vm8517_vm10 = vnez %v8516_v1  ;;  %v2856_v13 = vrot.slane %v2854_v2, 1 }
 0x11e   : > { %8513 = vst [vmem:[#allocation18_spill] sm:$0xff] %v6818_v52  ;;  %v3070_v45 = vsel %vm8517_vm10, %v8515_v60, 0.0  ;;  %v8526_v52 = vld [vmem:[#allocation24_spill] sm:$0xff]  ;;  %vm8537_vm10 = vsmask.f32 7424 }
 0x11f   : > { %v3100_v50 = vpack.c.bf16 %v3070_v45, %v8525_v15  ;;  %v2857_v45 = vsel %vm8537_vm10, %v2852_v5, %v2856_v13  ;;  %v8545_v5 = vld [vmem:[#allocation45_spill] sm:$0xff] }
 0x121   : > { %5162 = vmatmul.mubr.msk.bf16.gmra.mxu0 %vm8477_vm1, %v8508_v61  ;;  %vm8521_vm1 = vnez %v8520_v29  ;;  %v8522_v61 = vld [vmem:[#allocation25_spill] sm:$0xff] }
 0x122   : > { %5165 = vmatprep.mubr.msk.bf16.mxu0 %vm8511_vm6, %v8510_v18  ;;  %v3072_v18 = vsel %vm8521_vm1, %v8519_v11, 0.0  ;;  %vm8523_vm6 = vmmov %vm8512_vm12 }
 0x123   : > { %v6830_v7 = vsel %vm8523_vm6, %v8522_v61, %v2848_v6  ;;  %vm8527_vm12 = vmmov %vm8514_vm9  ;;  %vm8531_vm6 = vnez %v8420_v32  ;;  %v8534_v61 = vld [vmem:[#allocation44_spill] sm:$0xff]  ;;  %v8541_v32 = vrot.slane %v6718_v21, 2 }
 0x124   : > { %5136 = vmatmul.mubr.msk.bf16.gmra.mxu1 %vm8514_vm9, %v2594_v62  ;;  %8524 = vst [vmem:[#allocation5_spill] sm:$0xff] %v6830_v7  ;;  %v8528_v62 = vld [vmem:[#allocation42_spill] sm:$0xff]  ;;  %vm8529_vm9 = vcmask 1041408   ;;  %v3361_v6 = vsel %vm8531_vm6, %v5799_v36, 0.0  ;;  %vm8532_vm1 = vmmov %vm8527_vm12  ;;  %vm8542_vm6 = vcmask 1045504  }
 0x125   : > { %5175 = vmatprep.mubr.msk.bf16.mxu1 %vm8518_vm14, %v3099_v22  ;;  %v3101_v51 = vpack.c.bf16 %v3072_v18, %v8528_v62  ;;  %v3673_v1 = vsel %vm8529_vm9, %v6688_v56, 0  ;;  %vm8530_vm14 = vmmov %vm8527_vm12  ;;  %v3061_v22 = vrot.slane %v6715_v47, 2  ;;  %v8535_v18 = vld [vmem:[#allocation39_spill] sm:$0xff]  ;;  %v3392_v2 = vpack.c.bf16 %v5806_v39, %v3361_v6 }
 0x126   : > { %vm8536_vm9 = vnez %v8535_v18  ;;  %v8538_v47 = vld [vmem:[#allocation51_spill] sm:$0xff] }
 0x127   : > { %v3074_v56 = vsel %vm8536_vm9, %v8534_v61, 0.0  ;;  %v6858_v36 = vsel %vm8542_vm6, %v3061_v22, %v8541_v32  ;;  %v8548_v6 = vld [vmem:[#allocation55_spill] sm:$0xff] }
 0x128   : > { %v3899_v39 = vsel %vm6630_vm3, %v6858_v36, 0.0 }
 0x129   : > { %5166 = vmatmul.mubr.msk.bf16.gmra.mxu0 %vm8527_vm12, %v8526_v52  ;;  %vm8533_vm12 = vmmov %vm8532_vm1 }
 0x12a   : > { %5169 = vmatprep.mubr.msk.bf16.mxu0 %vm8530_vm14, %v6830_v7  ;;  %v8539_v7 = vld [vmem:[#allocation43_spill] sm:$0xff]  ;;  %vm8547_vm10 = vmmov %vm8533_vm12 }
 0x12b   : > { %vm8540_vm14 = vnez %v8539_v7 }
 0x12c   : > { %5176 = vmatmul.mubr.msk.bf16.vlgmr.msra.gmra.mxu1 %vm8532_vm1, %v3100_v50  ;;  %v3076_v29 = vsel %vm8540_vm14, %v8538_v47, 0.0  ;;  %v8543_v50 = vrot.slane %v6085_v3, 2  ;;  %vm8544_vm1 = vmmov %vm8542_vm6  ;;  %v3363_v3 = vsel %vm6076_vm4, %v5877_v37, 0.0  ;;  %vm8558_vm4 = vcmask 1041408  }
 0x12d   : > { %5242 = vmatpush3.bf16.msra.mxu1 %v3673_v1  ;;  %5179 = vmatprep.mubr.msk.bf16.mxu1 %vm8533_vm12, %v3101_v51  ;;  %v3102_v1 = vpack.c.bf16 %v3074_v56, %v8545_v5  ;;  %v3103_v32 = vpack.c.bf16 %v3076_v29, %v8548_v6  ;;  %vm8549_vm12 = vmmov %vm8547_vm10  ;;  %v3393_v56 = vpack.c.bf16 %v5880_v12, %v3363_v3  ;;  %v3969_v63 = vsel %vm8558_vm4, %v6731_v30, 0  ;;  %v8563_v30 = vld [vmem:[#allocation61_spill] sm:$0xff] }
 0x12e   : > { %5309 = vmatprep.subr.mxu1 %v8500_v44  ;;  %v6864_v51 = vsel %vm8544_vm1, %v8543_v50, %v3061_v22  ;;  %v3365_v22 = vsel %vm6091_vm5, %v8449_v0, 0.0  ;;  %vm8550_vm6 = vmmov %vm8547_vm10  ;;  %v8552_v50 = vld [vmem:[#allocation53_spill] sm:$0xff]  ;;  %v3367_v12 = vsel %vm6129_vm7, %v8451_v27, 0.0 }
 0x12f   : > { %v6871_v13 = vpack.c.bf16 %v3899_v39, %v6864_v51  ;;  %vm8551_vm1 = vmmov %vm8550_vm6  ;;  %v8555_v39 = vld [vmem:[#allocation57_spill] sm:$0xff] }
 0x130   : > { %vm8560_vm5 = vmmov %vm8551_vm1 }
 0x131   : > { %8546 = vst [vmem:[#allocation19_spill] sm:$0xff] %v6871_v13  ;;  %5170 = vmatmul.mubr.msk.bf16.gmra.mxu0 %vm8547_vm10, %v2857_v45  ;;  %v8553_v45 = vld [vmem:[#allocation48_spill] sm:$0xff]  ;;  %vm8570_vm7 = vmmov %vm8551_vm1 }
 0x132   : > { %5209 = vmatprep.mubr.msk.bf16.mxu0 %vm8549_vm12, %v3392_v2  ;;  %vm8554_vm10 = vnez %v8553_v45  ;;  %v3394_v2 = vpack.c.bf16 %v8453_v59, %v3365_v22  ;;  %v8556_v13 = vld [vmem:[#allocation52_spill] sm:$0xff]  ;;  %v3395_v59 = vpack.c.bf16 %v8455_v25, %v3367_v12 }
 0x133   : > { %v3078_v29 = vsel %vm8554_vm10, %v8552_v50, 0.0  ;;  %vm8557_vm12 = vnez %v8556_v13  ;;  %vm8562_vm10 = vmmov %vm8551_vm1  ;;  %v8566_v22 = vld [vmem:[#allocation64_spill] sm:$0xff] }
 0x134   : > { %5180 = vmatmul.mubr.msk.bf16.gmra.mxu1 %vm8550_vm6, %v3102_v1  ;;  %v3080_v37 = vsel %vm8557_vm12, %v8555_v39, 0.0  ;;  %v3104_v0 = vpack.c.bf16 %v3078_v29, %v8559_v46  ;;  %vm8561_vm6 = vmmov %vm8551_vm1 }
 0x135   : > { %5183 = vmatprep.mubr.msk.bf16.mxu1 %vm8551_vm1, %v3103_v32  ;;  %v3105_v1 = vpack.c.bf16 %v3080_v37, %v6416_v26  ;;  %v8564_v32 = vld [vmem:[#allocation54_spill] sm:$0xff]  ;;  %v8569_v37 = vld [vmem:[#allocation60_spill] sm:$0xff] }
 0x136   : > { %vm8565_vm4 = vnez %v8564_v32 }
 0x137   : > { %v3082_v3 = vsel %vm8565_vm4, %v8563_v30, 0.0 }
 0x138   : > { %v3106_v48 = vpack.c.bf16 %v3082_v3, %v8569_v37 }
 0x139   : > { %5210 = vmatmul.mubr.msk.bf16.vlgmr.msra.gmra.mxu0 %vm8560_vm5, %v3393_v56  ;;  %v8567_v56 = vld [vmem:[#allocation59_spill] sm:$0xff] }
 0x13a   : > { %5213 = vmatprep.mubr.msk.bf16.mxu0 %vm8561_vm6, %v3394_v2  ;;  %5276 = vmatpush3.bf16.msra.mxu0 %v3969_v63  ;;  %vm8568_vm5 = vnez %v8567_v56  ;;  %v6910_v2 = vpop.f32.mrf.mxu0  ;;  %vm8572_vm6 = vmmov %vm8551_vm1  ;;  %v6920_v63 = vpop.f32.mrf.mxu1 }
 0x13b   : > { %v3084_v29 = vsel %vm8568_vm5, %v8566_v22, 0.0  ;;  %8573 = vst [vmem:[#allocation46_spill] sm:$0xff] %v6920_v63 }
 0x13c   : > { %5184 = vmatmul.mubr.msk.bf16.gmra.mxu1 %vm8551_vm1, %v3104_v0  ;;  %v3107_v27 = vpack.c.bf16 %v3084_v29, %v6496_v55  ;;  %v6917_v25 = vpop.f32.mrf.mxu0  ;;  %v8574_v0 = vld [vmem:[#allocation63_spill] sm:$0xff]  ;;  %v6932_v3 = vpop.f32.mrf.mxu1 }
 0x13d   : > { %5187 = vmatprep.mubr.msk.bf16.mxu1 %vm8562_vm10, %v3105_v1  ;;  %vm8571_vm10 = vmmov %vm8551_vm1  ;;  %vm8575_vm5 = vnez %v8574_v0  ;;  %8577 = vst [vmem:[#allocation50_spill] sm:$0xff] %v6932_v3 }
 0x13e   : > { %v3086_v1 = vsel %vm8575_vm5, %v6509_v24, 0.0  ;;  %v6945_v52 = vpop.f32.mrf.mxu1 }
 0x13f   : > { %8583 = vst [vmem:[#allocation49_spill] sm:$0xff] %v6945_v52  ;;  %v3381_v52 = vsel %vm8482_vm0, %v5853_v57, 0.0  ;;  %v8595_v57 = vld [vmem:[#allocation72_spill] sm:$0xff] }
 0x140   : > { %v6958_v3 = vpop.f32.mrf.mxu1 }
 0x141   : > { %5214 = vmatmul.mubr.msk.bf16.gmra.mxu0 %vm8570_vm7, %v3395_v59  ;;  %vm8576_vm7 = vnez %v8396_v49  ;;  %v6929_v59 = vpop.f32.mrf.mxu0  ;;  %8588 = vst [vmem:[#allocation4_spill] sm:$0xff] %v6958_v3  ;;  %v3385_v3 = vsel %vm6438_vm11, %v8601_v54, 0.0 }
 0x142   : > { %5217 = vmatprep.mubr.msk.bf16.mxu0 %vm8571_vm10, %v6542_v20  ;;  %v3088_v12 = vsel %vm8576_vm7, %v6566_v28, 0.0  ;;  %v3108_v20 = vpack.c.bf16 %v3086_v1, %v6521_v53  ;;  %vm8578_vm10 = vmmov %vm8551_vm1 }
 0x143   : > { %v3109_v29 = vpack.c.bf16 %v3088_v12, %v6587_v17 }
 0x144   : > { %5188 = vmatmul.mubr.msk.bf16.gmra.mxu1 %vm8572_vm6, %v3106_v48  ;;  %vm8579_vm6 = vmmov %vm8551_vm1  ;;  %v6939_v48 = vpop.f32.mrf.mxu0 }
 0x145   : > { %5191 = vmatprep.mubr.msk.bf16.mxu1 %vm8551_vm1, %v3107_v27  ;;  %v8580_v27 = vld [vmem:[#allocation47_spill] sm:$0xff]  ;;  %vm8582_vm7 = vmmov %vm8579_vm6 }
 0x146   : > { %vm8581_vm1 = vnez %v8580_v27  ;;  %vm8584_vm5 = vmmov %vm8579_vm6  ;;  %v6955_v12 = vpop.f32.mrf.mxu0  ;;  %v8587_v27 = vld [vmem:[#allocation69_spill] sm:$0xff] }
 0x147   : > { %v3377_v63 = vsel %vm8581_vm1, %v5818_v4, 0.0  ;;  %vm8591_vm1 = vmmov %vm8584_vm5 }
 0x148   : > { %v3400_v1 = vpack.c.bf16 %v8483_v41, %v3377_v63  ;;  %v3379_v41 = vsel %vm6354_vm15, %v5824_v42, 0.0  ;;  %v6967_v63 = vpop.f32.mrf.mxu0  ;;  %v3402_v42 = vpack.c.bf16 %v5858_v9, %v3381_v52  ;;  %vm8597_vm15 = vmmov %vm8591_vm1  ;;  %v3383_v9 = vsel %vm6409_vm13, %v5981_v33, 0.0 }
 0x149   : > { %5218 = vmatmul.mubr.msk.bf16.gmra.mxu0 %vm8578_vm10, %v6560_v35  ;;  %vm8585_vm10 = vnez %v8406_v58  ;;  %vm8599_vm0 = vmmov %vm8591_vm1 }
 0x14a   : > { %5221 = vmatprep.mubr.msk.bf16.mxu0 %vm8579_vm6, %v6563_v43  ;;  %v3090_v35 = vsel %vm8585_vm10, %v6578_v40, 0.0  ;;  %vm8586_vm6 = vnez %v8409_v16  ;;  %v6984_v14 = vpop.f32.mrf.mxu0  ;;  %vm8603_vm3 = vmmov %vm8599_vm0 }
 0x14b   : > { %v3092_v43 = vsel %vm8586_vm6, %v6626_v8, 0.0  ;;  %v3110_v4 = vpack.c.bf16 %v3090_v35, %v8587_v27  ;;  %v6973_v35 = vpop.f32.mrf.mxu1  ;;  %vm8593_vm6 = vmmov %vm8591_vm1 }
 0x14c   : > { %5192 = vmatmul.mubr.msk.bf16.gmra.mxu1 %vm8582_vm7, %v3108_v20  ;;  %v8589_v20 = vld [vmem:[#allocation67_spill] sm:$0xff]  ;;  %vm8590_vm7 = vmmov %vm8584_vm5  ;;  %8592 = vst [vmem:[#allocation35_spill] sm:$0xff] %v6973_v35  ;;  %v6995_v52 = vpop.f32.mrf.mxu0 }
 0x14d   : > { %5195 = vmatprep.mubr.msk.bf16.mxu1 %vm8584_vm5, %v3109_v29  ;;  %v3111_v29 = vpack.c.bf16 %v3092_v43, %v6641_v38  ;;  %v3401_v43 = vpack.c.bf16 %v5832_v23, %v3379_v41  ;;  %v8609_v41 = vld [vmem:[#allocation14_spill] sm:$0xff]  ;;  %vm8611_vm11 = vmmov %vm8599_vm0 }
 0x14e   : > { %v3404_v33 = vpack.c.bf16 %v8609_v41, %v3385_v3  ;;  %vm8612_vm13 = vmmov %vm8599_vm0  ;;  %v8617_v41 = vld [vmem:[#allocation21_spill] sm:$0xff] }
 0x151   : > { %5222 = vmatmul.mubr.msk.bf16.gmra.mxu0 %vm8590_vm7, %v8589_v20  ;;  %vm8594_vm7 = vnez %v8423_v34  ;;  %v6987_v20 = vpop.f32.mrf.mxu1 }
 0x152   : > { %5225 = vmatprep.mubr.msk.bf16.mxu0 %vm8584_vm5, %v3400_v1  ;;  %v3094_v1 = vsel %vm8594_vm7, %v6635_v10, 0.0  ;;  %8596 = vst [vmem:[#allocation38_spill] sm:$0xff] %v6987_v20 }
 0x154   : > { %5196 = vmatmul.mubr.msk.bf16.gmra.mxu1 %vm8591_vm1, %v3110_v4  ;;  %v3112_v4 = vpack.c.bf16 %v3094_v1, %v8595_v57  ;;  %v7001_v1 = vpop.f32.mrf.mxu1  ;;  %vm8616_vm1 = vmmov %vm8599_vm0  ;;  %v8637_v57 = vld [vmem:[#allocation36_spill] sm:$0xff] }
 0x155   : > { %5199 = vmatprep.mubr.msk.bf16.mxu1 %vm8593_vm6, %v3111_v29  ;;  %v8598_v29 = vld [vmem:[#allocation32_spill] sm:$0xff]  ;;  %8604 = vst [vmem:[#allocation37_spill] sm:$0xff] %v7001_v1  ;;  %vm8605_vm6 = vmmov %vm8599_vm0 }
 0x156   : > { %v3113_v23 = vpack.c.bf16 %v3096_v19, %v8598_v29  ;;  %v7009_v29 = vpop.f32.mrf.mxu0  ;;  %v7011_v34 = vpop.f32.mrf.mxu1 }
 0x157   : > { %8610 = vst [vmem:[#allocation40_spill] sm:$0xff] %v7011_v34  ;;  %v8631_v34 = vld [vmem:[#allocation22_spill] sm:$0xff] }
 0x159   : > { %5226 = vmatmul.mubr.msk.bf16.gmra.mxu0 %vm8597_vm15, %v3401_v43  ;;  %v8606_v43 = vld [vmem:[#allocation12_spill] sm:$0xff]  ;;  %vm8619_vm15 = vmmov %vm8599_vm0 }
 0x15a   : > { %5229 = vmatprep.mubr.msk.bf16.mxu0 %vm8599_vm0, %v3402_v42  ;;  %v3403_v19 = vpack.c.bf16 %v8606_v43, %v3383_v9  ;;  %v8607_v42 = vld [vmem:[#allocation73_spill] sm:$0xff]  ;;  %v8624_v9 = vld [vmem:[#allocation26_spill] sm:$0xff] }
 0x15b   : > { %vm8608_vm5 = vnez %v8607_v42 }
 0x15c   : > { %5200 = vmatmul.mubr.msk.bf16.gmra.mxu1 %vm8603_vm3, %v3112_v4  ;;  %v3098_v20 = vsel %vm8608_vm5, %v6858_v36, 0.0  ;;  %v7015_v4 = vpop.f32.mrf.mxu0  ;;  %v7023_v36 = vpop.f32.mrf.mxu1  ;;  %vm8627_vm3 = vmmov %vm8599_vm0 }
 0x15d   : > { %5203 = vmatprep.mubr.msk.bf16.mxu1 %vm8605_vm6, %v3113_v23  ;;  %v3114_v35 = vpack.c.bf16 %v3098_v20, %v6864_v51  ;;  %v8613_v23 = vld [vmem:[#allocation20_spill] sm:$0xff]  ;;  %8615 = vst [vmem:[#allocation25_spill] sm:$0xff] %v7023_v36  ;;  %v8618_v20 = vld [vmem:[#allocation10_spill] sm:$0xff] }
 0x15e   : > { %v3387_v54 = vsel %vm8495_vm8, %v8613_v23, 0.0  ;;  %v7021_v43 = vpop.f32.mrf.mxu0  ;;  %vm8622_vm8 = vmmov %vm8599_vm0 }
 0x15f   : > { %v3405_v51 = vpack.c.bf16 %v8617_v41, %v3387_v54 }
 0x160   : > { %v7026_v3 = vpop.f32.mrf.mxu0 }
 0x161   : > { %5230 = vmatmul.mubr.msk.bf16.gmra.mxu0 %vm8611_vm11, %v3403_v19  ;;  %v7031_v19 = vpop.f32.mrf.mxu1  ;;  %vm8632_vm11 = vmmov %vm8599_vm0 }
 0x162   : > { %5233 = vmatprep.mubr.msk.bf16.mxu0 %vm8612_vm13, %v3404_v33  ;;  %8620 = vst [vmem:[#allocation41_spill] sm:$0xff] %v7031_v19  ;;  %v7035_v1 = vpop.f32.mrf.mxu0  ;;  %v8628_v19 = vld [vmem:[#allocation68_spill] sm:$0xff] }
 0x163   : > { %v7033_v33 = vpop.f32.mrf.mxu1  ;;  %vm8629_vm6 = vnez %v8628_v19 }
 0x164   : > { %5204 = vmatmul.mubr.msk.bf16.gmra.mxu1 %vm8616_vm1, %v3114_v35  ;;  %8621 = vst [vmem:[#allocation42_spill] sm:$0xff] %v7033_v33  ;;  %v4175_v35 = vld [vmem:[%s8076_s6 + $0x18] sm:$0xff]  ;;  %v7045_v54 = vpop.f32.mrf.mxu0  ;;  %v8626_v33 = vld [vmem:[#allocation11_spill] sm:$0xff]  ;;  %vm8636_vm1 = vmmov %vm8599_vm0 }
 0x165   : > { %5243 = vmatprep.mubr.msk.bf16.mxu1 %vm8619_vm15, %v8618_v20  ;;  %v7038_v23 = vpop.f32.mrf.mxu1  ;;  %v3871_v20 = vsel %vm8506_vm2, %v8515_v60, 0.0  ;;  %vm8633_vm2 = vmmov %vm8599_vm0  ;;  %vm8638_vm15 = vnez %v8637_v57 }
 0x166   : > { %8623 = vst [vmem:[#allocation44_spill] sm:$0xff] %v7038_v23  ;;  %v7055_v23 = vpop.f32.mrf.mxu0  ;;  %v3902_v41 = vpack.c.bf16 %v3871_v20, %v8525_v15  ;;  %v8634_v15 = vld [vmem:[#allocation34_spill] sm:$0xff]  ;;  %v3875_v38 = vsel %vm8638_vm15, %v8534_v61, 0.0  ;;  %vm8654_vm15 = vmmov %vm8599_vm0 }
 0x167   : > { %v5041_v42 = vpop.f32.mrf.mxu1  ;;  %vm8635_vm13 = vnez %v8634_v15 }
 0x168   : > { %v3873_v20 = vsel %vm8635_vm13, %v8519_v11, 0.0  ;;  %vm8650_vm13 = vnez %v8553_v45 }
 0x169   : > { %5234 = vmatmul.mubr.msk.bf16.gmra.mxu0 %vm8622_vm8, %v3405_v51  ;;  %v4174_v51 = vld [vmem:[%s8076_s6 + $0x10] sm:$0xff]  ;;  %v1963_v60 = vpop.f32.mrf.mxu1  ;;  %vm8640_vm8 = vmmov %vm8599_vm0  ;;  %v3903_v11 = vpack.c.bf16 %v3873_v20, %v8528_v62 }
 0x16a   : > { %5237 = vmatprep.mubr.msk.bf16.mxu0 %vm8599_vm0, %v8624_v9  ;;  %v8630_v9 = vsel %vm8629_vm6, %v6718_v21, 0.0  ;;  %vm8643_vm6 = vmmov %vm8599_vm0 }
 0x16b   : > { %v3407_v36 = vpack.c.bf16 %v8500_v44, %v8630_v9  ;;  %v5042_v19 = vpop.f32.mrf.mxu1  ;;  %v4172_v9 = vld [vmem:[%s8076_s6] sm:$0xff] }
 0x16c   : > { %5244 = vmatmul.mubr.msk.bf16.vlgmr.msra.gmra.mxu1 %vm8627_vm3, %v8626_v33  ;;  %v4173_v33 = vld [vmem:[%s8076_s6 + $0x8] sm:$0xff]  ;;  %vm8642_vm3 = vmmov %vm8599_vm0 }
 0x16d   : > { %5310 = vmatpush3.msra.mxu1 %v4175_v35  ;;  %5247 = vmatprep.mubr.msk.bf16.mxu1 %vm8632_vm11, %v8631_v34  ;;  %v7069_v35 = vpop.f32.mrf.mxu0  ;;  %v1966_v21 = vpop.f32.mrf.mxu1  ;;  %vm8645_vm11 = vmmov %vm8599_vm0 }
 0x16e   : > { %5311 = vmatprep.subr.mxu1 %v8500_v44 }
 0x16f   : > { %5312 = vmatpush3.msra.mxu1 %v4174_v51  ;;  %v7075_v34 = vpop.f32.mrf.mxu0  ;;  %v1967_v51 = vadd.f32 %v1966_v21, %v6939_v48  ;;  %v3904_v48 = vpack.c.bf16 %v3875_v38, %v8545_v5  ;;  %v3877_v38 = vsel %vm8536_vm9, %v8538_v47, 0.0  ;;  %vm8647_vm9 = vmmov %vm8599_vm0 }
 0x170   : > { %5313 = vmatprep.subr.mxu1 %v8500_v44 }
 0x171   : > { %5238 = vmatmul.mubr.msk.bf16.gmra.mxu0 %vm8633_vm2, %v3407_v36  ;;  %5314 = vmatpush3.msra.mxu1 %v4173_v33  ;;  %v7084_v31 = vpop.f32.mrf.mxu0  ;;  %v5045_v36 = vpop.f32.mrf.mxu1  ;;  %v8639_v33 = vld [vmem:[#allocation23_spill] sm:$0xff]  ;;  %vm8649_vm2 = vmmov %vm8599_vm0 }
 0x172   : > { %5277 = vmatprep.mubr.msk.bf16.mxu0 %vm8636_vm1, %v3902_v41  ;;  %5315 = vmatprep.subr.mxu1 %v8500_v44  ;;  %v1988_v15 = vadd.f32 %v5045_v36, %v6955_v12  ;;  %v8641_v44 = vld [vmem:[#allocation28_spill] sm:$0xff]  ;;  %v1964_v12 = vadd.f32 %v1963_v60, %v6917_v25  ;;  %v1975_v25 = vadd.f32 %v5042_v19, %v6929_v59  ;;  %v8646_v60 = vld [vmem:[#allocation31_spill] sm:$0xff]  ;;  %vm8652_vm1 = vmmov %vm8599_vm0 }
 0x173   : > { %5316 = vmatpush3.msra.mxu1 %v4172_v9  ;;  %v7093_v41 = vpop.f32.mrf.mxu0  ;;  %v1979_v21 = vpop.f32.mrf.mxu1  ;;  %v1972_v9 = vadd.f32 %v5041_v42, %v6910_v2  ;;  %v3879_v2 = vsel %vm8540_vm14, %v8552_v50, 0.0  ;;  %vm8648_vm14 = vmmov %vm8599_vm0 }
 0x174   : > { %5248 = vmatmul.mubr.msk.bf16.gmra.mxu1 %vm8640_vm8, %v8639_v33  ;;  %v1980_v61 = vadd.f32 %v1979_v21, %v6967_v63  ;;  %v3906_v59 = vpack.c.bf16 %v3879_v2, %v8559_v46  ;;  %v3881_v46 = vsel %vm8650_vm13, %v8555_v39, 0.0  ;;  %vm8656_vm8 = vmmov %vm8599_vm0 }
 0x175   : > { %5251 = vmatprep.mubr.msk.bf16.mxu1 %vm8599_vm0, %v8641_v44  ;;  %v7099_v57 = vpop.f32.mrf.mxu0  ;;  %v5046_v33 = vpop.f32.mrf.mxu1  ;;  %v3907_v45 = vpack.c.bf16 %v3881_v46, %v6416_v26  ;;  %v3885_v26 = vsel %vm8565_vm4, %v8566_v22, 0.0  ;;  %vm8662_vm4 = vmmov %vm8652_vm1 }
 0x176   : > { %v1991_v62 = vadd.f32 %v5046_v33, %v6984_v14  ;;  %v8644_v14 = vld [vmem:[#allocation30_spill] sm:$0xff]  ;;  %v3909_v32 = vpack.c.bf16 %v3885_v26, %v6496_v55  ;;  %vm8669_vm13 = vmmov %vm8652_vm1 }
 0x177   : > { %v5075_v20 = vpop.f32.mrf.mxu0  ;;  %v1982_v36 = vpop.f32.mrf.mxu1 }
 0x178   : > { %v7105_v16 = vadd.f32 %v5075_v20, %v1972_v9  ;;  %v1983_v44 = vadd.f32 %v1982_v36, %v6995_v52  ;;  %v3905_v52 = vpack.c.bf16 %v3877_v38, %v8548_v6  ;;  %v3883_v36 = vsel %vm8557_vm12, %v8563_v30, 0.0  ;;  %v8651_v38 = vld [vmem:[#allocation33_spill] sm:$0xff]  ;;  %vm8655_vm12 = vmmov %vm8599_vm0 }
 0x179   : > { %5278 = vmatmul.mubr.msk.bf16.vlgmr.msra.gmra.mxu0 %vm8642_vm3, %v3903_v11  ;;  %v2388_v5 = vpop.f32.mrf.mxu0  ;;  %v5049_v63 = vpop.f32.mrf.mxu1  ;;  %v7128_v11 = vld [vmem:[%s433_s15] sm:$0x1]  ;;  %v3908_v13 = vpack.c.bf16 %v3883_v36, %v8569_v37  ;;  %vm8657_vm0 = vnez %v8567_v56  ;;  %vm8659_vm3 = vmmov %vm8652_vm1 }
 0x17a   : > { %5281 = vmatprep.mubr.msk.bf16.mxu0 %vm8643_vm6, %v3904_v48  ;;  %v7122_v42 = vadd.f32 %v2388_v5, %v1964_v12  ;;  %v2004_v18 = vadd.f32 %v5049_v63, %v7009_v29  ;;  %v4838_v29 = vmul.f32 -1.442695, %v7128_v11  ;;  %vm8661_vm6 = vmmov %vm8652_vm1 }
 0x17b   : > { %v5076_v47 = vpop.f32.mrf.mxu0  ;;  %v1995_v7 = vpop.f32.mrf.mxu1 }
 0x17c   : > { %5252 = vmatmul.mubr.msk.bf16.gmra.mxu1 %vm8645_vm11, %v8644_v14  ;;  %v7130_v50 = vadd.f32 %v5076_v47, %v1975_v25  ;;  %v1996_v19 = vadd.f32 %v1995_v7, %v7015_v4  ;;  %5474 = vpow2.f32 %v4838_v29  ;;  %v8653_v25 = vld [vmem:[#allocation6_spill] sm:$0xff]  ;;  %vm8663_vm11 = vmmov %vm8652_vm1 }
 0x17d   : > { %5255 = vmatprep.mubr.msk.bf16.mxu1 %vm8647_vm9, %v8646_v60  ;;  %v2391_v21 = vpop.f32.mrf.mxu0  ;;  %v5050_v48 = vpop.f32.mrf.mxu1  ;;  %vm8664_vm9 = vnez %v8574_v0 }
 0x17e   : > { %v7134_v9 = vadd.f32 %v2391_v21, %v1967_v51  ;;  %v2007_v33 = vadd.f32 %v5050_v48, %v7021_v43  ;;  %v8660_v21 = vld [vmem:[#allocation15_spill] sm:$0xff]  ;;  %v3889_v55 = vsel %vm8664_vm9, %v6566_v28, 0.0  ;;  %vm4177_vm9 = vcmask 261120  }
 0x17f   : > { %v5079_v20 = vpop.f32.mrf.mxu0  ;;  %v1998_v6 = vpop.f32.mrf.mxu1  ;;  %v3911_v28 = vpack.c.bf16 %v3889_v55, %v6587_v17  ;;  %v3893_v17 = vsel %vm8585_vm10, %v6626_v8, 0.0 }
 0x180   : > { %v7139_v12 = vadd.f32 %v5079_v20, %v1988_v15  ;;  %v1999_v4 = vadd.f32 %v1998_v6, %v7026_v3 }
 0x181   : > { %5282 = vmatmul.mubr.msk.bf16.gmra.mxu0 %vm8648_vm14, %v3905_v52  ;;  %v2404_v51 = vpop.f32.mrf.mxu0  ;;  %v5053_v43 = vpop.f32.mrf.mxu1  ;;  %vm8665_vm14 = vnez %v8396_v49 }
 0x182   : > { %5285 = vmatprep.mubr.msk.bf16.mxu0 %vm8649_vm2, %v3906_v59  ;;  %v7151_v5 = vadd.f32 %v2404_v51, %v1980_v61  ;;  %v2020_v15 = vadd.f32 %v5053_v43, %v7035_v1  ;;  %vm8667_vm2 = vmmov %vm8652_vm1 }
 0x183   : > { %v5080_v2 = vpop.f32.mrf.mxu0  ;;  %v2011_v39 = vpop.f32.mrf.mxu1 }
 0x184   : > { %5256 = vmatmul.mubr.msk.bf16.gmra.mxu1 %vm8652_vm1, %v8651_v38  ;;  %v7157_v3 = vadd.f32 %v5080_v2, %v1991_v62  ;;  %v2012_v30 = vadd.f32 %v2011_v39, %v7045_v54  ;;  %v3887_v62 = vsel %vm8657_vm0, %v6509_v24, 0.0  ;;  %v8670_v39 = vld [vmem:[#allocation17_spill] sm:$0xff]  ;;  %vm8678_vm0 = vmmov %vm8652_vm1 }
 0x185   : > { %5259 = vmatprep.mubr.msk.bf16.mxu1 %vm8654_vm15, %v8653_v25  ;;  %v2407_v63 = vpop.f32.mrf.mxu0  ;;  %v5054_v14 = vpop.f32.mrf.mxu1  ;;  %v3910_v56 = vpack.c.bf16 %v3887_v62, %v6521_v53  ;;  %vm8671_vm15 = vmmov %vm8652_vm1 }
 0x186   : > { %v7161_v61 = vadd.f32 %v2407_v63, %v1983_v44  ;;  %v2023_v47 = vadd.f32 %v5054_v14, %v7055_v23  ;;  %v8658_v44 = vld [vmem:[#allocation9_spill] sm:$0xff]  ;;  %v8672_v14 = vld [vmem:[#allocation66_spill] sm:$0xff]  ;;  %vm8682_vm10 = vmmov %vm8678_vm0 }
 0x187   : > { %v5083_v1 = vpop.f32.mrf.mxu0  ;;  %v2014_v60 = vpop.f32.mrf.mxu1 }
 0x188   : > { %v7165_v52 = vadd.f32 %v5083_v1, %v2004_v18  ;;  %v2015_v37 = vadd.f32 %v2014_v60, %v7069_v35  ;;  %v8674_v60 = vld [vmem:[#allocation5_spill] sm:$0xff] }
 0x189   : > { %5286 = vmatmul.mubr.msk.bf16.gmra.mxu0 %vm8655_vm12, %v3907_v45  ;;  %v2420_v54 = vpop.f32.mrf.mxu0  ;;  %v5057_v23 = vpop.f32.mrf.mxu1  ;;  %vm8673_vm12 = vnez %v8672_v14  ;;  %v8695_v14 = vld [vmem:[#allocation4_spill] sm:$0xff] }
 0x18a   : > { %5289 = vmatprep.mubr.msk.bf16.mxu0 %vm8656_vm8, %v3908_v13  ;;  %v7177_v7 = vadd.f32 %v2420_v54, %v1996_v19  ;;  %v2036_v18 = vadd.f32 %v5057_v23, %v7075_v34  ;;  %v5475_v19 = vpop.eup %5474  ;;  %v3662_v13 = vshrl.u32 %v8670_v39, 16  ;;  %vm8675_vm8 = vmmov %vm8652_vm1  ;;  %v8676_v54 = vld [vmem:[#allocation8_spill] sm:$0xff]  ;;  %v8677_v23 = vld [vmem:[#allocation18_spill] sm:$0xff] }
 0x18b   : > { %v5084_v59 = vpop.f32.mrf.mxu0  ;;  %v2027_v22 = vpop.f32.mrf.mxu1  ;;  %v4168_v43 = vadd.f32 1.0, %v5475_v19 }
 0x18c   : > { %5260 = vmatmul.mubr.msk.bf16.gmra.mxu1 %vm8659_vm3, %v8658_v44  ;;  %v7183_v35 = vadd.f32 %v5084_v59, %v2007_v33  ;;  %v2028_v24 = vadd.f32 %v2027_v22, %v7084_v31  ;;  %v3891_v33 = vsel %vm8665_vm14, %v6578_v40, 0.0  ;;  %v3664_v62 = vor.u32 %v3662_v13, %v8676_v54  ;;  %v8679_v44 = vld [vmem:[#allocation71_spill] sm:$0xff]  ;;  %v8680_v59 = vld [vmem:[#allocation72_spill] sm:$0xff]  ;;  %vm8702_vm14 = vmmov %vm8678_vm0 }
 0x18d   : > { %5263 = vmatprep.mubr.msk.bf16.mxu1 %vm8661_vm6, %v8660_v21  ;;  %v2423_v48 = vpop.f32.mrf.mxu0  ;;  %v5058_v29 = vpop.f32.mrf.mxu1  ;;  %v3912_v2 = vpack.c.bf16 %v3891_v33, %v8587_v27  ;;  %5476 = vrcp.f32 %v4168_v43  ;;  %v3913_v58 = vpack.c.bf16 %v3893_v17, %v8679_v44  ;;  %vm8684_vm3 = vsmask.f32 7424  ;;  %vm8686_vm6 = vmmov %vm8678_vm0  ;;  %v8693_v13 = vld [vmem:[#allocation32_spill] sm:$0xff] }
 0x18e   : > { %v7187_v20 = vadd.f32 %v2423_v48, %v1999_v4  ;;  %v2039_v34 = vadd.f32 %v5058_v29, %v7093_v41  ;;  %v8666_v4 = vld [vmem:[#allocation16_spill] sm:$0xff]  ;;  %v8683_v29 = vld [vmem:[#allocation3_spill] sm:$0xff] }
 0x18f   : > { %v2030_v46 = vpop.f32.mrf.mxu1  ;;  %v3665_v19 = vsel %vm8684_vm3, %v3664_v62, %v8683_v29 }
 0x190   : > { %v5087_v6 = vpop.f32.mrf.mxu0  ;;  %v2031_v53 = vadd.f32 %v2030_v46, %v7099_v57 }
 0x191   : > { %5290 = vmatmul.mubr.msk.bf16.gmra.mxu0 %vm8662_vm4, %v3909_v32  ;;  %v7191_v51 = vadd.f32 %v5087_v6, %v2020_v15  ;;  %v8668_v15 = vld [vmem:[#allocation24_spill] sm:$0xff]  ;;  %v8681_v32 = vld [vmem:[#allocation46_spill] sm:$0xff]  ;;  %vm8691_vm4 = vmmov %vm8678_vm0 }
 0x192   : > { %5293 = vmatprep.mubr.msk.bf16.mxu0 %vm8663_vm11, %v3910_v56  ;;  %v2436_v31 = vpop.f32.mrf.mxu0  ;;  %v5061_v41 = vpop.f32.mrf.mxu1  ;;  %v8685_v6 = vld [vmem:[#allocation50_spill] sm:$0xff]  ;;  %vm5489_vm11 = vmmov 0  }
 0x193   : > { %v7203_v36 = vadd.f32 %v2436_v31, %v2012_v30  ;;  %v2052_v22 = vadd.f32 %v5061_v41, %v8681_v32 }
 0x194   : > { %5264 = vmatmul.mubr.msk.bf16.gmra.mxu1 %vm8667_vm2, %v8666_v4  ;;  %v5088_v38 = vpop.f32.mrf.mxu0  ;;  %v2043_v0 = vpop.f32.mrf.mxu1  ;;  %v8689_v4 = vld [vmem:[#allocation40_spill] sm:$0xff]  ;;  %vm8706_vm2 = vcmask 1045504  }
 0x195   : > { %5267 = vmatprep.mubr.msk.bf16.mxu1 %vm8669_vm13, %v8668_v15  ;;  %v7208_v57 = vadd.f32 %v5088_v38, %v2023_v47  ;;  %v3895_v47 = vsel %vm8673_vm12, %v6635_v10, 0.0  ;;  %v2044_v46 = vadd.f32 %v2043_v0, %v8685_v6  ;;  %v8690_v38 = vld [vmem:[#allocation49_spill] sm:$0xff]  ;;  %v8701_v6 = vld [vmem:[#allocation19_spill] sm:$0xff]  ;;  %vm4326_vm13 = vcmask 64512  }
 0x196   : > { %v2439_v49 = vpop.f32.mrf.mxu0  ;;  %v5062_v40 = vpop.f32.mrf.mxu1  ;;  %v3914_v21 = vpack.c.bf16 %v3895_v47, %v8680_v59 }
 0x197   : > { %v7211_v25 = vadd.f32 %v2439_v49, %v2015_v37  ;;  %v2055_v15 = vadd.f32 %v5062_v40, %v8690_v38  ;;  %v8692_v49 = vld [vmem:[#allocation25_spill] sm:$0xff] }
 0x198   : > { %v5091_v45 = vpop.f32.mrf.mxu0  ;;  %v2046_v30 = vpop.f32.mrf.mxu1  ;;  %v8696_v40 = vld [vmem:[#allocation41_spill] sm:$0xff] }
 0x199   : > { %5294 = vmatmul.mubr.msk.bf16.gmra.mxu0 %vm8652_vm1, %v3911_v28  ;;  %v7215_v63 = vadd.f32 %v5091_v45, %v2036_v18  ;;  %v2047_v47 = vadd.f32 %v2046_v30, %v8695_v14  ;;  %v8700_v30 = vld [vmem:[#allocation38_spill] sm:$0xff]  ;;  %v8709_v38 = vld [vmem:[#allocation37_spill] sm:$0xff]  ;;  %vm4428_vm1 = vcmask 57344  }
 0x19a   : > { %5297 = vmatprep.mubr.msk.bf16.mxu0 %vm8671_vm15, %v3912_v2  ;;  %v2452_v27 = vpop.f32.mrf.mxu0  ;;  %v5065_v1 = vpop.f32.mrf.mxu1 }
 0x19b   : > { %v7226_v26 = vadd.f32 %v2452_v27, %v2028_v24  ;;  %v5477_v0 = vpop.eup %5476  ;;  %v8694_v27 = vmov 0.0  }
 0x19c   : > { %5268 = vmatmul.mubr.msk.bf16.gmra.mxu1 %vm8675_vm8, %v8674_v60  ;;  %v5092_v37 = vpop.f32.mrf.mxu0  ;;  %v2059_v8 = vpop.f32.mrf.mxu1 }
 0x19d   : > { %5271 = vmatprep.mubr.msk.bf16.mxu1 %vm8678_vm0, %v8677_v23  ;;  %v7232_v18 = vadd.f32 %v5092_v37, %v2039_v34  ;;  %v8687_v34 = vld [vmem:[#allocation74_spill] sm:$0xff]  ;;  %v8697_v23 = vld [vmem:[#allocation35_spill] sm:$0xff] }
 0x19e   : > { %v2455_v10 = vpop.f32.mrf.mxu0  ;;  %v5066_v56 = vpop.f32.mrf.mxu1  ;;  %v3897_v41 = vsel %vm8594_vm7, %v8687_v34, 0.0  ;;  %v2068_v44 = vadd.f32 %v5065_v1, %v8697_v23  ;;  %vm8699_vm7 = vmmov %vm8678_vm0  ;;  %v8703_v1 = vld [vmem:[#allocation27_spill] sm:$0xff] }
 0x19f   : > { %v7236_v48 = vadd.f32 %v2455_v10, %v2031_v53  ;;  %v3915_v17 = vpack.c.bf16 %v3897_v41, %v8693_v13  ;;  %v8698_v10 = vld [vmem:[#allocation42_spill] sm:$0xff]  ;;  %v3901_v33 = vsel %vm8608_vm5, %v8703_v1, 0.0  ;;  %v8708_v41 = vld [vmem:[#allocation44_spill] sm:$0xff]  ;;  %vm8710_vm5 = vmmov %vm8678_vm0 }
 0x1a0   : > { %v2062_v55 = vpop.f32.mrf.mxu1 }
 0x1a1   : > { %v5095_v24 = vpop.f32.mrf.mxu0  ;;  %5298 = vmatmul.mubr.msk.bf16.gmra.mxu0 %vm8682_vm10, %v3913_v58  ;;  %v2063_v53 = vadd.f32 %v2062_v55, %v8689_v4 }
 0x1a2   : > { %v7242_v31 = vadd.f32 %v5095_v24, %v2052_v22  ;;  %5301 = vmatprep.mubr.msk.bf16.mxu0 %vm8686_vm6, %v3914_v21  ;;  %v4171_v21 = vmul.f32 %v5477_v0, %v7128_v11  ;;  %v2060_v24 = vadd.f32 %v2059_v8, %v8700_v30  ;;  %v2071_v8 = vadd.f32 %v5066_v56, %v8709_v38 }
 0x1a3   : > { %v2468_v43 = vpop.f32.mrf.mxu0 }
 0x1a4   : > { %v5069_v28 = vpop.f32.mrf.mxu1  ;;  %5272 = vmatmul.mubr.msk.bf16.gmra.mxu1 %vm8691_vm4, %v3665_v19  ;;  %v7251_v2 = vadd.f32 %v2468_v43, %v2044_v46  ;;  %v8704_v46 = vld [vmem:[#allocation7_spill] sm:$0xff] }
 0x1a5   : > { %v2084_v45 = vadd.f32 %v5069_v28, %v8692_v49  ;;  %v5096_v39 = vpop.f32.mrf.mxu0  ;;  %5317 = vmatprep.mubr.msk.f32.mxu1 %vm5489_vm11, %v8694_v27  ;;  %v8705_v55 = vrot.slane %v8704_v46, 2 }
 0x1a6   : > { %v2075_v60 = vpop.f32.mrf.mxu1  ;;  %v7257_v37 = vadd.f32 %v5096_v39, %v2055_v15 }
 0x1a7   : > { %v2076_v54 = vadd.f32 %v2075_v60, %v8696_v40  ;;  %v2471_v62 = vpop.f32.mrf.mxu0  ;;  %v3868_v34 = vsel %vm8706_vm2, %v8705_v55, %v8703_v1 }
 0x1a8   : > { %v5070_v58 = vpop.f32.mrf.mxu1  ;;  %v7261_v59 = vadd.f32 %v2471_v62, %v2047_v47  ;;  %v3917_v39 = vpack.c.bf16 %v3901_v33, %v3868_v34 }
 0x1a9   : > { %v2087_v32 = vadd.f32 %v5070_v58, %v8698_v10  ;;  %v5099_v22 = vpop.f32.mrf.mxu0  ;;  %5302 = vmatmul.mubr.msk.bf16.gmra.mxu0 %vm8699_vm7, %v3915_v17 }
 0x1aa   : > { %v2078_v29 = vpop.f32.mrf.mxu1  ;;  %v7267_v19 = vadd.f32 %v5099_v22, %v2068_v44  ;;  %5305 = vmatprep.mubr.msk.bf16.mxu0 %vm8702_vm14, %v8701_v6 }
 0x1ab   : > { %v2079_v4 = vadd.f32 %v2078_v29, %v8708_v41  ;;  %v2484_v43 = vpop.f32.mrf.mxu0 }
 0x1ac   : > { %v5109_v15 = vpop.f32.mrf.mxu1  ;;  %5318 = vmatmul.mubr.msk.f32.vlgmr.msra.gmra.mxu1 %vm4177_vm9, %v4171_v21  ;;  %v7280_v28 = vadd.f32 %v2484_v43, %v2060_v24 }
 0x1ad   : > { %v2811_v0 = vadd.f32 %v5109_v15, %v7105_v16  ;;  %v5100_v49 = vpop.f32.mrf.mxu0 }
 0x1ae   : > { %v2682_v13 = vpop.f32.mrf.mxu1  ;;  %v7283_v17 = vadd.f32 %v5100_v49, %v2071_v8 }
 0x1af   : > { %v2809_v27 = vadd.f32 %v2682_v13, %v7122_v42  ;;  %v2487_v14 = vpop.f32.mrf.mxu0 }
 0x1b0   : > { %v5110_v47 = vpop.f32.mrf.mxu1  ;;  %v7286_v60 = vadd.f32 %v2487_v14, %v2063_v53 }
 0x1b1   : > { %v2812_v40 = vadd.f32 %v5110_v47, %v7130_v50  ;;  %v5103_v56 = vpop.f32.mrf.mxu0  ;;  %5306 = vmatmul.mubr.msk.bf16.gmra.mxu0 %vm8710_vm5, %v3917_v39 }
 0x1b2   : > { %v2685_v62 = vpop.f32.mrf.mxu1  ;;  %v7290_v23 = vadd.f32 %v5103_v56, %v2084_v45 }
 0x1b3   : > { %v2810_v16 = vadd.f32 %v2685_v62, %v7134_v9  ;;  %v2500_v44 = vpop.f32.mrf.mxu0 }
 0x1b4   : > { %v5113_v58 = vpop.f32.mrf.mxu1  ;;  %v7293_v21 = vadd.f32 %v2500_v44, %v2076_v54 }
 0x1b5   : > { %v2815_v42 = vadd.f32 %v5113_v58, %v7139_v12  ;;  %v5104_v10 = vpop.f32.mrf.mxu0 }
 0x1b6   : > { %v2698_v22 = vpop.f32.mrf.mxu1  ;;  %v7296_v53 = vadd.f32 %v5104_v10, %v2087_v32 }
 0x1b7   : > { %v2813_v50 = vadd.f32 %v2698_v22, %v7151_v5  ;;  %v2503_v30 = vpop.f32.mrf.mxu0 }
 0x1b8   : > { %v5114_v24 = vpop.f32.mrf.mxu1  ;;  %v7299_v29 = vadd.f32 %v2503_v30, %v2079_v4 }
 0x1b9   : > { %v2816_v45 = vadd.f32 %v5114_v24, %v7157_v3  ;;  %v5143_v6 = vpop.f32.mrf.mxu0 }
 0x1ba   : > { %v2701_v9 = vpop.f32.mrf.mxu1  ;;  %v7302_v1 = vadd.f32 %v5143_v6, %v2811_v0 }
 0x1bb   : > { %v2814_v54 = vadd.f32 %v2701_v9, %v7161_v61  ;;  %v2901_v46 = vpop.f32.mrf.mxu0 }
 0x1bc   : > { %v5117_v12 = vpop.f32.mrf.mxu1  ;;  %v7305_v55 = vadd.f32 %v2901_v46, %v2809_v27 }
 0x1bd   : > { %v2819_v32 = vadd.f32 %v5117_v12, %v7165_v52  ;;  %v5144_v34 = vpop.f32.mrf.mxu0 }
 0x1be   : > { %v2714_v5 = vpop.f32.mrf.mxu1  ;;  %v7308_v11 = vadd.f32 %v5144_v34, %v2812_v40 }
 0x1bf   : > { %v2817_v33 = vadd.f32 %v2714_v5, %v7177_v7  ;;  %v2904_v41 = vpop.f32.mrf.mxu0 }
 0x1c0   : > { %v5118_v3 = vpop.f32.mrf.mxu1  ;;  %v7311_v4 = vadd.f32 %v2904_v41, %v2810_v16 }
 0x1c1   : > { %v2820_v43 = vadd.f32 %v5118_v3, %v7183_v35  ;;  %v5147_v38 = vpop.f32.mrf.mxu0 }
 0x1c2   : > { %v2717_v61 = vpop.f32.mrf.mxu1  ;;  %v7314_v8 = vadd.f32 %v5147_v38, %v2815_v42 }
 0x1c3   : > { %v2818_v15 = vadd.f32 %v2717_v61, %v7187_v20  ;;  %v2917_v0 = vpop.f32.mrf.mxu0 }
 0x1c4   : > { %v5121_v52 = vpop.f32.mrf.mxu1  ;;  %v7317_v49 = vadd.f32 %v2917_v0, %v2813_v50 }
 0x1c5   : > { %v2823_v39 = vadd.f32 %v5121_v52, %v7191_v51  ;;  %v5148_v13 = vpop.f32.mrf.mxu0 }
 0x1c6   : > { %v2730_v7 = vpop.f32.mrf.mxu1  ;;  %v7320_v27 = vadd.f32 %v5148_v13, %v2816_v45 }
 0x1c7   : > { %v2821_v14 = vadd.f32 %v2730_v7, %v7203_v36  ;;  %v2920_v47 = vpop.f32.mrf.mxu0 }
 0x1c8   : > { %v5122_v35 = vpop.f32.mrf.mxu1  ;;  %v7323_v40 = vadd.f32 %v2920_v47, %v2814_v54 }
 0x1c9   : > { %v2824_v56 = vadd.f32 %v5122_v35, %v7208_v57  ;;  %v5151_v62 = vpop.f32.mrf.mxu0 }
 0x1ca   : > { %v2733_v20 = vpop.f32.mrf.mxu1  ;;  %v7326_v16 = vadd.f32 %v5151_v62, %v2819_v32 }
 0x1cb   : > { %v2822_v44 = vadd.f32 %v2733_v20, %v7211_v25  ;;  %v2933_v58 = vpop.f32.mrf.mxu0 }
 0x1cc   : > { %v5125_v51 = vpop.f32.mrf.mxu1  ;;  %v7329_v42 = vadd.f32 %v2933_v58, %v2817_v33 }
 0x1cd   : > { %v2827_v10 = vadd.f32 %v5125_v51, %v7215_v63  ;;  %v5152_v22 = vpop.f32.mrf.mxu0 }
 0x1ce   : > { %v2746_v36 = vpop.f32.mrf.mxu1  ;;  %v7332_v50 = vadd.f32 %v5152_v22, %v2820_v43 }
 0x1cf   : > { %v2825_v30 = vadd.f32 %v2746_v36, %v7226_v26  ;;  %v2936_v24 = vpop.f32.mrf.mxu0 }
 0x1d0   : > { %v5126_v57 = vpop.f32.mrf.mxu1  ;;  %v7335_v45 = vadd.f32 %v2936_v24, %v2818_v15 }
 0x1d1   : > { %v2828_v6 = vadd.f32 %v5126_v57, %v7232_v18  ;;  %v5155_v9 = vpop.f32.mrf.mxu0 }
 0x1d2   : > { %v2749_v25 = vpop.f32.mrf.mxu1  ;;  %v7338_v54 = vadd.f32 %v5155_v9, %v2823_v39 }
 0x1d3   : > { %v2826_v46 = vadd.f32 %v2749_v25, %v7236_v48  ;;  %v2949_v12 = vpop.f32.mrf.mxu0 }
 0x1d4   : > { %v5129_v63 = vpop.f32.mrf.mxu1  ;;  %v7341_v32 = vadd.f32 %v2949_v12, %v2821_v14 }
 0x1d5   : > { %v2831_v34 = vadd.f32 %v5129_v63, %v7242_v31  ;;  %v5156_v5 = vpop.f32.mrf.mxu0 }
 0x1d6   : > { %v2762_v26 = vpop.f32.mrf.mxu1  ;;  %v7344_v33 = vadd.f32 %v5156_v5, %v2824_v56 }
 0x1d7   : > { %v2829_v41 = vadd.f32 %v2762_v26, %v7251_v2  ;;  %v2952_v3 = vpop.f32.mrf.mxu0 }
 0x1d8   : > { %v5130_v18 = vpop.f32.mrf.mxu1  ;;  %v7347_v43 = vadd.f32 %v2952_v3, %v2822_v44 }
 0x1d9   : > { %v2832_v38 = vadd.f32 %v5130_v18, %v7257_v37  ;;  %v5159_v61 = vpop.f32.mrf.mxu0 }
 0x1da   : > { %v2765_v48 = vpop.f32.mrf.mxu1  ;;  %v7350_v15 = vadd.f32 %v5159_v61, %v2827_v10 }
 0x1db   : > { %v2830_v0 = vadd.f32 %v2765_v48, %v7261_v59  ;;  %v2965_v52 = vpop.f32.mrf.mxu0 }
 0x1dc   : > { %v5133_v31 = vpop.f32.mrf.mxu1  ;;  %v7353_v39 = vadd.f32 %v2965_v52, %v2825_v30 }
 0x1dd   : > { %v2835_v13 = vadd.f32 %v5133_v31, %v7267_v19  ;;  %v5160_v7 = vpop.f32.mrf.mxu0 }
 0x1de   : > { %v2778_v2 = vpop.f32.mrf.mxu1  ;;  %v7356_v14 = vadd.f32 %v5160_v7, %v2828_v6 }
 0x1df   : > { %v2833_v47 = vadd.f32 %v2778_v2, %v7280_v28  ;;  %v2968_v35 = vpop.f32.mrf.mxu0 }
 0x1e0   : > { %v5134_v37 = vpop.f32.mrf.mxu1  ;;  %v7359_v56 = vadd.f32 %v2968_v35, %v2826_v46 }
 0x1e1   : > { %v2836_v62 = vadd.f32 %v5134_v37, %v7283_v17  ;;  %v5163_v20 = vpop.f32.mrf.mxu0 }
 0x1e2   : > { %v2781_v59 = vpop.f32.mrf.mxu1  ;;  %v7362_v44 = vadd.f32 %v5163_v20, %v2831_v34 }
 0x1e3   : > { %v2834_v58 = vadd.f32 %v2781_v59, %v7286_v60  ;;  %v2981_v51 = vpop.f32.mrf.mxu0 }
 0x1e4   : > { %v5137_v19 = vpop.f32.mrf.mxu1  ;;  %v7365_v10 = vadd.f32 %v2981_v51, %v2829_v41 }
 0x1e5   : > { %v2839_v22 = vadd.f32 %v5137_v19, %v7290_v23  ;;  %v5164_v36 = vpop.f32.mrf.mxu0 }
 0x1e6   : > { %v2794_v28 = vpop.f32.mrf.mxu1  ;;  %v7368_v30 = vadd.f32 %v5164_v36, %v2832_v38 }
 0x1e7   : > { %v2837_v24 = vadd.f32 %v2794_v28, %v7293_v21  ;;  %v2984_v57 = vpop.f32.mrf.mxu0 }
 0x1e8   : > { %v5138_v17 = vpop.f32.mrf.mxu1  ;;  %v7371_v6 = vadd.f32 %v2984_v57, %v2830_v0 }
 0x1e9   : > { %v2840_v9 = vadd.f32 %v5138_v17, %v7296_v53  ;;  %v5167_v25 = vpop.f32.mrf.mxu0 }
 0x1ea   : > { %v2797_v60 = vpop.f32.mrf.mxu1  ;;  %v7374_v46 = vadd.f32 %v5167_v25, %v2835_v13 }
 0x1eb   : > { %v2838_v12 = vadd.f32 %v2797_v60, %v7299_v29  ;;  %v2997_v63 = vpop.f32.mrf.mxu0 }
 0x1ec   : > { %v5177_v23 = vpop.f32.mrf.mxu1  ;;  %v7377_v34 = vadd.f32 %v2997_v63, %v2833_v47 }
 0x1ed   : > { %v3331_v5 = vadd.f32 %v5177_v23, %v7302_v1  ;;  %v5168_v26 = vpop.f32.mrf.mxu0 }
 0x1ee   : > { %v3202_v21 = vpop.f32.mrf.mxu1  ;;  %v7380_v41 = vadd.f32 %v5168_v26, %v2836_v62 }
 0x1ef   : > { %v3329_v3 = vadd.f32 %v3202_v21, %v7305_v55  ;;  %v3000_v18 = vpop.f32.mrf.mxu0 }
 0x1f0   : > { %v5178_v53 = vpop.f32.mrf.mxu1  ;;  %v7383_v38 = vadd.f32 %v3000_v18, %v2834_v58 }
 0x1f1   : > { %v3332_v61 = vadd.f32 %v5178_v53, %v7308_v11  ;;  %v5171_v48 = vpop.f32.mrf.mxu0 }
 0x1f2   : > { %v3205_v29 = vpop.f32.mrf.mxu1  ;;  %v7386_v0 = vadd.f32 %v5171_v48, %v2839_v22 }
 0x1f3   : > { %v3330_v52 = vadd.f32 %v3205_v29, %v7311_v4  ;;  %v3013_v31 = vpop.f32.mrf.mxu0 }
 0x1f4   : > { %v5181_v1 = vpop.f32.mrf.mxu1  ;;  %v7389_v13 = vadd.f32 %v3013_v31, %v2837_v24 }
 0x1f5   : > { %v3335_v7 = vadd.f32 %v5181_v1, %v7314_v8  ;;  %v5172_v2 = vpop.f32.mrf.mxu0 }
 0x1f6   : > { %v3218_v55 = vpop.f32.mrf.mxu1  ;;  %v7392_v47 = vadd.f32 %v5172_v2, %v2840_v9 }
 0x1f7   : > { %v3333_v35 = vadd.f32 %v3218_v55, %v7317_v49  ;;  %v3016_v37 = vpop.f32.mrf.mxu0 }
 0x1f8   : > { %v5182_v11 = vpop.f32.mrf.mxu1  ;;  %v7395_v62 = vadd.f32 %v3016_v37, %v2838_v12 }
 0x1f9   : > { %v3336_v20 = vadd.f32 %v5182_v11, %v7320_v27  ;;  %v5211_v59 = vpop.f32.mrf.mxu0 }
 0x1fa   : > { %v3221_v4 = vpop.f32.mrf.mxu1  ;;  %v7398_v58 = vadd.f32 %v5211_v59, %v3331_v5 }
 0x1fb   : > { %v3334_v51 = vadd.f32 %v3221_v4, %v7323_v40  ;;  %v3495_v19 = vpop.f32.mrf.mxu0 }
 0x1fc   : > { %v5185_v8 = vpop.f32.mrf.mxu1  ;;  %v7401_v22 = vadd.f32 %v3495_v19, %v3329_v3 }
 0x1fd   : > { %v3339_v36 = vadd.f32 %v5185_v8, %v7326_v16  ;;  %v5212_v28 = vpop.f32.mrf.mxu0 }
 0x1fe   : > { %v3234_v49 = vpop.f32.mrf.mxu1  ;;  %v7404_v24 = vadd.f32 %v5212_v28, %v3332_v61 }
 0x1ff   : > { %v3337_v57 = vadd.f32 %v3234_v49, %v7329_v42  ;;  %v3498_v17 = vpop.f32.mrf.mxu0 }
 0x200   : > { %v5186_v27 = vpop.f32.mrf.mxu1  ;;  %v7407_v9 = vadd.f32 %v3498_v17, %v3330_v52 }
 0x201   : > { %v3340_v25 = vadd.f32 %v5186_v27, %v7332_v50  ;;  %v5215_v60 = vpop.f32.mrf.mxu0 }
 0x202   : > { %v3237_v40 = vpop.f32.mrf.mxu1  ;;  %v7410_v12 = vadd.f32 %v5215_v60, %v3335_v7 }
 0x203   : > { %v3338_v63 = vadd.f32 %v3237_v40, %v7335_v45  ;;  %v3511_v23 = vpop.f32.mrf.mxu0 }
 0x204   : > { %v5189_v16 = vpop.f32.mrf.mxu1  ;;  %v7413_v5 = vadd.f32 %v3511_v23, %v3333_v35 }
 0x205   : > { %v3343_v26 = vadd.f32 %v5189_v16, %v7338_v54  ;;  %v5216_v21 = vpop.f32.mrf.mxu0 }
 0x206   : > { %v3250_v42 = vpop.f32.mrf.mxu1  ;;  %v7416_v3 = vadd.f32 %v5216_v21, %v3336_v20 }
 0x207   : > { %v3341_v18 = vadd.f32 %v3250_v42, %v7341_v32  ;;  %v3514_v53 = vpop.f32.mrf.mxu0 }
 0x208   : > { %v5190_v50 = vpop.f32.mrf.mxu1  ;;  %v7419_v61 = vadd.f32 %v3514_v53, %v3334_v51 }
 0x209   : > { %v3344_v48 = vadd.f32 %v5190_v50, %v7344_v33  ;;  %v5219_v29 = vpop.f32.mrf.mxu0 }
 0x20a   : > { %v3253_v45 = vpop.f32.mrf.mxu1  ;;  %v7422_v52 = vadd.f32 %v5219_v29, %v3339_v36 }
 0x20b   : > { %v3342_v31 = vadd.f32 %v3253_v45, %v7347_v43  ;;  %v3527_v1 = vpop.f32.mrf.mxu0 }
 0x20c   : > { %v5193_v54 = vpop.f32.mrf.mxu1  ;;  %v7425_v7 = vadd.f32 %v3527_v1, %v3337_v57 }
 0x20d   : > { %v3347_v2 = vadd.f32 %v5193_v54, %v7350_v15  ;;  %v5220_v55 = vpop.f32.mrf.mxu0 }
 0x20e   : > { %v3266_v32 = vpop.f32.mrf.mxu1  ;;  %v7428_v35 = vadd.f32 %v5220_v55, %v3340_v25 }
 0x20f   : > { %v3345_v37 = vadd.f32 %v3266_v32, %v7353_v39  ;;  %v3530_v11 = vpop.f32.mrf.mxu0 }
 0x210   : > { %v5194_v33 = vpop.f32.mrf.mxu1  ;;  %v7431_v20 = vadd.f32 %v3530_v11, %v3338_v63 }
 0x211   : > { %v3348_v59 = vadd.f32 %v5194_v33, %v7356_v14  ;;  %v5223_v4 = vpop.f32.mrf.mxu0 }
 0x212   : > { %v3269_v43 = vpop.f32.mrf.mxu1  ;;  %v7434_v51 = vadd.f32 %v5223_v4, %v3343_v26 }
 0x213   : > { %v3346_v19 = vadd.f32 %v3269_v43, %v7359_v56  ;;  %v3543_v8 = vpop.f32.mrf.mxu0 }
 0x214   : > { %v5197_v15 = vpop.f32.mrf.mxu1  ;;  %v7437_v36 = vadd.f32 %v3543_v8, %v3341_v18 }
 0x215   : > { %v3351_v28 = vadd.f32 %v5197_v15, %v7362_v44  ;;  %v5224_v49 = vpop.f32.mrf.mxu0 }
 0x216   : > { %v3282_v39 = vpop.f32.mrf.mxu1  ;;  %v7440_v57 = vadd.f32 %v5224_v49, %v3344_v48 }
 0x217   : > { %v3349_v17 = vadd.f32 %v3282_v39, %v7365_v10  ;;  %v3546_v27 = vpop.f32.mrf.mxu0 }
 0x218   : > { %v5198_v14 = vpop.f32.mrf.mxu1  ;;  %v7443_v25 = vadd.f32 %v3546_v27, %v3342_v31 }
 0x219   : > { %v3352_v60 = vadd.f32 %v5198_v14, %v7368_v30  ;;  %v5227_v40 = vpop.f32.mrf.mxu0 }
 0x21a   : > { %v3285_v56 = vpop.f32.mrf.mxu1  ;;  %v7446_v63 = vadd.f32 %v5227_v40, %v3347_v2 }
 0x21b   : > { %v7449_v23 = vadd.f32 %v3285_v56, %v7371_v6  ;;  %v3559_v44 = vpop.f32.mrf.mxu0 }
 0x21c   : > { %v5201_v16 = vpop.f32.mrf.mxu1  ;;  %v7451_v26 = vadd.f32 %v3559_v44, %v3345_v37 }
 0x21d   : > { %v3355_v21 = vadd.f32 %v5201_v16, %v7374_v46  ;;  %v5228_v10 = vpop.f32.mrf.mxu0 }
 0x21e   : > { %v3298_v42 = vpop.f32.mrf.mxu1  ;;  %v7454_v18 = vadd.f32 %v5228_v10, %v3348_v59 }
 0x21f   : > { %v7457_v53 = vadd.f32 %v3298_v42, %v7377_v34  ;;  %v3562_v30 = vpop.f32.mrf.mxu0 }
 0x220   : > { %v5202_v50 = vpop.f32.mrf.mxu1  ;;  %v7459_v48 = vadd.f32 %v3562_v30, %v3346_v19 }
 0x221   : > { %v3356_v6 = vadd.f32 %v5202_v50, %v7380_v41  ;;  %v5231_v29 = vpop.f32.mrf.mxu0 }
 0x222   : > { %8711 = vst [vmem:[#allocation39_spill] sm:$0xff] %v7459_v48  ;;  %v3301_v45 = vpop.f32.mrf.mxu1  ;;  %v7462_v31 = vadd.f32 %v5231_v29, %v3351_v28 }
 0x223   : > { %v3354_v1 = vadd.f32 %v3301_v45, %v7383_v38  ;;  %v3575_v46 = vpop.f32.mrf.mxu0 }
 0x224   : > { %8712 = vst [vmem:[#allocation51_spill] sm:$0xff] %v7462_v31  ;;  %v5205_v54 = vpop.f32.mrf.mxu1  ;;  %v7465_v2 = vadd.f32 %v3575_v46, %v3349_v17 }
 0x225   : > { %v3359_v55 = vadd.f32 %v5205_v54, %v7386_v0  ;;  %v5232_v34 = vpop.f32.mrf.mxu0 }
 0x226   : > { %8713 = vst [vmem:[#allocation43_spill] sm:$0xff] %v7465_v2  ;;  %v3314_v32 = vpop.f32.mrf.mxu1  ;;  %v7468_v37 = vadd.f32 %v5232_v34, %v3352_v60 }
 0x227   : > { %v3357_v11 = vadd.f32 %v3314_v32, %v7389_v13  ;;  %v7471_v33 = vpop.f32.mrf.mxu0 }
 0x228   : > { %8714 = vst [vmem:[#allocation45_spill] sm:$0xff] %v7468_v37  ;;  %v5206_v41 = vpop.f32.mrf.mxu1 }
 0x229   : > { %v3360_v59 = vadd.f32 %v5206_v41, %v7392_v47  ;;  %v5235_v4 = vpop.f32.mrf.mxu0 }
 0x22a   : > { %v3317_v43 = vpop.f32.mrf.mxu1  ;;  %v7474_v38 = vadd.f32 %v5235_v4, %v3355_v21 }
 0x22b   : > { %v3358_v19 = vadd.f32 %v3317_v43, %v7395_v62  ;;  %v7477_v8 = vpop.f32.mrf.mxu0 }
 0x22c   : > { %8715 = vst [vmem:[#allocation55_spill] sm:$0xff] %v7474_v38  ;;  %v5245_v0 = vpop.f32.mrf.mxu1 }
 0x22d   : > { %v5236_v15 = vpop.f32.mrf.mxu0 }
 0x22e   : > { %v3709_v28 = vpop.f32.mrf.mxu1  ;;  %v7479_v49 = vadd.f32 %v5236_v15, %v3356_v6 }
 0x22f   : > { %v3594_v39 = vpop.f32.mrf.mxu0 }
 0x230   : > { %8716 = vst [vmem:[#allocation53_spill] sm:$0xff] %v7479_v49  ;;  %v5246_v13 = vpop.f32.mrf.mxu1  ;;  %v7481_v17 = vadd.f32 %v3594_v39, %v3354_v1 }
 0x231   : > { %v5239_v27 = vpop.f32.mrf.mxu0 }
 0x232   : > { %8717 = vst [vmem:[#allocation48_spill] sm:$0xff] %v7481_v17  ;;  %v3712_v14 = vpop.f32.mrf.mxu1  ;;  %v7483_v47 = vadd.f32 %v5239_v27, %v3359_v55 }
 0x233   : > { %v3607_v60 = vpop.f32.mrf.mxu0 }
 0x234   : > { %8718 = vst [vmem:[#allocation57_spill] sm:$0xff] %v7483_v47  ;;  %v5249_v40 = vpop.f32.mrf.mxu1  ;;  %v7485_v56 = vadd.f32 %v3607_v60, %v3357_v11 }
 0x235   : > { %v5240_v62 = vpop.f32.mrf.mxu0 }
 0x236   : > { %8719 = vst [vmem:[#allocation52_spill] sm:$0xff] %v7485_v56  ;;  %v3725_v44 = vpop.f32.mrf.mxu1  ;;  %v7487_v16 = vadd.f32 %v5240_v62, %v3360_v59 }
 0x237   : > { %v3610_v21 = vpop.f32.mrf.mxu0 }
 0x238   : > { %8720 = vst [vmem:[#allocation56_spill] sm:$0xff] %v7487_v16  ;;  %v5250_v10 = vpop.f32.mrf.mxu1  ;;  %v7489_v42 = vadd.f32 %v3610_v21, %v3358_v19 }
 0x239   : > { %v5279_v30 = vpop.f32.mrf.mxu0 }
 0x23a   : > { %8721 = vst [vmem:[#allocation61_spill] sm:$0xff] %v7489_v42  ;;  %v3728_v50 = vpop.f32.mrf.mxu1 }
 0x23b   : > { %v4005_v6 = vpop.f32.mrf.mxu0 }
 0x23c   : > { %v5253_v29 = vpop.f32.mrf.mxu1 }
 0x23d   : > { %v5280_v45 = vpop.f32.mrf.mxu0 }
 0x23e   : > { %v3741_v1 = vpop.f32.mrf.mxu1 }
 0x23f   : > { %v4008_v46 = vpop.f32.mrf.mxu0 }
 0x240   : > { %v5254_v54 = vpop.f32.mrf.mxu1 }
 0x241   : > { %v5283_v55 = vpop.f32.mrf.mxu0 }
 0x242   : > { %v3744_v34 = vpop.f32.mrf.mxu1 }
 0x243   : > { %v4021_v32 = vpop.f32.mrf.mxu0 }
 0x244   : > { %v5257_v11 = vpop.f32.mrf.mxu1 }
 0x245   : > { %v5284_v41 = vpop.f32.mrf.mxu0 }
 0x246   : > { %v7491_v4 = vpop.f32.mrf.mxu1 }
 0x247   : > { %v4024_v59 = vpop.f32.mrf.mxu0 }
 0x248   : > { %v7493_v43 = vpop.f32.mrf.mxu1 }
 0x249   : > { %v5287_v19 = vpop.f32.mrf.mxu0 }
 0x24a   : > { %v7495_v15 = vpop.f32.mrf.mxu1 }
 0x24b   : > { %v4037_v39 = vpop.f32.mrf.mxu0 }
 0x24c   : > { %v7497_v27 = vpop.f32.mrf.mxu1 }
 0x24d   : > { %v7499_v60 = vpop.f32.mrf.mxu0 }
 0x24e   : > { %v7501_v62 = vpop.f32.mrf.mxu1 }
 0x24f   : > { %v7503_v21 = vpop.f32.mrf.mxu0 }
 0x250   : > { %8722 = vst [vmem:[#allocation54_spill] sm:$0xff] %v7503_v21  ;;  %v7505_v42 = vpop.f32.mrf.mxu1 }
 0x251   : > { %v7507_v16 = vpop.f32.mrf.mxu0 }
 0x252   : > { %8723 = vst [vmem:[#allocation64_spill] sm:$0xff] %v7507_v16  ;;  %v7509_v56 = vpop.f32.mrf.mxu1  ;;  %v3838_v16 = vadd.f32 %v5245_v0, %v7398_v58  ;;  %v3841_v58 = vadd.f32 %v3728_v50, %v7419_v61  ;;  %v3643_v61 = vadd.f32 %v7471_v33, %v7449_v23  ;;  %v3847_v23 = vadd.f32 %v5254_v54, %v7428_v35 }
 0x253   : > { %8724 = vst [vmem:[#allocation59_spill] sm:$0xff] %v7509_v56  ;;  %v7511_v47 = vpop.f32.mrf.mxu0  ;;  %v3850_v33 = vadd.f32 %v5257_v11, %v7434_v51  ;;  %v3848_v50 = vadd.f32 %v7491_v4, %v7437_v36  ;;  %v3849_v51 = vadd.f32 %v7495_v15, %v7443_v25  ;;  %v3852_v54 = vadd.f32 %v7501_v62, %v7451_v26  ;;  %v8735_v11 = vld [vmem:[#allocation39_spill] sm:$0xff] }
 0x254   : > { %8725 = vst [vmem:[#allocation60_spill] sm:$0xff] %v7511_v47  ;;  %v7513_v17 = vpop.f32.mrf.mxu1  ;;  %v3836_v47 = vadd.f32 %v3709_v28, %v7401_v22  ;;  %v7544_v22 = vld [vmem:[%s8075_s5] ss:$0 sm:$0xff]  ;;  %v8741_v26 = vld [vmem:[#allocation43_spill] sm:$0xff] }
 0x255   : > { %8726 = vst [vmem:[#allocation63_spill] sm:$0xff] %v7513_v17  ;;  %v7515_v49 = vpop.f32.mrf.mxu0 }
 0x256   : > { %8727 = vst [vmem:[#allocation47_spill] sm:$0xff] %v7515_v49  ;;  %v7517_v38 = vpop.f32.mrf.mxu1  ;;  %v3839_v49 = vadd.f32 %v5246_v13, %v7404_v24  ;;  %v4132_v24 = vadd.f32 %v4005_v6, %v3836_v47  ;;  %v3846_v13 = vadd.f32 %v5253_v29, %v7422_v52  ;;  %v3646_v47 = vadd.f32 %v7477_v8, %v7457_v53 }
 0x257   : > { %8728 = vst [vmem:[#allocation69_spill] sm:$0xff] %v7517_v38  ;;  %v7519_v37 = vpop.f32.mrf.mxu0  ;;  %v3837_v38 = vadd.f32 %v3712_v14, %v7407_v9  ;;  %v3845_v53 = vadd.f32 %v3744_v34, %v7431_v20  ;;  %v3851_v6 = vadd.f32 %v7493_v43, %v7440_v57  ;;  %v4143_v57 = vadd.f32 %v7499_v60, %v3847_v23  ;;  %v8734_v34 = vld [vmem:[#allocation54_spill] sm:$0xff]  ;;  %v8738_v43 = vld [vmem:[#allocation51_spill] sm:$0xff] }
 0x258   : > { %8729 = vst [vmem:[#allocation67_spill] sm:$0xff] %v7519_v37  ;;  %v7521_v2 = vpop.f32.mrf.mxu1  ;;  %v3842_v37 = vadd.f32 %v5249_v40, %v7410_v12  ;;  %v4135_v0 = vadd.f32 %v5280_v45, %v3839_v49  ;;  %v3844_v12 = vadd.f32 %v3741_v1, %v7425_v7  ;;  %v4142_v49 = vadd.f32 %v5287_v19, %v3846_v13 }
 0x259   : > { %8730 = vst [vmem:[#allocation58_spill] sm:$0xff] %v7521_v2  ;;  %v7523_v31 = vpop.f32.mrf.mxu0  ;;  %v4134_v2 = vadd.f32 %v5279_v30, %v3838_v16  ;;  %v4133_v9 = vadd.f32 %v4008_v46, %v3837_v38  ;;  %v7560_v7 = vadd.f32 %v7544_v22, %v4132_v24  ;;  %v3854_v1 = vadd.f32 %v7497_v27, %v7446_v63  ;;  %v8744_v24 = vld [vmem:[#allocation45_spill] sm:$0xff] }
 0x25a   : > { %8731 = vst [vmem:[#allocation13_spill] sm:$0xff] %v7523_v31  ;;  %v7525_v48 = vpop.f32.mrf.mxu1  ;;  %v3840_v31 = vadd.f32 %v3725_v44, %v7413_v5  ;;  %v4138_v5 = vadd.f32 %v5283_v55, %v3842_v37  ;;  %v4137_v44 = vadd.f32 %v4024_v59, %v3841_v58  ;;  %v4140_v52 = vadd.f32 %v4037_v39, %v3844_v12  ;;  %v8737_v59 = vld [vmem:[#allocation64_spill] sm:$0xff] }
 0x25b   : > { %8732 = vst [vmem:[#allocation62_spill] sm:$0xff] %v7525_v48  ;;  %v7527_v21 = vpop.f32.mrf.mxu0  ;;  %v3843_v48 = vadd.f32 %v5250_v10, %v7416_v3  ;;  %v7555_v38 = vadd.f32 %v7544_v22, %v4134_v2  ;;  %v7590_v45 = vadd.f32 %v7544_v22, %v4142_v49  ;;  %v3855_v55 = vadd.f32 %v7505_v42, %v7454_v18  ;;  %v8740_v39 = vld [vmem:[#allocation60_spill] sm:$0xff] }
 0x25c   : > { %8733 = vst [vmem:[#allocation12_spill] sm:$0xff] %v7527_v21  ;;  %v7530_v56 = vpop.f32.mrf.mxu1  ;;  %v4136_v14 = vadd.f32 %v4021_v32, %v3840_v31  ;;  %v7563_v31 = vadd.f32 %v7544_v22, %v4135_v0  ;;  %v7571_v2 = vadd.f32 %v7544_v22, %v4138_v5  ;;  %v4263_v20 = vadd.f32 %v7544_v22, %v4137_v44  ;;  %v8739_v19 = vld [vmem:[#allocation63_spill] sm:$0xff] }
 0x25d   : > { %v7535_v17 = vpop.f32.mrf.mxu0  ;;  %v4139_v40 = vadd.f32 %v5284_v41, %v3843_v48  ;;  %v7567_v48 = vadd.f32 %v7544_v22, %v4133_v9  ;;  %v4266_v36 = vadd.f32 %v7544_v22, %v4140_v52  ;;  %v4141_v25 = vadd.f32 %v8734_v34, %v3845_v53  ;;  %v8736_v41 = vld [vmem:[#allocation59_spill] sm:$0xff] }
 0x25e   : > { %v3805_v21 = vpop.f32.mrf.mxu1  ;;  %v7575_v8 = vadd.f32 %v7544_v22, %v4136_v14  ;;  %v3853_v4 = vadd.f32 %v8736_v41, %v8735_v11  ;;  %v4146_v63 = vadd.f32 %v8737_v59, %v3850_v33  ;;  %v3858_v15 = vadd.f32 %v8739_v19, %v8738_v43  ;;  %v8742_v60 = vld [vmem:[#allocation69_spill] sm:$0xff]  ;;  %v8743_v18 = vld [vmem:[#allocation47_spill] sm:$0xff] }
 0x25f   : > { %v4072_v28 = vpop.f32.mrf.mxu0  ;;  %v7582_v35 = vadd.f32 %v7544_v22, %v4139_v40  ;;  %v4144_v27 = vadd.f32 %v8740_v39, %v3848_v50  ;;  %v3856_v62 = vadd.f32 %v8742_v60, %v8741_v26  ;;  %v4147_v42 = vadd.f32 %v8743_v18, %v3851_v6  ;;  %v8746_v13 = vld [vmem:[#allocation67_spill] sm:$0xff]  ;;  %v4176_v50 = vld [vmem:[%s8077_s7] sm:$0x1] }
 0x260   : > { %v7548_v3 = vpop.f32.mrf.mxu1  ;;  %v8745_v0 = vld [vmem:[#allocation58_spill] sm:$0xff]  ;;  %v4145_v12 = vadd.f32 %v8746_v13, %v3849_v51  ;;  %v3860_v53 = vadd.f32 %v3805_v21, %v3646_v47  ;;  %v4269_v6 = vadd.f32 %v7544_v22, %v4143_v57  ;;  %v4151_v34 = vadd.f32 %v7535_v17, %v3855_v55 }
 0x261   : > { %v5299_v16 = vpop.f32.mrf.mxu0  ;;  %v3859_v9 = vadd.f32 %v8745_v0, %v8744_v24  ;;  %v8748_v44 = vld [vmem:[#allocation13_spill] sm:$0xff]  ;;  %v4149_v51 = vadd.f32 %v4072_v28, %v3853_v4  ;;  %v4267_v21 = vadd.f32 %v7544_v22, %v4141_v25  ;;  %v4272_v47 = vadd.f32 %v7544_v22, %v4146_v63 }
 0x262   : > { %v7557_v10 = vpop.f32.mrf.mxu1  ;;  %v8747_v14 = vld [vmem:[#allocation62_spill] sm:$0xff]  ;;  %v4150_v49 = vadd.f32 %v8748_v44, %v3854_v1  ;;  %v4154_v11 = vadd.f32 %v5299_v16, %v3858_v15  ;;  %v4273_v57 = vadd.f32 %v7544_v22, %v4147_v42  ;;  %v4271_v17 = vadd.f32 %v7544_v22, %v4145_v12 }
 0x263   : > { %v4085_v37 = vpop.f32.mrf.mxu0  ;;  %v3857_v40 = vadd.f32 %v8747_v14, %v3643_v61  ;;  %v8749_v52 = vld [vmem:[#allocation12_spill] sm:$0xff]  ;;  %v4275_v55 = vadd.f32 %v7544_v22, %v4149_v51 }
 0x264   : > { %v7577_v30 = vpop.f32.mrf.mxu1  ;;  %v4148_v23 = vadd.f32 %v8749_v52, %v3852_v54  ;;  %v4152_v59 = vadd.f32 %v4085_v37, %v3856_v62  ;;  %v4270_v54 = vadd.f32 %v7544_v22, %v4144_v27  ;;  %v4276_v28 = vadd.f32 %v7544_v22, %v4150_v49 }
 0x265   : > { %v5300_v29 = vpop.f32.mrf.mxu0  ;;  %v4280_v25 = vadd.f32 %v7544_v22, %v4154_v11 }
 0x266   : > { %v7595_v46 = vpop.f32.mrf.mxu1  ;;  %v4155_v61 = vadd.f32 %v5300_v29, %v3859_v9  ;;  %v4274_v16 = vadd.f32 %v7544_v22, %v4148_v23  ;;  %v4277_v29 = vadd.f32 %v7544_v22, %v4151_v34  ;;  %v4278_v63 = vadd.f32 %v7544_v22, %v4152_v59 }
 0x267   : > { %v4088_v32 = vpop.f32.mrf.mxu0 }
 0x268   : > { %v7609_v58 = vpop.f32.mrf.mxu1  ;;  %v4153_v43 = vadd.f32 %v4088_v32, %v3857_v40  ;;  %v8750_v32 = vld [vmem:[#allocation2_spill] sm:$0xff]  ;;  %v4281_v15 = vadd.f32 %v7544_v22, %v4155_v61 }
 0x269   : > { %v7617_v5 = vpop.f32.mrf.mxu0 }
 0x26a   : > { %v7622_v33 = vpop.f32.mrf.mxu1  ;;  %v4279_v27 = vadd.f32 %v7544_v22, %v4153_v43  ;;  %v8751_v43 = vld [vmem:[#allocation55_spill] sm:$0xff] }
 0x26b   : > { %v4101_v41 = vpop.f32.mrf.mxu0 }
 0x26c   : > { %v4247_v1 = vpop.f32.mrf.mxu1  ;;  %v4156_v19 = vadd.f32 %v4101_v41, %v3860_v53 }
 0x26d   : > { %v4248_v39 = vadd.f32 %v4247_v1, %v4176_v50  ;;  %v5304_v61 = vpop.f32.mrf.mxu0  ;;  %v3862_v1 = vadd.f32 %v7530_v56, %v8751_v43 }
 0x26e   : > { %v5319_v37 = vpop.f32.mrf.mxu1  ;;  %v4282_v26 = vadd.f32 %v7544_v22, %v4156_v19  ;;  %v8752_v19 = vld [vmem:[#allocation53_spill] sm:$0xff] }
 0x26f   : > { %v7640_v4 = vrot.slane %v4248_v39, %v8750_v32  ;;  %v4158_v39 = vadd.f32 %v7617_v5, %v3862_v1  ;;  %v4104_v37 = vpop.f32.mrf.mxu0  ;;  %v8755_v5 = vld [vmem:[#allocation52_spill] sm:$0xff] }
 0x271   : > { %v7655_v60 = vadd.f32 %v7640_v4, %v7560_v7  ;;  %v7659_v62 = vadd.f32 %v7640_v4, %v7567_v48  ;;  %v7663_v18 = vadd.f32 %v7640_v4, %v7555_v38  ;;  %v7667_v42 = vadd.f32 %v7640_v4, %v7563_v31 }
 0x272   : > { %v7671_v24 = vadd.f32 %v7640_v4, %v7575_v8  ;;  %v7674_v7 = vadd.f32 %v7640_v4, %v4263_v20  ;;  %v7678_v48 = vadd.f32 %v7640_v4, %v7571_v2  ;;  %v7682_v38 = vadd.f32 %v7640_v4, %v7582_v35 }
 0x273   : > { %v7685_v31 = vadd.f32 %v7640_v4, %v4266_v36  ;;  %v7688_v8 = vadd.f32 %v7640_v4, %v4267_v21  ;;  %v7692_v20 = vadd.f32 %v7640_v4, %v7590_v45  ;;  %v7695_v0 = vadd.f32 %v7640_v4, %v4269_v6  ;;  %4327 = vst.msk [vmem:[%s7650_s24] sm:$0xff] %vm4326_vm13, %v7655_v60 }
 0x274   : > { %4328 = vst.msk [vmem:[%s7650_s24 + $0x8] sm:$0xff] %vm4326_vm13, %v7659_v62  ;;  %4329 = vst.msk [vmem:[%s7650_s24 + $0x10] sm:$0xff] %vm4326_vm13, %v7663_v18  ;;  %v7710_v2 = vadd.f32 %v7640_v4, %v4270_v54  ;;  %v7713_v35 = vadd.f32 %v7640_v4, %v4271_v17  ;;  %v7716_v45 = vadd.f32 %v7640_v4, %v4272_v47  ;;  %v4359_v53 = vsel %vm4326_vm13, %v7655_v60, 0.0 }
 0x275   : > { %4330 = vst.msk [vmem:[%s7650_s24 + $0x18] sm:$0xff] %vm4326_vm13, %v7667_v42  ;;  %v7719_v36 = vadd.f32 %v7640_v4, %v4273_v57  ;;  %4331 = vst.msk [vmem:[%s7650_s24 + $0x20] sm:$0xff] %vm4326_vm13, %v7671_v24  ;;  %v7734_v9 = vadd.f32 %v7640_v4, %v4274_v16  ;;  %v7737_v13 = vadd.f32 %v7640_v4, %v4275_v55  ;;  %v4360_v50 = vsel %vm4326_vm13, %v7659_v62, 0.0  ;;  %v8754_v55 = vld [vmem:[#allocation57_spill] sm:$0xff] }
 0x276   : > { %4332 = vst.msk [vmem:[%s7650_s24 + $0x28] sm:$0xff] %vm4326_vm13, %v7674_v7  ;;  %4333 = vst.msk [vmem:[%s7650_s24 + $0x30] sm:$0xff] %vm4326_vm13, %v7678_v48  ;;  %v7740_v12 = vadd.f32 %v7640_v4, %v4276_v28  ;;  %v7743_v14 = vadd.f32 %v7640_v4, %v4277_v29  ;;  %v7758_v40 = vadd.f32 %v7640_v4, %v4278_v63  ;;  %v4362_v34 = vsel %vm4326_vm13, %v7663_v18, 0.0  ;;  %v8753_v29 = vld [vmem:[#allocation48_spill] sm:$0xff] }
 0x277   : > { %4334 = vst.msk [vmem:[%s7650_s24 + $0x38] sm:$0xff] %vm4326_vm13, %v7682_v38  ;;  %4335 = vst.msk [vmem:[%s7650_s24 + $0x40] sm:$0xff] %vm4326_vm13, %v7685_v31  ;;  %v7761_v44 = vadd.f32 %v7640_v4, %v4279_v27  ;;  %v7764_v49 = vadd.f32 %v7640_v4, %v4280_v25  ;;  %v7767_v52 = vadd.f32 %v7640_v4, %v4281_v15  ;;  %v4364_v11 = vsel %vm4326_vm13, %v7667_v42, 0.0  ;;  %v8756_v15 = vld [vmem:[#allocation56_spill] sm:$0xff] }
 0x278   : > { %4336 = vst.msk [vmem:[%s7650_s24 + $0x48] sm:$0xff] %vm4326_vm13, %v7688_v8  ;;  %4337 = vst.msk [vmem:[%s7650_s24 + $0x50] sm:$0xff] %vm4326_vm13, %v7692_v20  ;;  %v7782_v23 = vadd.f32 %v7640_v4, %v4282_v26  ;;  %v4361_v6 = vadd.f32 %v4360_v50, %v4359_v53  ;;  %v4366_v59 = vsel %vm4326_vm13, %v7671_v24, 0.0  ;;  %v3863_v21 = vadd.f32 %v7548_v3, %v8752_v19 }
 0x279   : > { %4338 = vst.msk [vmem:[%s7650_s24 + $0x58] sm:$0xff] %vm4326_vm13, %v7695_v0  ;;  %4339 = vst.msk [vmem:[%s7650_s24 + $0x60] sm:$0xff] %vm4326_vm13, %v7710_v2  ;;  %v4368_v54 = vsel %vm4326_vm13, %v7674_v7, 0.0  ;;  %v4370_v28 = vsel %vm4326_vm13, %v7678_v48, 0.0  ;;  %v4430_v16 = vmul.f32 %v7655_v60, %v7655_v60  ;;  %v4431_v56 = vmul.f32 %v7659_v62, %v7659_v62  ;;  %v8757_v62 = vld [vmem:[#allocation61_spill] sm:$0xff] }
 0x27a   : > { %4340 = vst.msk [vmem:[%s7650_s24 + $0x68] sm:$0xff] %vm4326_vm13, %v7713_v35  ;;  %4341 = vst.msk [vmem:[%s7650_s24 + $0x70] sm:$0xff] %vm4326_vm13, %v7716_v45  ;;  %v4363_v51 = vadd.f32 %v4362_v34, %v4361_v6  ;;  %v4159_v17 = vadd.f32 %v5304_v61, %v3863_v21  ;;  %v3861_v3 = vadd.f32 %v7557_v10, %v8753_v29  ;;  %v4372_v26 = vsel %vm4326_vm13, %v7682_v38, 0.0 }
 0x27b   : > { %4342 = vst.msk [vmem:[%s7650_s24 + $0x78] sm:$0xff] %vm4326_vm13, %v7719_v36  ;;  %4343 = vst.msk [vmem:[%s7650_s24 + $0x80] sm:$0xff] %vm4326_vm13, %v7734_v9  ;;  %v3866_v25 = vadd.f32 %v7577_v30, %v8754_v55  ;;  %v3864_v63 = vadd.f32 %v7595_v46, %v8755_v5  ;;  %v7842_v27 = vadd.f32 %v7609_v58, %v8756_v15  ;;  %v4374_v46 = vsel %vm4326_vm13, %v7685_v31, 0.0 }
 0x27c   : > { %4344 = vst.msk [vmem:[%s7650_s24 + $0x88] sm:$0xff] %vm4326_vm13, %v7737_v13  ;;  %4345 = vst.msk [vmem:[%s7650_s24 + $0x90] sm:$0xff] %vm4326_vm13, %v7740_v12  ;;  %v4365_v41 = vadd.f32 %v4364_v11, %v4363_v51  ;;  %v4432_v60 = vmul.f32 %v7663_v18, %v7663_v18  ;;  %v7850_v10 = vadd.f32 %v7622_v33, %v8757_v62  ;;  %v4462_v6 = vsel %vm4326_vm13, %v4430_v16, 0.0  ;;  %v5307_v18 = vpop.f32.mrf.mxu0 }
 0x27d   : > { %4346 = vst.msk [vmem:[%s7650_s24 + $0x98] sm:$0xff] %vm4326_vm13, %v7743_v14  ;;  %4347 = vst.msk [vmem:[%s7650_s24 + $0xa0] sm:$0xff] %vm4326_vm13, %v7758_v40  ;;  %v4284_v30 = vadd.f32 %v7544_v22, %v4158_v39  ;;  %v4285_v50 = vadd.f32 %v7544_v22, %v4159_v17  ;;  %v4433_v58 = vmul.f32 %v7667_v42, %v7667_v42  ;;  %v4463_v34 = vsel %vm4326_vm13, %v4431_v56, 0.0 }
 0x27e   : > { %4348 = vst.msk [vmem:[%s7650_s24 + $0xa8] sm:$0xff] %vm4326_vm13, %v7761_v44  ;;  %4349 = vst.msk [vmem:[%s7650_s24 + $0xb0] sm:$0xff] %vm4326_vm13, %v7764_v49  ;;  %v4367_v47 = vadd.f32 %v4366_v59, %v4365_v41  ;;  %v4376_v33 = vsel %vm4326_vm13, %v7688_v8, 0.0  ;;  %v4464_v11 = vadd.f32 %v4463_v34, %v4462_v6  ;;  %v4157_v41 = vadd.f32 %v4104_v37, %v3861_v3  ;;  %v4117_v17 = vpop.f32.mrf.mxu0 }
 0x27f   : > { %4350 = vst.msk [vmem:[%s7650_s24 + $0xb8] sm:$0xff] %vm4326_vm13, %v7767_v52  ;;  %4351 = vst.msk [vmem:[%s7650_s24 + $0xc0] sm:$0xff] %vm4326_vm13, %v7782_v23  ;;  %v4378_v59 = vsel %vm4326_vm13, %v7692_v20, 0.0  ;;  %v4380_v61 = vsel %vm4326_vm13, %v7695_v0, 0.0  ;;  %v4434_v42 = vmul.f32 %v7671_v24, %v7671_v24  ;;  %v4465_v43 = vsel %vm4326_vm13, %v4432_v60, 0.0 }
 0x280   : > { %v4369_v57 = vadd.f32 %v4368_v54, %v4367_v47  ;;  %v4382_v19 = vsel %vm4326_vm13, %v7710_v2, 0.0  ;;  %v4384_v21 = vsel %vm4326_vm13, %v7713_v35, 0.0  ;;  %v4466_v47 = vadd.f32 %v4465_v43, %v4464_v11 }
 0x281   : > { %v4386_v54 = vsel %vm4326_vm13, %v7716_v45, 0.0  ;;  %v4435_v39 = vmul.f32 %v7674_v7, %v7674_v7  ;;  %v4467_v24 = vsel %vm4326_vm13, %v4433_v58, 0.0  ;;  %v4388_v16 = vsel %vm4326_vm13, %v7719_v36, 0.0 }
 0x282   : > { %v4371_v32 = vadd.f32 %v4370_v28, %v4369_v57  ;;  %v4454_v57 = vmul.f32 %v7782_v23, %v7782_v23  ;;  %v4390_v56 = vsel %vm4326_vm13, %v7734_v9, 0.0  ;;  %v4468_v37 = vadd.f32 %v4467_v24, %v4466_v47 }
 0x283   : > { %v4392_v29 = vsel %vm4326_vm13, %v7737_v13, 0.0  ;;  %v4436_v7 = vmul.f32 %v7678_v48, %v7678_v48  ;;  %v4437_v3 = vmul.f32 %v7682_v38, %v7682_v38  ;;  %v4469_v55 = vsel %vm4326_vm13, %v4434_v42, 0.0 }
 0x284   : > { %v4373_v53 = vadd.f32 %v4372_v26, %v4371_v32  ;;  %v4438_v5 = vmul.f32 %v7685_v31, %v7685_v31  ;;  %v4439_v15 = vmul.f32 %v7688_v8, %v7688_v8  ;;  %v4470_v26 = vadd.f32 %v4469_v55, %v4468_v37 }
 0x285   : > { %v4440_v60 = vmul.f32 %v7692_v20, %v7692_v20  ;;  %v4471_v62 = vsel %vm4326_vm13, %v4435_v39, 0.0  ;;  %v7899_v48 = vsel %vm4326_vm13, %v4454_v57, 0.0  ;;  %v7902_v38 = vadd.f32 %v7640_v4, %v4285_v50 }
 0x286   : > { %v4375_v51 = vadd.f32 %v4374_v46, %v4373_v53  ;;  %v5308_v53 = vpop.f32.mrf.mxu0  ;;  %v4472_v58 = vadd.f32 %v4471_v62, %v4470_v26  ;;  %v4283_v31 = vadd.f32 %v7544_v22, %v4157_v41  ;;  %v7906_v8 = vadd.f32 %v7640_v4, %v4284_v30 }
 0x287   : > { %v4473_v6 = vsel %vm4326_vm13, %v4436_v7, 0.0  ;;  %4354 = vst.msk [vmem:[%s7650_s24 + $0xd8] sm:$0xff] %vm4326_vm13, %v7902_v38  ;;  %v4457_v20 = vmul.f32 %v7902_v38, %v7902_v38  ;;  %v4162_v34 = vadd.f32 %v5307_v18, %v3866_v25  ;;  %v4160_v50 = vadd.f32 %v4117_v17, %v3864_v63 }
 0x288   : > { %v4377_v1 = vadd.f32 %v4376_v33, %v4375_v51  ;;  %v4474_v33 = vadd.f32 %v4473_v6, %v4472_v58  ;;  %v4475_v11 = vsel %vm4326_vm13, %v4437_v3, 0.0  ;;  %v7916_v41 = vadd.f32 %v7640_v4, %v4283_v31  ;;  %4353 = vst.msk [vmem:[%s7650_s24 + $0xd0] sm:$0xff] %vm4326_vm13, %v7906_v8  ;;  %v4120_v63 = vpop.f32.mrf.mxu0 }
 0x289   : > { %v7922_v30 = vsel %vm4326_vm13, %v4457_v20, 0.0  ;;  %v4286_v25 = vadd.f32 %v7544_v22, %v4160_v50  ;;  %v4477_v43 = vsel %vm4326_vm13, %v4438_v5, 0.0  ;;  %v4161_v17 = vadd.f32 %v4120_v63, %v7850_v10 }
 0x28a   : > { %v4379_v28 = vadd.f32 %v4378_v59, %v4377_v1  ;;  %v4456_v59 = vmul.f32 %v7906_v8, %v7906_v8  ;;  %v4476_v42 = vadd.f32 %v4475_v11, %v4474_v33  ;;  %4352 = vst.msk [vmem:[%s7650_s24 + $0xc8] sm:$0xff] %vm4326_vm13, %v7916_v41  ;;  %v4455_v1 = vmul.f32 %v7916_v41, %v7916_v41 }
 0x28b   : > { %v7941_v47 = vadd.f32 %v7640_v4, %v4286_v25  ;;  %v4479_v37 = vsel %vm4326_vm13, %v4439_v15, 0.0  ;;  %v4442_v55 = vmul.f32 %v7710_v2, %v7710_v2  ;;  %v4443_v2 = vmul.f32 %v7713_v35, %v7713_v35 }
 0x28c   : > { %v4381_v32 = vadd.f32 %v4380_v61, %v4379_v28  ;;  %v4288_v61 = vadd.f32 %v7544_v22, %v4162_v34  ;;  %v4478_v57 = vadd.f32 %v4477_v43, %v4476_v42  ;;  %v7945_v24 = vsel %vm4326_vm13, %v4455_v1, 0.0 }
 0x28d   : > { %v4441_v28 = vmul.f32 %v7695_v0, %v7695_v0  ;;  %4355 = vst.msk [vmem:[%s7650_s24 + $0xe0] sm:$0xff] %vm4326_vm13, %v7941_v47  ;;  %v4287_v0 = vadd.f32 %v7544_v22, %v4161_v17  ;;  %v4444_v6 = vmul.f32 %v7716_v45, %v7716_v45  ;;  %v4485_v35 = vsel %vm4326_vm13, %v4442_v55, 0.0 }
 0x28e   : > { %v4383_v46 = vadd.f32 %v4382_v19, %v4381_v32  ;;  %v7935_v19 = vsel %vm4326_vm13, %v4456_v59, 0.0  ;;  %v4480_v3 = vadd.f32 %v4479_v37, %v4478_v57  ;;  %v4481_v32 = vsel %vm4326_vm13, %v4440_v60, 0.0 }
 0x28f   : > { %v4483_v60 = vsel %vm4326_vm13, %v4441_v28, 0.0  ;;  %v4398_v33 = vsel %vm4326_vm13, %v7758_v40, 0.0  ;;  %v4445_v11 = vmul.f32 %v7719_v36, %v7719_v36  ;;  %v4487_v59 = vsel %vm4326_vm13, %v4443_v2, 0.0 }
 0x290   : > { %v4385_v51 = vadd.f32 %v4384_v21, %v4383_v46  ;;  %v7938_v21 = vadd.f32 %v7640_v4, %v4288_v61  ;;  %v4400_v63 = vsel %vm4326_vm13, %v7761_v44, 0.0  ;;  %v4489_v42 = vsel %vm4326_vm13, %v4444_v6, 0.0 }
 0x291   : > { %v4447_v36 = vmul.f32 %v7737_v13, %v7737_v13  ;;  %v4404_v28 = vsel %vm4326_vm13, %v7767_v52, 0.0  ;;  %v4449_v13 = vmul.f32 %v7743_v14, %v7743_v14  ;;  %v4450_v55 = vmul.f32 %v7758_v40, %v7758_v40 }
 0x292   : > { %v4387_v18 = vadd.f32 %v4386_v54, %v4385_v51  ;;  %v4163_v54 = vadd.f32 %v5308_v53, %v7842_v27  ;;  %4357 = vst.msk [vmem:[%s7650_s24 + $0xf0] sm:$0xff] %vm4326_vm13, %v7938_v21  ;;  %v4460_v7 = vmul.f32 %v7938_v21, %v7938_v21  ;;  %v4458_v27 = vmul.f32 %v7941_v47, %v7941_v47 }
 0x293   : > { %v7974_v53 = vadd.f32 %v7640_v4, %v4287_v0  ;;  %v4452_v40 = vmul.f32 %v7764_v49, %v7764_v49 }
 0x294   : > { %v4389_v39 = vadd.f32 %v4388_v16, %v4387_v18  ;;  %v4289_v10 = vadd.f32 %v7544_v22, %v4163_v54  ;;  %v7967_v5 = vsel %vm4326_vm13, %v4460_v7, 0.0  ;;  %v7970_v15 = vsel %vm4326_vm13, %v4458_v27, 0.0 }
 0x295   : > { %v4394_v22 = vsel %vm4326_vm13, %v7740_v12, 0.0  ;;  %4356 = vst.msk [vmem:[%s7650_s24 + $0xe8] sm:$0xff] %vm4326_vm13, %v7974_v53  ;;  %v4459_v20 = vmul.f32 %v7974_v53, %v7974_v53  ;;  %v4446_v18 = vmul.f32 %v7734_v9, %v7734_v9  ;;  %v4402_v54 = vsel %vm4326_vm13, %v7764_v49, 0.0 }
 0x296   : > { %v4391_v16 = vadd.f32 %v4390_v56, %v4389_v39  ;;  %v4482_v56 = vadd.f32 %v4481_v32, %v4480_v3  ;;  %v4325_v62 = vadd.f32 %v7640_v4, %v4289_v10  ;;  %v4396_v4 = vsel %vm4326_vm13, %v7743_v14, 0.0 }
 0x297   : > { %v4519_v45 = vsel %vm4326_vm13, %v4459_v20, 0.0  ;;  %v4491_v39 = vsel %vm4326_vm13, %v4445_v11, 0.0  ;;  %v4448_v9 = vmul.f32 %v7740_v12, %v7740_v12  ;;  %v4493_v37 = vsel %vm4326_vm13, %v4446_v18, 0.0 }
 0x298   : > { %v4393_v26 = vadd.f32 %v4392_v29, %v4391_v16  ;;  %v4484_v58 = vadd.f32 %v4483_v60, %v4482_v56  ;;  %4358 = vst.msk [vmem:[%s7650_s24 + $0xf8] sm:$0xff] %vm4326_vm13, %v4325_v62  ;;  %v7984_v29 = vsel %vm4326_vm13, %v4325_v62, 0.0  ;;  %v4461_v31 = vmul.f32 %v4325_v62, %v4325_v62 }
 0x299   : > { %v4406_v16 = vsel %vm4326_vm13, %v7782_v23, 0.0  ;;  %v4495_v3 = vsel %vm4326_vm13, %v4447_v36, 0.0  ;;  %v4497_v32 = vsel %vm4326_vm13, %v4448_v9, 0.0  ;;  %v4408_v12 = vsel %vm4326_vm13, %v7916_v41, 0.0 }
 0x29a   : > { %v4395_v46 = vadd.f32 %v4394_v22, %v4393_v26  ;;  %v4486_v50 = vadd.f32 %v4485_v35, %v4484_v58  ;;  %v7997_v51 = vsel %vm4326_vm13, %v4461_v31, 0.0  ;;  %v4451_v23 = vmul.f32 %v7761_v44, %v7761_v44 }
 0x29b   : > { %v4499_v62 = vsel %vm4326_vm13, %v4449_v13, 0.0  ;;  %v4410_v14 = vsel %vm4326_vm13, %v7906_v8, 0.0  ;;  %v4501_v60 = vsel %vm4326_vm13, %v4450_v55, 0.0  ;;  %v4412_v41 = vsel %vm4326_vm13, %v7902_v38, 0.0 }
 0x29c   : > { %v4397_v34 = vadd.f32 %v4396_v4, %v4395_v46  ;;  %v4488_v25 = vadd.f32 %v4487_v59, %v4486_v50  ;;  %v4453_v44 = vmul.f32 %v7767_v52, %v7767_v52  ;;  %v4503_v31 = vsel %vm4326_vm13, %v4451_v23, 0.0 }
 0x29d   : > { %v4414_v8 = vsel %vm4326_vm13, %v7941_v47, 0.0  ;;  %v4505_v35 = vsel %vm4326_vm13, %v4452_v40, 0.0  ;;  %v4416_v49 = vsel %vm4326_vm13, %v7974_v53, 0.0  ;;  %v4418_v52 = vsel %vm4326_vm13, %v7938_v21, 0.0 }
 0x29e   : > { %v4399_v61 = vadd.f32 %v4398_v33, %v4397_v34  ;;  %v4490_v1 = vadd.f32 %v4489_v42, %v4488_v25  ;;  %v4507_v38 = vsel %vm4326_vm13, %v4453_v44, 0.0 }
 0x2a0   : > { %v4401_v43 = vadd.f32 %v4400_v63, %v4399_v61  ;;  %v4492_v17 = vadd.f32 %v4491_v39, %v4490_v1 }
 0x2a2   : > { %v4403_v57 = vadd.f32 %v4402_v54, %v4401_v43  ;;  %v4494_v27 = vadd.f32 %v4493_v37, %v4492_v17 }
 0x2a4   : > { %v4405_v7 = vadd.f32 %v4404_v28, %v4403_v57  ;;  %v4496_v0 = vadd.f32 %v4495_v3, %v4494_v27 }
 0x2a6   : > { %v4407_v10 = vadd.f32 %v4406_v16, %v4405_v7  ;;  %v4498_v26 = vadd.f32 %v4497_v32, %v4496_v0 }
 0x2a8   : > { %v4409_v56 = vadd.f32 %v4408_v12, %v4407_v10  ;;  %v4500_v22 = vadd.f32 %v4499_v62, %v4498_v26 }
 0x2aa   : > { %v4411_v2 = vadd.f32 %v4410_v14, %v4409_v56  ;;  %v4502_v46 = vadd.f32 %v4501_v60, %v4500_v22 }
 0x2ac   : > { %v4413_v58 = vadd.f32 %v4412_v41, %v4411_v2  ;;  %v4504_v4 = vadd.f32 %v4503_v31, %v4502_v46 }
 0x2ae   : > { %v4415_v6 = vadd.f32 %v4414_v8, %v4413_v58  ;;  %v4506_v20 = vadd.f32 %v4505_v35, %v4504_v4 }
 0x2b0   : > { %v4417_v34 = vadd.f32 %v4416_v49, %v4415_v6  ;;  %v4508_v50 = vadd.f32 %v4507_v38, %v4506_v20 }
 0x2b2   : > { %v4419_v33 = vadd.f32 %v4418_v52, %v4417_v34  ;;  %v4510_v11 = vadd.f32 %v7899_v48, %v4508_v50 }
 0x2b4   : > { %v4421_v47 = vadd.f32 %v7984_v29, %v4419_v33  ;;  %v4512_v59 = vadd.f32 %v7945_v24, %v4510_v11 }
 0x2b6   : > { %v4422_v61 = vrot.slane %v4421_v47, 4  ;;  %v4514_v25 = vadd.f32 %v7935_v19, %v4512_v59 }
 0x2b8   : > { %v4423_v53 = vadd.f32 %v4422_v61, %v4421_v47  ;;  %v4516_v63 = vadd.f32 %v7922_v30, %v4514_v25 }
 0x2ba   : > { %v4424_v18 = vrot.slane %v4423_v53, 2  ;;  %v4518_v42 = vadd.f32 %v7970_v15, %v4516_v63 }
 0x2bc   : > { %v4425_v43 = vadd.f32 %v4424_v18, %v4423_v53  ;;  %v4520_v1 = vadd.f32 %v4519_v45, %v4518_v42 }
 0x2be   : > { %v4426_v21 = vrot.slane %v4425_v43, 1  ;;  %v4522_v24 = vadd.f32 %v7967_v5, %v4520_v1 }
 0x2c0   : > { %v4427_v48 = vadd.f32 %v4426_v21, %v4425_v43  ;;  %v4524_v19 = vadd.f32 %v7997_v51, %v4522_v24 }
 0x2c2   : > { %4429 = vst.msk [vmem:[%s441_s26] sm:$0x1] %vm4428_vm1, %v4427_v48  ;;  %v4525_v29 = vrot.slane %v4524_v19, 4 }
 0x2c4   : > { %v4526_v30 = vadd.f32 %v4525_v29, %v4524_v19 }
 0x2c6   : > { %v4527_v54 = vrot.slane %v4526_v30, 2 }
 0x2c8   : > { %v4528_v36 = vadd.f32 %v4527_v54, %v4526_v30 }
 0x2ca   : > { %v4529_v39 = vrot.slane %v4528_v36, 1 }
 0x2cc   : > { %v4530_v15 = vadd.f32 %v4529_v39, %v4528_v36 }
 0x2ce   : > { %4531 = vst.msk [vmem:[%s444_s29] sm:$0x1] %vm4428_vm1, %v4530_v15 }
 0x2cf PF: > { %s23_s21 = sadd.s32 1, %s5484_s21  }
 0x2d0   : > { %p20_p4 = scmp.ge.s32.totalorder %s23_s21, 4  }
 0x2d2   :  { %22 = sbr.rel (!%p20_p4) target bundleno = 1 (0x1), region = 125 }

// kernel: resnet_block_forward.5
= control target key start
LH: loop header
LB: loop body
LE: loop exit
PB: predicated region body
PF: predicated region fallthrough
CT: control target
= control target key end

     0   :  { %s5492_s13 = smov 0   ;;  %s7743_s0 = inlined_call_operand.vmem [shape: f32[2,1,8], index: 0, kind: input, shape index: {}]   ;;  %s7744_s1 = inlined_call_operand.vmem [shape: f32[2,1,8], index: 1, kind: input, shape index: {}]   ;;  %s7745_s2 = inlined_call_operand.vmem [shape: f32[1,8], index: 2, kind: input, shape index: {}]   ;;  %s7746_s3 = inlined_call_operand.vmem [shape: f32[1,8], index: 3, kind: input, shape index: {}]   ;;  %s7747_s4 = inlined_call_operand.vmem [shape: bf16[9,8,8], index: 4, kind: input, shape index: {}]   ;;  %s7748_s5 = inlined_call_operand.vmem [shape: f32[1,8], index: 5, kind: input, shape index: {}]   ;;  %s7749_s6 = inlined_call_operand.vmem [shape: bf16[4,8], index: 6, kind: input, shape index: {}]   ;;  %s7750_s7 = inlined_call_operand.vmem [shape: f32[1,8], index: 7, kind: input, shape index: {}]   ;;  %s7751_s8 = inlined_call_operand.vmem [shape: f32[2,256,8], index: 8, kind: input, shape index: {}]   ;;  %s7752_s9 = inlined_call_operand.vmem [shape: f32[2,256,4], index: 9, kind: input, shape index: {}]   ;;  %s7753_s10 = inlined_call_operand.vmem [shape: f32[2,256,8], index: 10, kind: output, shape index: {}]  }
   0x1 LB: > { %s4548_s14 = sadd.s32 4294967295, %s5432_s13   ;;  %p4552_p0 = scmp.ge.s32.totalorder %s5432_s13, 1  ;;  %s5432_s13 = sphi %s5492_s13, %s20_s13  }
   0x2   : > { %p322_p1 = scmp.lt.s32.totalorder %s5432_s13, 3 }
   0x4   : > { %p323_p2 = pnand %p4552_p0, %p322_p1 }
   0x6   : > { %326 = sbr.rel (%p323_p2) target bundleno = 649 (0x289), region = 60 }
   0xb   : > { %v1457_v0 = vld [vmem:[%s7747_s4] sm:$0xf]  ;;  %vm7780_vm0 = vcmask 1043456   ;;  %v4591_v1 = vld [vmem:[%s7747_s4 + $0x4] sm:$0xf]  ;;  %vm383_vm1 = vcmask 57344   ;;  %v436_v22 = vlaneseq }
   0xc   : > { %5276 = vmatprep.subr.msk.bf16.mxu1 %vm7780_vm0, %v1457_v0  ;;  %v1871_v2 = vsel %vm7780_vm0, %v1457_v0, 0  ;;  %5275 = vmatprep.subr.msk.bf16.mxu0 %vm7780_vm0, %v4591_v1  ;;  %v1660_v3 = vsel %vm7780_vm0, %v4591_v1, 0  ;;  %v381_v4 = vld [vmem:[%s7743_s0] sm:$0x1]  ;;  %v5434_v5 = vmov 0.0|0.0   ;;  %p365_p3 = scmp.lt.s32.totalorder %s4548_s14, 1 }
   0xd   : > { %4970 = vmatpush3.bf16.msra.mxu1 %v1871_v2  ;;  %4971 = vmatprep.mubr.bf16.mxu1 %v5434_v5  ;;  %v382_v6 = vld [vmem:[%s7743_s0 + $0x1] sm:$0x1]  ;;  %v384_v7 = vsel %vm383_vm1, %v381_v4, 0.0  ;;  %v387_v8 = vld [vmem:[%s7744_s1] sm:$0x1]  ;;  %v5540_v23 = vshrl.u32 %v436_v22, 7 }
   0xe   : > { %4936 = vmatpush3.bf16.msra.mxu0 %v1660_v3  ;;  %v385_v9 = vsel %vm383_vm1, %v382_v6, 0.0  ;;  %v388_v10 = vld [vmem:[%s7744_s1 + $0x1] sm:$0x1]  ;;  %v389_v11 = vsel %vm383_vm1, %v387_v8, 0.0  ;;  %v5525_v16 = vld [vmem:[%s7747_s4 + $0x8] sm:$0xf] }
   0xf   : > { %v386_v12 = vadd.f32 %v385_v9, %v384_v7  ;;  %v390_v13 = vsel %vm383_vm1, %v388_v10, 0.0  ;;  %v5530_v17 = vld [vmem:[%s7747_s4 + $0xc] sm:$0xf]  ;;  %5277 = vmatprep.subr.msk.bf16.mxu0 %vm7780_vm0, %v5525_v16  ;;  %s8524_s14 = smov (!%p365_p3, %s4548_s14), 1  ;;  %v392_v24 = vld [vmem:[%s7745_s2] sm:$0x1] }
  0x10   : > { %v391_v14 = vadd.f32 %v390_v13, %v389_v11  ;;  %5278 = vmatprep.subr.msk.bf16.mxu1 %vm7780_vm0, %v5530_v17  ;;  %s5542_s11 = sshll.u32 %s8524_s14, 8  ;;  %v438_v25 = vsub.s32 0, %v5540_v23  ;;  %v393_v27 = vld [vmem:[%s7746_s3] sm:$0x1]  ;;  %v5580_v51 = vadd.s32 16, %v5540_v23  ;;  %vm7811_vm2 = vcmask 1040384  }
  0x11   : > { %v394_v15 = vmul.f32 0.001953125, %v386_v12  ;;  %s5551_s18 = scalar_lea.vmem %s7751_s8, %s5542_s11  ;;  %vm7789_vm5 = vcmask 64512   ;;  %vm7786_vm7 = vsmask.f32 7424  ;;  %vm7785_vm14 = vcmask 1045504   ;;  %s7004_s17 = scalar_lea.vmem %s7752_s9, %s5542_s11 }
  0x12   : > { %v395_v18 = vmul.f32 0.001953125, %v391_v14  ;;  %v403_v29 = vld [vmem:[%s5551_s18] sm:$0xff]  ;;  %v404_v30 = vld [vmem:[%s5551_s18 + $0x8] sm:$0xff]  ;;  %v405_v31 = vld [vmem:[%s5551_s18 + $0x10] sm:$0xff]  ;;  %s7531_s23 = scalar_lea.vmem %s7753_s10, %s5542_s11 }
  0x13   : > { %v396_v19 = vmul.f32 %v394_v15, %v394_v15  ;;  %v406_v33 = vld [vmem:[%s5551_s18 + $0x18] sm:$0xff]  ;;  %v407_v34 = vld [vmem:[%s5551_s18 + $0x20] sm:$0xff]  ;;  %v408_v36 = vld [vmem:[%s5551_s18 + $0x28] sm:$0xff] }
  0x14   : > { %v409_v37 = vld [vmem:[%s5551_s18 + $0x30] sm:$0xff]  ;;  %v410_v42 = vld [vmem:[%s5551_s18 + $0x38] sm:$0xff]  ;;  %v411_v43 = vld [vmem:[%s5551_s18 + $0x40] sm:$0xff] }
  0x15   : > { %v397_v20 = vsub.f32 %v395_v18, %v396_v19  ;;  %v412_v49 = vld [vmem:[%s5551_s18 + $0x48] sm:$0xff]  ;;  %v413_v50 = vld [vmem:[%s5551_s18 + $0x50] sm:$0xff]  ;;  %v414_v58 = vld [vmem:[%s5551_s18 + $0x58] sm:$0xff] }
  0x16   : > { %v415_v63 = vld [vmem:[%s5551_s18 + $0x60] sm:$0xff]  ;;  %v416_v0 = vld [vmem:[%s5551_s18 + $0x68] sm:$0xff]  ;;  %v417_v8 = vld [vmem:[%s5551_s18 + $0x70] sm:$0xff] }
  0x17   : > { %v398_v21 = vadd.f32 1e-05, %v397_v20  ;;  %v418_v12 = vld [vmem:[%s5551_s18 + $0x78] sm:$0xff] }
  0x19   : > { %5296 = vrsqrt.f32 %v398_v21 }
  0x26   : > { %v5297_v26 = vpop.eup %5296 }
  0x27   : > { %v400_v28 = vmul.f32 %v5297_v26, %v392_v24 }
  0x29   : > { %v401_v32 = vmul.f32 %v400_v28, %v394_v15  ;;  %v5562_v35 = vrot.slane %v400_v28, %v438_v25 }
  0x2b   : > { %7927 = vst [vmem:[#allocation2_spill] sm:$0xff] %v5562_v35  ;;  %v402_v38 = vsub.f32 %v393_v27, %v401_v32  ;;  %v441_v39 = vmul.f32 %v5562_v35, %v403_v29  ;;  %v442_v40 = vmul.f32 %v5562_v35, %v404_v30  ;;  %v443_v41 = vmul.f32 %v5562_v35, %v405_v31 }
  0x2c   : > { %v444_v44 = vmul.f32 %v5562_v35, %v406_v33  ;;  %v445_v45 = vmul.f32 %v5562_v35, %v407_v34  ;;  %v446_v46 = vmul.f32 %v5562_v35, %v408_v36  ;;  %v447_v48 = vmul.f32 %v5562_v35, %v409_v37 }
  0x2d   : > { %v5574_v47 = vrot.slane %v402_v38, %v438_v25  ;;  %v448_v52 = vmul.f32 %v5562_v35, %v410_v42  ;;  %v449_v53 = vmul.f32 %v5562_v35, %v411_v43  ;;  %v450_v61 = vmul.f32 %v5562_v35, %v412_v49 }
  0x2e   : > { %v451_v62 = vmul.f32 %v5562_v35, %v413_v50  ;;  %v452_v7 = vmul.f32 %v5562_v35, %v414_v58  ;;  %v453_v11 = vmul.f32 %v5562_v35, %v415_v63  ;;  %v454_v15 = vmul.f32 %v5562_v35, %v416_v0 }
  0x2f   : > { %v5585_v54 = vadd.f32 %v5574_v47, %v441_v39  ;;  %v5588_v55 = vadd.f32 %v5574_v47, %v442_v40  ;;  %v5591_v56 = vadd.f32 %v5574_v47, %v443_v41  ;;  %v5594_v57 = vadd.f32 %v5574_v47, %v444_v44  ;;  %v419_v44 = vld [vmem:[%s5551_s18 + $0x80] sm:$0xff] }
  0x30   : > { %v5598_v59 = vadd.f32 %v5574_v47, %v445_v45  ;;  %v5601_v60 = vadd.f32 %v5574_v47, %v446_v46  ;;  %v5611_v4 = vadd.f32 %v5574_v47, %v447_v48  ;;  %v5615_v6 = vadd.f32 %v5574_v47, %v448_v52  ;;  %v420_v48 = vld [vmem:[%s5551_s18 + $0x88] sm:$0xff] }
  0x31   : > { %v4559_v1 = vmul.f32 -1.442695, %v5585_v54  ;;  %v4560_v2 = vmul.f32 -1.442695, %v5588_v55  ;;  %v4561_v3 = vmul.f32 -1.442695, %v5591_v56  ;;  %v5621_v10 = vadd.f32 %v5574_v47, %v449_v53 }
  0x32   : > { %v4562_v5 = vmul.f32 -1.442695, %v5594_v57  ;;  %v4563_v9 = vmul.f32 -1.442695, %v5598_v59  ;;  %v4564_v13 = vmul.f32 -1.442695, %v5601_v60  ;;  %v5627_v14 = vadd.f32 %v5574_v47, %v450_v61 }
  0x33   : > { %5298 = vpow2.f32 %v4559_v1  ;;  %v4565_v18 = vmul.f32 -1.442695, %v5611_v4  ;;  %v5632_v19 = vadd.f32 %v5574_v47, %v451_v62  ;;  %v455_v20 = vmul.f32 %v5562_v35, %v417_v8  ;;  %v421_v53 = vld [vmem:[%s5551_s18 + $0x90] sm:$0xff]  ;;  %v422_v62 = vld [vmem:[%s5551_s18 + $0x98] sm:$0xff] }
  0x34   : > { %5300 = vpow2.f32 %v4560_v2  ;;  %v4566_v21 = vmul.f32 -1.442695, %v5615_v6  ;;  %v5637_v22 = vadd.f32 %v5574_v47, %v452_v7  ;;  %v456_v24 = vmul.f32 %v5562_v35, %v418_v12 }
  0x35   : > { %5302 = vpow2.f32 %v4561_v3  ;;  %v4567_v25 = vmul.f32 -1.442695, %v5621_v10  ;;  %v5642_v26 = vadd.f32 %v5574_v47, %v453_v11  ;;  %v917_v27 = vand.u32 15, %v5580_v51 }
  0x36   : > { %5304 = vpow2.f32 %v4562_v5  ;;  %v4568_v28 = vmul.f32 -1.442695, %v5627_v14  ;;  %v5647_v29 = vadd.f32 %v5574_v47, %v454_v15  ;;  %v5435_v30 = vmov 0  }
  0x37   : > { %5306 = vpow2.f32 %v4563_v9  ;;  %v5649_v31 = vrot.slane %v5435_v30, 1  ;;  %v4569_v32 = vmul.f32 -1.442695, %v5632_v19  ;;  %v5653_v33 = vadd.f32 %v5574_v47, %v455_v20  ;;  %v423_v9 = vld [vmem:[%s5551_s18 + $0xa0] sm:$0xff] }
  0x38   : > { %5308 = vpow2.f32 %v4564_v13  ;;  %v5656_v34 = vadd.s32 32, %v5540_v23  ;;  %v4570_v36 = vmul.f32 -1.442695, %v5637_v22  ;;  %v5660_v37 = vadd.f32 %v5574_v47, %v456_v24  ;;  %v431_v24 = vld [vmem:[%s5551_s18 + $0xe0] sm:$0xff] }
  0x39   : > { %7928 = vst [vmem:[#allocation3_spill] sm:$0xff] %v5649_v31  ;;  %5310 = vpow2.f32 %v4565_v18  ;;  %v5664_v38 = vsel %vm7780_vm0, %v5525_v16, 0  ;;  %v5667_v39 = vadd.s32 48, %v5540_v23  ;;  %v4571_v40 = vmul.f32 -1.442695, %v5642_v26  ;;  %v424_v18 = vld [vmem:[%s5551_s18 + $0xa8] sm:$0xff] }
  0x3a   : > { %5312 = vpow2.f32 %v4566_v21  ;;  %v5671_v41 = vadd.s32 64, %v5540_v23  ;;  %v5674_v42 = vadd.s32 80, %v5540_v23  ;;  %v4572_v43 = vmul.f32 -1.442695, %v5647_v29 }
  0x3b   : > { %5314 = vpow2.f32 %v4567_v25  ;;  %v5680_v16 = vsel %vm7780_vm0, %v5530_v17, 0  ;;  %v5683_v45 = vadd.s32 96, %v5540_v23  ;;  %v4573_v46 = vmul.f32 -1.442695, %v5653_v33 }
  0x3c   : > { %5316 = vpow2.f32 %v4568_v28  ;;  %v931_v49 = vand.u32 15, %v5656_v34  ;;  %v5689_v50 = vadd.s32 112, %v5540_v23  ;;  %v4574_v52 = vmul.f32 -1.442695, %v5660_v37  ;;  %v425_v28 = vld [vmem:[%s5551_s18 + $0xb0] sm:$0xff] }
  0x3d   : > { %5318 = vpow2.f32 %v4569_v32  ;;  %v5695_v58 = vadd.s32 128, %v5540_v23  ;;  %v457_v61 = vmul.f32 %v5562_v35, %v419_v44  ;;  %v458_v2 = vmul.f32 %v5562_v35, %v420_v48  ;;  %v427_v44 = vld [vmem:[%s5551_s18 + $0xc0] sm:$0xff] }
  0x3e   : > { %5320 = vpow2.f32 %v4570_v36  ;;  %v459_v8 = vmul.f32 %v5562_v35, %v421_v53  ;;  %v460_v15 = vmul.f32 %v5562_v35, %v422_v62  ;;  %v462_v53 = vmul.f32 %v5562_v35, %v424_v18 }
  0x3f   : > { %5322 = vpow2.f32 %v4571_v40  ;;  %v5710_v25 = vadd.f32 %v5574_v47, %v457_v61  ;;  %v5714_v36 = vadd.f32 %v5574_v47, %v458_v2  ;;  %v461_v40 = vmul.f32 %v5562_v35, %v423_v9 }
  0x40   : > { %v5299_v63 = vpop.eup %5298  ;;  %5324 = vpow2.f32 %v4572_v43  ;;  %v426_v43 = vld [vmem:[%s5551_s18 + $0xb8] sm:$0xff]  ;;  %v463_v2 = vmul.f32 %v5562_v35, %v425_v28  ;;  %vm5752_vm3 = vcmp.gt.s32.totalorder %v917_v27, 0  ;;  %vm5771_vm4 = vcmp.gt.s32.totalorder %v931_v49, 0 }
  0x41   : > { %v5301_v3 = vpop.eup %5300  ;;  %v607_v5 = vadd.f32 1.0, %v5299_v63  ;;  %5326 = vpow2.f32 %v4573_v46  ;;  %v5724_v63 = vadd.f32 %v5574_v47, %v460_v15  ;;  %v5734_v15 = vadd.f32 %v5574_v47, %v461_v40 }
  0x42   : > { %v5303_v11 = vpop.eup %5302  ;;  %v608_v12 = vadd.f32 1.0, %v5301_v3  ;;  %5328 = vpow2.f32 %v4574_v52  ;;  %v5720_v52 = vadd.f32 %v5574_v47, %v459_v8  ;;  %v428_v3 = vld [vmem:[%s5551_s18 + $0xc8] sm:$0xff]  ;;  %v5747_v40 = vadd.f32 %v5574_v47, %v463_v2 }
  0x43   : > { %v5305_v20 = vpop.eup %5304  ;;  %v609_v21 = vadd.f32 1.0, %v5303_v11  ;;  %5330 = vrcp.f32 %v607_v5  ;;  %7929 = vst [vmem:[#allocation4_spill] sm:$0xff] %v5724_v63  ;;  %v464_v11 = vmul.f32 %v5562_v35, %v426_v43  ;;  %7930 = vst [vmem:[#allocation5_spill] sm:$0xff] %v5734_v15  ;;  %v466_v43 = vmul.f32 %v5562_v35, %v428_v3 }
  0x44   : > { %v5307_v30 = vpop.eup %5306  ;;  %v610_v32 = vadd.f32 1.0, %v5305_v20  ;;  %5332 = vrcp.f32 %v608_v12  ;;  %v465_v12 = vmul.f32 %v5562_v35, %v427_v44  ;;  %v5731_v20 = vmul.f32 -1.442695, %v5710_v25  ;;  %7932 = vst [vmem:[#allocation7_spill] sm:$0xff] %v5747_v40 }
  0x45   : > { %v5309_v46 = vpop.eup %5308  ;;  %v611_v48 = vadd.f32 1.0, %v5307_v30  ;;  %5334 = vrcp.f32 %v609_v21  ;;  %v5737_v30 = vmul.f32 -1.442695, %v5714_v36  ;;  %v5757_v3 = vadd.f32 %v5574_v47, %v464_v11 }
  0x46   : > { %v5311_v61 = vpop.eup %5310  ;;  %5336 = vrcp.f32 %v610_v32  ;;  %v612_v62 = vadd.f32 1.0, %v5309_v46  ;;  %v5740_v32 = vadd.f32 %v5574_v47, %v462_v53  ;;  %v5764_v51 = vmul.f32 -1.442695, %v5724_v63 }
  0x47   : > { %v5313_v5 = vpop.eup %5312  ;;  %5338 = vrcp.f32 %v611_v48  ;;  %v613_v9 = vadd.f32 1.0, %v5311_v61  ;;  %v5744_v48 = vmul.f32 -1.442695, %v5720_v52  ;;  %v429_v61 = vld [vmem:[%s5551_s18 + $0xd0] sm:$0xff]  ;;  %7936 = vst [vmem:[#allocation9_spill] sm:$0xff] %v5757_v3  ;;  %v7938_v11 = vmov 0 }
  0x48   : > { %v5315_v8 = vpop.eup %5314  ;;  %5340 = vrcp.f32 %v612_v62  ;;  %v614_v18 = vadd.f32 1.0, %v5313_v5  ;;  %7931 = vst [vmem:[#allocation6_spill] sm:$0xff] %v5740_v32  ;;  %v7933_v5 = vmov 0  ;;  %v5767_v27 = vmul.f32 -1.442695, %v5734_v15 }
  0x49   : > { %v5317_v21 = vpop.eup %5316  ;;  %v615_v28 = vadd.f32 1.0, %v5315_v8  ;;  %5342 = vrcp.f32 %v613_v9  ;;  %v7934_v5 = vsel %vm5752_vm3, 4294967295, %v7933_v5  ;;  %v5760_v9 = vadd.f32 %v5574_v47, %v465_v12  ;;  %v430_v8 = vld [vmem:[%s5551_s18 + $0xd8] sm:$0xff] }
  0x4a   : > { %v5319_v44 = vpop.eup %5318  ;;  %v616_v46 = vadd.f32 1.0, %v5317_v21  ;;  %7935 = vst [vmem:[#allocation8_spill] sm:$0xff] %v7934_v5  ;;  %5344 = vrcp.f32 %v614_v18  ;;  %v7939_v11 = vsel %vm5771_vm4, 4294967295, %v7938_v11  ;;  %v5784_v34 = vmul.f32 -1.442695, %v5747_v40 }
  0x4b   : > { %v5321_v62 = vpop.eup %5320  ;;  %v617_v53 = vadd.f32 1.0, %v5319_v44  ;;  %7937 = vst [vmem:[#allocation10_spill] sm:$0xff] %v5760_v9  ;;  %5346 = vrcp.f32 %v615_v28  ;;  %7940 = vst [vmem:[#allocation11_spill] sm:$0xff] %v7939_v11  ;;  %v5776_v44 = vmul.f32 -1.442695, %v5740_v32  ;;  %v5779_v28 = vadd.f32 %v5574_v47, %v466_v43 }
  0x4c   : > { %v5323_v2 = vpop.eup %5322  ;;  %v618_v21 = vadd.f32 1.0, %v5321_v62  ;;  %v467_v62 = vmul.f32 %v5562_v35, %v429_v61  ;;  %5348 = vrcp.f32 %v616_v46  ;;  %v468_v49 = vmul.f32 %v5562_v35, %v430_v8  ;;  %v433_v61 = vld [vmem:[%s5551_s18 + $0xf0] sm:$0xff] }
  0x4d   : > { %v5325_v18 = vpop.eup %5324  ;;  %v619_v12 = vadd.f32 1.0, %v5323_v2  ;;  %v432_v2 = vld [vmem:[%s5551_s18 + $0xe8] sm:$0xff]  ;;  %5350 = vrcp.f32 %v617_v53  ;;  %v5789_v17 = vmul.f32 -1.442695, %v5757_v3  ;;  %v5792_v43 = vmul.f32 -1.442695, %v5760_v9 }
  0x4e   : > { %v5327_v13 = vpop.eup %5326  ;;  %v620_v7 = vadd.f32 1.0, %v5325_v18  ;;  %v7941_v46 = vand.u32 15, %v5667_v39  ;;  %v7942_v18 = vmov 0  ;;  %5352 = vrcp.f32 %v618_v21 }
  0x4f   : > { %v5329_v1 = vpop.eup %5328  ;;  %v621_v0 = vadd.f32 1.0, %v5327_v13  ;;  %v5802_v40 = vmul.f32 %v5562_v35, %v431_v24  ;;  %v5805_v13 = vadd.s32 24, %v5540_v23  ;;  %5354 = vrcp.f32 %v619_v12 }
  0x50   : > { %v5331_v32 = vpop.eup %5330  ;;  %vm5797_vm6 = vcmp.gt.s32.totalorder %v7941_v46, 0  ;;  %v622_v8 = vadd.f32 1.0, %v5329_v1  ;;  %v5809_v3 = vadd.f32 %v5574_v47, %v467_v62  ;;  %v5812_v39 = vmul.f32 %v5562_v35, %v432_v2 }
  0x51   : > { %v7943_v18 = vsel %vm5797_vm6, 4294967295, %v7942_v18  ;;  %v5333_v53 = vpop.eup %5332  ;;  %v703_v9 = vmul.f32 %v5331_v32, %v5585_v54  ;;  %5356 = vrcp.f32 %v620_v7  ;;  %v5816_v1 = vadd.f32 %v5574_v47, %v468_v49 }
  0x52   : > { %7944 = vst [vmem:[#allocation12_spill] sm:$0xff] %v7943_v18  ;;  %v5335_v46 = vpop.eup %5334  ;;  %v704_v21 = vmul.f32 %v5333_v53, %v5588_v55  ;;  %v5819_v24 = vmul.f32 %v5562_v35, %v433_v61  ;;  %5358 = vrcp.f32 %v621_v0  ;;  %v7946_v0 = vmov 0 }
  0x53   : > { %v5337_v15 = vpop.eup %5336  ;;  %v705_v54 = vmul.f32 %v5335_v46, %v5591_v56  ;;  %v768_v32 = vrot.slane %v703_v9, 7  ;;  %5360 = vrcp.f32 %v622_v8  ;;  %v7945_v56 = vand.u32 15, %v5671_v41 }
  0x54   : > { %v5339_v62 = vpop.eup %5338  ;;  %v706_v2 = vmul.f32 %v5337_v15, %v5594_v57  ;;  %v769_v63 = vrot.slane %v704_v21, 7  ;;  %5362 = vpow2.f32 %v5731_v20  ;;  %v7959_v35 = vmov 0 }
  0x55   : > { %v5341_v7 = vpop.eup %5340  ;;  %v707_v49 = vmul.f32 %v5339_v62, %v5598_v59  ;;  %v771_v61 = vrot.slane %v705_v54, 7  ;;  %v5827_v53 = vsel %vm7811_vm2, 0.0, %v768_v32  ;;  %vm5831_vm8 = vcmp.gt.s32.totalorder %v7945_v56, 0 }
  0x56   : > { %v7947_v0 = vsel %vm5831_vm8, 4294967295, %v7946_v0  ;;  %v5837_v57 = vsel %vm7811_vm2, %v768_v32, %v769_v63  ;;  %v773_v15 = vrot.slane %v706_v2, 7  ;;  %v1411_v59 = vsel %vm5752_vm3, %v5827_v53, 0.0  ;;  %v5343_v8 = vpop.eup %5342 }
  0x57   : > { %7948 = vst [vmem:[#allocation13_spill] sm:$0xff] %v7947_v0  ;;  %v708_v9 = vmul.f32 %v5341_v7, %v5601_v60  ;;  %v5844_v46 = vsel %vm7811_vm2, %v769_v63, %v771_v61  ;;  %v775_v41 = vrot.slane %v707_v49, 7  ;;  %v1442_v21 = vpack.c.bf16 %v5837_v57, %v1411_v59  ;;  %v5345_v20 = vpop.eup %5344  ;;  %v5860_v63 = vld [vmem:[%s7747_s4 + $0x14] sm:$0xf] }
  0x58   : > { %7949 = vst [vmem:[#allocation14_spill] sm:$0xff] %v5844_v46  ;;  %5364 = vpow2.f32 %v5737_v30  ;;  %v5849_v54 = vsel %vm7811_vm2, %v771_v61, %v773_v15  ;;  %v1458_v32 = vpack.c.bf16 %v5837_v57, %v5827_v53  ;;  %v1413_v60 = vsel %vm5771_vm4, %v5844_v46, 0.0  ;;  %7951 = vst [vmem:[#allocation16_spill] sm:$0xff] %v5860_v63  ;;  %v5347_v62 = vpop.eup %5346 }
  0x59   : > { %7950 = vst [vmem:[#allocation15_spill] sm:$0xff] %v5849_v54  ;;  %5366 = vpow2.f32 %v5744_v48  ;;  %v5863_v30 = vsel %vm7811_vm2, %v773_v15, %v775_v41  ;;  %4972 = vmatmul.mubr.msk.bf16.vlgmr.msra.gmra.mxu1 %vm7789_vm5, %v1442_v21  ;;  %v1459_v7 = vpack.c.bf16 %v5849_v54, %v5844_v46  ;;  %v1443_v49 = vpack.c.bf16 %v5849_v54, %v1413_v60  ;;  %v5349_v2 = vpop.eup %5348 }
  0x5a   : > { %7952 = vst [vmem:[#allocation17_spill] sm:$0xff] %v5863_v30  ;;  %v7953_v48 = vand.u32 15, %v5674_v42  ;;  %v7954_v61 = vmov 0  ;;  %v1485_v15 = vshll.u32 %v1458_v32, 16  ;;  %v1489_v59 = vshrl.u32 %v1458_v32, 16  ;;  %5038 = vmatpush3.bf16.msra.mxu1 %v5680_v16  ;;  %v5351_v56 = vpop.eup %5350 }
  0x5b   : > { %v777_v21 = vrot.slane %v708_v9, 7  ;;  %v1493_v55 = vshll.u32 %v1459_v7, 16  ;;  %4975 = vmatprep.mubr.msk.bf16.mxu1 %vm7789_vm5, %v1443_v49  ;;  %v1415_v42 = vsel %vm5797_vm6, %v5863_v30, 0.0  ;;  %v1497_v60 = vshrl.u32 %v1459_v7, 16  ;;  %5280 = vmatprep.subr.msk.bf16.mxu1 %vm7780_vm0, %v5860_v63  ;;  %v5353_v7 = vpop.eup %5352 }
  0x5c   : > { %vm5872_vm9 = vcmp.gt.s32.totalorder %v7953_v48, 0  ;;  %v709_v48 = vmul.f32 %v5343_v8, %v5611_v4  ;;  %v1487_v12 = vrot.slane %v1485_v15, 1  ;;  %v710_v16 = vmul.f32 %v5345_v20, %v5615_v6 }
  0x5d   : > { %v7955_v61 = vsel %vm5872_vm9, 4294967295, %v7954_v61  ;;  %v5888_v32 = vsel %vm7811_vm2, %v775_v41, %v777_v21  ;;  %v711_v9 = vmul.f32 %v5347_v62, %v5621_v10  ;;  %v7958_v49 = vand.u32 15, %v5683_v45  ;;  %v5355_v41 = vpop.eup %5354 }
  0x5e   : > { %7956 = vst [vmem:[#allocation18_spill] sm:$0xff] %v7955_v61  ;;  %7957 = vst [vmem:[#allocation19_spill] sm:$0xff] %v5888_v32  ;;  %v1495_v4 = vrot.slane %v1493_v55, 1  ;;  %v1444_v8 = vpack.c.bf16 %v5888_v32, %v1415_v42  ;;  %v1460_v15 = vpack.c.bf16 %v5888_v32, %v5863_v30  ;;  %v779_v18 = vrot.slane %v709_v48, 7  ;;  %v5357_v55 = vpop.eup %5356 }
  0x5f   : > { %vm5894_vm10 = vcmp.gt.s32.totalorder %v7958_v49, 0  ;;  %v1488_v6 = vsel %vm7786_vm7, %v5649_v31, %v1487_v12  ;;  %v1491_v20 = vor.u32 %v1489_v59, %v1487_v12  ;;  %v781_v10 = vrot.slane %v710_v16, 7  ;;  %v5359_v31 = vpop.eup %5358  ;;  %v5926_v59 = vld [vmem:[%s7747_s4 + $0x10] sm:$0xf] }
  0x60   : > { %v7960_v35 = vsel %vm5894_vm10, 4294967295, %v7959_v35  ;;  %v712_v45 = vmul.f32 %v5349_v2, %v5627_v14  ;;  %v7962_v62 = vand.u32 15, %v5689_v50  ;;  %v7963_v49 = vmov 0  ;;  %4937 = vmatprep.mubr.msk.bf16.mxu0 %vm7789_vm5, %v1488_v6  ;;  %v8069_v5 = vld [vmem:[#allocation16_spill] sm:$0xff] }
  0x61   : > { %7961 = vst [vmem:[#allocation20_spill] sm:$0xff] %v7960_v35  ;;  %v1499_v42 = vor.u32 %v1497_v60, %v1495_v4  ;;  %v1501_v63 = vshll.u32 %v1460_v15, 16  ;;  %v5912_v48 = vsel %vm7811_vm2, %v777_v21, %v779_v18  ;;  %v1505_v32 = vshrl.u32 %v1460_v15, 16  ;;  %v5361_v21 = vpop.eup %5360  ;;  %4976 = vmatmul.mubr.msk.bf16.gmra.mxu1 %vm7789_vm5, %v1444_v8 }
  0x62   : > { %vm5906_vm11 = vcmp.gt.s32.totalorder %v7962_v62, 0  ;;  %7966 = vst [vmem:[#allocation22_spill] sm:$0xff] %v5912_v48  ;;  %v5915_v12 = vsel %vm7786_vm7, %v1491_v20, %v1495_v4  ;;  %v5918_v14 = vsel %vm7811_vm2, %v779_v18, %v781_v10  ;;  %v1417_v50 = vsel %vm5831_vm8, %v5912_v48, 0.0  ;;  %v5363_v15 = vpop.eup %5362 }
  0x63   : > { %v7964_v49 = vsel %vm5906_vm11, 4294967295, %v7963_v49  ;;  %7967 = vst [vmem:[#allocation23_spill] sm:$0xff] %v5915_v12  ;;  %7968 = vst [vmem:[#allocation24_spill] sm:$0xff] %v5918_v14  ;;  %v783_v2 = vrot.slane %v711_v9, 7  ;;  %4938 = vmatmul.mubr.msk.bf16.vlgmr.msra.gmra.mxu0 %vm7789_vm5, %v5915_v12  ;;  %v1503_v60 = vrot.slane %v1501_v63, 1  ;;  %v1461_v18 = vpack.c.bf16 %v5918_v14, %v5912_v48 }
  0x64   : > { %7965 = vst [vmem:[#allocation21_spill] sm:$0xff] %v7964_v49  ;;  %v1445_v16 = vpack.c.bf16 %v5918_v14, %v1417_v50  ;;  %v785_v4 = vrot.slane %v712_v45, 7  ;;  %5004 = vmatpush3.bf16.msra.mxu0 %v5664_v38  ;;  %v713_v6 = vmul.f32 %v5351_v56, %v5632_v19  ;;  %v714_v20 = vmul.f32 %v5353_v7, %v5637_v22 }
  0x65   : > { %v5936_v9 = vsel %vm7811_vm2, %v781_v10, %v783_v2  ;;  %v715_v62 = vmul.f32 %v5355_v41, %v5642_v26  ;;  %v5942_v63 = vsel %vm7786_vm7, %v1499_v42, %v1503_v60  ;;  %v1507_v8 = vor.u32 %v1505_v32, %v1503_v60  ;;  %5279 = vmatprep.subr.msk.bf16.mxu0 %vm7780_vm0, %v5926_v59  ;;  %v5365_v38 = vpop.eup %5364 }
  0x66   : > { %7969 = vst [vmem:[#allocation25_spill] sm:$0xff] %v5936_v9  ;;  %7970 = vst [vmem:[#allocation26_spill] sm:$0xff] %v5942_v63  ;;  %v1509_v12 = vshll.u32 %v1461_v18, 16  ;;  %4979 = vmatprep.mubr.msk.bf16.mxu1 %vm7789_vm5, %v1445_v16  ;;  %v5946_v45 = vsel %vm7811_vm2, %v783_v2, %v785_v4  ;;  %4941 = vmatprep.mubr.msk.bf16.mxu0 %vm7789_vm5, %v5942_v63  ;;  %v1419_v19 = vsel %vm5872_vm9, %v5936_v9, 0.0  ;;  %v1513_v26 = vshrl.u32 %v1461_v18, 16  ;;  %v5367_v42 = vpop.eup %5366 }
  0x67   : > { %7971 = vst [vmem:[#allocation27_spill] sm:$0xff] %v5946_v45  ;;  %v1462_v22 = vpack.c.bf16 %v5946_v45, %v5936_v9  ;;  %v787_v56 = vrot.slane %v713_v6, 7  ;;  %v7972_v32 = vand.u32 15, %v5695_v58  ;;  %v7973_v7 = vmov 0 }
  0x68   : > { %v7976_v41 = vand.u32 15, %v5540_v23  ;;  %v7977_v10 = vmov 0  ;;  %v1511_v50 = vrot.slane %v1509_v12, 1  ;;  %v1446_v2 = vpack.c.bf16 %v5946_v45, %v1419_v19 }
  0x69   : > { %vm5959_vm12 = vcmp.gt.s32.totalorder %v7972_v32, 0  ;;  %v789_v60 = vrot.slane %v714_v20, 7  ;;  %v716_v18 = vmul.f32 %v5357_v55, %v5647_v29  ;;  %v1517_v16 = vshll.u32 %v1462_v22, 16 }
  0x6a   : > { %v7974_v7 = vsel %vm5959_vm12, 4294967295, %v7973_v7  ;;  %vm5965_vm13 = vcmp.gt.s32.totalorder %v7976_v41, 0  ;;  %v5972_v58 = vsel %vm7811_vm2, %v785_v4, %v787_v56  ;;  %v1521_v6 = vshrl.u32 %v1462_v22, 16  ;;  %4980 = vmatmul.mubr.msk.bf16.gmra.mxu1 %vm7789_vm5, %v1446_v2 }
  0x6b   : > { %7975 = vst [vmem:[#allocation28_spill] sm:$0xff] %v7974_v7  ;;  %v7978_v10 = vsel %vm5965_vm13, 4294967295, %v7977_v10  ;;  %7980 = vst [vmem:[#allocation30_spill] sm:$0xff] %v5972_v58  ;;  %v791_v32 = vrot.slane %v715_v62, 7  ;;  %v5975_v63 = vsel %vm7786_vm7, %v1507_v8, %v1511_v50  ;;  %v1515_v41 = vor.u32 %v1513_v26, %v1511_v50 }
  0x6c   : > { %7979 = vst [vmem:[#allocation29_spill] sm:$0xff] %v7978_v10  ;;  %7981 = vst [vmem:[#allocation31_spill] sm:$0xff] %v5975_v63  ;;  %v5978_v61 = vsel %vm7811_vm2, %v787_v56, %v789_v60  ;;  %v1421_v12 = vsel %vm5894_vm10, %v5972_v58, 0.0  ;;  %v1519_v20 = vrot.slane %v1517_v16, 1  ;;  %4942 = vmatmul.mubr.msk.bf16.gmra.mxu0 %vm7789_vm5, %v5975_v63  ;;  %v793_v62 = vrot.slane %v716_v18, 7 }
  0x6d   : > { %7982 = vst [vmem:[#allocation32_spill] sm:$0xff] %v5978_v61  ;;  %v1463_v29 = vpack.c.bf16 %v5978_v61, %v5972_v58  ;;  %v1447_v55 = vpack.c.bf16 %v5978_v61, %v1421_v12  ;;  %v5987_v4 = vsel %vm7811_vm2, %v789_v60, %v791_v32  ;;  %v717_v19 = vmul.f32 %v5359_v31, %v5653_v33 }
  0x6e   : > { %7983 = vst [vmem:[#allocation33_spill] sm:$0xff] %v5987_v4  ;;  %v1423_v8 = vsel %vm5906_vm11, %v5987_v4, 0.0  ;;  %v5997_v22 = vmul.f32 %v5361_v21, %v5660_v37  ;;  %v6000_v26 = vsel %vm7786_vm7, %v1515_v41, %v1519_v20  ;;  %v1523_v56 = vor.u32 %v1521_v6, %v1519_v20 }
  0x6f   : > { %7984 = vst [vmem:[#allocation34_spill] sm:$0xff] %v6000_v26  ;;  %v1525_v50 = vshll.u32 %v1463_v29, 16  ;;  %4983 = vmatprep.mubr.msk.bf16.mxu1 %vm7789_vm5, %v1447_v55  ;;  %v1529_v60 = vshrl.u32 %v1463_v29, 16  ;;  %4945 = vmatprep.mubr.msk.bf16.mxu0 %vm7789_vm5, %v6000_v26  ;;  %v6006_v2 = vsel %vm7811_vm2, %v791_v32, %v793_v62  ;;  %v795_v18 = vrot.slane %v717_v19, 7 }
  0x70   : > { %7985 = vst [vmem:[#allocation35_spill] sm:$0xff] %v6006_v2  ;;  %v797_v31 = vrot.slane %v5997_v22, 7  ;;  %v623_v33 = vadd.f32 1.0, %v5363_v15  ;;  %v1448_v21 = vpack.c.bf16 %v6006_v2, %v1423_v8  ;;  %v1464_v16 = vpack.c.bf16 %v6006_v2, %v5987_v4 }
  0x71   : > { %v1527_v37 = vrot.slane %v1525_v50, 1  ;;  %v624_v6 = vadd.f32 1.0, %v5365_v38  ;;  %v6013_v41 = vsel %vm7811_vm2, %v793_v62, %v795_v18  ;;  %v625_v32 = vadd.f32 1.0, %v5367_v42 }
  0x72   : > { %7986 = vst [vmem:[#allocation36_spill] sm:$0xff] %v6013_v41  ;;  %v6018_v12 = vsel %vm7811_vm2, %v795_v18, %v797_v31  ;;  %5368 = vrcp.f32 %v623_v33  ;;  %v1533_v29 = vshll.u32 %v1464_v16, 16  ;;  %v1537_v38 = vshrl.u32 %v1464_v16, 16  ;;  %4984 = vmatmul.mubr.msk.bf16.gmra.mxu1 %vm7789_vm5, %v1448_v21 }
  0x73   : > { %7987 = vst [vmem:[#allocation37_spill] sm:$0xff] %v6018_v12  ;;  %v6021_v20 = vsel %vm7786_vm7, %v1523_v56, %v1527_v37  ;;  %v1531_v15 = vor.u32 %v1529_v60, %v1527_v37  ;;  %v6025_v55 = vpack.c.bf16 %v6018_v12, %v6013_v41  ;;  %v1425_v62 = vsel %vm5959_vm12, %v6013_v41, 0.0 }
  0x74   : > { %7988 = vst [vmem:[#allocation38_spill] sm:$0xff] %v6021_v20  ;;  %5370 = vrcp.f32 %v624_v6  ;;  %v2491_v8 = vsel %vm5965_vm13, %v5827_v53, 0.0  ;;  %v1535_v42 = vrot.slane %v1533_v29, 1  ;;  %v1449_v56 = vpack.c.bf16 %v6018_v12, %v1425_v62  ;;  %4946 = vmatmul.mubr.msk.bf16.gmra.mxu0 %vm7789_vm5, %v6021_v20 }
  0x75   : > { %v1541_v19 = vshll.u32 %v6025_v55, 16  ;;  %v7989_v50 = vand.u32 15, %v5805_v13  ;;  %v7990_v60 = vmov 0  ;;  %5372 = vpow2.f32 %v5764_v51 }
  0x76   : > { %v6046_v18 = vpack.c.bf16 %v5837_v57, %v2491_v8  ;;  %v7773_v33 = vrot.slane %v5827_v53, 2  ;;  %v7772_v37 = vrot.slane %v5844_v46, 2  ;;  %v6051_v13 = vsel %vm7786_vm7, %v1531_v15, %v1535_v42  ;;  %4987 = vmatprep.mubr.msk.bf16.mxu1 %vm7789_vm5, %v1449_v56 }
  0x77   : > { %vm6037_vm15 = vcmp.lt.s32.totalorder %v7989_v50, 15  ;;  %7993 = vst [vmem:[#allocation40_spill] sm:$0xff] %v6051_v13  ;;  %v1539_v16 = vor.u32 %v1537_v38, %v1535_v42  ;;  %v1543_v6 = vrot.slane %v1541_v19, 1  ;;  %5374 = vrcp.f32 %v625_v32  ;;  %4949 = vmatprep.mubr.msk.bf16.mxu0 %vm7789_vm5, %v6051_v13 }
  0x78   : > { %v7991_v60 = vsel %vm6037_vm15, 4294967295, %v7990_v60  ;;  %5376 = vpow2.f32 %v5767_v27  ;;  %v6059_v51 = vadd.f32 %v5574_v47, %v5802_v40  ;;  %v7994_v21 = vrot.slane %v5837_v57, 2 }
  0x79   : > { %7992 = vst [vmem:[#allocation39_spill] sm:$0xff] %v7991_v60  ;;  %v885_v27 = vadd.s32 144, %v5540_v23  ;;  %5378 = vpow2.f32 %v5776_v44  ;;  %v4584_v40 = vmul.f32 -1.442695, %v5779_v28  ;;  %v6080_v38 = vadd.f32 %v5574_v47, %v5812_v39 }
  0x7a   : > { %v6066_v15 = vsel %vm7785_vm14, %v7773_v33, %v7994_v21  ;;  %v7995_v32 = vmov %v7994_v21  ;;  %5380 = vpow2.f32 %v5784_v34  ;;  %v4585_v62 = vmul.f32 -1.442695, %v5809_v3 }
  0x7b   : > { %v6073_v29 = vsel %vm7785_vm14, %v7995_v32, %v7772_v37  ;;  %v6086_v57 = vadd.f32 %v5574_v47, %v5819_v24  ;;  %v6092_v44 = vsel %vm7786_vm7, %v1539_v16, %v1543_v6  ;;  %5382 = vpow2.f32 %v5789_v17 }
  0x7c   : > { %v2200_v8 = vsel %vm6037_vm15, %v6073_v29, 0.0  ;;  %7996 = vst [vmem:[#allocation41_spill] sm:$0xff] %v6092_v44  ;;  %v4586_v39 = vmul.f32 -1.442695, %v5816_v1  ;;  %5384 = vpow2.f32 %v5792_v43  ;;  %v4587_v34 = vmul.f32 -1.442695, %v6059_v51  ;;  %4950 = vmatmul.mubr.msk.bf16.gmra.mxu0 %vm7789_vm5, %v6092_v44 }
  0x7d   : > { %v6097_v42 = vpack.c.bf16 %v2200_v8, %v6066_v15  ;;  %5386 = vpow2.f32 %v4584_v40  ;;  %v4588_v24 = vmul.f32 -1.442695, %v6080_v38  ;;  %v1029_v19 = vand.u32 15, %v885_v27 }
  0x7e   : > { %5388 = vpow2.f32 %v4585_v62  ;;  %v4589_v56 = vmul.f32 -1.442695, %v6086_v57  ;;  %v7997_v32 = vmov 0  ;;  %v887_v10 = vadd.s32 160, %v5540_v23 }
  0x7f   : > { %v5369_v17 = vpop.eup %5368  ;;  %5390 = vpow2.f32 %v4586_v39  ;;  %vm6109_vm1 = vcmp.gt.s32.totalorder %v1029_v19, 0  ;;  %vm8027_vm15 = vcmask 64512   ;;  %v2129_v49 = vrot.slane %v6006_v2, 2 }
  0x80   : > { %v719_v50 = vmul.f32 %v5369_v17, %v5710_v25  ;;  %5392 = vpow2.f32 %v4587_v34  ;;  %v7998_v32 = vsel %vm6109_vm1, 4294967295, %v7997_v32  ;;  %v1545_v34 = vshrl.u32 %v6025_v55, 16 }
  0x81   : > { %v5371_v16 = vpop.eup %5370  ;;  %5394 = vpow2.f32 %v4588_v24  ;;  %7999 = vst [vmem:[#allocation42_spill] sm:$0xff] %v7998_v32 }
  0x82   : > { %v6107_v43 = vmul.f32 %v5371_v16, %v5714_v36  ;;  %v799_v21 = vrot.slane %v719_v50, 7  ;;  %5396 = vpow2.f32 %v4589_v56  ;;  %v5373_v27 = vpop.eup %5372  ;;  %v1547_v37 = vor.u32 %v1545_v34, %v1543_v6 }
  0x83   : > { %v626_v8 = vadd.f32 1.0, %v5373_v27 }
  0x84   : > { %v5375_v40 = vpop.eup %5374  ;;  %v6116_v62 = vsel %vm7811_vm2, %v797_v31, %v799_v21  ;;  %v7774_v25 = vrot.slane %v6107_v43, 7 }
  0x85   : > { %8000 = vst [vmem:[#allocation43_spill] sm:$0xff] %v6116_v62  ;;  %v5377_v39 = vpop.eup %5376  ;;  %v1427_v36 = vsel %vm6109_vm1, %v6116_v62, 0.0  ;;  %5398 = vrcp.f32 %v626_v8  ;;  %v721_v6 = vmul.f32 %v5375_v40, %v5720_v52 }
  0x86   : > { %v5379_v24 = vpop.eup %5378  ;;  %v6126_v19 = vsel %vm7811_vm2, %v799_v21, %v7774_v25  ;;  %v627_v22 = vadd.f32 1.0, %v5377_v39 }
  0x87   : > { %8001 = vst [vmem:[#allocation44_spill] sm:$0xff] %v6126_v19  ;;  %v5381_v31 = vpop.eup %5380  ;;  %v1450_v56 = vpack.c.bf16 %v6126_v19, %v1427_v36  ;;  %v6131_v17 = vpack.c.bf16 %v6126_v19, %v6116_v62  ;;  %v628_v50 = vadd.f32 1.0, %v5379_v24  ;;  %v803_v52 = vrot.slane %v721_v6, 7 }
  0x88   : > { %v5383_v16 = vpop.eup %5382  ;;  %5400 = vrcp.f32 %v627_v22  ;;  %v629_v27 = vadd.f32 1.0, %v5381_v31  ;;  %v8007_v6 = vrot.slane %v6107_v43, 7  ;;  %v8011_v43 = vmov 0 }
  0x89   : > { %v5385_v55 = vpop.eup %5384  ;;  %4988 = vmatmul.mubr.msk.bf16.gmra.mxu1 %vm7789_vm5, %v1450_v56  ;;  %v1549_v21 = vshll.u32 %v6131_v17, 16  ;;  %5402 = vrcp.f32 %v628_v50  ;;  %v630_v39 = vadd.f32 1.0, %v5383_v16 }
  0x8a   : > { %v5387_v8 = vpop.eup %5386  ;;  %5404 = vrcp.f32 %v629_v27  ;;  %v631_v33 = vadd.f32 1.0, %v5385_v55  ;;  %v1043_v27 = vand.u32 15, %v887_v10  ;;  %v889_v55 = vadd.s32 176, %v5540_v23 }
  0x8b   : > { %v5389_v36 = vpop.eup %5388  ;;  %v1551_v25 = vrot.slane %v1549_v21, 1  ;;  %v632_v44 = vadd.f32 1.0, %v5387_v8  ;;  %5406 = vrcp.f32 %v630_v39  ;;  %v891_v21 = vadd.s32 192, %v5540_v23 }
  0x8c   : > { %v5391_v24 = vpop.eup %5390  ;;  %v633_v22 = vadd.f32 1.0, %v5389_v36  ;;  %5408 = vrcp.f32 %v631_v33  ;;  %v895_v33 = vadd.s32 224, %v5540_v23  ;;  %vm6146_vm0 = vcmp.gt.s32.totalorder %v1043_v27, 0 }
  0x8d   : > { %v5393_v31 = vpop.eup %5392  ;;  %v6137_v13 = vsel %vm7786_vm7, %v1547_v37, %v1551_v25  ;;  %v634_v34 = vadd.f32 1.0, %v5391_v24  ;;  %5410 = vrcp.f32 %v632_v44  ;;  %v893_v37 = vadd.s32 208, %v5540_v23  ;;  %v8006_v24 = vld [vmem:[#allocation4_spill] sm:$0xff] }
  0x8e   : > { %8002 = vst [vmem:[#allocation45_spill] sm:$0xff] %v6137_v13  ;;  %v5395_v56 = vpop.eup %5394  ;;  %4953 = vmatprep.mubr.msk.bf16.mxu0 %vm7789_vm5, %v6137_v13  ;;  %v635_v50 = vadd.f32 1.0, %v5393_v31  ;;  %5412 = vrcp.f32 %v633_v22  ;;  %v8003_v44 = vmov 0  ;;  %v1057_v10 = vand.u32 15, %v889_v55 }
  0x8f   : > { %v5397_v16 = vpop.eup %5396  ;;  %5414 = vrcp.f32 %v634_v34  ;;  %v636_v8 = vadd.f32 1.0, %v5395_v56  ;;  %v8004_v44 = vsel %vm6146_vm0, 4294967295, %v8003_v44  ;;  %v1071_v36 = vand.u32 15, %v891_v21  ;;  %v8009_v21 = vld [vmem:[#allocation5_spill] sm:$0xff] }
  0x90   : > { %5416 = vrcp.f32 %v635_v50  ;;  %v637_v40 = vadd.f32 1.0, %v5397_v16  ;;  %8005 = vst [vmem:[#allocation46_spill] sm:$0xff] %v8004_v44  ;;  %v1085_v13 = vand.u32 15, %v893_v37  ;;  %v897_v22 = vadd.s32 240, %v5540_v23 }
  0x91   : > { %5418 = vrcp.f32 %v636_v8  ;;  %v6155_v56 = vsel %vm7811_vm2, %v8007_v6, %v803_v52  ;;  %v1553_v50 = vshrl.u32 %v6131_v17, 16  ;;  %v1099_v16 = vand.u32 15, %v895_v33 }
  0x92   : > { %v5399_v39 = vpop.eup %5398  ;;  %8008 = vst [vmem:[#allocation4_spill] sm:$0xff] %v6155_v56  ;;  %v1429_v55 = vsel %vm6146_vm0, %v6155_v56, 0.0  ;;  %5420 = vrcp.f32 %v637_v40  ;;  %vm6163_vm14 = vcmp.gt.s32.totalorder %v1057_v10, 0  ;;  %vm6167_vm7 = vcmp.gt.s32.totalorder %v1071_v36, 0 }
  0x93   : > { %v722_v31 = vmul.f32 %v5399_v39, %v8006_v24  ;;  %v8010_v39 = vld [vmem:[#allocation6_spill] sm:$0xff]  ;;  %v8012_v43 = vsel %vm6163_vm14, 4294967295, %v8011_v43  ;;  %v8014_v6 = vmov 0  ;;  %vm6175_vm5 = vcmp.gt.s32.totalorder %v1085_v13, 0  ;;  %v8026_v13 = vld [vmem:[#allocation9_spill] sm:$0xff] }
  0x94   : > { %8013 = vst [vmem:[#allocation5_spill] sm:$0xff] %v8012_v43  ;;  %v8015_v6 = vsel %vm6167_vm7, 4294967295, %v8014_v6  ;;  %v1113_v40 = vand.u32 15, %v897_v22  ;;  %vm6182_vm13 = vcmp.gt.s32.totalorder %v1099_v16, 0  ;;  %vm8035_vm0 = vsmask.f32 7424 }
  0x95   : > { %v5401_v34 = vpop.eup %5400  ;;  %v805_v20 = vrot.slane %v722_v31, 7  ;;  %8016 = vst [vmem:[#allocation6_spill] sm:$0xff] %v8015_v6  ;;  %v8018_v31 = vld [vmem:[#allocation7_spill] sm:$0xff] }
  0x96   : > { %v5403_v27 = vpop.eup %5402  ;;  %v723_v37 = vmul.f32 %v5401_v34, %v8009_v21  ;;  %v8019_v34 = vmov 0 }
  0x97   : > { %v5405_v8 = vpop.eup %5404  ;;  %v724_v24 = vmul.f32 %v5403_v27, %v8010_v39  ;;  %v6172_v17 = vsel %vm7811_vm2, %v803_v52, %v805_v20  ;;  %v8020_v34 = vsel %vm6175_vm5, 4294967295, %v8019_v34  ;;  %v8022_v39 = vmov 0 }
  0x98   : > { %8017 = vst [vmem:[#allocation47_spill] sm:$0xff] %v6172_v17  ;;  %v807_v33 = vrot.slane %v723_v37, 7  ;;  %v725_v26 = vmul.f32 %v5405_v8, %v8018_v31  ;;  %8021 = vst [vmem:[#allocation7_spill] sm:$0xff] %v8020_v34  ;;  %v5407_v27 = vpop.eup %5406  ;;  %v1467_v10 = vpack.c.bf16 %v6172_v17, %v6155_v56  ;;  %v1451_v36 = vpack.c.bf16 %v6172_v17, %v1429_v55 }
  0x99   : > { %v809_v21 = vrot.slane %v724_v24, 7  ;;  %v8023_v39 = vsel %vm6182_vm13, 4294967295, %v8022_v39  ;;  %v5409_v52 = vpop.eup %5408  ;;  %v1555_v37 = vor.u32 %v1553_v50, %v1551_v25  ;;  %v726_v31 = vmul.f32 %v5407_v27, %v8026_v13  ;;  %v8030_v13 = vld [vmem:[#allocation10_spill] sm:$0xff] }
  0x9a   : > { %8024 = vst [vmem:[#allocation48_spill] sm:$0xff] %v8023_v39  ;;  %v6187_v8 = vsel %vm7811_vm2, %v805_v20, %v807_v33  ;;  %v811_v63 = vrot.slane %v725_v26, 7  ;;  %v5411_v22 = vpop.eup %5410  ;;  %v1557_v60 = vshll.u32 %v1467_v10, 16  ;;  %4991 = vmatprep.mubr.msk.bf16.mxu1 %vm8027_vm15, %v1451_v36  ;;  %v1561_v55 = vshrl.u32 %v1467_v10, 16 }
  0x9b   : > { %8025 = vst [vmem:[#allocation49_spill] sm:$0xff] %v6187_v8  ;;  %v6192_v44 = vsel %vm7811_vm2, %v807_v33, %v809_v21  ;;  %v1431_v16 = vsel %vm6163_vm14, %v6187_v8, 0.0  ;;  %v5413_v24 = vpop.eup %5412  ;;  %v813_v50 = vrot.slane %v726_v31, 7  ;;  %v727_v43 = vmul.f32 %v5409_v52, %v8030_v13 }
  0x9c   : > { %8028 = vst [vmem:[#allocation9_spill] sm:$0xff] %v6192_v44  ;;  %v1452_v25 = vpack.c.bf16 %v6192_v44, %v1431_v16  ;;  %v1468_v20 = vpack.c.bf16 %v6192_v44, %v6187_v8  ;;  %v6201_v26 = vsel %vm7811_vm2, %v809_v21, %v811_v63  ;;  %v5415_v27 = vpop.eup %5414  ;;  %v1559_v36 = vrot.slane %v1557_v60, 1 }
  0x9d   : > { %8029 = vst [vmem:[#allocation50_spill] sm:$0xff] %v6201_v26  ;;  %v1433_v33 = vsel %vm6167_vm7, %v6201_v26, 0.0  ;;  %v728_v10 = vmul.f32 %v5411_v22, %v5779_v28  ;;  %v5417_v17 = vpop.eup %5416  ;;  %v6210_v44 = vsel %vm7811_vm2, %v811_v63, %v813_v50  ;;  %v729_v31 = vmul.f32 %v5413_v24, %v5809_v3  ;;  %vm8037_vm2 = vmmov %vm8027_vm15 }
  0x9e   : > { %4992 = vmatmul.mubr.msk.bf16.gmra.mxu1 %vm8027_vm15, %v1452_v25  ;;  %v1565_v16 = vshll.u32 %v1468_v20, 16  ;;  %8031 = vst [vmem:[#allocation10_spill] sm:$0xff] %v6210_v44  ;;  %v1569_v21 = vshrl.u32 %v1468_v20, 16  ;;  %vm6213_vm14 = vcmp.gt.s32.totalorder %v1113_v40, 0  ;;  %v8032_v60 = vmov 0  ;;  %v5419_v40 = vpop.eup %5418  ;;  %vm8043_vm1 = vmmov %vm8037_vm2 }
  0x9f   : > { %v8033_v60 = vsel %vm6213_vm14, 4294967295, %v8032_v60  ;;  %v6218_v6 = vsel %vm8035_vm0, %v1555_v37, %v1559_v36  ;;  %v1563_v52 = vor.u32 %v1561_v55, %v1559_v36  ;;  %v1469_v28 = vpack.c.bf16 %v6210_v44, %v6201_v26 }
  0xa0   : > { %8034 = vst [vmem:[#allocation51_spill] sm:$0xff] %v8033_v60  ;;  %8036 = vst [vmem:[#allocation52_spill] sm:$0xff] %v6218_v6  ;;  %v1453_v22 = vpack.c.bf16 %v6210_v44, %v1433_v33  ;;  %4954 = vmatmul.mubr.msk.bf16.gmra.mxu0 %vm8027_vm15, %v6218_v6  ;;  %v1567_v63 = vrot.slane %v1565_v16, 1  ;;  %v815_v25 = vrot.slane %v727_v43, 7  ;;  %v817_v20 = vrot.slane %v728_v10, 7  ;;  %v5421_v10 = vpop.eup %5420 }
  0xa1   : > { %v730_v3 = vmul.f32 %v5415_v27, %v5816_v1  ;;  %v1573_v24 = vshll.u32 %v1469_v28, 16  ;;  %v1577_v37 = vshrl.u32 %v1469_v28, 16  ;;  %v819_v13 = vrot.slane %v729_v31, 7 }
  0xa2   : > { %4995 = vmatprep.mubr.msk.bf16.mxu1 %vm8037_vm2, %v1453_v22  ;;  %v731_v55 = vmul.f32 %v5417_v17, %v6059_v51  ;;  %v6229_v36 = vsel %vm8035_vm0, %v1563_v52, %v1567_v63  ;;  %v1571_v33 = vor.u32 %v1569_v21, %v1567_v63  ;;  %vm8039_vm7 = vcmask 1040384  }
  0xa3   : > { %8038 = vst [vmem:[#allocation53_spill] sm:$0xff] %v6229_v36  ;;  %v6232_v44 = vsel %vm8039_vm7, %v813_v50, %v815_v25  ;;  %vm8041_vm15 = vmmov %vm8039_vm7  ;;  %4957 = vmatprep.mubr.msk.bf16.mxu0 %vm8043_vm1, %v6229_v36  ;;  %v1575_v1 = vrot.slane %v1573_v24, 1  ;;  %v821_v16 = vrot.slane %v730_v3, 7  ;;  %v732_v31 = vmul.f32 %v5419_v40, %v6080_v38 }
  0xa4   : > { %8040 = vst [vmem:[#allocation54_spill] sm:$0xff] %v6232_v44  ;;  %v6235_v43 = vsel %vm8041_vm15, %v815_v25, %v817_v20  ;;  %v1435_v27 = vsel %vm6175_vm5, %v6232_v44, 0.0  ;;  %vm8044_vm2 = vmmov %vm8039_vm7  ;;  %v6260_v3 = vmul.f32 %v5421_v10, %v6086_v57  ;;  %v2151_v6 = vrot.slane %v6232_v44, 2 }
  0xa5   : > { %8042 = vst [vmem:[#allocation55_spill] sm:$0xff] %v6235_v43  ;;  %v1470_v51 = vpack.c.bf16 %v6235_v43, %v6232_v44  ;;  %v6245_v17 = vsel %vm8044_vm2, %v817_v20, %v819_v13  ;;  %v1454_v50 = vpack.c.bf16 %v6235_v43, %v1435_v27  ;;  %vm8046_vm7 = vmmov %vm8035_vm0  ;;  %v1579_v28 = vor.u32 %v1577_v37, %v1575_v1 }
  0xa6   : > { %8045 = vst [vmem:[#allocation56_spill] sm:$0xff] %v6245_v17  ;;  %v1437_v21 = vsel %vm6182_vm13, %v6245_v17, 0.0  ;;  %v6253_v52 = vsel %vm8046_vm7, %v1571_v33, %v1575_v1  ;;  %vm8048_vm0 = vmmov %vm8044_vm2  ;;  %v823_v20 = vrot.slane %v731_v55, 7  ;;  %v825_v24 = vrot.slane %v732_v31, 7 }
  0xa7   : > { %8047 = vst [vmem:[#allocation57_spill] sm:$0xff] %v6253_v52  ;;  %v1581_v22 = vshll.u32 %v1470_v51, 16  ;;  %v1585_v63 = vshrl.u32 %v1470_v51, 16  ;;  %4996 = vmatmul.mubr.msk.bf16.gmra.mxu1 %vm8043_vm1, %v1454_v50  ;;  %v6257_v25 = vsel %vm8048_vm0, %v819_v13, %v821_v16  ;;  %v868_v37 = vadd.s32 8, %v5540_v23  ;;  %vm8049_vm15 = vmmov %vm8043_vm1 }
  0xa8   : > { %v1471_v38 = vpack.c.bf16 %v6257_v25, %v6245_v17  ;;  %v1455_v40 = vpack.c.bf16 %v6257_v25, %v1437_v21  ;;  %4958 = vmatmul.mubr.msk.bf16.gmra.mxu0 %vm8049_vm15, %v6253_v52  ;;  %vm8050_vm2 = vmmov %vm8048_vm0  ;;  %v7824_v57 = vrot.slane %v6260_v3, 7  ;;  %vm8052_vm1 = vsmask.f32 7424 }
  0xa9   : > { %v1583_v27 = vrot.slane %v1581_v22, 1  ;;  %v6269_v33 = vsel %vm8050_vm2, %v821_v16, %v823_v20  ;;  %vm8051_vm7 = vmmov %vm8048_vm0 }
  0xaa   : > { %v6272_v13 = vsel %vm8051_vm7, %v823_v20, %v825_v24  ;;  %v1589_v1 = vshll.u32 %v1471_v38, 16  ;;  %vm8054_vm0 = vmmov %vm8049_vm15  ;;  %v1439_v51 = vsel %vm6213_vm14, %v6269_v33, 0.0  ;;  %v1593_v21 = vshrl.u32 %v1471_v38, 16 }
  0xab   : > { %v6276_v55 = vsel %vm8052_vm1, %v1579_v28, %v1583_v27  ;;  %v1587_v10 = vor.u32 %v1585_v63, %v1583_v27  ;;  %4999 = vmatprep.mubr.msk.bf16.mxu1 %vm8054_vm0, %v1455_v40  ;;  %vm8055_vm15 = vmmov %vm8054_vm0  ;;  %v1456_v50 = vpack.c.bf16 %v6272_v13, %v1439_v51  ;;  %v1472_v16 = vpack.c.bf16 %v6272_v13, %v6269_v33 }
  0xac   : > { %8053 = vst [vmem:[#allocation58_spill] sm:$0xff] %v6276_v55  ;;  %4961 = vmatprep.mubr.msk.bf16.mxu0 %vm8055_vm15, %v6276_v55  ;;  %v6290_v31 = vsel %vm8050_vm2, %v825_v24, %v7824_v57  ;;  %v1591_v28 = vrot.slane %v1589_v1, 1  ;;  %v910_v63 = vand.u32 15, %v868_v37  ;;  %v7822_v20 = vmov 0.0   ;;  %vm8057_vm7 = vmmov %vm8052_vm1 }
  0xad   : > { %v1473_v22 = vpack.c.bf16 %v6290_v31, %v6290_v31  ;;  %v6295_v27 = vrot.slane %v7822_v20, 2  ;;  %v1597_v40 = vshll.u32 %v1472_v16, 16  ;;  %v1601_v38 = vshrl.u32 %v1472_v16, 16  ;;  %vm8059_vm1 = vmmov %vm8054_vm0 }
  0xae   : > { %v6298_v51 = vsel %vm8057_vm7, %v1587_v10, %v1591_v28  ;;  %v1595_v55 = vor.u32 %v1593_v21, %v1591_v28  ;;  %v2493_v1 = vsel %vm5752_vm3, %v5844_v46, 0.0  ;;  %vm6306_vm15 = vcmp.lt.s32.totalorder %v910_v63, 15  ;;  %vm8065_vm7 = vmmov %vm8054_vm0 }
  0xaf   : > { %8056 = vst [vmem:[#allocation59_spill] sm:$0xff] %v6295_v27  ;;  %8058 = vst [vmem:[#allocation60_spill] sm:$0xff] %v6298_v51  ;;  %v1605_v52 = vshll.u32 %v1473_v22, 16  ;;  %5000 = vmatmul.mubr.msk.bf16.gmra.mxu1 %vm8059_vm1, %v1456_v50  ;;  %v1599_v24 = vrot.slane %v1597_v40, 1  ;;  %v8060_v37 = vmov 0  ;;  %v8063_v10 = vrot.slane %v5827_v53, 2 }
  0xb0   : > { %5039 = vmatprep.mubr.msk.bf16.mxu1 %vm8054_vm0, %v6046_v18  ;;  %v8061_v37 = vsel %vm6306_vm15, 4294967295, %v8060_v37  ;;  %vm8064_vm2 = vcmask 1045504   ;;  %v872_v21 = vadd.s32 40, %v5540_v23  ;;  %4962 = vmatmul.mubr.msk.bf16.gmra.mxu0 %vm8065_vm7, %v6298_v51  ;;  %vm8066_vm1 = vsmask.f32 7424  ;;  %v8068_v40 = vld [vmem:[#allocation19_spill] sm:$0xff]  ;;  %vm8077_vm3 = vmmov %vm8054_vm0 }
  0xb1   : > { %8062 = vst [vmem:[#allocation61_spill] sm:$0xff] %v8061_v37  ;;  %v2104_v16 = vsel %vm8064_vm2, %v6295_v27, %v8063_v10  ;;  %v6318_v50 = vsel %vm8066_vm1, %v1595_v55, %v1599_v24  ;;  %v2495_v18 = vsel %vm5771_vm4, %v5863_v30, 0.0  ;;  %v6325_v28 = vor.u32 %v1601_v38, %v1599_v24  ;;  %vm8071_vm7 = vmmov %vm8066_vm1 }
  0xb2   : > { %8067 = vst [vmem:[#allocation62_spill] sm:$0xff] %v6318_v50  ;;  %4965 = vmatprep.mubr.msk.bf16.mxu0 %vm8054_vm0, %v6318_v50  ;;  %v1607_v53 = vrot.slane %v1605_v52, 1  ;;  %v2524_v22 = vpack.c.bf16 %v5849_v54, %v2493_v1  ;;  %v2198_v63 = vsel %vm6306_vm15, %v2104_v16, 0.0  ;;  %v2525_v10 = vpack.c.bf16 %v8068_v40, %v2495_v18  ;;  %v6342_v1 = vld [vmem:[%s7747_s4 + $0x1c] sm:$0xf]  ;;  %vm8072_vm1 = vmmov %vm8054_vm0 }
  0xb3   : > { %v938_v20 = vand.u32 15, %v872_v21  ;;  %v2109_v55 = vrot.slane %v5849_v54, 2  ;;  %v2111_v57 = vrot.slane %v5863_v30, 2  ;;  %vm8070_vm2 = vcmask 1043456   ;;  %v4157_v21 = vld [vmem:[%s7004_s17 + $0x50] sm:$0xff] }
  0xb4   : > { %v3110_v11 = vsel %vm8070_vm2, %v8069_v5, 0  ;;  %v1608_v38 = vsel %vm8071_vm7, %v6325_v28, %v1607_v53  ;;  %v2229_v52 = vpack.c.bf16 %v2198_v63, %v6295_v27  ;;  %v874_v24 = vadd.s32 56, %v5540_v23 }
  0xb5   : > { %v2497_v16 = vsel %vm5797_vm6, %v5912_v48, 0.0  ;;  %vm6349_vm2 = vcmp.lt.s32.totalorder %v938_v20, 15  ;;  %vm8076_vm7 = vcmask 1045504   ;;  %v876_v53 = vadd.s32 72, %v5540_v23 }
  0xb6   : > { %v6354_v18 = vsel %vm8076_vm7, %v2109_v55, %v2111_v57  ;;  %v952_v20 = vand.u32 15, %v874_v24  ;;  %v2115_v63 = vrot.slane %v5912_v48, 2  ;;  %v2526_v27 = vpack.c.bf16 %v5918_v14, %v2497_v16  ;;  %v8081_v48 = vld [vmem:[#allocation2_spill] sm:$0xff] }
  0xb7   : > { %5040 = vmatmul.mubr.msk.bf16.vlgmr.msra.gmra.mxu1 %vm8072_vm1, %v2524_v22  ;;  %vm8078_vm1 = vcmask 1043456   ;;  %v2113_v22 = vrot.slane %v8068_v40, 2  ;;  %v8079_v5 = vrot.slane %v5844_v46, 2  ;;  %v2202_v0 = vsel %vm6349_vm2, %v6354_v18, 0.0 }
  0xb8   : > { %5106 = vmatpush3.bf16.msra.mxu1 %v3110_v11  ;;  %5043 = vmatprep.mubr.msk.bf16.mxu1 %vm8054_vm0, %v2525_v10  ;;  %v2499_v11 = vsel %vm5831_vm8, %v5936_v9, 0.0  ;;  %v434_v10 = vld [vmem:[%s5551_s18 + $0xf8] sm:$0xff]  ;;  %v2117_v24 = vrot.slane %v5918_v14, 2  ;;  %v2119_v40 = vrot.slane %v5936_v9, 2  ;;  %v2519_v34 = vsel %vm6182_vm13, %v6269_v33, 0.0 }
  0xb9   : > { %4966 = vmatmul.mubr.msk.bf16.gmra.mxu0 %vm8077_vm3, %v1608_v38  ;;  %5282 = vmatprep.subr.msk.bf16.mxu1 %vm8078_vm1, %v6342_v1  ;;  %vm8080_vm3 = vmmov %vm8076_vm7  ;;  %v2527_v30 = vpack.c.bf16 %v5946_v45, %v2499_v11  ;;  %v472_v54 = vmul.f32 %v8081_v48, %v434_v10  ;;  %vm6381_vm7 = vcmp.lt.s32.totalorder %v952_v20, 15  ;;  %v2501_v48 = vsel %vm5872_vm9, %v5972_v58, 0.0 }
  0xba   : > { %5005 = vmatprep.mubr.msk.bf16.mxu0 %vm8054_vm0, %v2229_v52  ;;  %v6371_v38 = vsel %vm8080_vm3, %v8079_v5, %v2109_v55  ;;  %v966_v52 = vand.u32 15, %v876_v53  ;;  %vm8084_vm1 = vmmov %vm8080_vm3  ;;  %v878_v5 = vadd.s32 88, %v5540_v23  ;;  %vm8085_vm0 = vcmask 1043456  }
  0xbb   : > { %v2231_v16 = vpack.c.bf16 %v2202_v0, %v6371_v38  ;;  %v6386_v55 = vsel %vm8084_vm1, %v2113_v22, %v2115_v63  ;;  %v2809_v53 = vsel %vm8085_vm0, %v5926_v59, 0  ;;  %vm8086_vm3 = vcmask 64512   ;;  %vm8092_vm0 = vmmov %vm8084_vm1 }
  0xbc   : > { %v6396_v0 = vadd.f32 %v5574_v47, %v472_v54  ;;  %vm8088_vm8 = vmmov %vm8086_vm3  ;;  %vm6399_vm6 = vcmp.lt.s32.totalorder %v966_v52, 15  ;;  %v6404_v10 = vsel %vm8084_vm1, %v2117_v24, %v2119_v40  ;;  %v2503_v59 = vsel %vm5894_vm10, %v5987_v4, 0.0  ;;  %v6413_v47 = vld [vmem:[%s7747_s4 + $0x18] sm:$0xf] }
  0xbd   : > { %v6418_v54 = vsel %vm8092_vm0, %v2111_v57, %v2113_v22  ;;  %v2528_v35 = vpack.c.bf16 %v5978_v61, %v2501_v48  ;;  %vm8093_vm1 = vmmov %vm8092_vm0  ;;  %v980_v9 = vand.u32 15, %v878_v5  ;;  %v2206_v57 = vsel %vm6399_vm6, %v6404_v10, 0.0 }
  0xbe   : > { %v4590_v52 = vmul.f32 -1.442695, %v6396_v0  ;;  %v6427_v11 = vsel %vm8093_vm1, %v2115_v63, %v2117_v24  ;;  %v2123_v22 = vrot.slane %v5972_v58, 2  ;;  %v2529_v14 = vpack.c.bf16 %v6006_v2, %v2503_v59  ;;  %vm8095_vm0 = vmmov %vm8086_vm3 }
  0xbf   : > { %5044 = vmatmul.mubr.msk.bf16.gmra.mxu1 %vm8086_vm3, %v2526_v27  ;;  %v880_v27 = vadd.s32 104, %v5540_v23  ;;  %v2127_v63 = vrot.slane %v5987_v4, 2  ;;  %v3012_v24 = vsel %vm6306_vm15, %v6073_v29, 0.0  ;;  %v2233_v59 = vpack.c.bf16 %v2206_v57, %v6427_v11 }
  0xc0   : > { %5047 = vmatprep.mubr.msk.bf16.mxu1 %vm8088_vm8, %v2527_v30  ;;  %vm8091_vm8 = vmmov %vm8086_vm3  ;;  %v2204_v30 = vsel %vm6381_vm7, %v6386_v55, 0.0  ;;  %5422 = vpow2.f32 %v4590_v52  ;;  %v6444_v48 = vpack.c.bf16 %v3012_v24, %v6066_v15  ;;  %v8096_v52 = vmov 0 }
  0xc1   : > { %5006 = vmatmul.mubr.msk.bf16.vlgmr.msra.gmra.mxu0 %vm8091_vm8, %v6097_v42  ;;  %v2121_v42 = vrot.slane %v5946_v45, 2  ;;  %vm8094_vm8 = vcmask 1043456   ;;  %v2232_v5 = vpack.c.bf16 %v2204_v30, %v6418_v54  ;;  %v2505_v29 = vsel %vm5906_vm11, %v6013_v41, 0.0 }
  0xc2   : > { %5072 = vmatpush3.bf16.msra.mxu0 %v2809_v53  ;;  %5009 = vmatprep.mubr.msk.bf16.mxu0 %vm8086_vm3, %v2231_v16  ;;  %v994_v16 = vand.u32 15, %v880_v27  ;;  %v2125_v53 = vrot.slane %v5978_v61, 2  ;;  %vm6448_vm3 = vcmp.lt.s32.totalorder %v980_v9, 15  ;;  %v882_v30 = vadd.s32 120, %v5540_v23 }
  0xc3   : > { %5281 = vmatprep.subr.msk.bf16.mxu0 %vm8094_vm8, %v6413_v47  ;;  %v8097_v52 = vsel %vm6448_vm3, 4294967295, %v8096_v52  ;;  %v6453_v27 = vsel %vm8093_vm1, %v2121_v42, %v2123_v22  ;;  %vm8098_vm8 = vmmov %vm8095_vm0  ;;  %v8099_v15 = vmov 0  ;;  %v884_v9 = vadd.s32 136, %v5540_v23 }
  0xc4   : > { %vm6460_vm15 = vcmp.lt.s32.totalorder %v994_v16, 15  ;;  %vm8103_vm10 = vmmov %vm8098_vm8  ;;  %v2507_v57 = vsel %vm5959_vm12, %v6116_v62, 0.0  ;;  %v2530_v16 = vpack.c.bf16 %v6018_v12, %v2505_v29  ;;  %v1008_v7 = vand.u32 15, %v882_v30 }
  0xc5   : > { %v8100_v15 = vsel %vm6460_vm15, 4294967295, %v8099_v15  ;;  %v2133_v4 = vrot.slane %v6018_v12, 2  ;;  %v2135_v61 = vrot.slane %v6116_v62, 2  ;;  %v2137_v45 = vrot.slane %v6126_v19, 2 }
  0xc6   : > { %8101 = vst [vmem:[#allocation16_spill] sm:$0xff] %v8100_v15 }
  0xc7   : > { %5048 = vmatmul.mubr.msk.bf16.gmra.mxu1 %vm8095_vm0, %v2528_v35  ;;  %vm8102_vm0 = vmmov %vm8093_vm1 }
  0xc8   : > { %5051 = vmatprep.mubr.msk.bf16.mxu1 %vm8098_vm8, %v2529_v14  ;;  %v6465_v35 = vsel %vm8102_vm0, %v2125_v53, %v2127_v63  ;;  %vm8104_vm1 = vmmov %vm8098_vm8  ;;  %v2208_v14 = vsel %vm6448_vm3, %v6453_v27, 0.0 }
  0xc9   : > { %5010 = vmatmul.mubr.msk.bf16.gmra.mxu0 %vm8103_vm10, %v2232_v5  ;;  %vm8105_vm11 = vmmov %vm8102_vm0  ;;  %v2210_v5 = vsel %vm6460_vm15, %v6465_v35, 0.0 }
  0xca   : > { %5013 = vmatprep.mubr.msk.bf16.mxu0 %vm8104_vm1, %v2233_v59  ;;  %v6474_v24 = vsel %vm8105_vm11, %v2119_v40, %v2121_v42  ;;  %vm8106_vm8 = vmmov %vm8102_vm0  ;;  %v2131_v59 = vrot.slane %v6013_v41, 2  ;;  %v2531_v40 = vpack.c.bf16 %v6126_v19, %v2507_v57  ;;  %v1022_v42 = vand.u32 15, %v884_v9 }
  0xcb   : > { %v6481_v37 = vsel %vm8106_vm8, %v2123_v22, %v2125_v53  ;;  %v2234_v29 = vpack.c.bf16 %v2208_v14, %v6474_v24  ;;  %vm8107_vm10 = vmmov %vm8104_vm1  ;;  %vm6494_vm11 = vcmp.lt.s32.totalorder %v1008_v7, 15  ;;  %v8108_v53 = vmov 0 }
  0xcc   : > { %v2235_v22 = vpack.c.bf16 %v2210_v5, %v6481_v37  ;;  %v8109_v53 = vsel %vm6494_vm11, 4294967295, %v8108_v53  ;;  %v6499_v30 = vsel %vm8102_vm0, %v2129_v49, %v2131_v59  ;;  %vm8111_vm1 = vnez %v7998_v32  ;;  %vm8112_vm8 = vmmov %vm8107_vm10  ;;  %v8120_v32 = vld [vmem:[#allocation46_spill] sm:$0xff] }
  0xcd   : > { %8110 = vst [vmem:[#allocation2_spill] sm:$0xff] %v8109_v53  ;;  %v2509_v9 = vsel %vm8111_vm1, %v6155_v56, 0.0  ;;  %v886_v57 = vadd.s32 152, %v5540_v23  ;;  %v5423_v62 = vpop.eup %5422  ;;  %vm6506_vm12 = vcmp.lt.s32.totalorder %v1022_v42, 15  ;;  %v8113_v14 = vmov 0  ;;  %v8123_v42 = vld [vmem:[#allocation47_spill] sm:$0xff] }
  0xce   : > { %v8114_v14 = vsel %vm6506_vm12, 4294967295, %v8113_v14  ;;  %vm8121_vm1 = vnez %v8120_v32  ;;  %v638_v2 = vadd.f32 1.0, %v5423_v62  ;;  %v2532_v41 = vpack.c.bf16 %v8123_v42, %v2509_v9 }
  0xcf   : > { %5052 = vmatmul.mubr.msk.bf16.gmra.mxu1 %vm8107_vm10, %v2530_v16  ;;  %8115 = vst [vmem:[#allocation63_spill] sm:$0xff] %v8114_v14  ;;  %vm8116_vm10 = vmmov %vm8102_vm0  ;;  %v888_v16 = vadd.s32 168, %v5540_v23  ;;  %v2511_v12 = vsel %vm8121_vm1, %v6187_v8, 0.0  ;;  %v1036_v62 = vand.u32 15, %v886_v57  ;;  %v2141_v50 = vrot.slane %v8123_v42, 2 }
  0xd0   : > { %5055 = vmatprep.mubr.msk.bf16.mxu1 %vm8112_vm8, %v2531_v40  ;;  %v6511_v7 = vsel %vm8116_vm10, %v2133_v4, %v2135_v61  ;;  %vm8117_vm0 = vmmov %vm8112_vm8  ;;  %v2212_v40 = vsel %vm6494_vm11, %v6499_v30, 0.0  ;;  %5424 = vrcp.f32 %v638_v2  ;;  %v2143_v9 = vrot.slane %v6187_v8, 2  ;;  %v8133_v2 = vld [vmem:[#allocation5_spill] sm:$0xff] }
  0xd1   : > { %5014 = vmatmul.mubr.msk.bf16.gmra.mxu0 %vm8117_vm0, %v2234_v29  ;;  %vm8118_vm9 = vmmov %vm8116_vm10  ;;  %v2139_v29 = vrot.slane %v6155_v56, 2  ;;  %v1050_v58 = vand.u32 15, %v888_v16  ;;  %v890_v57 = vadd.s32 184, %v5540_v23  ;;  %v8136_v16 = vmov 0 }
  0xd2   : > { %v6516_v5 = vsel %vm8118_vm9, %v2127_v63, %v2129_v49  ;;  %vm8122_vm8 = vmmov %vm8117_vm0  ;;  %v2214_v63 = vsel %vm6506_vm12, %v6511_v7, 0.0 }
  0xd3   : > { %8119 = vst [vmem:[#allocation64_spill] sm:$0xff] %v6516_v5  ;;  %5017 = vmatprep.mubr.msk.bf16.mxu0 %vm8122_vm8, %v2235_v22  ;;  %vm8124_vm10 = vmmov %vm8118_vm9  ;;  %v8126_v22 = vld [vmem:[#allocation9_spill] sm:$0xff]  ;;  %v2236_v19 = vpack.c.bf16 %v2212_v40, %v6516_v5  ;;  %vm6552_vm4 = vcmp.lt.s32.totalorder %v1050_v58, 15  ;;  %v892_v40 = vadd.s32 200, %v5540_v23 }
  0xd4   : > { %v6529_v49 = vsel %vm8124_vm10, %v2131_v59, %v2133_v4  ;;  %v2533_v32 = vpack.c.bf16 %v8126_v22, %v2511_v12  ;;  %vm8127_vm9 = vmmov %vm8117_vm0  ;;  %vm6540_vm0 = vcmp.lt.s32.totalorder %v1036_v62, 15  ;;  %v8128_v4 = vmov 0 }
  0xd5   : > { %8125 = vst [vmem:[#allocation65_spill] sm:$0xff] %v6529_v49  ;;  %v2237_v56 = vpack.c.bf16 %v2214_v63, %v6529_v49  ;;  %v8129_v4 = vsel %vm6540_vm0, 4294967295, %v8128_v4  ;;  %vm8131_vm8 = vmmov %vm8124_vm10  ;;  %vm8134_vm10 = vnez %v8133_v2  ;;  %v8137_v16 = vsel %vm6552_vm4, 4294967295, %v8136_v16  ;;  %v8142_v63 = vld [vmem:[#allocation6_spill] sm:$0xff] }
  0xd6   : > { %8130 = vst [vmem:[#allocation66_spill] sm:$0xff] %v8129_v4  ;;  %v6545_v59 = vsel %vm8131_vm8, %v2137_v45, %v2139_v29  ;;  %v2513_v12 = vsel %vm8134_vm10, %v6201_v26, 0.0  ;;  %vm8135_vm1 = vmmov %vm8127_vm9  ;;  %v2145_v42 = vrot.slane %v8126_v22, 2  ;;  %v8226_v4 = vld [vmem:[#allocation52_spill] sm:$0xff] }
  0xd7   : > { %5056 = vmatmul.mubr.msk.bf16.gmra.mxu1 %vm8127_vm9, %v2532_v41  ;;  %8132 = vst [vmem:[#allocation67_spill] sm:$0xff] %v6545_v59  ;;  %8138 = vst [vmem:[#allocation68_spill] sm:$0xff] %v8137_v16  ;;  %v2216_v58 = vsel %vm6540_vm0, %v6545_v59, 0.0 }
  0xd8   : > { %5059 = vmatprep.mubr.msk.bf16.mxu1 %vm8135_vm1, %v2533_v32  ;;  %vm8139_vm9 = vmmov %vm8131_vm8  ;;  %vm8143_vm8 = vnez %v8142_v63  ;;  %v8147_v32 = vld [vmem:[#allocation10_spill] sm:$0xff]  ;;  %v1064_v63 = vand.u32 15, %v890_v57  ;;  %v2517_v57 = vsel %vm6175_vm5, %v6245_v17, 0.0 }
  0xd9   : > { %v6557_v41 = vsel %vm8139_vm9, %v2141_v50, %v2143_v9  ;;  %vm8141_vm12 = vmmov %vm8135_vm1  ;;  %v2515_v62 = vsel %vm8143_vm8, %v6232_v44, 0.0  ;;  %v2534_v8 = vpack.c.bf16 %v8147_v32, %v2513_v12  ;;  %v2149_v36 = vrot.slane %v8147_v32, 2 }
  0xda   : > { %8140 = vst [vmem:[#allocation69_spill] sm:$0xff] %v6557_v41  ;;  %5018 = vmatmul.mubr.msk.bf16.gmra.mxu0 %vm8141_vm12, %v2236_v19  ;;  %vm8144_vm10 = vmmov %vm8135_vm1  ;;  %v2218_v19 = vsel %vm6552_vm4, %v6557_v41, 0.0  ;;  %v2536_v44 = vpack.c.bf16 %v6257_v25, %v2517_v57  ;;  %v2159_v57 = vrot.slane %v6269_v33, 2 }
  0xdb   : > { %5021 = vmatprep.mubr.msk.bf16.mxu0 %vm8144_vm10, %v2237_v56  ;;  %vm8145_vm11 = vmmov %vm8139_vm9  ;;  %v2147_v56 = vrot.slane %v6201_v26, 2  ;;  %v2157_v26 = vrot.slane %v6257_v25, 2 }
  0xdc   : > { %v6566_v2 = vsel %vm8145_vm11, %v2135_v61, %v2137_v45  ;;  %vm8148_vm1 = vmmov %vm8139_vm9  ;;  %v2535_v61 = vpack.c.bf16 %v6235_v43, %v2515_v62  ;;  %v1078_v45 = vand.u32 15, %v892_v40  ;;  %vm6586_vm11 = vcmp.lt.s32.totalorder %v1064_v63, 15 }
  0xdd   : > { %8146 = vst [vmem:[#allocation70_spill] sm:$0xff] %v6566_v2  ;;  %v6574_v51 = vsel %vm8148_vm1, %v2139_v29, %v2141_v50  ;;  %v2238_v12 = vpack.c.bf16 %v2216_v58, %v6566_v2  ;;  %vm8150_vm12 = vmmov %vm8144_vm10  ;;  %v8151_v50 = vmov 0  ;;  %v894_v40 = vadd.s32 216, %v5540_v23  ;;  %v5425_v62 = vpop.eup %5424 }
  0xde   : > { %8149 = vst [vmem:[#allocation71_spill] sm:$0xff] %v6574_v51  ;;  %v2239_v22 = vpack.c.bf16 %v2218_v19, %v6574_v51  ;;  %v8152_v50 = vsel %vm6586_vm11, 4294967295, %v8151_v50  ;;  %vm8154_vm10 = vmmov %vm8148_vm1  ;;  %vm6598_vm1 = vcmp.lt.s32.totalorder %v1078_v45, 15  ;;  %v8157_v58 = vmov 0 }
  0xdf   : > { %5060 = vmatmul.mubr.msk.bf16.gmra.mxu1 %vm8150_vm12, %v2534_v8  ;;  %8153 = vst [vmem:[#allocation72_spill] sm:$0xff] %v8152_v50  ;;  %v6591_v29 = vsel %vm8154_vm10, %v2145_v42, %v2147_v56  ;;  %vm8156_vm9 = vmmov %vm8150_vm12  ;;  %v8158_v58 = vsel %vm6598_vm1, 4294967295, %v8157_v58  ;;  %v896_v63 = vadd.s32 232, %v5540_v23  ;;  %v1092_v39 = vand.u32 15, %v894_v40 }
  0xe0   : > { %8155 = vst [vmem:[#allocation73_spill] sm:$0xff] %v6591_v29  ;;  %5063 = vmatprep.mubr.msk.bf16.mxu1 %vm8156_vm9, %v2535_v61  ;;  %8159 = vst [vmem:[#allocation74_spill] sm:$0xff] %v8158_v58  ;;  %v6614_v61 = vmul.f32 %v5425_v62, %v6396_v0  ;;  %v2220_v45 = vsel %vm6586_vm11, %v6591_v29, 0.0  ;;  %v2155_v0 = vrot.slane %v6245_v17, 2  ;;  %v2537_v62 = vpack.c.bf16 %v6272_v13, %v2519_v34 }
  0xe1   : > { %vm8160_vm12 = vmmov %vm8154_vm10  ;;  %v1106_v32 = vand.u32 15, %v896_v63  ;;  %v8170_v34 = vmov 0 }
  0xe2   : > { %v6603_v8 = vsel %vm8160_vm12, %v2149_v36, %v2151_v6  ;;  %vm8162_vm10 = vmmov %vm8156_vm9 }
  0xe3   : > { %8161 = vst [vmem:[#allocation75_spill] sm:$0xff] %v6603_v8  ;;  %5022 = vmatmul.mubr.msk.bf16.gmra.mxu0 %vm8162_vm10, %v2238_v12  ;;  %vm8163_vm8 = vmmov %vm8160_vm12 }
  0xe4   : > { %v6608_v19 = vsel %vm8163_vm8, %v2143_v9, %v2145_v42  ;;  %5025 = vmatprep.mubr.msk.bf16.mxu0 %vm8156_vm9, %v2239_v22  ;;  %vm8165_vm12 = vmmov %vm8163_vm8  ;;  %v2153_v42 = vrot.slane %v6235_v43, 2  ;;  %v2222_v9 = vsel %vm6598_vm1, %v6603_v8, 0.0  ;;  %v7887_v22 = vrot.slane %v6614_v61, 7 }
  0xe5   : > { %8164 = vst [vmem:[#allocation76_spill] sm:$0xff] %v6608_v19  ;;  %v6622_v12 = vsel %vm8165_vm12, %v2147_v56, %v2149_v36  ;;  %v2240_v36 = vpack.c.bf16 %v2220_v45, %v6608_v19  ;;  %v8167_v56 = vrot.slane %v6260_v3, 7  ;;  %vm8168_vm8 = vcmask 1040384   ;;  %vm8169_vm10 = vmmov %vm8156_vm9 }
  0xe6   : > { %8166 = vst [vmem:[#allocation77_spill] sm:$0xff] %v6622_v12  ;;  %v2241_v40 = vpack.c.bf16 %v2222_v9, %v6622_v12  ;;  %vm6647_vm9 = vcmp.lt.s32.totalorder %v1092_v39, 15  ;;  %v6652_v63 = vsel %vm8165_vm12, %v2153_v42, %v2155_v0  ;;  %v898_v3 = vadd.s32 248, %v5540_v23  ;;  %vm8174_vm13 = vmmov %vm8169_vm10 }
  0xe7   : > { %v6639_v43 = vsel %vm8168_vm8, %v8167_v56, %v7887_v22  ;;  %5064 = vmatmul.mubr.msk.bf16.gmra.mxu1 %vm8169_vm10, %v2536_v44  ;;  %v8171_v34 = vsel %vm6647_vm9, 4294967295, %v8170_v34  ;;  %8173 = vst [vmem:[#allocation79_spill] sm:$0xff] %v6652_v63  ;;  %v2521_v45 = vsel %vm6213_vm14, %v6290_v31, 0.0  ;;  %vm6659_vm8 = vcmp.lt.s32.totalorder %v1106_v32, 15  ;;  %vm8178_vm10 = vmmov %vm8165_vm12 }
  0xe8   : > { %v6644_v17 = vpack.c.bf16 %v6639_v43, %v6290_v31  ;;  %8172 = vst [vmem:[#allocation78_spill] sm:$0xff] %v8171_v34  ;;  %5067 = vmatprep.mubr.msk.bf16.mxu1 %vm8174_vm13, %v2537_v62  ;;  %v8175_v9 = vmov 0  ;;  %v6664_v44 = vsel %vm8178_vm10, %v2157_v26, %v2159_v57  ;;  %vm8180_vm5 = vmmov %vm8174_vm13  ;;  %v2224_v23 = vsel %vm6647_vm9, %v6652_v63, 0.0 }
  0xe9   : > { %v8176_v9 = vsel %vm6659_vm8, 4294967295, %v8175_v9  ;;  %8179 = vst [vmem:[#allocation81_spill] sm:$0xff] %v6664_v44  ;;  %vm8181_vm12 = vmmov %vm8178_vm10  ;;  %v2161_v62 = vrot.slane %v6272_v13, 2  ;;  %v2538_v60 = vpack.c.bf16 %v6639_v43, %v2521_v45  ;;  %v8187_v45 = vmov 0 }
  0xea   : > { %8177 = vst [vmem:[#allocation80_spill] sm:$0xff] %v8176_v9  ;;  %v2790_v39 = vshll.u32 %v6644_v17, 16  ;;  %v6669_v56 = vsel %vm8181_vm12, %v2151_v6, %v2153_v42  ;;  %vm8183_vm1 = vmmov %vm8180_vm5  ;;  %v2226_v6 = vsel %vm6659_vm8, %v6664_v44, 0.0  ;;  %v1120_v42 = vand.u32 15, %v898_v3 }
  0xeb   : > { %5026 = vmatmul.mubr.msk.bf16.gmra.mxu0 %vm8180_vm5, %v2240_v36  ;;  %8182 = vst [vmem:[#allocation82_spill] sm:$0xff] %v6669_v56  ;;  %vm8184_vm13 = vmmov %vm8178_vm10  ;;  %v7892_v36 = vrot.slane %v6290_v31, 2  ;;  %vm8186_vm5 = vsmask.f32 7424 }
  0xec   : > { %5029 = vmatprep.mubr.msk.bf16.mxu0 %vm8183_vm1, %v2241_v40  ;;  %v6676_v32 = vsel %vm8184_vm13, %v2155_v0, %v2157_v26  ;;  %v6679_v22 = vrot.slane %v2790_v39, 1  ;;  %v2242_v26 = vpack.c.bf16 %v2224_v23, %v6669_v56  ;;  %vm6694_vm10 = vcmp.lt.s32.totalorder %v1120_v42, 15  ;;  %v8191_v39 = vld [vmem:[#allocation39_spill] sm:$0xff]  ;;  %vm8194_vm14 = vmmov %vm8183_vm1 }
  0xed   : > { %8185 = vst [vmem:[#allocation83_spill] sm:$0xff] %v6676_v32  ;;  %v2243_v0 = vpack.c.bf16 %v2226_v6, %v6676_v32  ;;  %v8188_v45 = vsel %vm6694_vm10, 4294967295, %v8187_v45  ;;  %v6701_v3 = vsel %vm8181_vm12, %v2161_v62, %v7892_v36  ;;  %vm8192_vm13 = vnez %v8191_v39  ;;  %vm8195_vm8 = vmmov %vm8181_vm12 }
  0xee   : > { %v6689_v40 = vsel %vm8186_vm5, %v6325_v28, %v6679_v22  ;;  %8189 = vst [vmem:[#allocation84_spill] sm:$0xff] %v8188_v45  ;;  %8190 = vst [vmem:[#allocation85_spill] sm:$0xff] %v6701_v3  ;;  %v3014_v28 = vsel %vm8192_vm13, %v6354_v18, 0.0  ;;  %v6714_v23 = vsel %vm8195_vm8, %v2159_v57, %v2161_v62  ;;  %v2228_v6 = vsel %vm6694_vm10, %v6701_v3, 0.0  ;;  %v8200_v62 = vld [vmem:[#allocation23_spill] sm:$0xff] }
  0xef   : > { %5068 = vmatmul.mubr.msk.bf16.gmra.mxu1 %vm8183_vm1, %v2538_v60  ;;  %vm8193_vm5 = vmmov %vm8183_vm1  ;;  %v3016_v60 = vsel %vm6349_vm2, %v6386_v55, 0.0  ;;  %8196 = vst [vmem:[#allocation39_spill] sm:$0xff] %v6714_v23  ;;  %v3044_v42 = vpack.c.bf16 %v3014_v28, %v6371_v38  ;;  %vm7893_vm8 = vcmask 1041408   ;;  %v3018_v57 = vsel %vm6381_vm7, %v6404_v10, 0.0 }
  0xf0   : > { %5107 = vmatprep.mubr.msk.bf16.mxu1 %vm8193_vm5, %v6444_v48  ;;  %v3045_v36 = vpack.c.bf16 %v3016_v60, %v6418_v54  ;;  %v2244_v48 = vpack.c.bf16 %v2228_v6, %v6714_v23  ;;  %vm8198_vm12 = vmmov %vm8183_vm1  ;;  %v3046_v28 = vpack.c.bf16 %v3018_v57, %v6427_v11  ;;  %v3022_v6 = vsel %vm6448_vm3, %v6465_v35, 0.0 }
  0xf1   : > { %vm8199_vm5 = vmmov %vm8183_vm1  ;;  %v3048_v57 = vpack.c.bf16 %v3022_v6, %v6481_v37 }
  0xf2   : > { %vm8215_vm3 = vmmov %vm8183_vm1 }
  0xf3   : > { %5030 = vmatmul.mubr.msk.bf16.gmra.mxu0 %vm8194_vm14, %v2242_v26  ;;  %vm8197_vm14 = vcmask 1043456  }
  0xf4   : > { %5033 = vmatprep.mubr.msk.bf16.mxu0 %vm8183_vm1, %v2243_v0  ;;  %v3617_v26 = vsel %vm8197_vm14, %v6342_v1, 0  ;;  %v6727_v0 = vld [vmem:[%s7749_s6] sm:$0x3]  ;;  %v3020_v1 = vsel %vm6399_vm6, %v6453_v27, 0.0  ;;  %vm8201_vm14 = vmmov %vm8183_vm1 }
  0xf7   : > { %5108 = vmatmul.mubr.msk.bf16.vlgmr.msra.gmra.mxu1 %vm8198_vm12, %v3044_v42  ;;  %vm8202_vm12 = vcmask 1043456   ;;  %v6754_v42 = vld [vmem:[%s7747_s4 + $0x20] sm:$0xf] }
  0xf8   : > { %5174 = vmatpush3.bf16.msra.mxu1 %v3617_v26  ;;  %5111 = vmatprep.mubr.msk.bf16.mxu1 %vm8199_vm5, %v3045_v36  ;;  %v3047_v36 = vpack.c.bf16 %v3020_v1, %v6474_v24  ;;  %v3403_v60 = vsel %vm8202_vm12, %v6413_v47, 0  ;;  %vm8203_vm5 = vmmov %vm8183_vm1  ;;  %v3024_v47 = vsel %vm6460_vm15, %v6499_v30, 0.0  ;;  %v8206_v26 = vld [vmem:[#allocation31_spill] sm:$0xff] }
  0xf9   : > { %5284 = vmatprep.subr.msk.bf16.mxu1 %vm7893_vm8, %v6727_v0  ;;  %vm8207_vm12 = vmmov %vm8183_vm1  ;;  %v3049_v1 = vpack.c.bf16 %v3024_v47, %v6516_v5 }
  0xfa   : > { %vm8209_vm8 = vmmov %vm8183_vm1 }
  0xfb   : > { %5034 = vmatmul.mubr.msk.bf16.gmra.mxu0 %vm8183_vm1, %v2244_v48  ;;  %v8204_v48 = vld [vmem:[#allocation26_spill] sm:$0xff]  ;;  %vm8212_vm15 = vmmov %vm8183_vm1 }
  0xfc   : > { %5073 = vmatprep.mubr.msk.bf16.mxu0 %vm8201_vm14, %v8200_v62  ;;  %vm8205_vm14 = vmmov %vm8183_vm1 }
  0xff   : > { %5112 = vmatmul.mubr.msk.bf16.gmra.mxu1 %vm8203_vm5, %v3046_v28  ;;  %vm8208_vm5 = vcmask 1043456   ;;  %v8211_v28 = vld [vmem:[#allocation34_spill] sm:$0xff] }
 0x100   : > { %5115 = vmatprep.mubr.msk.bf16.mxu1 %vm8183_vm1, %v3047_v36 }
 0x103   : > { %5074 = vmatmul.mubr.msk.bf16.vlgmr.msra.gmra.mxu0 %vm8205_vm14, %v8204_v48  ;;  %vm8210_vm14 = vnez %v8109_v53  ;;  %v8220_v53 = vld [vmem:[#allocation41_spill] sm:$0xff] }
 0x104   : > { %5140 = vmatpush3.bf16.msra.mxu0 %v3403_v60  ;;  %5077 = vmatprep.mubr.msk.bf16.mxu0 %vm8207_vm12, %v8206_v26  ;;  %v3026_v62 = vsel %vm8210_vm14, %v6511_v7, 0.0  ;;  %vm8213_vm12 = vnez %v8114_v14  ;;  %v8214_v60 = vld [vmem:[#allocation38_spill] sm:$0xff]  ;;  %v3032_v14 = vsel %vm6552_vm4, %v6591_v29, 0.0 }
 0x105   : > { %5283 = vmatprep.subr.msk.bf16.mxu0 %vm8208_vm5, %v6754_v42  ;;  %v3028_v36 = vsel %vm8213_vm12, %v6545_v59, 0.0  ;;  %v3050_v6 = vpack.c.bf16 %v3026_v62, %v6529_v49  ;;  %vm8216_vm5 = vmmov %vm8183_vm1 }
 0x106   : > { %v3051_v47 = vpack.c.bf16 %v3028_v36, %v6566_v2  ;;  %v3053_v36 = vpack.c.bf16 %v3032_v14, %v6608_v19  ;;  %v8241_v19 = vrot.slane %v6290_v31, 2 }
 0x107   : > { %5116 = vmatmul.mubr.msk.bf16.gmra.mxu1 %vm8183_vm1, %v3048_v57  ;;  %v3030_v57 = vsel %vm6540_vm0, %v6557_v41, 0.0 }
 0x108   : > { %5119 = vmatprep.mubr.msk.bf16.mxu1 %vm8209_vm8, %v3049_v1  ;;  %vm8217_vm8 = vmmov %vm8183_vm1  ;;  %v8218_v1 = vld [vmem:[#allocation40_spill] sm:$0xff]  ;;  %v3052_v62 = vpack.c.bf16 %v3030_v57, %v6574_v51  ;;  %v2794_v51 = vshrl.u32 %v6644_v17, 16 }
 0x10a   : > { %v6871_v17 = vor.u32 %v2794_v51, %v6679_v22  ;;  %v8257_v22 = vld [vmem:[#allocation15_spill] sm:$0xff] }
 0x10b   : > { %5078 = vmatmul.mubr.msk.bf16.gmra.mxu0 %vm8212_vm15, %v8211_v28  ;;  %vm8219_vm15 = vmmov %vm8183_vm1 }
 0x10c   : > { %5081 = vmatprep.mubr.msk.bf16.mxu0 %vm8215_vm3, %v8214_v60  ;;  %vm8221_vm3 = vmmov %vm8183_vm1 }
 0x10f   : > { %5120 = vmatmul.mubr.msk.bf16.gmra.mxu1 %vm8216_vm5, %v3050_v6  ;;  %vm8222_vm5 = vmmov %vm8183_vm1  ;;  %v3034_v6 = vsel %vm6586_vm11, %v6603_v8, 0.0 }
 0x110   : > { %5123 = vmatprep.mubr.msk.bf16.mxu1 %vm8217_vm8, %v3051_v47  ;;  %v8223_v47 = vld [vmem:[#allocation45_spill] sm:$0xff]  ;;  %vm8224_vm8 = vmmov %vm8183_vm1  ;;  %v3054_v14 = vpack.c.bf16 %v3034_v6, %v6622_v12 }
 0x113   : > { %5082 = vmatmul.mubr.msk.bf16.gmra.mxu0 %vm8219_vm15, %v8218_v1  ;;  %vm8225_vm15 = vnez %v8158_v58  ;;  %v3038_v58 = vsel %vm6647_vm9, %v6664_v44, 0.0 }
 0x114   : > { %5085 = vmatprep.mubr.msk.bf16.mxu0 %vm8221_vm3, %v8220_v53  ;;  %v3036_v16 = vsel %vm8225_vm15, %v6652_v63, 0.0  ;;  %vm8227_vm3 = vmmov %vm8183_vm1  ;;  %v8233_v63 = vld [vmem:[#allocation53_spill] sm:$0xff]  ;;  %vm8234_vm15 = vnez %v8176_v9 }
 0x115   : > { %v3055_v57 = vpack.c.bf16 %v3036_v16, %v6669_v56  ;;  %v3040_v16 = vsel %vm8234_vm15, %v6701_v3, 0.0 }
 0x116   : > { %v3057_v34 = vpack.c.bf16 %v3040_v16, %v6714_v23 }
 0x117   : > { %5124 = vmatmul.mubr.msk.bf16.gmra.mxu1 %vm8183_vm1, %v3052_v62  ;;  %v8228_v62 = vrot.slane %v6614_v61, 7  ;;  %vm8229_vm1 = vcmask 1040384   ;;  %v3005_v61 = vrot.slane %v6639_v43, 2 }
 0x118   : > { %5127 = vmatprep.mubr.msk.bf16.mxu1 %vm8222_vm5, %v3053_v36  ;;  %vm8231_vm5 = vmmov %vm8227_vm3 }
 0x119   : > { %v6812_v36 = vsel %vm8229_vm1, %v8228_v62, 0.0  ;;  %v4973_v50 = vpop.f32.mrf.mxu1  ;;  %vm8236_vm1 = vmmov %vm8227_vm3 }
 0x11a   : > { %8230 = vst [vmem:[#allocation23_spill] sm:$0xff] %v6812_v36  ;;  %v7911_v6 = vrot.slane %v6812_v36, 2 }
 0x11b   : > { %5086 = vmatmul.mubr.msk.bf16.gmra.mxu0 %vm8224_vm8, %v8223_v47  ;;  %vm8232_vm8 = vmmov %vm8227_vm3  ;;  %v1907_v62 = vpop.f32.mrf.mxu1 }
 0x11c   : > { %5089 = vmatprep.mubr.msk.bf16.mxu0 %vm8227_vm3, %v8226_v4 }
 0x11d   : > { %v4974_v56 = vpop.f32.mrf.mxu1 }
 0x11f   : > { %5128 = vmatmul.mubr.msk.bf16.gmra.mxu1 %vm8231_vm5, %v3054_v14  ;;  %v8235_v14 = vld [vmem:[#allocation57_spill] sm:$0xff]  ;;  %vm8237_vm5 = vcmask 1045504   ;;  %v1910_v9 = vpop.f32.mrf.mxu1 }
 0x120   : > { %5131 = vmatprep.mubr.msk.bf16.mxu1 %vm8232_vm8, %v3055_v57  ;;  %v3056_v57 = vpack.c.bf16 %v3038_v58, %v6676_v32  ;;  %v6833_v44 = vsel %vm8237_vm5, %v3005_v61, %v7911_v6  ;;  %vm8239_vm8 = vmmov %vm8236_vm1  ;;  %v8244_v6 = vld [vmem:[#allocation58_spill] sm:$0xff]  ;;  %v8246_v32 = vld [vmem:[#allocation60_spill] sm:$0xff] }
 0x121   : > { %8238 = vst [vmem:[#allocation26_spill] sm:$0xff] %v6833_v44  ;;  %v4977_v12 = vpop.f32.mrf.mxu1  ;;  %v3042_v58 = vsel %vm6694_vm10, %v6833_v44, 0.0 }
 0x123   : > { %5090 = vmatmul.mubr.msk.bf16.gmra.mxu0 %vm8227_vm3, %v8233_v63  ;;  %v4939_v3 = vpop.f32.mrf.mxu0  ;;  %vm8240_vm3 = vmmov %vm8236_vm1 }
 0x124   : > { %5093 = vmatprep.mubr.msk.bf16.mxu0 %vm8236_vm1, %v8235_v14  ;;  %vm8242_vm1 = vmmov %vm8237_vm5  ;;  %v6845_v16 = vadd.f32 %v4973_v50, %v4939_v3 }
 0x125   : > { %v6840_v8 = vsel %vm8242_vm1, %v8241_v19, %v3005_v61  ;;  %vm8245_vm5 = vmmov %vm8240_vm3  ;;  %v1696_v23 = vpop.f32.mrf.mxu0 }
 0x126   : > { %8243 = vst [vmem:[#allocation31_spill] sm:$0xff] %v6840_v8  ;;  %v6853_v29 = vadd.f32 %v1907_v62, %v1696_v23  ;;  %v3058_v19 = vpack.c.bf16 %v3042_v58, %v6840_v8  ;;  %vm8248_vm1 = vmmov %vm8240_vm3  ;;  %v8249_v62 = vld [vmem:[#allocation62_spill] sm:$0xff] }
 0x127   : > { %5132 = vmatmul.mubr.msk.bf16.gmra.mxu1 %vm8239_vm8, %v3056_v57  ;;  %v1923_v57 = vpop.f32.mrf.mxu1  ;;  %vm8247_vm8 = vmmov %vm8240_vm3  ;;  %v4940_v61 = vpop.f32.mrf.mxu0 }
 0x128   : > { %5135 = vmatprep.mubr.msk.bf16.mxu1 %vm8240_vm3, %v3057_v34  ;;  %v2786_v34 = vpack.c.bf16 %v6812_v36, %v6812_v36  ;;  %v6856_v44 = vadd.f32 %v4974_v56, %v4940_v61  ;;  %v8253_v61 = vld [vmem:[#allocation29_spill] sm:$0xff] }
 0x129   : > { %v4978_v45 = vpop.f32.mrf.mxu1  ;;  %v1699_v50 = vpop.f32.mrf.mxu0 }
 0x12a   : > { %v2798_v2 = vshll.u32 %v2786_v34, 16  ;;  %v6859_v41 = vadd.f32 %v1910_v9, %v1699_v50 }
 0x12b   : > { %5094 = vmatmul.mubr.msk.bf16.gmra.mxu0 %vm8245_vm5, %v8244_v6  ;;  %v1926_v3 = vpop.f32.mrf.mxu1  ;;  %vm8250_vm5 = vmmov %vm8248_vm1 }
 0x12c   : > { %5097 = vmatprep.mubr.msk.bf16.mxu0 %vm8247_vm8, %v8246_v32  ;;  %v4943_v59 = vpop.f32.mrf.mxu0  ;;  %vm8251_vm8 = vmmov %vm8248_vm1  ;;  %v2800_v9 = vrot.slane %v2798_v2, 1 }
 0x12d   : > { %v4981_v49 = vpop.f32.mrf.mxu1  ;;  %v6864_v23 = vadd.f32 %v4977_v12, %v4943_v59 }
 0x12e   : > { %v1712_v56 = vpop.f32.mrf.mxu0 }
 0x12f   : > { %5136 = vmatmul.mubr.msk.bf16.gmra.mxu1 %vm8240_vm3, %v3058_v19  ;;  %v1939_v58 = vpop.f32.mrf.mxu1  ;;  %v6873_v34 = vadd.f32 %v1923_v57, %v1712_v56  ;;  %v8252_v19 = vld [vmem:[#allocation14_spill] sm:$0xff]  ;;  %vm8254_vm3 = vnez %v8253_v61 }
 0x130   : > { %5175 = vmatprep.mubr.msk.bf16.mxu1 %vm8248_vm1, %v8204_v48  ;;  %v3305_v48 = vsel %vm8254_vm3, %v8252_v19, 0.0  ;;  %v4944_v59 = vpop.f32.mrf.mxu0  ;;  %vm8255_vm1 = vcmask 1041408   ;;  %vm8259_vm3 = vmmov %vm8251_vm8 }
 0x131   : > { %v4982_v12 = vpop.f32.mrf.mxu1  ;;  %v6878_v50 = vadd.f32 %v4978_v45, %v4944_v59  ;;  %v4254_v8 = vsel %vm8255_vm1, %v6727_v0, 0  ;;  %v3336_v2 = vpack.c.bf16 %v8257_v22, %v3305_v48  ;;  %vm8261_vm1 = vmmov %vm8259_vm3  ;;  %v8270_v59 = vld [vmem:[#allocation19_spill] sm:$0xff] }
 0x132   : > { %v1715_v5 = vpop.f32.mrf.mxu0  ;;  %vm8262_vm10 = vmmov %vm8261_vm1 }
 0x133   : > { %5098 = vmatmul.mubr.msk.bf16.gmra.mxu0 %vm8250_vm5, %v8249_v62  ;;  %v1942_v15 = vpop.f32.mrf.mxu1  ;;  %vm8256_vm5 = vsmask.f32 7424  ;;  %v6885_v57 = vadd.f32 %v1926_v3, %v1715_v5  ;;  %v8263_v5 = vld [vmem:[#allocation22_spill] sm:$0xff]  ;;  %v8264_v3 = vld [vmem:[#allocation11_spill] sm:$0xff] }
 0x134   : > { %5101 = vmatprep.mubr.msk.bf16.mxu0 %vm8251_vm8, %v6689_v40  ;;  %v2801_v51 = vsel %vm8256_vm5, %v6871_v17, %v2800_v9  ;;  %v4947_v56 = vpop.f32.mrf.mxu0  ;;  %vm8265_vm5 = vnez %v8264_v3 }
 0x135   : > { %8258 = vst [vmem:[#allocation34_spill] sm:$0xff] %v6885_v57  ;;  %v6891_v45 = vadd.f32 %v4981_v49, %v4947_v56  ;;  %v4985_v19 = vpop.f32.mrf.mxu1  ;;  %v3309_v61 = vsel %vm8265_vm5, %v8263_v5, 0.0  ;;  %vm8274_vm5 = vmmov %vm8261_vm1 }
 0x136   : > { %v1728_v0 = vpop.f32.mrf.mxu0 }
 0x137   : > { %5176 = vmatmul.mubr.msk.bf16.vlgmr.msra.gmra.mxu1 %vm8251_vm8, %v8206_v26  ;;  %8260 = vst [vmem:[#allocation38_spill] sm:$0xff] %v6891_v45  ;;  %v6895_v9 = vadd.f32 %v1939_v58, %v1728_v0  ;;  %v1955_v56 = vpop.f32.mrf.mxu1  ;;  %v8271_v45 = vld [vmem:[#allocation24_spill] sm:$0xff] }
 0x138   : > { %5242 = vmatpush3.bf16.msra.mxu1 %v4254_v8  ;;  %5179 = vmatprep.mubr.msk.bf16.mxu1 %vm8259_vm3, %v8211_v28  ;;  %v4948_v26 = vpop.f32.mrf.mxu0  ;;  %v8266_v8 = vld [vmem:[#allocation8_spill] sm:$0xff]  ;;  %v8268_v28 = vld [vmem:[#allocation17_spill] sm:$0xff]  ;;  %v3338_v57 = vpack.c.bf16 %v8271_v45, %v3309_v61  ;;  %vm8273_vm3 = vmmov %vm8261_vm1 }
 0x139   : > { %v6900_v48 = vadd.f32 %v4982_v12, %v4948_v26  ;;  %vm8267_vm8 = vnez %v8266_v8  ;;  %v4986_v5 = vpop.f32.mrf.mxu1  ;;  %v8277_v45 = vld [vmem:[#allocation12_spill] sm:$0xff]  ;;  %v8280_v26 = vld [vmem:[#allocation13_spill] sm:$0xff] }
 0x13a   : > { %v8269_v49 = vsel %vm8267_vm8, %v8268_v28, 0.0  ;;  %vm8275_vm8 = vmmov %vm8261_vm1  ;;  %vm8278_vm15 = vnez %v8277_v45  ;;  %v8282_v28 = vld [vmem:[#allocation27_spill] sm:$0xff] }
 0x13b   : > { %5102 = vmatmul.mubr.msk.bf16.gmra.mxu0 %vm8261_vm1, %v2801_v51  ;;  %v3337_v22 = vpack.c.bf16 %v8270_v59, %v8269_v49  ;;  %v1731_v51 = vpop.f32.mrf.mxu0  ;;  %v1958_v59 = vpop.f32.mrf.mxu1 }
 0x13c   : > { %5141 = vmatprep.mubr.msk.bf16.mxu0 %vm8262_vm10, %v3336_v2  ;;  %v6908_v2 = vadd.f32 %v1942_v15, %v1731_v51  ;;  %vm8272_vm10 = vcmask 1043456   ;;  %v8276_v15 = vld [vmem:[#allocation25_spill] sm:$0xff]  ;;  %v8283_v51 = vld [vmem:[#allocation32_spill] sm:$0xff] }
 0x13d   : > { %v3913_v58 = vsel %vm8272_vm10, %v6754_v42, 0  ;;  %v4951_v12 = vpop.f32.mrf.mxu0  ;;  %v3311_v42 = vsel %vm8278_vm15, %v8276_v15, 0.0  ;;  %vm8281_vm10 = vnez %v8280_v26  ;;  %vm8285_vm15 = vmmov %vm8261_vm1  ;;  %v8291_v15 = vld [vmem:[#allocation20_spill] sm:$0xff]  ;;  %v8294_v26 = vld [vmem:[#allocation37_spill] sm:$0xff] }
 0x13e   : > { %v6916_v0 = vadd.f32 %v4985_v19, %v4951_v12  ;;  %v3339_v49 = vpack.c.bf16 %v8282_v28, %v3311_v42  ;;  %v8288_v12 = vld [vmem:[#allocation18_spill] sm:$0xff]  ;;  %v8293_v42 = vld [vmem:[#allocation35_spill] sm:$0xff] }
 0x13f   : > { %5180 = vmatmul.mubr.msk.bf16.gmra.mxu1 %vm8273_vm3, %v8214_v60  ;;  %v1744_v3 = vpop.f32.mrf.mxu0  ;;  %v8279_v60 = vld [vmem:[#allocation30_spill] sm:$0xff]  ;;  %vm8284_vm3 = vmmov %vm8261_vm1 }
 0x140   : > { %5183 = vmatprep.mubr.msk.bf16.mxu1 %vm8261_vm1, %v8218_v1  ;;  %v6923_v61 = vadd.f32 %v1955_v56, %v1744_v3  ;;  %v3313_v8 = vsel %vm8281_vm10, %v8279_v60, 0.0  ;;  %v8287_v56 = vld [vmem:[#allocation33_spill] sm:$0xff]  ;;  %v8290_v3 = vld [vmem:[#allocation36_spill] sm:$0xff]  ;;  %vm8292_vm10 = vnez %v8291_v15 }
 0x141   : > { %v4952_v1 = vpop.f32.mrf.mxu0  ;;  %v3317_v45 = vsel %vm8292_vm10, %v8290_v3, 0.0  ;;  %v8310_v15 = vld [vmem:[#allocation49_spill] sm:$0xff] }
 0x142   : > { %v6928_v19 = vadd.f32 %v4986_v5, %v4952_v1  ;;  %v8299_v1 = vld [vmem:[#allocation21_spill] sm:$0xff] }
 0x143   : > { %5142 = vmatmul.mubr.msk.bf16.vlgmr.msra.gmra.mxu0 %vm8274_vm5, %v3337_v22  ;;  %v1747_v22 = vpop.f32.mrf.mxu0  ;;  %vm8286_vm5 = vmmov %vm8261_vm1 }
 0x144   : > { %5208 = vmatpush3.bf16.msra.mxu0 %v3913_v58  ;;  %5145 = vmatprep.mubr.msk.bf16.mxu0 %vm8275_vm8, %v3338_v57  ;;  %v3340_v58 = vpack.c.bf16 %v8283_v51, %v3313_v8  ;;  %v6932_v57 = vadd.f32 %v1958_v59, %v1747_v22  ;;  %vm8289_vm8 = vnez %v8288_v12  ;;  %v3342_v8 = vpack.c.bf16 %v8294_v26, %v3317_v45  ;;  %v8301_v59 = vld [vmem:[#allocation4_spill] sm:$0xff]  ;;  %v8311_v45 = vld [vmem:[#allocation42_spill] sm:$0xff] }
 0x145   : > { %v3315_v5 = vsel %vm8289_vm8, %v8287_v56, 0.0  ;;  %vm8300_vm8 = vnez %v8299_v1  ;;  %v8302_v22 = vld [vmem:[#allocation28_spill] sm:$0xff]  ;;  %v8313_v26 = vld [vmem:[#allocation50_spill] sm:$0xff] }
 0x146   : > { %v3341_v60 = vpack.c.bf16 %v8293_v42, %v3315_v5  ;;  %vm8303_vm10 = vnez %v8302_v22  ;;  %v8308_v5 = vmov 0.0  }
 0x147   : > { %5184 = vmatmul.mubr.msk.bf16.gmra.mxu1 %vm8284_vm3, %v8220_v53  ;;  %vm8295_vm3 = vmmov %vm8261_vm1  ;;  %v3321_v51 = vsel %vm8303_vm10, %v8301_v59, 0.0  ;;  %v3598_v3 = vpack.c.bf16 %v8308_v5, %v6812_v36 }
 0x148   : > { %5187 = vmatprep.mubr.msk.bf16.mxu1 %vm8285_vm15, %v8223_v47  ;;  %vm8296_vm15 = vmmov %vm8261_vm1  ;;  %v8298_v47 = vld [vmem:[#allocation43_spill] sm:$0xff] }
 0x149   : > { %v4989_v53 = vpop.f32.mrf.mxu1  ;;  %v3319_v28 = vsel %vm8300_vm8, %v8298_v47, 0.0  ;;  %vm8312_vm8 = vnez %v8311_v45  ;;  %v8316_v47 = vld [vmem:[#allocation9_spill] sm:$0xff] }
 0x14a   : > { %v3323_v42 = vsel %vm8312_vm8, %v8310_v15, 0.0  ;;  %v8322_v15 = vld [vmem:[#allocation5_spill] sm:$0xff] }
 0x14b   : > { %5146 = vmatmul.mubr.msk.bf16.gmra.mxu0 %vm8261_vm1, %v3339_v49  ;;  %v1971_v49 = vpop.f32.mrf.mxu1  ;;  %v3345_v1 = vpack.c.bf16 %v8316_v47, %v3323_v42  ;;  %vm8323_vm8 = vnez %v8322_v15  ;;  %v3606_v47 = vshrl.u32 %v3598_v3, 16 }
 0x14c   : > { %5149 = vmatprep.mubr.msk.bf16.mxu0 %vm8286_vm5, %v3340_v58  ;;  %vm8297_vm5 = vmmov %vm8261_vm1  ;;  %v8304_v58 = vld [vmem:[#allocation44_spill] sm:$0xff] }
 0x14d   : > { %v3343_v56 = vpack.c.bf16 %v8304_v58, %v3319_v28  ;;  %v3602_v28 = vshll.u32 %v3598_v3, 16 }
 0x14f   : > { %5188 = vmatmul.mubr.msk.bf16.gmra.mxu1 %vm8295_vm3, %v8226_v4  ;;  %v8305_v4 = vld [vmem:[#allocation47_spill] sm:$0xff]  ;;  %vm8306_vm3 = vmmov %vm8261_vm1 }
 0x150   : > { %5191 = vmatprep.mubr.msk.bf16.mxu1 %vm8296_vm15, %v8233_v63  ;;  %v3344_v12 = vpack.c.bf16 %v8305_v4, %v3321_v51  ;;  %v4990_v63 = vpop.f32.mrf.mxu1  ;;  %vm8307_vm15 = vmmov %vm8261_vm1 }
 0x153   : > { %5150 = vmatmul.mubr.msk.bf16.gmra.mxu0 %vm8261_vm1, %v3341_v60  ;;  %v1974_v60 = vpop.f32.mrf.mxu1 }
 0x154   : > { %5153 = vmatprep.mubr.msk.bf16.mxu0 %vm8297_vm5, %v3342_v8  ;;  %vm8309_vm5 = vmmov %vm8261_vm1  ;;  %v8314_v8 = vld [vmem:[#allocation46_spill] sm:$0xff] }
 0x155   : > { %vm8315_vm10 = vnez %v8314_v8  ;;  %v8325_v8 = vld [vmem:[#allocation6_spill] sm:$0xff] }
 0x157   : > { %5192 = vmatmul.mubr.msk.bf16.gmra.mxu1 %vm8306_vm3, %v8235_v14  ;;  %v3325_v14 = vsel %vm8315_vm10, %v8313_v26, 0.0  ;;  %vm8318_vm3 = vmmov %vm8261_vm1  ;;  %vm8326_vm10 = vnez %v8325_v8  ;;  %v8332_v8 = vld [vmem:[#allocation7_spill] sm:$0xff] }
 0x158   : > { %5195 = vmatprep.mubr.msk.bf16.mxu1 %vm8307_vm15, %v8244_v6  ;;  %v8317_v6 = vld [vmem:[#allocation10_spill] sm:$0xff]  ;;  %vm8319_vm15 = vmmov %vm8261_vm1 }
 0x159   : > { %v3346_v59 = vpack.c.bf16 %v8317_v6, %v3325_v14  ;;  %v8327_v6 = vld [vmem:[#allocation55_spill] sm:$0xff] }
 0x15b   : > { %5154 = vmatmul.mubr.msk.bf16.gmra.mxu0 %vm8261_vm1, %v3343_v56  ;;  %v3604_v56 = vrot.slane %v3602_v28, 1 }
 0x15c   : > { %5157 = vmatprep.mubr.msk.bf16.mxu0 %vm8309_vm5, %v3344_v12  ;;  %vm8320_vm5 = vmmov %vm8261_vm1  ;;  %v8321_v12 = vld [vmem:[#allocation54_spill] sm:$0xff] }
 0x15d   : > { %v3327_v45 = vsel %vm8323_vm8, %v8321_v12, 0.0  ;;  %vm8331_vm8 = vmmov %vm8261_vm1 }
 0x15e   : > { %v4993_v22 = vpop.f32.mrf.mxu1  ;;  %v3347_v28 = vpack.c.bf16 %v8327_v6, %v3327_v45  ;;  %v3608_v45 = vor.u32 %v3606_v47, %v3604_v56  ;;  %v8336_v6 = vld [vmem:[#allocation3_spill] sm:$0xff] }
 0x15f   : > { %5196 = vmatmul.mubr.msk.bf16.gmra.mxu1 %vm8318_vm3, %v8246_v32  ;;  %v8324_v32 = vld [vmem:[#allocation56_spill] sm:$0xff]  ;;  %vm8328_vm3 = vsmask.f32 7424 }
 0x160   : > { %5199 = vmatprep.mubr.msk.bf16.mxu1 %vm8319_vm15, %v8249_v62  ;;  %v4955_v51 = vpop.f32.mrf.mxu0  ;;  %v1987_v58 = vpop.f32.mrf.mxu1  ;;  %v3329_v62 = vsel %vm8326_vm10, %v8324_v32, 0.0  ;;  %vm8329_vm15 = vmmov %vm8261_vm1  ;;  %vm8333_vm10 = vnez %v8332_v8 }
 0x161   : > { %v6983_v4 = vadd.f32 %v4989_v53, %v4955_v51  ;;  %v3348_v12 = vpack.c.bf16 %v6257_v25, %v3329_v62  ;;  %v3331_v62 = vsel %vm8333_vm10, %v6269_v33, 0.0 }
 0x162   : > { %v1760_v42 = vpop.f32.mrf.mxu0  ;;  %v4994_v26 = vpop.f32.mrf.mxu1 }
 0x163   : > { %5158 = vmatmul.mubr.msk.bf16.gmra.mxu0 %vm8261_vm1, %v3345_v1  ;;  %v6992_v14 = vadd.f32 %v1971_v49, %v1760_v42  ;;  %v4148_v42 = vld [vmem:[%s7004_s17 + $0x8] sm:$0xff] }
 0x164   : > { %5161 = vmatprep.mubr.msk.bf16.mxu0 %vm8320_vm5, %v3346_v59  ;;  %v4956_v1 = vpop.f32.mrf.mxu0  ;;  %v1990_v53 = vpop.f32.mrf.mxu1  ;;  %v3605_v59 = vsel %vm8328_vm3, %v6871_v17, %v3604_v56  ;;  %vm8330_vm5 = vmmov %vm8261_vm1  ;;  %v8334_v56 = vld [vmem:[#allocation48_spill] sm:$0xff] }
 0x165   : > { %v6997_v51 = vadd.f32 %v4990_v63, %v4956_v1  ;;  %v4147_v63 = vld [vmem:[%s7004_s17] sm:$0xff]  ;;  %vm8335_vm3 = vnez %v8334_v56  ;;  %vm8340_vm10 = vmmov %vm8330_vm5 }
 0x166   : > { %v1763_v49 = vpop.f32.mrf.mxu0  ;;  %v3333_v47 = vsel %vm8335_vm3, %v6290_v31, 0.0 }
 0x167   : > { %v4997_v3 = vpop.f32.mrf.mxu1  ;;  %5200 = vmatmul.mubr.msk.bf16.gmra.mxu1 %vm8329_vm15, %v6689_v40  ;;  %v7008_v15 = vadd.f32 %v1974_v60, %v1763_v49  ;;  %vm8337_vm15 = vsmask.f32 7424 }
 0x168   : > { %5203 = vmatprep.mubr.msk.bf16.mxu1 %vm8261_vm1, %v3605_v59  ;;  %v4959_v17 = vpop.f32.mrf.mxu0  ;;  %vm4203_vm1 = vcmask 31744  }
 0x169   : > { %v2003_v25 = vpop.f32.mrf.mxu1  ;;  %v7014_v32 = vadd.f32 %v4993_v22, %v4959_v17  ;;  %v3609_v22 = vsel %vm8337_vm15, %v3608_v45, %v8336_v6  ;;  %v3350_v17 = vpack.c.bf16 %v6639_v43, %v3333_v47  ;;  %v4149_v45 = vld [vmem:[%s7004_s17 + $0x10] sm:$0xff]  ;;  %v8341_v43 = vld [vmem:[#allocation51_spill] sm:$0xff] }
 0x16a   : > { %v1776_v40 = vpop.f32.mrf.mxu0  ;;  %vm8342_vm3 = vnez %v8341_v43 }
 0x16b   : > { %5162 = vmatmul.mubr.msk.bf16.gmra.mxu0 %vm8330_vm5, %v3347_v28  ;;  %v4998_v60 = vpop.f32.mrf.mxu1  ;;  %v7023_v1 = vadd.f32 %v1987_v58, %v1776_v40  ;;  %v4179_v28 = vpack.c.bf16 %v4148_v42, %v4147_v63  ;;  %v4150_v63 = vld [vmem:[%s7004_s17 + $0x18] sm:$0xff]  ;;  %v4152_v40 = vld [vmem:[%s7004_s17 + $0x28] sm:$0xff]  ;;  %v3335_v56 = vsel %vm8342_vm3, %v6812_v36, 0.0 }
 0x16c   : > { %5165 = vmatprep.mubr.msk.bf16.mxu0 %vm8331_vm8, %v3348_v12  ;;  %v4960_v59 = vpop.f32.mrf.mxu0  ;;  %v3349_v12 = vpack.c.bf16 %v6272_v13, %v3331_v62  ;;  %vm8338_vm8 = vmmov %vm8330_vm5  ;;  %v4151_v62 = vld [vmem:[%s7004_s17 + $0x20] sm:$0xff]  ;;  %v4180_v6 = vpack.c.bf16 %v4150_v63, %v4149_v45 }
 0x16d   : > { %v2006_v33 = vpop.f32.mrf.mxu1  ;;  %v7028_v49 = vadd.f32 %v4994_v26, %v4960_v59 }
 0x16e   : > { %v1779_v8 = vpop.f32.mrf.mxu0 }
 0x16f   : > { %v5001_v31 = vpop.f32.mrf.mxu1  ;;  %5204 = vmatmul.mubr.msk.bf16.gmra.mxu1 %vm8330_vm5, %v3609_v22  ;;  %v7032_v58 = vadd.f32 %v1990_v53, %v1779_v8  ;;  %v8343_v22 = vld [vmem:[#allocation61_spill] sm:$0xff] }
 0x170   : > { %5243 = vmatprep.mubr.msk.bf16.mxu1 %vm4203_vm1, %v4179_v28  ;;  %v4963_v42 = vpop.f32.mrf.mxu0  ;;  %vm8344_vm15 = vnez %v8343_v22 }
 0x171   : > { %v2019_v13 = vpop.f32.mrf.mxu1  ;;  %v7040_v26 = vadd.f32 %v4997_v3, %v4963_v42  ;;  %v3815_v28 = vsel %vm8344_vm15, %v6354_v18, 0.0  ;;  %v4153_v18 = vld [vmem:[%s7004_s17 + $0x30] sm:$0xff] }
 0x172   : > { %v1792_v53 = vpop.f32.mrf.mxu0  ;;  %v3846_v43 = vpack.c.bf16 %v3815_v28, %v6371_v38  ;;  %v3817_v38 = vsel %vm8192_vm13, %v6386_v55, 0.0 }
 0x173   : > { %5166 = vmatmul.mubr.msk.bf16.gmra.mxu0 %vm8338_vm8, %v3349_v12  ;;  %8339 = vst [vmem:[#allocation40_spill] sm:$0xff] %v7040_v26  ;;  %v5002_v47 = vpop.f32.mrf.mxu1  ;;  %v7049_v59 = vadd.f32 %v2003_v25, %v1792_v53  ;;  %v4181_v12 = vpack.c.bf16 %v4152_v40, %v4151_v62  ;;  %v4154_v25 = vld [vmem:[%s7004_s17 + $0x38] sm:$0xff]  ;;  %v4156_v40 = vld [vmem:[%s7004_s17 + $0x48] sm:$0xff]  ;;  %vm8345_vm8 = vmmov %vm8330_vm5  ;;  %v3819_v53 = vsel %vm6349_vm2, %v6404_v10, 0.0  ;;  %v3847_v39 = vpack.c.bf16 %v3817_v38, %v6418_v54 }
 0x174   : > { %5169 = vmatprep.mubr.msk.bf16.mxu0 %vm8340_vm10, %v3350_v17  ;;  %v4964_v3 = vpop.f32.mrf.mxu0  ;;  %v3351_v17 = vpack.c.bf16 %v8308_v5, %v3335_v56  ;;  %v4155_v5 = vld [vmem:[%s7004_s17 + $0x40] sm:$0xff]  ;;  %v4182_v56 = vpack.c.bf16 %v4154_v25, %v4153_v18  ;;  %v4158_v10 = vld [vmem:[%s7004_s17 + $0x58] sm:$0xff]  ;;  %vm8346_vm2 = vmmov %vm8330_vm5  ;;  %vm8350_vm10 = vnez %v8097_v52 }
 0x175   : > { %v2022_v8 = vpop.f32.mrf.mxu1  ;;  %v7052_v42 = vadd.f32 %v4998_v60, %v4964_v3  ;;  %v4183_v22 = vpack.c.bf16 %v4156_v40, %v4155_v5  ;;  %v4159_v18 = vld [vmem:[%s7004_s17 + $0x60] sm:$0xff]  ;;  %v4160_v25 = vld [vmem:[%s7004_s17 + $0x68] sm:$0xff]  ;;  %vm8347_vm13 = vmmov %vm8346_vm2  ;;  %v4184_v5 = vpack.c.bf16 %v4158_v10, %v4157_v21  ;;  %v3823_v40 = vsel %vm6399_vm6, %v6465_v35, 0.0 }
 0x176   : > { %v1795_v36 = vpop.f32.mrf.mxu0  ;;  %vm8348_vm6 = vmmov %vm8346_vm2 }
 0x177   : > { %v5041_v26 = vpop.f32.mrf.mxu1  ;;  %5244 = vmatmul.mubr.msk.bf16.vlgmr.msra.gmra.mxu1 %vm4203_vm1, %v4180_v6  ;;  %v7056_v45 = vadd.f32 %v2006_v33, %v1795_v36  ;;  %vm8356_vm15 = vmmov %vm8346_vm2 }
 0x178   : > { %5247 = vmatprep.mubr.msk.bf16.mxu1 %vm4203_vm1, %v4181_v12  ;;  %v3848_v12 = vpack.c.bf16 %v3819_v53, %v6427_v11  ;;  %v3821_v11 = vsel %vm6381_vm7, %v6453_v27, 0.0  ;;  %vm8349_vm7 = vmmov %vm8346_vm2 }
 0x179   : > { %v4967_v63 = vpop.f32.mrf.mxu0  ;;  %v2626_v62 = vpop.f32.mrf.mxu1  ;;  %v3849_v53 = vpack.c.bf16 %v3821_v11, %v6474_v24 }
 0x17a   : > { %v7067_v60 = vadd.f32 %v5001_v31, %v4967_v63 }
 0x17b   : > { %5170 = vmatmul.mubr.msk.bf16.gmra.mxu0 %vm8330_vm5, %v3351_v17  ;;  %v1808_v36 = vpop.f32.mrf.mxu0  ;;  %v5042_v33 = vpop.f32.mrf.mxu1  ;;  %vm8358_vm5 = vmmov %vm8346_vm2 }
 0x17c   : > { %5209 = vmatprep.mubr.msk.bf16.mxu0 %vm8345_vm8, %v3846_v43  ;;  %v7073_v6 = vadd.f32 %v2019_v13, %v1808_v36  ;;  %v4185_v36 = vpack.c.bf16 %v4160_v25, %v4159_v18  ;;  %v8351_v18 = vld [vmem:[#allocation16_spill] sm:$0xff] }
 0x17d   : > { %v4968_v55 = vpop.f32.mrf.mxu0  ;;  %v2629_v31 = vpop.f32.mrf.mxu1  ;;  %vm8352_vm3 = vnez %v8351_v18 }
 0x17e   : > { %v7076_v28 = vadd.f32 %v5002_v47, %v4968_v55  ;;  %v4162_v55 = vld [vmem:[%s7004_s17 + $0x78] sm:$0xff]  ;;  %v3827_v25 = vsel %vm8352_vm3, %v6511_v7, 0.0 }
 0x17f   : > { %v1811_v3 = vpop.f32.mrf.mxu0  ;;  %v5045_v17 = vpop.f32.mrf.mxu1  ;;  %5248 = vmatmul.mubr.msk.bf16.gmra.mxu1 %vm4203_vm1, %v4182_v56 }
 0x180   : > { %v7080_v43 = vadd.f32 %v2022_v8, %v1811_v3  ;;  %5251 = vmatprep.mubr.msk.bf16.mxu1 %vm4203_vm1, %v4183_v22  ;;  %v3850_v22 = vpack.c.bf16 %v3823_v40, %v6481_v37  ;;  %v4163_v3 = vld [vmem:[%s7004_s17 + $0x80] sm:$0xff]  ;;  %v4164_v37 = vld [vmem:[%s7004_s17 + $0x88] sm:$0xff]  ;;  %v8354_v40 = vld [vmem:[#allocation65_spill] sm:$0xff] }
 0x181   : > { %v5007_v13 = vpop.f32.mrf.mxu0  ;;  %v2642_v54 = vpop.f32.mrf.mxu1 }
 0x182   : > { %v2461_v47 = vadd.f32 %v5007_v13, %v6845_v16 }
 0x183   : > { %5210 = vmatmul.mubr.msk.bf16.vlgmr.msra.gmra.mxu0 %vm8346_vm2, %v3847_v39  ;;  %v2332_v8 = vpop.f32.mrf.mxu0  ;;  %v5046_v63 = vpop.f32.mrf.mxu1 }
 0x184   : > { %5213 = vmatprep.mubr.msk.bf16.mxu0 %vm8347_vm13, %v3848_v12  ;;  %v2459_v38 = vadd.f32 %v2332_v8, %v6853_v29  ;;  %v7097_v56 = vadd.f32 %v5041_v26, %v2461_v47  ;;  %v4161_v26 = vld [vmem:[%s7004_s17 + $0x70] sm:$0xff] }
 0x185   : > { %v5008_v16 = vpop.f32.mrf.mxu0  ;;  %v2645_v46 = vpop.f32.mrf.mxu1 }
 0x186   : > { %v2462_v27 = vadd.f32 %v5008_v16, %v6856_v44  ;;  %v7102_v39 = vadd.f32 %v2626_v62, %v2459_v38  ;;  %v3852_v38 = vpack.c.bf16 %v3827_v25, %v8354_v40 }
 0x187   : > { %v2335_v20 = vpop.f32.mrf.mxu0  ;;  %v5049_v35 = vpop.f32.mrf.mxu1  ;;  %5252 = vmatmul.mubr.msk.bf16.gmra.mxu1 %vm4203_vm1, %v4184_v5  ;;  %v8353_v5 = vld [vmem:[#allocation64_spill] sm:$0xff] }
 0x188   : > { %v2460_v29 = vadd.f32 %v2335_v20, %v6859_v41  ;;  %5255 = vmatprep.mubr.msk.bf16.mxu1 %vm4203_vm1, %v4185_v36  ;;  %v7109_v24 = vadd.f32 %v5042_v33, %v2462_v27  ;;  %v3825_v41 = vsel %vm8350_vm10, %v6499_v30, 0.0  ;;  %v4186_v33 = vpack.c.bf16 %v4162_v55, %v4161_v26  ;;  %v4166_v27 = vld [vmem:[%s7004_s17 + $0x98] sm:$0xff]  ;;  %v4168_v26 = vld [vmem:[%s7004_s17 + $0xa8] sm:$0xff] }
 0x189   : > { %v5011_v12 = vpop.f32.mrf.mxu0  ;;  %v2658_v44 = vpop.f32.mrf.mxu1  ;;  %v3851_v52 = vpack.c.bf16 %v3825_v41, %v8353_v5 }
 0x18a   : > { %v2465_v62 = vadd.f32 %v5011_v12, %v6864_v23  ;;  %v7119_v21 = vadd.f32 %v2629_v31, %v2460_v29  ;;  %v4187_v23 = vpack.c.bf16 %v4164_v37, %v4163_v3  ;;  %v4167_v29 = vld [vmem:[%s7004_s17 + $0xa0] sm:$0xff]  ;;  %v8359_v12 = vld [vmem:[#allocation67_spill] sm:$0xff] }
 0x18b   : > { %5214 = vmatmul.mubr.msk.bf16.gmra.mxu0 %vm8348_vm6, %v3849_v53  ;;  %v2348_v10 = vpop.f32.mrf.mxu0  ;;  %v5050_v13 = vpop.f32.mrf.mxu1  ;;  %v3829_v37 = vsel %vm8210_vm14, %v8359_v12, 0.0  ;;  %vm8365_vm14 = vmmov %vm8346_vm2 }
 0x18c   : > { %5217 = vmatprep.mubr.msk.bf16.mxu0 %vm8349_vm7, %v3850_v22  ;;  %v2463_v47 = vadd.f32 %v2348_v10, %v6873_v34  ;;  %v7125_v11 = vadd.f32 %v5045_v17, %v2465_v62  ;;  %v8355_v34 = vld [vmem:[#allocation34_spill] sm:$0xff]  ;;  %v4165_v17 = vld [vmem:[%s7004_s17 + $0x90] sm:$0xff]  ;;  %vm8397_vm7 = vcmask 1045504  }
 0x18d   : > { %v5012_v8 = vpop.f32.mrf.mxu0  ;;  %v2661_v30 = vpop.f32.mrf.mxu1 }
 0x18e   : > { %v2466_v31 = vadd.f32 %v5012_v8, %v6878_v50  ;;  %v7130_v36 = vadd.f32 %v2642_v54, %v2463_v47  ;;  %v8357_v54 = vld [vmem:[#allocation38_spill] sm:$0xff] }
 0x18f   : > { %v2351_v16 = vpop.f32.mrf.mxu0  ;;  %v5053_v7 = vpop.f32.mrf.mxu1  ;;  %5256 = vmatmul.mubr.msk.bf16.gmra.mxu1 %vm4203_vm1, %v4186_v33  ;;  %v8361_v33 = vld [vmem:[#allocation69_spill] sm:$0xff] }
 0x190   : > { %v2464_v53 = vadd.f32 %v2351_v16, %v8355_v34  ;;  %5259 = vmatprep.mubr.msk.bf16.mxu1 %vm4203_vm1, %v4187_v23  ;;  %v7137_v22 = vadd.f32 %v5046_v63, %v2466_v31  ;;  %v4188_v63 = vpack.c.bf16 %v4166_v27, %v4165_v17  ;;  %v3831_v25 = vsel %vm8213_vm12, %v8361_v33, 0.0  ;;  %v4170_v27 = vld [vmem:[%s7004_s17 + $0xb8] sm:$0xff]  ;;  %vm8366_vm12 = vmmov %vm8346_vm2 }
 0x191   : > { %v5015_v20 = vpop.f32.mrf.mxu0  ;;  %v2674_v50 = vpop.f32.mrf.mxu1  ;;  %v4189_v23 = vpack.c.bf16 %v4168_v26, %v4167_v29  ;;  %v4171_v26 = vld [vmem:[%s7004_s17 + $0xc0] sm:$0xff] }
 0x192   : > { %v2469_v55 = vadd.f32 %v5015_v20, %v8357_v54  ;;  %v7147_v62 = vadd.f32 %v2645_v46, %v2464_v53  ;;  %v4172_v54 = vld [vmem:[%s7004_s17 + $0xc8] sm:$0xff] }
 0x193   : > { %5218 = vmatmul.mubr.msk.bf16.gmra.mxu0 %vm8356_vm15, %v3851_v52  ;;  %v2364_v41 = vpop.f32.mrf.mxu0  ;;  %v5054_v10 = vpop.f32.mrf.mxu1  ;;  %v8363_v52 = vld [vmem:[#allocation70_spill] sm:$0xff] }
 0x194   : > { %5221 = vmatprep.mubr.msk.bf16.mxu0 %vm8358_vm5, %v3852_v38  ;;  %v2467_v47 = vadd.f32 %v2364_v41, %v6895_v9  ;;  %v7153_v8 = vadd.f32 %v5049_v35, %v2469_v55  ;;  %v3853_v31 = vpack.c.bf16 %v3829_v37, %v8363_v52  ;;  %v8364_v38 = vld [vmem:[#allocation71_spill] sm:$0xff]  ;;  %v4169_v35 = vld [vmem:[%s7004_s17 + $0xb0] sm:$0xff]  ;;  %v8367_v55 = vld [vmem:[#allocation73_spill] sm:$0xff] }
 0x195   : > { %v5016_v5 = vpop.f32.mrf.mxu0  ;;  %v2677_v46 = vpop.f32.mrf.mxu1  ;;  %v3854_v16 = vpack.c.bf16 %v3831_v25, %v8364_v38 }
 0x196   : > { %v2470_v40 = vadd.f32 %v5016_v5, %v6900_v48  ;;  %v7158_v34 = vadd.f32 %v2658_v44, %v2467_v47  ;;  %v8371_v5 = vld [vmem:[#allocation76_spill] sm:$0xff] }
 0x197   : > { %v2367_v53 = vpop.f32.mrf.mxu0  ;;  %v5057_v17 = vpop.f32.mrf.mxu1  ;;  %5260 = vmatmul.mubr.msk.bf16.gmra.mxu1 %vm4203_vm1, %v4188_v63  ;;  %v8369_v63 = vld [vmem:[#allocation75_spill] sm:$0xff] }
 0x198   : > { %v2468_v9 = vadd.f32 %v2367_v53, %v6908_v2  ;;  %5263 = vmatprep.mubr.msk.bf16.mxu1 %vm4203_vm1, %v4189_v23  ;;  %v7165_v20 = vadd.f32 %v5050_v13, %v2470_v40  ;;  %v3833_v2 = vsel %vm6540_vm0, %v8367_v55, 0.0  ;;  %v4190_v13 = vpack.c.bf16 %v4170_v27, %v4169_v35  ;;  %v8372_v40 = vld [vmem:[#allocation77_spill] sm:$0xff]  ;;  %vm8374_vm0 = vmmov %vm8346_vm2 }
 0x199   : > { %v2690_v48 = vpop.f32.mrf.mxu1  ;;  %v3835_v18 = vsel %vm6552_vm4, %v8369_v63, 0.0  ;;  %v3855_v52 = vpack.c.bf16 %v3833_v2, %v8371_v5  ;;  %v4174_v35 = vld [vmem:[%s7004_s17 + $0xd8] sm:$0xff]  ;;  %vm8373_vm4 = vmmov %vm8346_vm2  ;;  %v8378_v63 = vld [vmem:[#allocation74_spill] sm:$0xff] }
 0x19a   : > { %v5019_v29 = vpop.f32.mrf.mxu0  ;;  %v7175_v3 = vadd.f32 %v2661_v30, %v2468_v9  ;;  %v3856_v38 = vpack.c.bf16 %v3835_v18, %v8372_v40  ;;  %vm8379_vm8 = vnez %v8378_v63  ;;  %vm8383_vm2 = vmmov %vm8374_vm0 }
 0x19b   : > { %5222 = vmatmul.mubr.msk.bf16.gmra.mxu0 %vm8365_vm14, %v3853_v31  ;;  %v2473_v44 = vadd.f32 %v5019_v29, %v6916_v0  ;;  %v5058_v41 = vpop.f32.mrf.mxu1  ;;  %v4191_v0 = vpack.c.bf16 %v4172_v54, %v4171_v26  ;;  %v4175_v26 = vld [vmem:[%s7004_s17 + $0xe0] sm:$0xff]  ;;  %v4176_v54 = vld [vmem:[%s7004_s17 + $0xe8] sm:$0xff]  ;;  %vm8393_vm6 = vmmov %vm8374_vm0 }
 0x19c   : > { %5225 = vmatprep.mubr.msk.bf16.mxu0 %vm8366_vm12, %v3854_v16  ;;  %v2380_v37 = vpop.f32.mrf.mxu0  ;;  %vm8400_vm10 = vmmov %vm8374_vm0 }
 0x19d   : > { %v2471_v25 = vadd.f32 %v2380_v37, %v6923_v61  ;;  %v7181_v47 = vadd.f32 %v5053_v7, %v2473_v44  ;;  %v2693_v30 = vpop.f32.mrf.mxu1  ;;  %v4173_v7 = vld [vmem:[%s7004_s17 + $0xd0] sm:$0xff]  ;;  %v8375_v44 = vld [vmem:[#allocation79_spill] sm:$0xff]  ;;  %vm8447_vm3 = vmmov %vm8374_vm0 }
 0x19e   : > { %v5020_v23 = vpop.f32.mrf.mxu0  ;;  %vm8448_vm15 = vmmov %vm8374_vm0 }
 0x19f   : > { %v2474_v31 = vadd.f32 %v5020_v23, %v6928_v19  ;;  %v7186_v16 = vadd.f32 %v2674_v50, %v2471_v25  ;;  %v5061_v9 = vpop.f32.mrf.mxu1  ;;  %5264 = vmatmul.mubr.msk.bf16.gmra.mxu1 %vm4203_vm1, %v4190_v13  ;;  %v8377_v13 = vld [vmem:[#allocation81_spill] sm:$0xff]  ;;  %v8380_v23 = vld [vmem:[#allocation82_spill] sm:$0xff]  ;;  %vm8449_vm5 = vmmov %vm8374_vm0 }
 0x1a0   : > { %v2383_v53 = vpop.f32.mrf.mxu0  ;;  %5267 = vmatprep.mubr.msk.bf16.mxu1 %vm4203_vm1, %v4191_v0  ;;  %v3839_v33 = vsel %vm8379_vm8, %v8377_v13, 0.0  ;;  %vm8450_vm14 = vmmov %vm8374_vm0 }
 0x1a1   : > { %v2472_v61 = vadd.f32 %v2383_v53, %v6932_v57  ;;  %v7193_v27 = vadd.f32 %v5054_v10, %v2474_v31  ;;  %v2706_v19 = vpop.f32.mrf.mxu1  ;;  %v3837_v57 = vsel %vm6586_vm11, %v8375_v44, 0.0  ;;  %v4192_v10 = vpack.c.bf16 %v4174_v35, %v4173_v7  ;;  %v8381_v31 = vld [vmem:[#allocation83_spill] sm:$0xff]  ;;  %vm8382_vm11 = vmmov %vm8374_vm0 }
 0x1a2   : > { %v3857_v5 = vpack.c.bf16 %v3837_v57, %v8380_v23  ;;  %v3858_v40 = vpack.c.bf16 %v3839_v33, %v8381_v31  ;;  %v8389_v33 = vld [vmem:[#allocation39_spill] sm:$0xff]  ;;  %vm8451_vm12 = vmmov %vm8374_vm0 }
 0x1a3   : > { %v5023_v29 = vpop.f32.mrf.mxu0  ;;  %5226 = vmatmul.mubr.msk.bf16.gmra.mxu0 %vm8373_vm4, %v3855_v52  ;;  %v7203_v12 = vadd.f32 %v2677_v46, %v2472_v61  ;;  %v5062_v37 = vpop.f32.mrf.mxu1  ;;  %v8390_v23 = vld [vmem:[#allocation31_spill] sm:$0xff]  ;;  %vm8452_vm4 = vmmov %vm8374_vm0 }
 0x1a4   : > { %v2477_v50 = vadd.f32 %v5023_v29, %v6983_v4  ;;  %5229 = vmatprep.mubr.msk.bf16.mxu0 %vm8374_vm0, %v3856_v38  ;;  %v4193_v4 = vpack.c.bf16 %v4176_v54, %v4175_v26  ;;  %vm8453_vm8 = vmmov %vm8374_vm0 }
 0x1a5   : > { %v2396_v2 = vpop.f32.mrf.mxu0  ;;  %v2709_v52 = vpop.f32.mrf.mxu1 }
 0x1a6   : > { %v2475_v18 = vadd.f32 %v2396_v2, %v6992_v14  ;;  %v7209_v25 = vadd.f32 %v5057_v17, %v2477_v50  ;;  %v4177_v14 = vld [vmem:[%s7004_s17 + $0xf0] sm:$0xff]  ;;  %v4178_v17 = vld [vmem:[%s7004_s17 + $0xf8] sm:$0xff]  ;;  %v8386_v2 = vld [vmem:[#allocation26_spill] sm:$0xff] }
 0x1a7   : > { %v5024_v0 = vpop.f32.mrf.mxu0  ;;  %v5065_v61 = vpop.f32.mrf.mxu1  ;;  %5268 = vmatmul.mubr.msk.bf16.gmra.mxu1 %vm4203_vm1, %v4192_v10  ;;  %v4194_v57 = vpack.c.bf16 %v4178_v17, %v4177_v14  ;;  %v8395_v17 = vld [vmem:[#allocation23_spill] sm:$0xff] }
 0x1a8   : > { %v2478_v46 = vadd.f32 %v5024_v0, %v6997_v51  ;;  %v7214_v38 = vadd.f32 %v2690_v48, %v2475_v18  ;;  %5271 = vmatprep.mubr.msk.bf16.mxu1 %vm4203_vm1, %v4193_v4  ;;  %v8384_v48 = vld [vmem:[#allocation85_spill] sm:$0xff] }
 0x1a9   : > { %v2399_v53 = vpop.f32.mrf.mxu0  ;;  %v2722_v51 = vpop.f32.mrf.mxu1  ;;  %v3841_v50 = vsel %vm6647_vm9, %v8384_v48, 0.0  ;;  %vm8391_vm9 = vmmov %vm8374_vm0 }
 0x1aa   : > { %v2476_v7 = vadd.f32 %v2399_v53, %v7008_v15  ;;  %v7221_v35 = vadd.f32 %v5058_v41, %v2478_v46  ;;  %v8387_v41 = vld [vmem:[#allocation80_spill] sm:$0xff]  ;;  %v3859_v18 = vpack.c.bf16 %v3841_v50, %v8389_v33 }
 0x1ab   : > { %v5027_v29 = vpop.f32.mrf.mxu0  ;;  %5230 = vmatmul.mubr.msk.bf16.gmra.mxu0 %vm8382_vm11, %v3857_v5  ;;  %v5066_v55 = vpop.f32.mrf.mxu1  ;;  %vm8388_vm13 = vnez %v8387_v41  ;;  %vm8454_vm11 = vmmov %vm8374_vm0 }
 0x1ac   : > { %v2481_v26 = vadd.f32 %v5027_v29, %v7014_v32  ;;  %5233 = vmatprep.mubr.msk.bf16.mxu0 %vm8383_vm2, %v3858_v40  ;;  %v7229_v44 = vadd.f32 %v2693_v30, %v2476_v7  ;;  %v3843_v10 = vsel %vm8388_vm13, %v8386_v2, 0.0  ;;  %v8392_v7 = vld [vmem:[#allocation40_spill] sm:$0xff]  ;;  %vm8455_vm2 = vmmov %vm8374_vm0 }
 0x1ad   : > { %v2412_v15 = vpop.f32.mrf.mxu0  ;;  %v2725_v4 = vpop.f32.mrf.mxu1  ;;  %v3860_v30 = vpack.c.bf16 %v3843_v10, %v8390_v23  ;;  %vm8456_vm13 = vmmov %vm8374_vm0 }
 0x1ae   : > { %v2479_v13 = vadd.f32 %v2412_v15, %v7023_v1  ;;  %v7235_v63 = vadd.f32 %v5061_v9, %v2481_v26  ;;  %v8398_v26 = vld [vmem:[#allocation84_spill] sm:$0xff] }
 0x1af   : > { %v5028_v32 = vpop.f32.mrf.mxu0  ;;  %v5069_v31 = vpop.f32.mrf.mxu1  ;;  %5272 = vmatmul.mubr.msk.bf16.gmra.mxu1 %vm4203_vm1, %v4194_v57  ;;  %vm8399_vm1 = vnez %v8398_v26 }
 0x1b0   : > { %v2482_v0 = vadd.f32 %v5028_v32, %v7028_v49  ;;  %v7240_v5 = vadd.f32 %v2706_v19, %v2479_v13  ;;  %v8394_v49 = vld [vmem:[#allocation59_spill] sm:$0xff]  ;;  %v8396_v19 = vrot.slane %v8395_v17, 2 }
 0x1b1   : > { %v2415_v46 = vpop.f32.mrf.mxu0  ;;  %v2738_v9 = vpop.f32.mrf.mxu1  ;;  %v3845_v48 = vsel %vm8399_vm1, %v8394_v49, 0.0  ;;  %vm8470_vm1 = vmmov %vm8374_vm0 }
 0x1b2   : > { %v2480_v40 = vadd.f32 %v2415_v46, %v7032_v58  ;;  %v7244_v53 = vadd.f32 %v5062_v37, %v2482_v0  ;;  %v3812_v29 = vsel %vm8397_vm7, %v8396_v19, %v8394_v49  ;;  %vm8467_vm7 = vmmov %vm8374_vm0 }
 0x1b3   : > { %v5031_v1 = vpop.f32.mrf.mxu0  ;;  %5234 = vmatmul.mubr.msk.bf16.gmra.mxu0 %vm8391_vm9, %v3859_v18  ;;  %v5070_v54 = vpop.f32.mrf.mxu1  ;;  %v3861_v2 = vpack.c.bf16 %v3845_v48, %v3812_v29  ;;  %vm8459_vm9 = vmmov %vm8374_vm0 }
 0x1b4   : > { %v2485_v14 = vadd.f32 %v5031_v1, %v8392_v7  ;;  %5237 = vmatprep.mubr.msk.bf16.mxu0 %vm8393_vm6, %v3860_v30  ;;  %v7256_v58 = vadd.f32 %v2709_v52, %v2480_v40  ;;  %vm8463_vm6 = vmmov %vm8374_vm0 }
 0x1b5   : > { %v2428_v37 = vpop.f32.mrf.mxu0  ;;  %v2741_v41 = vpop.f32.mrf.mxu1 }
 0x1b6   : > { %v2483_v50 = vadd.f32 %v2428_v37, %v7049_v59  ;;  %v7259_v15 = vadd.f32 %v5065_v61, %v2485_v14 }
 0x1b7   : > { %v5032_v57 = vpop.f32.mrf.mxu0  ;;  %v5109_v33 = vpop.f32.mrf.mxu1 }
 0x1b8   : > { %v2486_v10 = vadd.f32 %v5032_v57, %v7052_v42  ;;  %v7262_v13 = vadd.f32 %v2722_v51, %v2483_v50 }
 0x1b9   : > { %v2431_v32 = vpop.f32.mrf.mxu0  ;;  %v3146_v23 = vpop.f32.mrf.mxu1 }
 0x1ba   : > { %v2484_v18 = vadd.f32 %v2431_v32, %v7056_v45  ;;  %v7265_v0 = vadd.f32 %v5066_v55, %v2486_v10 }
 0x1bb   : > { %v5035_v52 = vpop.f32.mrf.mxu0  ;;  %5238 = vmatmul.mubr.msk.bf16.gmra.mxu0 %vm8400_vm10, %v3861_v2  ;;  %v5110_v46 = vpop.f32.mrf.mxu1  ;;  %vm8475_vm10 = vmmov %vm8374_vm0 }
 0x1bc   : > { %v2489_v59 = vadd.f32 %v5035_v52, %v7067_v60  ;;  %v7269_v61 = vadd.f32 %v2725_v4, %v2484_v18 }
 0x1bd   : > { %v2444_v30 = vpop.f32.mrf.mxu0  ;;  %v3149_v1 = vpop.f32.mrf.mxu1 }
 0x1be   : > { %v2487_v42 = vadd.f32 %v2444_v30, %v7073_v6  ;;  %v7272_v51 = vadd.f32 %v5069_v31, %v2489_v59 }
 0x1bf   : > { %v5036_v40 = vpop.f32.mrf.mxu0  ;;  %v5113_v14 = vpop.f32.mrf.mxu1 }
 0x1c0   : > { %v2490_v45 = vadd.f32 %v5036_v40, %v7076_v28  ;;  %v7275_v55 = vadd.f32 %v2738_v9, %v2487_v42 }
 0x1c1   : > { %v2447_v7 = vpop.f32.mrf.mxu0  ;;  %v3162_v4 = vpop.f32.mrf.mxu1 }
 0x1c2   : > { %v2488_v49 = vadd.f32 %v2447_v7, %v7080_v43  ;;  %v7278_v17 = vadd.f32 %v5070_v54, %v2490_v45 }
 0x1c3   : > { %v5075_v60 = vpop.f32.mrf.mxu0  ;;  %v5114_v31 = vpop.f32.mrf.mxu1 }
 0x1c4   : > { %v2974_v19 = vadd.f32 %v5075_v60, %v7097_v56  ;;  %v7281_v29 = vadd.f32 %v2741_v41, %v2488_v49 }
 0x1c5   : > { %v2845_v6 = vpop.f32.mrf.mxu0  ;;  %v3165_v9 = vpop.f32.mrf.mxu1 }
 0x1c6   : > { %v2972_v26 = vadd.f32 %v2845_v6, %v7102_v39  ;;  %v7284_v48 = vadd.f32 %v5109_v33, %v2974_v19 }
 0x1c7   : > { %v5076_v28 = vpop.f32.mrf.mxu0  ;;  %v5117_v54 = vpop.f32.mrf.mxu1 }
 0x1c8   : > { %v2975_v37 = vadd.f32 %v5076_v28, %v7109_v24  ;;  %v7287_v50 = vadd.f32 %v3146_v23, %v2972_v26 }
 0x1c9   : > { %v2848_v43 = vpop.f32.mrf.mxu0  ;;  %v3178_v41 = vpop.f32.mrf.mxu1 }
 0x1ca   : > { %v2973_v57 = vadd.f32 %v2848_v43, %v7119_v21  ;;  %v7290_v2 = vadd.f32 %v5110_v46, %v2975_v37 }
 0x1cb   : > { %v5079_v56 = vpop.f32.mrf.mxu0  ;;  %v5118_v33 = vpop.f32.mrf.mxu1 }
 0x1cc   : > { %v2978_v10 = vadd.f32 %v5079_v56, %v7125_v11  ;;  %v7293_v32 = vadd.f32 %v3149_v1, %v2973_v57 }
 0x1cd   : > { %v2861_v39 = vpop.f32.mrf.mxu0  ;;  %v3181_v23 = vpop.f32.mrf.mxu1 }
 0x1ce   : > { %v2976_v18 = vadd.f32 %v2861_v39, %v7130_v36  ;;  %v7296_v52 = vadd.f32 %v5113_v14, %v2978_v10 }
 0x1cf   : > { %v5080_v24 = vpop.f32.mrf.mxu0  ;;  %v5121_v46 = vpop.f32.mrf.mxu1 }
 0x1d0   : > { %v2979_v59 = vadd.f32 %v5080_v24, %v7137_v22  ;;  %v7299_v30 = vadd.f32 %v3162_v4, %v2976_v18 }
 0x1d1   : > { %v2864_v21 = vpop.f32.mrf.mxu0  ;;  %v3194_v1 = vpop.f32.mrf.mxu1 }
 0x1d2   : > { %v2977_v42 = vadd.f32 %v2864_v21, %v7147_v62  ;;  %v7302_v40 = vadd.f32 %v5114_v31, %v2979_v59 }
 0x1d3   : > { %v5083_v11 = vpop.f32.mrf.mxu0  ;;  %v5122_v14 = vpop.f32.mrf.mxu1 }
 0x1d4   : > { %v2982_v45 = vadd.f32 %v5083_v11, %v7153_v8  ;;  %v7305_v7 = vadd.f32 %v3165_v9, %v2977_v42 }
 0x1d5   : > { %v2877_v36 = vpop.f32.mrf.mxu0  ;;  %v3197_v4 = vpop.f32.mrf.mxu1 }
 0x1d6   : > { %v2980_v49 = vadd.f32 %v2877_v36, %v7158_v34  ;;  %v7308_v60 = vadd.f32 %v5117_v54, %v2982_v45 }
 0x1d7   : > { %v5084_v22 = vpop.f32.mrf.mxu0  ;;  %v5125_v31 = vpop.f32.mrf.mxu1 }
 0x1d8   : > { %v2983_v19 = vadd.f32 %v5084_v22, %v7165_v20  ;;  %v7311_v6 = vadd.f32 %v3178_v41, %v2980_v49 }
 0x1d9   : > { %v2880_v62 = vpop.f32.mrf.mxu0  ;;  %v3210_v9 = vpop.f32.mrf.mxu1 }
 0x1da   : > { %v2981_v26 = vadd.f32 %v2880_v62, %v7175_v3  ;;  %v7314_v28 = vadd.f32 %v5118_v33, %v2983_v19 }
 0x1db   : > { %v5087_v8 = vpop.f32.mrf.mxu0  ;;  %v5126_v54 = vpop.f32.mrf.mxu1 }
 0x1dc   : > { %v2986_v37 = vadd.f32 %v5087_v8, %v7181_v47  ;;  %v7317_v43 = vadd.f32 %v3181_v23, %v2981_v26 }
 0x1dd   : > { %v2893_v34 = vpop.f32.mrf.mxu0  ;;  %v3213_v41 = vpop.f32.mrf.mxu1 }
 0x1de   : > { %v2984_v57 = vadd.f32 %v2893_v34, %v7186_v16  ;;  %v7320_v56 = vadd.f32 %v5121_v46, %v2986_v37 }
 0x1df   : > { %v5088_v20 = vpop.f32.mrf.mxu0  ;;  %v5129_v33 = vpop.f32.mrf.mxu1 }
 0x1e0   : > { %v2987_v10 = vadd.f32 %v5088_v20, %v7193_v27  ;;  %v7323_v39 = vadd.f32 %v3194_v1, %v2984_v57 }
 0x1e1   : > { %v2896_v3 = vpop.f32.mrf.mxu0  ;;  %v3226_v23 = vpop.f32.mrf.mxu1 }
 0x1e2   : > { %v2985_v18 = vadd.f32 %v2896_v3, %v7203_v12  ;;  %v7326_v24 = vadd.f32 %v5122_v14, %v2987_v10 }
 0x1e3   : > { %v5091_v47 = vpop.f32.mrf.mxu0  ;;  %v5130_v46 = vpop.f32.mrf.mxu1 }
 0x1e4   : > { %v2990_v59 = vadd.f32 %v5091_v47, %v7209_v25  ;;  %v7329_v21 = vadd.f32 %v3197_v4, %v2985_v18 }
 0x1e5   : > { %v2909_v16 = vpop.f32.mrf.mxu0  ;;  %v3229_v1 = vpop.f32.mrf.mxu1 }
 0x1e6   : > { %v2988_v42 = vadd.f32 %v2909_v16, %v7214_v38  ;;  %v7332_v11 = vadd.f32 %v5125_v31, %v2990_v59 }
 0x1e7   : > { %v5092_v27 = vpop.f32.mrf.mxu0  ;;  %v5133_v14 = vpop.f32.mrf.mxu1 }
 0x1e8   : > { %v2991_v45 = vadd.f32 %v5092_v27, %v7221_v35  ;;  %v7335_v36 = vadd.f32 %v3210_v9, %v2988_v42 }
 0x1e9   : > { %v2912_v12 = vpop.f32.mrf.mxu0  ;;  %v3242_v4 = vpop.f32.mrf.mxu1 }
 0x1ea   : > { %v2989_v49 = vadd.f32 %v2912_v12, %v7229_v44  ;;  %v7338_v22 = vadd.f32 %v5126_v54, %v2991_v45 }
 0x1eb   : > { %v5095_v25 = vpop.f32.mrf.mxu0  ;;  %v5134_v31 = vpop.f32.mrf.mxu1 }
 0x1ec   : > { %8401 = vst [vmem:[#allocation41_spill] sm:$0xff] %v7338_v22  ;;  %v2994_v19 = vadd.f32 %v5095_v25, %v7235_v63  ;;  %v7341_v62 = vadd.f32 %v3213_v41, %v2989_v49 }
 0x1ed   : > { %v2925_v38 = vpop.f32.mrf.mxu0  ;;  %v3245_v9 = vpop.f32.mrf.mxu1 }
 0x1ee   : > { %8402 = vst [vmem:[#allocation45_spill] sm:$0xff] %v7341_v62  ;;  %v2992_v26 = vadd.f32 %v2925_v38, %v7240_v5  ;;  %v7344_v8 = vadd.f32 %v5129_v33, %v2994_v19 }
 0x1ef   : > { %v5096_v35 = vpop.f32.mrf.mxu0  ;;  %v5137_v54 = vpop.f32.mrf.mxu1 }
 0x1f0   : > { %8403 = vst [vmem:[#allocation52_spill] sm:$0xff] %v7344_v8  ;;  %v2995_v37 = vadd.f32 %v5096_v35, %v7244_v53  ;;  %v7347_v34 = vadd.f32 %v3226_v23, %v2992_v26 }
 0x1f1   : > { %v2928_v44 = vpop.f32.mrf.mxu0  ;;  %v3258_v41 = vpop.f32.mrf.mxu1 }
 0x1f2   : > { %8404 = vst [vmem:[#allocation53_spill] sm:$0xff] %v7347_v34  ;;  %v2993_v57 = vadd.f32 %v2928_v44, %v7256_v58  ;;  %v7350_v20 = vadd.f32 %v5130_v46, %v2995_v37 }
 0x1f3   : > { %v5099_v63 = vpop.f32.mrf.mxu0  ;;  %v5138_v33 = vpop.f32.mrf.mxu1 }
 0x1f4   : > { %8405 = vst [vmem:[#allocation57_spill] sm:$0xff] %v7350_v20  ;;  %v2998_v10 = vadd.f32 %v5099_v63, %v7259_v15  ;;  %v7353_v3 = vadd.f32 %v3229_v1, %v2993_v57 }
 0x1f5   : > { %v2941_v5 = vpop.f32.mrf.mxu0  ;;  %v3261_v23 = vpop.f32.mrf.mxu1 }
 0x1f6   : > { %8406 = vst [vmem:[#allocation58_spill] sm:$0xff] %v7353_v3  ;;  %v2996_v18 = vadd.f32 %v2941_v5, %v7262_v13  ;;  %v7356_v47 = vadd.f32 %v5133_v14, %v2998_v10 }
 0x1f7   : > { %v5100_v53 = vpop.f32.mrf.mxu0  ;;  %v7361_v46 = vpop.f32.mrf.mxu1 }
 0x1f8   : > { %8407 = vst [vmem:[#allocation60_spill] sm:$0xff] %v7356_v47  ;;  %v2999_v59 = vadd.f32 %v5100_v53, %v7265_v0  ;;  %v7359_v16 = vadd.f32 %v3242_v4, %v2996_v18 }
 0x1f9   : > { %v2944_v58 = vpop.f32.mrf.mxu0  ;;  %v7366_v1 = vpop.f32.mrf.mxu1 }
 0x1fa   : > { %8408 = vst [vmem:[#allocation62_spill] sm:$0xff] %v7359_v16  ;;  %v2997_v42 = vadd.f32 %v2944_v58, %v7269_v61  ;;  %v7364_v15 = vadd.f32 %v5134_v31, %v2999_v59 }
 0x1fb   : > { %v5103_v27 = vpop.f32.mrf.mxu0  ;;  %v7371_v14 = vpop.f32.mrf.mxu1 }
 0x1fc   : > { %8409 = vst [vmem:[#allocation14_spill] sm:$0xff] %v7364_v15  ;;  %v3002_v13 = vadd.f32 %v5103_v27, %v7272_v51  ;;  %v7369_v45 = vadd.f32 %v3245_v9, %v2997_v42 }
 0x1fd   : > { %v2957_v12 = vpop.f32.mrf.mxu0  ;;  %v7376_v4 = vpop.f32.mrf.mxu1 }
 0x1fe   : > { %8410 = vst [vmem:[#allocation29_spill] sm:$0xff] %v7369_v45  ;;  %v3000_v0 = vadd.f32 %v2957_v12, %v7275_v55  ;;  %v7374_v49 = vadd.f32 %v5137_v54, %v3002_v13 }
 0x1ff   : > { %v5104_v25 = vpop.f32.mrf.mxu0  ;;  %v7381_v31 = vpop.f32.mrf.mxu1 }
 0x200   : > { %8411 = vst [vmem:[#allocation15_spill] sm:$0xff] %v7374_v49  ;;  %v3003_v61 = vadd.f32 %v5104_v25, %v7278_v17  ;;  %v7379_v19 = vadd.f32 %v3258_v41, %v3000_v0 }
 0x201   : > { %v2960_v38 = vpop.f32.mrf.mxu0  ;;  %v7386_v9 = vpop.f32.mrf.mxu1 }
 0x202   : > { %8412 = vst [vmem:[#allocation22_spill] sm:$0xff] %v7379_v19  ;;  %v3001_v51 = vadd.f32 %v2960_v38, %v7281_v29  ;;  %v7384_v26 = vadd.f32 %v5138_v33, %v3003_v61 }
 0x203   : > { %v5143_v35 = vpop.f32.mrf.mxu0  ;;  %v7390_v44 = vpop.f32.mrf.mxu1 }
 0x204   : > { %8413 = vst [vmem:[#allocation11_spill] sm:$0xff] %v7384_v26  ;;  %v7388_v55 = vadd.f32 %v3261_v23, %v3001_v51 }
 0x205   : > { %v3439_v37 = vpop.f32.mrf.mxu0  ;;  %v7394_v17 = vpop.f32.mrf.mxu1 }
 0x206   : > { %8414 = vst [vmem:[#allocation8_spill] sm:$0xff] %v7388_v55 }
 0x207   : > { %v7392_v54 = vpop.f32.mrf.mxu0  ;;  %v7398_v63 = vpop.f32.mrf.mxu1 }
 0x209   : > { %v7396_v57 = vpop.f32.mrf.mxu0  ;;  %v7402_v29 = vpop.f32.mrf.mxu1 }
 0x20b   : > { %v7400_v41 = vpop.f32.mrf.mxu0  ;;  %v7406_v5 = vpop.f32.mrf.mxu1 }
 0x20d   : > { %v7404_v10 = vpop.f32.mrf.mxu0  ;;  %v7410_v18 = vpop.f32.mrf.mxu1 }
 0x20f   : > { %v7408_v33 = vpop.f32.mrf.mxu0  ;;  %v7414_v23 = vpop.f32.mrf.mxu1 }
 0x211   : > { %v7412_v53 = vpop.f32.mrf.mxu0  ;;  %v7418_v58 = vpop.f32.mrf.mxu1 }
 0x213   : > { %v7416_v59 = vpop.f32.mrf.mxu0  ;;  %v7422_v27 = vpop.f32.mrf.mxu1 }
 0x215   : > { %v7420_v42 = vpop.f32.mrf.mxu0  ;;  %v7426_v12 = vpop.f32.mrf.mxu1 }
 0x216   : > { %8415 = vst [vmem:[#allocation17_spill] sm:$0xff] %v7426_v12 }
 0x217   : > { %v7424_v13 = vpop.f32.mrf.mxu0  ;;  %v7430_v25 = vpop.f32.mrf.mxu1 }
 0x218   : > { %8416 = vst [vmem:[#allocation19_spill] sm:$0xff] %v7430_v25 }
 0x219   : > { %v7428_v0 = vpop.f32.mrf.mxu0  ;;  %v7434_v38 = vpop.f32.mrf.mxu1 }
 0x21a   : > { %8417 = vst [vmem:[#allocation24_spill] sm:$0xff] %v7434_v38 }
 0x21b   : > { %v7432_v61 = vpop.f32.mrf.mxu0  ;;  %v7438_v55 = vpop.f32.mrf.mxu1 }
 0x21c   : > { %8418 = vst [vmem:[#allocation25_spill] sm:$0xff] %v7438_v55 }
 0x21d   : > { %v7436_v51 = vpop.f32.mrf.mxu0  ;;  %v7442_v19 = vpop.f32.mrf.mxu1 }
 0x21e   : > { %8419 = vst [vmem:[#allocation12_spill] sm:$0xff] %v7442_v19 }
 0x21f   : > { %v7440_v26 = vpop.f32.mrf.mxu0  ;;  %v7446_v45 = vpop.f32.mrf.mxu1 }
 0x220   : > { %8420 = vst [vmem:[#allocation30_spill] sm:$0xff] %v7446_v45 }
 0x221   : > { %v7444_v49 = vpop.f32.mrf.mxu0  ;;  %v7450_v16 = vpop.f32.mrf.mxu1 }
 0x222   : > { %8421 = vst [vmem:[#allocation13_spill] sm:$0xff] %v7450_v16 }
 0x223   : > { %v7448_v15 = vpop.f32.mrf.mxu0  ;;  %v7454_v3 = vpop.f32.mrf.mxu1 }
 0x224   : > { %8423 = vst [vmem:[#allocation32_spill] sm:$0xff] %v7454_v3 }
 0x225   : > { %v7452_v47 = vpop.f32.mrf.mxu0  ;;  %v7458_v34 = vpop.f32.mrf.mxu1 }
 0x226   : > { %8422 = vst [vmem:[#allocation27_spill] sm:$0xff] %v7452_v47  ;;  %8425 = vst [vmem:[#allocation18_spill] sm:$0xff] %v7458_v34  ;;  %v3570_v47 = vadd.f32 %v7404_v10, %v7299_v30  ;;  %v3573_v30 = vadd.f32 %v7408_v33, %v7302_v40 }
 0x227   : > { %v7456_v20 = vpop.f32.mrf.mxu0  ;;  %v7462_v8 = vpop.f32.mrf.mxu1 }
 0x228   : > { %8424 = vst [vmem:[#allocation33_spill] sm:$0xff] %v7456_v20  ;;  %8427 = vst [vmem:[#allocation20_spill] sm:$0xff] %v7462_v8  ;;  %v3784_v40 = vadd.f32 %v7386_v9, %v3570_v47 }
 0x229   : > { %v7460_v55 = vpop.f32.mrf.mxu0  ;;  %v7466_v38 = vpop.f32.mrf.mxu1 }
 0x22a   : > { %8426 = vst [vmem:[#allocation36_spill] sm:$0xff] %v7460_v55  ;;  %8429 = vst [vmem:[#allocation37_spill] sm:$0xff] %v7466_v38 }
 0x22b   : > { %v7464_v19 = vpop.f32.mrf.mxu0  ;;  %v7470_v62 = vpop.f32.mrf.mxu1 }
 0x22c   : > { %8428 = vst [vmem:[#allocation35_spill] sm:$0xff] %v7464_v19  ;;  %8431 = vst [vmem:[#allocation21_spill] sm:$0xff] %v7470_v62 }
 0x22d   : > { %v7468_v45 = vpop.f32.mrf.mxu0  ;;  %v7474_v25 = vpop.f32.mrf.mxu1 }
 0x22e   : > { %8430 = vst [vmem:[#allocation43_spill] sm:$0xff] %v7468_v45  ;;  %8433 = vst [vmem:[#allocation28_spill] sm:$0xff] %v7474_v25 }
 0x22f   : > { %v7472_v16 = vpop.f32.mrf.mxu0  ;;  %v7478_v20 = vpop.f32.mrf.mxu1 }
 0x230   : > { %8432 = vst [vmem:[#allocation4_spill] sm:$0xff] %v7472_v16  ;;  %8435 = vst [vmem:[#allocation47_spill] sm:$0xff] %v7478_v20 }
 0x231   : > { %v7476_v3 = vpop.f32.mrf.mxu0  ;;  %v7482_v55 = vpop.f32.mrf.mxu1 }
 0x232   : > { %8434 = vst [vmem:[#allocation44_spill] sm:$0xff] %v7476_v3  ;;  %8437 = vst [vmem:[#allocation42_spill] sm:$0xff] %v7482_v55 }
 0x233   : > { %v7480_v34 = vpop.f32.mrf.mxu0  ;;  %v7486_v19 = vpop.f32.mrf.mxu1 }
 0x234   : > { %8436 = vst [vmem:[#allocation49_spill] sm:$0xff] %v7480_v34  ;;  %8439 = vst [vmem:[#allocation46_spill] sm:$0xff] %v7486_v19  ;;  %v3568_v34 = vadd.f32 %v5143_v35, %v7284_v48  ;;  %v3566_v19 = vadd.f32 %v3439_v37, %v7287_v50  ;;  %v3567_v48 = vadd.f32 %v7396_v57, %v7293_v32  ;;  %v7517_v50 = vld [vmem:[%s7748_s5] ss:$0 sm:$0xff] }
 0x235   : > { %v7484_v8 = vpop.f32.mrf.mxu0  ;;  %v7490_v45 = vpop.f32.mrf.mxu1 }
 0x236   : > { %8438 = vst [vmem:[#allocation50_spill] sm:$0xff] %v7484_v8  ;;  %8441 = vst [vmem:[#allocation10_spill] sm:$0xff] %v7490_v45  ;;  %v7505_v45 = vld [vmem:[%s7750_s7] ss:$0 sm:$0xff]  ;;  %v3780_v12 = vadd.f32 %v7366_v1, %v3566_v19 }
 0x237   : > { %v7488_v38 = vpop.f32.mrf.mxu0  ;;  %v5245_v16 = vpop.f32.mrf.mxu1 }
 0x238   : > { %8440 = vst [vmem:[#allocation9_spill] sm:$0xff] %v7488_v38 }
 0x239   : > { %v7492_v62 = vpop.f32.mrf.mxu0  ;;  %v4290_v3 = vpop.f32.mrf.mxu1 }
 0x23a   : > { %8442 = vst [vmem:[#allocation54_spill] sm:$0xff] %v7492_v62  ;;  %v4291_v1 = vadd.f32 %v7505_v45, %v4290_v3 }
 0x23b   : > { %v7494_v25 = vpop.f32.mrf.mxu0  ;;  %v5246_v20 = vpop.f32.mrf.mxu1 }
 0x23c   : > { %8443 = vst [vmem:[#allocation5_spill] sm:$0xff] %v7494_v25  ;;  %v3569_v25 = vadd.f32 %v7392_v54, %v7290_v2  ;;  %v3572_v2 = vadd.f32 %v7400_v41, %v7296_v52 }
 0x23d   : > { %v7496_v22 = vpop.f32.mrf.mxu0  ;;  %v4293_v8 = vpop.f32.mrf.mxu1 }
 0x23e   : > { %8444 = vst [vmem:[#allocation56_spill] sm:$0xff] %v7496_v22  ;;  %v3782_v22 = vadd.f32 %v7361_v46, %v3568_v34  ;;  %v3783_v57 = vadd.f32 %v7371_v14, %v3569_v25  ;;  %v3786_v10 = vadd.f32 %v7381_v31, %v3572_v2  ;;  %v4302_v25 = vadd.f32 %v5246_v20, %v7505_v45 }
 0x23f   : > { %v7499_v55 = vpop.f32.mrf.mxu0  ;;  %v5249_v38 = vpop.f32.mrf.mxu1 }
 0x240   : > { %8445 = vst [vmem:[#allocation6_spill] sm:$0xff] %v7499_v55  ;;  %v4299_v55 = vadd.f32 %v5245_v16, %v7505_v45  ;;  %v3781_v16 = vadd.f32 %v7376_v4, %v3567_v48  ;;  %v3571_v48 = vadd.f32 %v7412_v53, %v7305_v7  ;;  %v4315_v20 = vadd.f32 %v5249_v38, %v7505_v45 }
 0x241   : > { %v7507_v62 = vpop.f32.mrf.mxu0  ;;  %v4306_v37 = vpop.f32.mrf.mxu1  ;;  %v3787_v53 = vadd.f32 %v7390_v44, %v3573_v30  ;;  %v3574_v38 = vadd.f32 %v7420_v42, %v7311_v6 }
 0x242   : > { %8446 = vst [vmem:[#allocation55_spill] sm:$0xff] %v7507_v62 }
 0x243   : > { %v5211_v35 = vpop.f32.mrf.mxu0  ;;  %v5250_v34 = vpop.f32.mrf.mxu1 }
 0x244   : > { %v4078_v62 = vadd.f32 %v5211_v35, %v3782_v22  ;;  %v4294_v35 = vadd.f32 %v7505_v45, %v4293_v8 }
 0x245   : > { %v3949_v54 = vpop.f32.mrf.mxu0  ;;  %v4309_v52 = vpop.f32.mrf.mxu1 }
 0x246   : > { %v4117_v46 = vadd.f32 %v7517_v50, %v4078_v62  ;;  %v4076_v32 = vadd.f32 %v3949_v54, %v3780_v12 }
 0x247   : > { %v5212_v22 = vpop.f32.mrf.mxu0  ;;  %v5253_v12 = vpop.f32.mrf.mxu1 }
 0x248   : > { %v4419_v19 = vadd.f32 %v4299_v55, %v4117_v46  ;;  %v4115_v62 = vadd.f32 %v7517_v50, %v4076_v32  ;;  %v4079_v14 = vadd.f32 %v5212_v22, %v3783_v57  ;;  %v3576_v32 = vadd.f32 %v7416_v59, %v7308_v60 }
 0x249   : > { %v3952_v41 = vpop.f32.mrf.mxu0  ;;  %v4322_v33 = vpop.f32.mrf.mxu1  ;;  %v4307_v60 = vadd.f32 %v7505_v45, %v4306_v37 }
 0x24a   : > { %4451 = vst.msk [vmem:[%s7531_s23 + $0x10] sm:$0xff] %vm8447_vm3, %v4419_v19  ;;  %v4417_v4 = vadd.f32 %v4291_v1, %v4115_v62  ;;  %v4118_v3 = vadd.f32 %v7517_v50, %v4079_v14  ;;  %v4077_v55 = vadd.f32 %v3952_v41, %v3781_v16  ;;  %v3785_v16 = vadd.f32 %v7394_v17, %v3571_v48  ;;  %vm8479_vm3 = vmmov %vm8374_vm0 }
 0x24b   : > { %v5215_v54 = vpop.f32.mrf.mxu0  ;;  %v5254_v7 = vpop.f32.mrf.mxu1  ;;  %v3577_v14 = vadd.f32 %v7424_v13, %v7314_v28  ;;  %v3790_v30 = vadd.f32 %v7398_v63, %v3576_v32  ;;  %v4318_v17 = vadd.f32 %v5250_v34, %v7505_v45  ;;  %v3788_v28 = vadd.f32 %v7402_v29, %v3574_v38 }
 0x24c   : > { %4449 = vst.msk [vmem:[%s7531_s23] sm:$0xff] %vm8448_vm15, %v4417_v4  ;;  %v4420_v31 = vadd.f32 %v4302_v25, %v4118_v3  ;;  %v4116_v2 = vadd.f32 %v7517_v50, %v4077_v55  ;;  %v4082_v46 = vadd.f32 %v5215_v54, %v3786_v10  ;;  %v3575_v10 = vadd.f32 %v7428_v0, %v7317_v43  ;;  %vm8483_vm15 = vmmov %vm8374_vm0 }
 0x24d   : > { %v3965_v57 = vpop.f32.mrf.mxu0  ;;  %v4325_v1 = vpop.f32.mrf.mxu1  ;;  %v4310_v25 = vadd.f32 %v7505_v45, %v4309_v52  ;;  %v4331_v34 = vadd.f32 %v5253_v12, %v7505_v45  ;;  %v3580_v48 = vadd.f32 %v7432_v61, %v7320_v56  ;;  %v3791_v54 = vadd.f32 %v7406_v5, %v3577_v14 }
 0x24e   : > { %4452 = vst.msk [vmem:[%s7531_s23 + $0x18] sm:$0xff] %vm8449_vm5, %v4420_v31  ;;  %v4418_v8 = vadd.f32 %v4294_v35, %v4116_v2  ;;  %v4121_v47 = vadd.f32 %v7517_v50, %v4082_v46  ;;  %v4080_v9 = vadd.f32 %v3965_v57, %v3784_v40  ;;  %v3578_v12 = vadd.f32 %v7436_v51, %v7323_v39  ;;  %vm8486_vm5 = vmmov %vm8374_vm0 }
 0x24f   : > { %v5216_v22 = vpop.f32.mrf.mxu0  ;;  %v5257_v6 = vpop.f32.mrf.mxu1  ;;  %v3789_v31 = vadd.f32 %v7410_v18, %v3575_v10  ;;  %v4323_v56 = vadd.f32 %v7505_v45, %v4322_v33  ;;  %v3581_v32 = vadd.f32 %v7440_v26, %v7326_v24  ;;  %v3794_v57 = vadd.f32 %v7414_v23, %v3580_v48 }
 0x250   : > { %4450 = vst.msk [vmem:[%s7531_s23 + $0x8] sm:$0xff] %vm8450_vm14, %v4418_v8  ;;  %v4423_v59 = vadd.f32 %v4315_v20, %v4121_v47  ;;  %v4119_v19 = vadd.f32 %v7517_v50, %v4080_v9  ;;  %v4083_v62 = vadd.f32 %v5216_v22, %v3787_v53  ;;  %v4334_v18 = vadd.f32 %v5254_v7, %v7505_v45  ;;  %vm8491_vm14 = vmmov %vm8374_vm0 }
 0x251   : > { %v3968_v44 = vpop.f32.mrf.mxu0  ;;  %v4338_v13 = vpop.f32.mrf.mxu1  ;;  %v3579_v47 = vadd.f32 %v7444_v49, %v7329_v21  ;;  %v4326_v9 = vadd.f32 %v7505_v45, %v4325_v1  ;;  %v3792_v24 = vadd.f32 %v7418_v58, %v3578_v12  ;;  %v4347_v7 = vadd.f32 %v5257_v6, %v7505_v45 }
 0x252   : > { %4455 = vst.msk [vmem:[%s7531_s23 + $0x30] sm:$0xff] %vm8451_vm12, %v4423_v59  ;;  %v4421_v42 = vadd.f32 %v4307_v60, %v4119_v19  ;;  %v4122_v37 = vadd.f32 %v7517_v50, %v4083_v62  ;;  %v4081_v41 = vadd.f32 %v3968_v44, %v3785_v16  ;;  %v3584_v16 = vadd.f32 %v7448_v15, %v7332_v11  ;;  %v8457_v19 = vld [vmem:[#allocation27_spill] sm:$0xff]  ;;  %v8458_v44 = vld [vmem:[#allocation17_spill] sm:$0xff]  ;;  %vm8495_vm12 = vmmov %vm8374_vm0 }
 0x253   : > { %v5219_v4 = vpop.f32.mrf.mxu0  ;;  %v5258_v43 = vpop.f32.mrf.mxu1  ;;  %v3795_v59 = vadd.f32 %v7422_v27, %v3581_v32  ;;  %v3582_v62 = vadd.f32 %v8457_v19, %v7335_v36  ;;  %v4339_v11 = vadd.f32 %v7505_v45, %v4338_v13 }
 0x254   : > { %4453 = vst.msk [vmem:[%s7531_s23 + $0x20] sm:$0xff] %vm8452_vm4, %v4421_v42  ;;  %v4424_v63 = vadd.f32 %v4318_v17, %v4122_v37  ;;  %v4120_v3 = vadd.f32 %v7517_v50, %v4081_v41  ;;  %v4086_v55 = vadd.f32 %v5219_v4, %v3790_v30  ;;  %v3793_v30 = vadd.f32 %v8458_v44, %v3579_v47  ;;  %v8460_v37 = vld [vmem:[#allocation41_spill] sm:$0xff]  ;;  %vm8499_vm4 = vmmov %vm8374_vm0 }
 0x255   : > { %v3981_v35 = vpop.f32.mrf.mxu0  ;;  %v4341_v20 = vpop.f32.mrf.mxu1  ;;  %v8461_v41 = vld [vmem:[#allocation33_spill] sm:$0xff] }
 0x256   : > { %4456 = vst.msk [vmem:[%s7531_s23 + $0x38] sm:$0xff] %vm8374_vm0, %v4424_v63  ;;  %v4422_v0 = vadd.f32 %v4310_v25, %v4120_v3  ;;  %v4125_v29 = vadd.f32 %v7517_v50, %v4086_v55  ;;  %v4084_v52 = vadd.f32 %v3981_v35, %v3788_v28  ;;  %v3585_v10 = vadd.f32 %v8461_v41, %v8460_v37  ;;  %v8462_v25 = vld [vmem:[#allocation19_spill] sm:$0xff]  ;;  %v8464_v3 = vld [vmem:[#allocation45_spill] sm:$0xff]  ;;  %v8465_v55 = vld [vmem:[#allocation36_spill] sm:$0xff] }
 0x257   : > { %v5220_v40 = vpop.f32.mrf.mxu0  ;;  %v5261_v39 = vpop.f32.mrf.mxu1  ;;  %v3798_v4 = vadd.f32 %v8462_v25, %v3584_v16  ;;  %v4350_v28 = vadd.f32 %v5258_v43, %v7505_v45  ;;  %v3583_v48 = vadd.f32 %v8465_v55, %v8464_v3  ;;  %v4342_v35 = vadd.f32 %v7505_v45, %v4341_v20  ;;  %v8476_v16 = vld [vmem:[#allocation57_spill] sm:$0xff] }
 0x258   : > { %4454 = vst.msk [vmem:[%s7531_s23 + $0x28] sm:$0xff] %vm8453_vm8, %v4422_v0  ;;  %v4427_v61 = vadd.f32 %v4331_v34, %v4125_v29  ;;  %v4123_v2 = vadd.f32 %v7517_v50, %v4084_v52  ;;  %v4087_v46 = vadd.f32 %v5220_v40, %v3791_v54  ;;  %v8466_v29 = vld [vmem:[#allocation24_spill] sm:$0xff]  ;;  %v4363_v43 = vadd.f32 %v5261_v39, %v7505_v45  ;;  %v8482_v37 = vld [vmem:[#allocation13_spill] sm:$0xff]  ;;  %vm8506_vm8 = vmmov %vm8374_vm0 }
 0x259   : > { %v3984_v5 = vpop.f32.mrf.mxu0  ;;  %v4354_v26 = vpop.f32.mrf.mxu1  ;;  %v3796_v52 = vadd.f32 %v8466_v29, %v3582_v62  ;;  %v8488_v29 = vld [vmem:[#allocation62_spill] sm:$0xff] }
 0x25a   : > { %4459 = vst.msk [vmem:[%s7531_s23 + $0x50] sm:$0xff] %vm8454_vm11, %v4427_v61  ;;  %v4425_v51 = vadd.f32 %v4323_v56, %v4123_v2  ;;  %v4126_v33 = vadd.f32 %v7517_v50, %v4087_v46  ;;  %v4085_v8 = vadd.f32 %v3984_v5, %v3789_v31  ;;  %v8468_v56 = vld [vmem:[#allocation52_spill] sm:$0xff]  ;;  %v8469_v61 = vld [vmem:[#allocation35_spill] sm:$0xff]  ;;  %vm8510_vm11 = vmmov %vm8374_vm0 }
 0x25b   : > { %v5223_v53 = vpop.f32.mrf.mxu0  ;;  %v5262_v21 = vpop.f32.mrf.mxu1  ;;  %v3588_v2 = vadd.f32 %v8469_v61, %v8468_v56 }
 0x25c   : > { %4457 = vst.msk [vmem:[%s7531_s23 + $0x40] sm:$0xff] %vm8455_vm2, %v4425_v51  ;;  %v4428_v23 = vadd.f32 %v4334_v18, %v4126_v33  ;;  %v4124_v38 = vadd.f32 %v7517_v50, %v4085_v8  ;;  %v4090_v22 = vadd.f32 %v5223_v53, %v3794_v57  ;;  %v8471_v18 = vld [vmem:[#allocation25_spill] sm:$0xff]  ;;  %v8473_v8 = vld [vmem:[#allocation43_spill] sm:$0xff]  ;;  %v4366_v62 = vadd.f32 %v5262_v21, %v7505_v45  ;;  %vm8514_vm2 = vmmov %vm8374_vm0 }
 0x25d   : > { %v3997_v60 = vpop.f32.mrf.mxu0  ;;  %v4357_v6 = vpop.f32.mrf.mxu1  ;;  %v3799_v51 = vadd.f32 %v8471_v18, %v3585_v10  ;;  %v8472_v33 = vld [vmem:[#allocation53_spill] sm:$0xff]  ;;  %v8494_v18 = vld [vmem:[#allocation20_spill] sm:$0xff] }
 0x25e   : > { %4460 = vst.msk [vmem:[%s7531_s23 + $0x58] sm:$0xff] %vm8456_vm13, %v4428_v23  ;;  %v4426_v49 = vadd.f32 %v4326_v9, %v4124_v38  ;;  %v4129_v58 = vadd.f32 %v7517_v50, %v4090_v22  ;;  %v4088_v1 = vadd.f32 %v3997_v60, %v3792_v24  ;;  %v3586_v39 = vadd.f32 %v8473_v8, %v8472_v33  ;;  %v8474_v9 = vld [vmem:[#allocation12_spill] sm:$0xff]  ;;  %vm8515_vm13 = vmmov %vm8374_vm0 }
 0x25f   : > { %v5224_v14 = vpop.f32.mrf.mxu0  ;;  %v5265_v36 = vpop.f32.mrf.mxu1  ;;  %v3797_v53 = vadd.f32 %v8474_v9, %v3583_v48  ;;  %v4355_v23 = vadd.f32 %v7505_v45, %v4354_v26  ;;  %v8477_v60 = vld [vmem:[#allocation4_spill] sm:$0xff]  ;;  %v8496_v9 = vld [vmem:[#allocation29_spill] sm:$0xff] }
 0x260   : > { %4458 = vst.msk [vmem:[%s7531_s23 + $0x48] sm:$0xff] %vm8459_vm9, %v4426_v49  ;;  %v4431_v15 = vadd.f32 %v4347_v7, %v4129_v58  ;;  %v4127_v17 = vadd.f32 %v7517_v50, %v4088_v1  ;;  %v4091_v42 = vadd.f32 %v5224_v14, %v3795_v59  ;;  %v3589_v49 = vadd.f32 %v8477_v60, %v8476_v16  ;;  %v8478_v1 = vld [vmem:[#allocation30_spill] sm:$0xff]  ;;  %vm8518_vm9 = vmmov %vm8374_vm0 }
 0x261   : > { %v4000_v27 = vpop.f32.mrf.mxu0  ;;  %v4370_v54 = vpop.f32.mrf.mxu1  ;;  %v3802_v59 = vadd.f32 %v8478_v1, %v3588_v2  ;;  %v3800_v41 = vadd.f32 %v8482_v37, %v3586_v39  ;;  %v4379_v21 = vadd.f32 %v5265_v36, %v7505_v45  ;;  %v8500_v1 = vld [vmem:[#allocation15_spill] sm:$0xff] }
 0x262   : > { %4463 = vst.msk [vmem:[%s7531_s23 + $0x70] sm:$0xff] %vm8463_vm6, %v4431_v15  ;;  %v4429_v63 = vadd.f32 %v4339_v11, %v4127_v17  ;;  %v4130_v13 = vadd.f32 %v7517_v50, %v4091_v42  ;;  %v4089_v34 = vadd.f32 %v4000_v27, %v3793_v30  ;;  %v8480_v30 = vld [vmem:[#allocation58_spill] sm:$0xff]  ;;  %v8481_v11 = vld [vmem:[#allocation44_spill] sm:$0xff]  ;;  %v4358_v17 = vadd.f32 %v7505_v45, %v4357_v6  ;;  %vm8519_vm6 = vmmov %vm8374_vm0 }
 0x263   : > { %v5227_v0 = vpop.f32.mrf.mxu0  ;;  %v5266_v32 = vpop.f32.mrf.mxu1  ;;  %v3587_v15 = vadd.f32 %v8481_v11, %v8480_v30  ;;  %v8502_v11 = vld [vmem:[#allocation21_spill] sm:$0xff] }
 0x264   : > { %4461 = vst.msk [vmem:[%s7531_s23 + $0x60] sm:$0xff] %vm8467_vm7, %v4429_v63  ;;  %v4432_v12 = vadd.f32 %v4350_v28, %v4130_v13  ;;  %v4128_v40 = vadd.f32 %v7517_v50, %v4089_v34  ;;  %v4094_v31 = vadd.f32 %v5227_v0, %v3798_v4  ;;  %v8484_v28 = vld [vmem:[#allocation60_spill] sm:$0xff]  ;;  %v8485_v63 = vld [vmem:[#allocation49_spill] sm:$0xff]  ;;  %v4382_v8 = vadd.f32 %v5266_v32, %v7505_v45  ;;  %vm8520_vm7 = vmmov %vm8374_vm0 }
 0x265   : > { %v4013_v46 = vpop.f32.mrf.mxu0  ;;  %v4373_v24 = vpop.f32.mrf.mxu1  ;;  %v3592_v13 = vadd.f32 %v8485_v63, %v8484_v28  ;;  %v8507_v63 = vld [vmem:[#allocation11_spill] sm:$0xff] }
 0x266   : > { %4464 = vst.msk [vmem:[%s7531_s23 + $0x78] sm:$0xff] %vm8470_vm1, %v4432_v12  ;;  %v4430_v20 = vadd.f32 %v4342_v35, %v4128_v40  ;;  %v4133_v5 = vadd.f32 %v7517_v50, %v4094_v31  ;;  %v4092_v57 = vadd.f32 %v4013_v46, %v3796_v52  ;;  %v8487_v35 = vld [vmem:[#allocation32_spill] sm:$0xff]  ;;  %v8489_v52 = vld [vmem:[#allocation50_spill] sm:$0xff]  ;;  %v4371_v31 = vadd.f32 %v7505_v45, %v4370_v54  ;;  %vm8521_vm1 = vmmov %vm8374_vm0 }
 0x267   : > { %v5228_v47 = vpop.f32.mrf.mxu0  ;;  %v5269_v19 = vpop.f32.mrf.mxu1  ;;  %v3803_v0 = vadd.f32 %v8487_v35, %v3589_v49  ;;  %v3590_v36 = vadd.f32 %v8489_v52, %v8488_v29  ;;  %v8492_v46 = vld [vmem:[#allocation14_spill] sm:$0xff] }
 0x268   : > { %4462 = vst.msk [vmem:[%s7531_s23 + $0x68] sm:$0xff] %vm8475_vm10, %v4430_v20  ;;  %v4435_v7 = vadd.f32 %v4363_v43, %v4133_v5  ;;  %v4131_v38 = vadd.f32 %v7517_v50, %v4092_v57  ;;  %v4095_v22 = vadd.f32 %v5228_v47, %v3799_v51  ;;  %v8490_v43 = vld [vmem:[#allocation18_spill] sm:$0xff]  ;;  %v8493_v20 = vld [vmem:[#allocation9_spill] sm:$0xff]  ;;  %v3806_v51 = vadd.f32 %v8494_v18, %v3592_v13  ;;  %vm8522_vm10 = vmmov %vm8374_vm0 }
 0x269   : > { %v4016_v58 = vpop.f32.mrf.mxu0  ;;  %v4386_v10 = vpop.f32.mrf.mxu1  ;;  %v3801_v40 = vadd.f32 %v8490_v43, %v3587_v15  ;;  %v3593_v5 = vadd.f32 %v8493_v20, %v8492_v46  ;;  %v4395_v49 = vadd.f32 %v5269_v19, %v7505_v45  ;;  %v8508_v13 = vld [vmem:[#allocation6_spill] sm:$0xff] }
 0x26a   : > { %4467 = vst.msk [vmem:[%s7531_s23 + $0x90] sm:$0xff] %vm8479_vm3, %v4435_v7  ;;  %v4433_v14 = vadd.f32 %v4355_v23, %v4131_v38  ;;  %v4134_v26 = vadd.f32 %v7517_v50, %v4095_v22  ;;  %v4093_v44 = vadd.f32 %v4016_v58, %v3797_v53  ;;  %v8497_v53 = vld [vmem:[#allocation54_spill] sm:$0xff]  ;;  %v4374_v7 = vadd.f32 %v7505_v45, %v4373_v24  ;;  %v8498_v22 = vld [vmem:[#allocation37_spill] sm:$0xff] }
 0x26b   : > { %v5231_v42 = vpop.f32.mrf.mxu0  ;;  %v5270_v3 = vpop.f32.mrf.mxu1  ;;  %v3591_v23 = vadd.f32 %v8497_v53, %v8496_v9  ;;  %v3804_v16 = vadd.f32 %v8498_v22, %v3590_v36  ;;  %v3807_v15 = vadd.f32 %v8502_v11, %v3593_v5  ;;  %v8511_v36 = vld [vmem:[#allocation8_spill] sm:$0xff] }
 0x26c   : > { %4465 = vst.msk [vmem:[%s7531_s23 + $0x80] sm:$0xff] %vm8483_vm15, %v4433_v14  ;;  %v4436_v27 = vadd.f32 %v4366_v62, %v4134_v26  ;;  %v4132_v25 = vadd.f32 %v7517_v50, %v4093_v44  ;;  %v4098_v4 = vadd.f32 %v5231_v42, %v3802_v59  ;;  %v8501_v59 = vld [vmem:[#allocation5_spill] sm:$0xff]  ;;  %v8504_v42 = vld [vmem:[#allocation56_spill] sm:$0xff] }
 0x26d   : > { %v4029_v34 = vpop.f32.mrf.mxu0  ;;  %v4389_v33 = vpop.f32.mrf.mxu1  ;;  %v3596_v62 = vadd.f32 %v8501_v59, %v8500_v1 }
 0x26e   : > { %4468 = vst.msk [vmem:[%s7531_s23 + $0x98] sm:$0xff] %vm8486_vm5, %v4436_v27  ;;  %v4434_v6 = vadd.f32 %v4358_v17, %v4132_v25  ;;  %v4137_v55 = vadd.f32 %v7517_v50, %v4098_v4  ;;  %v4096_v48 = vadd.f32 %v4029_v34, %v3800_v41  ;;  %v8503_v17 = vld [vmem:[#allocation22_spill] sm:$0xff]  ;;  %v8505_v41 = vld [vmem:[#allocation28_spill] sm:$0xff]  ;;  %v3597_v34 = vadd.f32 %v8508_v13, %v8507_v63 }
 0x26f   : > { %v5232_v12 = vpop.f32.mrf.mxu0  ;;  %v5273_v26 = vpop.f32.mrf.mxu1  ;;  %v3594_v19 = vadd.f32 %v8504_v42, %v8503_v17  ;;  %v3805_v27 = vadd.f32 %v8505_v41, %v3591_v23 }
 0x270   : > { %4466 = vst.msk [vmem:[%s7531_s23 + $0x88] sm:$0xff] %vm8491_vm14, %v4434_v6  ;;  %v4439_v56 = vadd.f32 %v4379_v21, %v4137_v55  ;;  %v4135_v61 = vadd.f32 %v7517_v50, %v4096_v48  ;;  %v4099_v2 = vadd.f32 %v5232_v12, %v3803_v0  ;;  %v4387_v21 = vadd.f32 %v7505_v45, %v4386_v10  ;;  %v8509_v48 = vld [vmem:[#allocation47_spill] sm:$0xff] }
 0x271   : > { %v4032_v57 = vpop.f32.mrf.mxu0  ;;  %v4402_v55 = vpop.f32.mrf.mxu1  ;;  %v3810_v35 = vadd.f32 %v8509_v48, %v3596_v62  ;;  %v4398_v0 = vadd.f32 %v5270_v3, %v7505_v45  ;;  %v8512_v12 = vld [vmem:[#allocation55_spill] sm:$0xff]  ;;  %v4411_v46 = vadd.f32 %v5273_v26, %v7505_v45 }
 0x272   : > { %4471 = vst.msk [vmem:[%s7531_s23 + $0xb0] sm:$0xff] %vm8495_vm12, %v4439_v56  ;;  %v4437_v39 = vadd.f32 %v4371_v31, %v4135_v61  ;;  %v4138_v54 = vadd.f32 %v7517_v50, %v4099_v2  ;;  %v4097_v47 = vadd.f32 %v4032_v57, %v3801_v40  ;;  %v3595_v43 = vadd.f32 %v8512_v12, %v8511_v36  ;;  %v8513_v56 = vld [vmem:[#allocation42_spill] sm:$0xff] }
 0x273   : > { %v5235_v38 = vpop.f32.mrf.mxu0  ;;  %v4390_v40 = vadd.f32 %v7505_v45, %v4389_v33  ;;  %v3808_v61 = vadd.f32 %v8513_v56, %v3594_v19  ;;  %v5274_v5 = vpop.f32.mrf.mxu1  ;;  %v4403_v53 = vadd.f32 %v7505_v45, %v4402_v55 }
 0x274   : > { %4469 = vst.msk [vmem:[%s7531_s23 + $0xa0] sm:$0xff] %vm8499_vm4, %v4437_v39  ;;  %v4440_v60 = vadd.f32 %v4382_v8, %v4138_v54  ;;  %v4136_v32 = vadd.f32 %v7517_v50, %v4097_v47  ;;  %v4102_v58 = vadd.f32 %v5235_v38, %v3806_v51  ;;  %v8516_v8 = vld [vmem:[#allocation46_spill] sm:$0xff] }
 0x275   : > { %v4045_v14 = vpop.f32.mrf.mxu0  ;;  %v3811_v39 = vadd.f32 %v8516_v8, %v3597_v34  ;;  %v8517_v47 = vld [vmem:[#allocation10_spill] sm:$0xff]  ;;  %v4405_v22 = vpop.f32.mrf.mxu1 }
 0x276   : > { %4472 = vst.msk [vmem:[%s7531_s23 + $0xb8] sm:$0xff] %vm8374_vm0, %v4440_v60  ;;  %v4438_v24 = vadd.f32 %v4374_v7, %v4136_v32  ;;  %v4141_v44 = vadd.f32 %v7517_v50, %v4102_v58  ;;  %v4100_v30 = vadd.f32 %v4045_v14, %v3804_v16  ;;  %v3809_v9 = vadd.f32 %v8517_v47, %v3595_v43 }
 0x277   : > { %v5236_v37 = vpop.f32.mrf.mxu0  ;;  %v4414_v60 = vadd.f32 %v5274_v5, %v7505_v45  ;;  %v4406_v1 = vadd.f32 %v7505_v45, %v4405_v22 }
 0x278   : > { %4470 = vst.msk [vmem:[%s7531_s23 + $0xa8] sm:$0xff] %vm8506_vm8, %v4438_v24  ;;  %v4443_v25 = vadd.f32 %v4395_v49, %v4141_v44  ;;  %v4139_v4 = vadd.f32 %v7517_v50, %v4100_v30  ;;  %v4103_v28 = vadd.f32 %v5236_v37, %v3807_v15 }
 0x279   : > { %v4048_v6 = vpop.f32.mrf.mxu0 }
 0x27a   : > { %4475 = vst.msk [vmem:[%s7531_s23 + $0xd0] sm:$0xff] %vm8510_vm11, %v4443_v25  ;;  %v4441_v29 = vadd.f32 %v4387_v21, %v4139_v4  ;;  %v4142_v10 = vadd.f32 %v7517_v50, %v4103_v28  ;;  %v4101_v52 = vadd.f32 %v4048_v6, %v3805_v27 }
 0x27b   : > { %v5239_v31 = vpop.f32.mrf.mxu0 }
 0x27c   : > { %4473 = vst.msk [vmem:[%s7531_s23 + $0xc0] sm:$0xff] %vm8514_vm2, %v4441_v29  ;;  %v4444_v2 = vadd.f32 %v4398_v0, %v4142_v10  ;;  %v4140_v3 = vadd.f32 %v7517_v50, %v4101_v52  ;;  %v4106_v20 = vadd.f32 %v5239_v31, %v3810_v35 }
 0x27d   : > { %v4061_v57 = vpop.f32.mrf.mxu0 }
 0x27e   : > { %4476 = vst.msk [vmem:[%s7531_s23 + $0xd8] sm:$0xff] %vm8515_vm13, %v4444_v2  ;;  %v4442_v18 = vadd.f32 %v4390_v40, %v4140_v3  ;;  %v4145_v51 = vadd.f32 %v7517_v50, %v4106_v20  ;;  %v4104_v33 = vadd.f32 %v4061_v57, %v3808_v61 }
 0x27f   : > { %v5240_v54 = vpop.f32.mrf.mxu0 }
 0x280   : > { %4474 = vst.msk [vmem:[%s7531_s23 + $0xc8] sm:$0xff] %vm8518_vm9, %v4442_v18  ;;  %v4447_v23 = vadd.f32 %v4411_v46, %v4145_v51  ;;  %v4143_v7 = vadd.f32 %v7517_v50, %v4104_v33  ;;  %v4107_v38 = vadd.f32 %v5240_v54, %v3811_v39 }
 0x281   : > { %v4064_v16 = vpop.f32.mrf.mxu0 }
 0x282   : > { %4479 = vst.msk [vmem:[%s7531_s23 + $0xf0] sm:$0xff] %vm8519_vm6, %v4447_v23  ;;  %v4445_v49 = vadd.f32 %v4403_v53, %v4143_v7  ;;  %v4146_v32 = vadd.f32 %v7517_v50, %v4107_v38  ;;  %v4105_v58 = vadd.f32 %v4064_v16, %v3809_v9 }
 0x284   : > { %4477 = vst.msk [vmem:[%s7531_s23 + $0xe0] sm:$0xff] %vm8520_vm7, %v4445_v49  ;;  %v4448_v59 = vadd.f32 %v4414_v60, %v4146_v32  ;;  %v4144_v62 = vadd.f32 %v7517_v50, %v4105_v58 }
 0x286   : > { %4480 = vst.msk [vmem:[%s7531_s23 + $0xf8] sm:$0xff] %vm8521_vm1, %v4448_v59  ;;  %v4446_v14 = vadd.f32 %v4406_v1, %v4144_v62 }
 0x288   : > { %4478 = vst.msk [vmem:[%s7531_s23 + $0xe8] sm:$0xff] %vm8522_vm10, %v4446_v14 }
 0x289 PF: > { %s20_s13 = sadd.s32 1, %s5432_s13  }
 0x28a   : > { %p17_p4 = scmp.ge.s32.totalorder %s20_s13, 4  }
 0x28c   :  { %19 = sbr.rel (!%p17_p4) target bundleno = 1 (0x1), region = 101 }

</bundles_post_ra>
